<compile_context>
chip_gen: v7x
topology: tpu7x:2x2x1
jax: 0.10.0
libtpu: 0.0.40
codegen_flags: <defaults>
</compile_context>

<pallas_src>
import numpy as np
import jax
import jax.numpy as jnp
from jax.experimental import pallas as pl
from jax.experimental.pallas import tpu as pltpu

TEXT_DIM = 768
IMAGE_DIM = 768
AUDIO_DIM = 512
QUANTUM_DIM = 4
FUSION_IN = TEXT_DIM + IMAGE_DIM + AUDIO_DIM + QUANTUM_DIM   # 2052
FUSION_OUT = 2048

LANE = 128
NEG_INF = -1e30


def _round_up(n, m):
    return ((n + m - 1) // m) * m


FUSION_IN_PAD = _round_up(FUSION_IN, LANE)   # 2176 (clean (8,128) tiling)
TN_FUSION = 1024                             # fusion output column tile -> grid=(2,)


# ----------------------------------------------------------------------------
# Fused Pallas kernel: relu(x @ Wf + bf) @ Wh + bh, then per-head softmax.
# Grid iterates over 1024-wide fusion column tiles; head logits accumulate in
# a small VMEM scratch; softmax per head segment on the last grid step.
# ----------------------------------------------------------------------------
def _make_fused_kernel(seg_widths_padded):
    def kernel(x_ref, fw_ref, fb_ref, hw_ref, hb_ref, o_ref, acc_ref):
        j = pl.program_id(0)

        @pl.when(j == 0)
        def _init():
            acc_ref[...] = jnp.zeros_like(acc_ref)

        # h_j = relu(x @ Wf[:, tile_j] + bf[tile_j])      (exact per-column op)
        h = jnp.dot(x_ref[...], fw_ref[...], preferred_element_type=jnp.float32)
        h = jnp.maximum(h + fb_ref[...], 0.0)
        # logits += h_j @ Wh[tile_j, :]   (f32 accumulate, bf16 MXU operands)
        acc_ref[...] += jnp.dot(h.astype(jnp.bfloat16), hw_ref[...],
                                preferred_element_type=jnp.float32)

        @pl.when(j == pl.num_programs(0) - 1)
        def _finalize():
            logits = acc_ref[...] + hb_ref[...]
            off = 0
            for w in seg_widths_padded:          # static Python loop over heads
                seg = logits[:, off:off + w]
                m = jnp.max(seg, axis=-1, keepdims=True)
                e = jnp.exp(seg - m)             # padded cols: exp(-1e30 - m) == 0
                s = jnp.sum(e, axis=-1, keepdims=True)
                o_ref[:, off:off + w] = (
                    e * pl.reciprocal(s, approx=True)).astype(o_ref.dtype)
                off += w

    return kernel


def _fused_pallas_forward(params, fused_x_pad):
    B = fused_x_pad.shape[0]
    seg_pad = params["head_seg_pad"]
    n_head_pad = sum(seg_pad)
    n_tiles = FUSION_OUT // TN_FUSION

    return pl.pallas_call(
        _make_fused_kernel(seg_pad),
        out_shape=jax.ShapeDtypeStruct((B, n_head_pad), jnp.float32),
        grid_spec=pltpu.PrefetchScalarGridSpec(
            num_scalar_prefetch=0,
            grid=(n_tiles,),
            in_specs=[
                pl.BlockSpec((B, FUSION_IN_PAD), lambda j: (0, 0)),       # x (resident)
                pl.BlockSpec((FUSION_IN_PAD, TN_FUSION), lambda j: (0, j)),  # Wf col tile
                pl.BlockSpec((1, TN_FUSION), lambda j: (0, j)),           # bf tile
                pl.BlockSpec((TN_FUSION, n_head_pad), lambda j: (j, 0)),  # Wh row tile
                pl.BlockSpec((1, n_head_pad), lambda j: (0, 0)),          # bh (resident)
            ],
            out_specs=pl.BlockSpec((B, n_head_pad), lambda j: (0, 0)),    # resident acc
            scratch_shapes=[pltpu.VMEM((B, n_head_pad), jnp.float32)],
        ),
        compiler_params=pltpu.CompilerParams(
            dimension_semantics=("arbitrary",),   # reduction over fusion tiles
            vmem_limit_bytes=32 * 1024 * 1024,
        ),
    )(fused_x_pad, params["fusion_w"], params["fusion_b"],
      params["head_w"], params["head_b"])


# ----------------------------------------------------------------------------
# Parameter init (deterministic, PyTorch nn.Linear-style uniform init),
# repacked / padded / cast for the fused kernel.
# ----------------------------------------------------------------------------
def _linear_params(key, fan_in, fan_out):
    kw, kb = jax.random.split(key)
    bound = 1.0 / np.sqrt(fan_in)
    w = jax.random.uniform(kw, (fan_in, fan_out), jnp.float32, -bound, bound)
    b = jax.random.uniform(kb, (1, fan_out), jnp.float32, -bound, bound)
    return w, b


def init_params(key, num_diagnoses, num_treatments):
    keys = jax.random.split(key, 5)

    fw, fb = _linear_params(keys[0], FUSION_IN, FUSION_OUT)
    # Pad the reduction dim to a multiple of 128 with exact-zero rows.
    fw = jnp.pad(fw, ((0, FUSION_IN_PAD - FUSION_IN), (0, 0)))

    head_sizes = (num_diagnoses, num_treatments, 5, 2)
    head_seg_pad = tuple(_round_up(n, LANE) for n in head_sizes)

    head_ws, head_bs = [], []
    for k, n, npad in zip(keys[1:], head_sizes, head_seg_pad):
        w, b = _linear_params(k, FUSION_OUT, n)
        pad = npad - n
        head_ws.append(jnp.pad(w, ((0, 0), (0, pad))))                        # zero cols
        head_bs.append(jnp.pad(b, ((0, 0), (0, pad)), constant_values=NEG_INF))  # -> softmax 0

    return {
        "fusion_w": fw.astype(jnp.bfloat16),
        "fusion_b": fb,                                          # f32 bias
        "head_w": jnp.concatenate(head_ws, axis=1).astype(jnp.bfloat16),
        "head_b": jnp.concatenate(head_bs, axis=1),              # f32 bias
        "head_sizes": head_sizes,
        "head_seg_pad": head_seg_pad,
    }


# ----------------------------------------------------------------------------
# Quantum fusion circuit (exact 4-qubit statevector simulation, glue code)
# ----------------------------------------------------------------------------
def quantum_fusion_expvals(thetas):
    """for i in range(4): RX(theta_i, i); CNOT(i,(i+1)%4); return <Z_i>."""
    n, dim = 4, 16
    state = np.zeros(dim, dtype=np.complex128)
    state[0] = 1.0

    def rx_full(theta, q):
        rx = np.array([[np.cos(theta / 2), -1j * np.sin(theta / 2)],
                       [-1j * np.sin(theta / 2), np.cos(theta / 2)]])
        mats = [np.eye(2, dtype=np.complex128)] * n
        mats[q] = rx
        u = mats[0]
        for m in mats[1:]:
            u = np.kron(u, m)
        return u

    def cnot_full(c, t):
        u = np.zeros((dim, dim))
        for b in range(dim):
            bits = [(b >> (n - 1 - k)) & 1 for k in range(n)]
            if bits[c] == 1:
                bits[t] ^= 1
            b2 = 0
            for k in range(n):
                b2 = (b2 << 1) | bits[k]
            u[b2, b] = 1.0
        return u

    for i in range(n):
        state = rx_full(float(thetas[i]), i) @ state
        state = cnot_full(i, (i + 1) % n) @ state
    probs = np.abs(state) ** 2
    z = []
    for i in range(n):
        sign = np.array([1.0 if ((b >> (n - 1 - i)) & 1) == 0 else -1.0
                         for b in range(dim)])
        z.append(float(np.sum(sign * probs)))
    return np.asarray(z, dtype=np.float32)


# ----------------------------------------------------------------------------
# Forward pass (matches QARCHANGEL.forward after the frozen encoders)
# ----------------------------------------------------------------------------
def qarchangel_forward(params, text_features, image_features, audio_features,
                       quantum_features):
    fused = jnp.concatenate(
        [text_features, image_features, audio_features, quantum_features], axis=1)
    # Zero-pad the reduction dim to 2176 and cast to bf16 for the MXU.
    fused = jnp.pad(fused, ((0, 0), (0, FUSION_IN_PAD - FUSION_IN)))
    fused = fused.astype(jnp.bfloat16)

    # nn.Dropout(0.2) is identity at inference time (eval mode).
    probs = _fused_pallas_forward(params, fused)

    names = ("diagnosis", "treatment", "severity", "emergency")
    out, off = {}, 0
    for name, n, npad in zip(names, params["head_sizes"], params["head_seg_pad"]):
        out[name] = probs[:, off:off + n]
        off += npad
    return out


if __name__ == "__main__":
    # Small, deterministic problem instance.
    BATCH = 2
    NUM_DIAGNOSES = 256     # constructor arg (default 10000), scaled down
    NUM_TREATMENTS = 128    # constructor arg (default 5000), scaled down

    root = jax.random.PRNGKey(0)
    k_param, k_text, k_img, k_aud, k_q = jax.random.split(root, 5)

    params = init_params(k_param, NUM_DIAGNOSES, NUM_TREATMENTS)

    # TODO(synk): BioBERT / ViT / Whisper pooled encoder outputs replaced with
    # deterministic synthetic features of the correct widths.
    text_feat = jax.random.normal(k_text, (BATCH, TEXT_DIM), jnp.float32)
    image_feat = jax.random.normal(k_img, (BATCH, IMAGE_DIM), jnp.float32)
    audio_feat = jax.random.normal(k_aud, (BATCH, AUDIO_DIM), jnp.float32)

    # torch.rand(4) -> deterministic uniform angles; exact circuit sim for <Z_i>.
    thetas = np.asarray(jax.random.uniform(k_q, (QUANTUM_DIM,), jnp.float32))
    q_out = quantum_fusion_expvals(thetas)                       # (4,)
    quantum_feat = jnp.tile(jnp.asarray(q_out)[None, :], (BATCH, 1))

    out = qarchangel_forward(params, text_feat, image_feat, audio_feat,
                             quantum_feat)
    out = jax.tree_util.tree_map(jax.block_until_ready, out)

    # Sanity: each head is a softmax over dim=1 (approx-reciprocal normalization
    # + bf16 MXU operands => slightly looser tolerance on the row sums).
    for name, expected_n in [("diagnosis", NUM_DIAGNOSES),
                             ("treatment", NUM_TREATMENTS),
                             ("severity", 5), ("emergency", 2)]:
        arr = np.asarray(out[name])
        assert arr.shape == (BATCH, expected_n), (name, arr.shape)
        assert np.allclose(arr.sum(axis=1), 1.0, atol=1e-2), (name, arr.sum(axis=1))
        assert np.all(arr >= 0.0), name

    print("KERNEL_OK")
</pallas_src>

<mosaic_0001>
module attributes {stable_mosaic.version = 11 : i64} {
  func.func @kernel(%arg0: i32, %arg1: memref<2x2176xbf16, #tpu.memory_space<vmem>>, %arg2: memref<2176x1024xbf16, #tpu.memory_space<vmem>>, %arg3: memref<1x1024xf32, #tpu.memory_space<vmem>>, %arg4: memref<1024x640xbf16, #tpu.memory_space<vmem>>, %arg5: memref<1x640xf32, #tpu.memory_space<vmem>>, %arg6: memref<2x640xf32, #tpu.memory_space<vmem>>, %arg7: memref<2x640xf32, #tpu.memory_space<vmem>>) attributes {dimension_semantics = [#tpu.dimension_semantics<arbitrary>], iteration_bounds = array<i64: 2>, scalar_prefetch = 0 : i64, scratch_operands = 1 : i64, tpu.core_type = #tpu.core_type<tc>, window_params = [{pipeline_mode = #tpu.pipeline_mode<synchronous>, transform_indices = @transform_0, window_bounds = array<i64: 2, 2176>}, {transform_indices = @transform_1, window_bounds = array<i64: 2176, 1024>}, {transform_indices = @transform_2, window_bounds = array<i64: 1, 1024>}, {transform_indices = @transform_3, window_bounds = array<i64: 1024, 640>}, {pipeline_mode = #tpu.pipeline_mode<synchronous>, transform_indices = @transform_4, window_bounds = array<i64: 1, 640>}, {pipeline_mode = #tpu.pipeline_mode<synchronous>, transform_indices = @transform_5, window_bounds = array<i64: 2, 640>}]} {
    %c0_i32 = arith.constant 0 : i32
    %0 = arith.cmpi eq, %arg0, %c0_i32 : i32
    %1 = arith.extui %0 : i1 to i32
    %c0_i32_0 = arith.constant 0 : i32
    %2 = arith.cmpi ne, %1, %c0_i32_0 : i32
    scf.if %2 {
      %cst_15 = arith.constant 0.000000e+00 : f32
      %20 = vector.broadcast %cst_15 : f32 to vector<2x640xf32>
      %c0_16 = arith.constant 0 : index
      %c0_17 = arith.constant 0 : index
      %21 = vector.load %arg7[%c0_16, %c0_17] : memref<2x640xf32, #tpu.memory_space<vmem>>, vector<2x640xf32>
      tpu.vector_store %arg7[%c0_16, %c0_17], %20 {strides = array<i32>} : memref<2x640xf32, #tpu.memory_space<vmem>>, vector<2x640xf32>,
    } else {
    }
    %c0 = arith.constant 0 : index
    %c0_1 = arith.constant 0 : index
    %3 = vector.load %arg1[%c0, %c0_1] : memref<2x2176xbf16, #tpu.memory_space<vmem>>, vector<2x2176xbf16>
    %c0_2 = arith.constant 0 : index
    %c0_3 = arith.constant 0 : index
    %4 = vector.load %arg2[%c0_2, %c0_3] : memref<2176x1024xbf16, #tpu.memory_space<vmem>>, vector<2176x1024xbf16>
    %cst = arith.constant dense<0.000000e+00> : vector<2x1024xf32>
    %5 = tpu.matmul %3, %4, %cst {dimension_numbers = #tpu.dot_dimension_numbers<[1], [0], [0], [1], [0, 0, 1, 1], [], []>} : vector<2x2176xbf16>, vector<2176x1024xbf16>, vector<2x1024xf32> -> vector<2x1024xf32>
    %c0_4 = arith.constant 0 : index
    %c0_5 = arith.constant 0 : index
    %6 = vector.load %arg3[%c0_4, %c0_5] : memref<1x1024xf32, #tpu.memory_space<vmem>>, vector<1x1024xf32>
    %7 = vector.broadcast %6 : vector<1x1024xf32> to vector<2x1024xf32>
    %8 = arith.addf %5, %7 : vector<2x1024xf32>
    %cst_6 = arith.constant 0.000000e+00 : f32
    %9 = vector.broadcast %cst_6 : f32 to vector<2x1024xf32>
    %10 = arith.maximumf %8, %9 : vector<2x1024xf32>
    %c0_7 = arith.constant 0 : index
    %c0_8 = arith.constant 0 : index
    %11 = vector.load %arg7[%c0_7, %c0_8] : memref<2x640xf32, #tpu.memory_space<vmem>>, vector<2x640xf32>
    %12 = arith.truncf %10 : vector<2x1024xf32> to vector<2x1024xbf16>
    %c0_9 = arith.constant 0 : index
    %c0_10 = arith.constant 0 : index
    %13 = vector.load %arg4[%c0_9, %c0_10] : memref<1024x640xbf16, #tpu.memory_space<vmem>>, vector<1024x640xbf16>
    %cst_11 = arith.constant dense<0.000000e+00> : vector<2x640xf32>
    %14 = tpu.matmul %12, %13, %cst_11 {dimension_numbers = #tpu.dot_dimension_numbers<[1], [0], [0], [1], [0, 0, 1, 1], [], []>} : vector<2x1024xbf16>, vector<1024x640xbf16>, vector<2x640xf32> -> vector<2x640xf32>
    %15 = arith.addf %11, %14 : vector<2x640xf32>
    %c0_12 = arith.constant 0 : index
    %c0_13 = arith.constant 0 : index
    %16 = vector.load %arg7[%c0_12, %c0_13] : memref<2x640xf32, #tpu.memory_space<vmem>>, vector<2x640xf32>
    tpu.vector_store %arg7[%c0_12, %c0_13], %15 {strides = array<i32>} : memref<2x640xf32, #tpu.memory_space<vmem>>, vector<2x640xf32>,
    %c1_i32 = arith.constant 1 : i32
    %17 = arith.cmpi eq, %arg0, %c1_i32 : i32
    %18 = arith.extui %17 : i1 to i32
    %c0_i32_14 = arith.constant 0 : i32
    %19 = arith.cmpi ne, %18, %c0_i32_14 : i32
    scf.if %19 {
      %c0_15 = arith.constant 0 : index
      %c0_16 = arith.constant 0 : index
      %20 = vector.load %arg7[%c0_15, %c0_16] : memref<2x640xf32, #tpu.memory_space<vmem>>, vector<2x640xf32>
      %c0_17 = arith.constant 0 : index
      %c0_18 = arith.constant 0 : index
      %21 = vector.load %arg5[%c0_17, %c0_18] : memref<1x640xf32, #tpu.memory_space<vmem>>, vector<1x640xf32>
      %22 = vector.broadcast %21 : vector<1x640xf32> to vector<2x640xf32>
      %23 = arith.addf %20, %22 : vector<2x640xf32>
      %24 = vector.extract_strided_slice %23 {offsets = [0, 0], sizes = [2, 256], strides = [1, 1]} : vector<2x640xf32> to vector<2x256xf32>
      %cst_19 = arith.constant dense<0xFF800000> : vector<2xf32>
      %25 = vector.multi_reduction <maximumf>, %24, %cst_19 [1] : vector<2x256xf32> to vector<2xf32>
      %26 = vector.shape_cast %25 : vector<2xf32> to vector<2x1xf32>
      %27 = vector.broadcast %26 : vector<2x1xf32> to vector<2x256xf32>
      %28 = arith.subf %24, %27 : vector<2x256xf32>
      %29 = math.exp %28 : vector<2x256xf32>
      %cst_20 = arith.constant dense<0.000000e+00> : vector<2xf32>
      %30 = vector.multi_reduction <add>, %29, %cst_20 [1] : vector<2x256xf32> to vector<2xf32>
      %31 = vector.shape_cast %30 : vector<2xf32> to vector<2x1xf32>
      %32 = tpu.reciprocal %31 {approx = true} : vector<2x1xf32> -> vector<2x1xf32>
      %33 = vector.broadcast %32 : vector<2x1xf32> to vector<2x256xf32>
      %34 = arith.mulf %29, %33 : vector<2x256xf32>
      %c0_21 = arith.constant 0 : index
      %c0_22 = arith.constant 0 : index
      %35 = vector.load %arg6[%c0_21, %c0_22] : memref<2x640xf32, #tpu.memory_space<vmem>>, vector<2x256xf32>
      tpu.vector_store %arg6[%c0_21, %c0_22], %34 {strides = array<i32>} : memref<2x640xf32, #tpu.memory_space<vmem>>, vector<2x256xf32>,
      %36 = vector.extract_strided_slice %23 {offsets = [0, 256], sizes = [2, 128], strides = [1, 1]} : vector<2x640xf32> to vector<2x128xf32>
      %cst_23 = arith.constant dense<0xFF800000> : vector<2xf32>
      %37 = vector.multi_reduction <maximumf>, %36, %cst_23 [1] : vector<2x128xf32> to vector<2xf32>
      %38 = vector.shape_cast %37 : vector<2xf32> to vector<2x1xf32>
      %39 = vector.broadcast %38 : vector<2x1xf32> to vector<2x128xf32>
      %40 = arith.subf %36, %39 : vector<2x128xf32>
      %41 = math.exp %40 : vector<2x128xf32>
      %cst_24 = arith.constant dense<0.000000e+00> : vector<2xf32>
      %42 = vector.multi_reduction <add>, %41, %cst_24 [1] : vector<2x128xf32> to vector<2xf32>
      %43 = vector.shape_cast %42 : vector<2xf32> to vector<2x1xf32>
      %44 = tpu.reciprocal %43 {approx = true} : vector<2x1xf32> -> vector<2x1xf32>
      %45 = vector.broadcast %44 : vector<2x1xf32> to vector<2x128xf32>
      %46 = arith.mulf %41, %45 : vector<2x128xf32>
      %c0_25 = arith.constant 0 : index
      %c256 = arith.constant 256 : index
      %47 = vector.load %arg6[%c0_25, %c256] : memref<2x640xf32, #tpu.memory_space<vmem>>, vector<2x128xf32>
      tpu.vector_store %arg6[%c0_25, %c256], %46 {strides = array<i32>} : memref<2x640xf32, #tpu.memory_space<vmem>>, vector<2x128xf32>,
      %48 = vector.extract_strided_slice %23 {offsets = [0, 384], sizes = [2, 128], strides = [1, 1]} : vector<2x640xf32> to vector<2x128xf32>
      %cst_26 = arith.constant dense<0xFF800000> : vector<2xf32>
      %49 = vector.multi_reduction <maximumf>, %48, %cst_26 [1] : vector<2x128xf32> to vector<2xf32>
      %50 = vector.shape_cast %49 : vector<2xf32> to vector<2x1xf32>
      %51 = vector.broadcast %50 : vector<2x1xf32> to vector<2x128xf32>
      %52 = arith.subf %48, %51 : vector<2x128xf32>
      %53 = math.exp %52 : vector<2x128xf32>
      %cst_27 = arith.constant dense<0.000000e+00> : vector<2xf32>
      %54 = vector.multi_reduction <add>, %53, %cst_27 [1] : vector<2x128xf32> to vector<2xf32>
      %55 = vector.shape_cast %54 : vector<2xf32> to vector<2x1xf32>
      %56 = tpu.reciprocal %55 {approx = true} : vector<2x1xf32> -> vector<2x1xf32>
      %57 = vector.broadcast %56 : vector<2x1xf32> to vector<2x128xf32>
      %58 = arith.mulf %53, %57 : vector<2x128xf32>
      %c0_28 = arith.constant 0 : index
      %c384 = arith.constant 384 : index
      %59 = vector.load %arg6[%c0_28, %c384] : memref<2x640xf32, #tpu.memory_space<vmem>>, vector<2x128xf32>
      tpu.vector_store %arg6[%c0_28, %c384], %58 {strides = array<i32>} : memref<2x640xf32, #tpu.memory_space<vmem>>, vector<2x128xf32>,
      %60 = vector.extract_strided_slice %23 {offsets = [0, 512], sizes = [2, 128], strides = [1, 1]} : vector<2x640xf32> to vector<2x128xf32>
      %cst_29 = arith.constant dense<0xFF800000> : vector<2xf32>
      %61 = vector.multi_reduction <maximumf>, %60, %cst_29 [1] : vector<2x128xf32> to vector<2xf32>
      %62 = vector.shape_cast %61 : vector<2xf32> to vector<2x1xf32>
      %63 = vector.broadcast %62 : vector<2x1xf32> to vector<2x128xf32>
      %64 = arith.subf %60, %63 : vector<2x128xf32>
      %65 = math.exp %64 : vector<2x128xf32>
      %cst_30 = arith.constant dense<0.000000e+00> : vector<2xf32>
      %66 = vector.multi_reduction <add>, %65, %cst_30 [1] : vector<2x128xf32> to vector<2xf32>
      %67 = vector.shape_cast %66 : vector<2xf32> to vector<2x1xf32>
      %68 = tpu.reciprocal %67 {approx = true} : vector<2x1xf32> -> vector<2x1xf32>
      %69 = vector.broadcast %68 : vector<2x1xf32> to vector<2x128xf32>
      %70 = arith.mulf %65, %69 : vector<2x128xf32>
      %c0_31 = arith.constant 0 : index
      %c512 = arith.constant 512 : index
      %71 = vector.load %arg6[%c0_31, %c512] : memref<2x640xf32, #tpu.memory_space<vmem>>, vector<2x128xf32>
      tpu.vector_store %arg6[%c0_31, %c512], %70 {strides = array<i32>} : memref<2x640xf32, #tpu.memory_space<vmem>>, vector<2x128xf32>,
    } else {
    }
    return
  }
  func.func @transform_0(%arg0: i32) -> (i32, i32) {
    %c0_i32 = arith.constant 0 : i32
    %c0_i32_0 = arith.constant 0 : i32
    %c0_i32_1 = arith.constant 0 : i32
    return %c0_i32, %c0_i32_0 : i32, i32
  }
  func.func @transform_1(%arg0: i32) -> (i32, i32) {
    %c0_i32 = arith.constant 0 : i32
    %c0_i32_0 = arith.constant 0 : i32
    return %c0_i32, %arg0 : i32, i32
  }
  func.func @transform_2(%arg0: i32) -> (i32, i32) {
    %c0_i32 = arith.constant 0 : i32
    %c0_i32_0 = arith.constant 0 : i32
    return %c0_i32, %arg0 : i32, i32
  }
  func.func @transform_3(%arg0: i32) -> (i32, i32) {
    %c0_i32 = arith.constant 0 : i32
    %c0_i32_0 = arith.constant 0 : i32
    return %arg0, %c0_i32 : i32, i32
  }
  func.func @transform_4(%arg0: i32) -> (i32, i32) {
    %c0_i32 = arith.constant 0 : i32
    %c0_i32_0 = arith.constant 0 : i32
    %c0_i32_1 = arith.constant 0 : i32
    return %c0_i32, %c0_i32_0 : i32, i32
  }
  func.func @transform_5(%arg0: i32) -> (i32, i32) {
    %c0_i32 = arith.constant 0 : i32
    %c0_i32_0 = arith.constant 0 : i32
    %c0_i32_1 = arith.constant 0 : i32
    return %c0_i32, %c0_i32_0 : i32, i32
  }
}

</mosaic_0001>

<bundles_post_ra>
// kernel: tpu_custom_call.1
= control target key start
LH: loop header
LB: loop body
LE: loop exit
PB: predicated region body
PF: predicated region fallthrough
CT: control target
= control target key end

     0   :  { %s15875_s0 = inlined_call_operand.hbm [shape: bf16[2,2176], index: 0, kind: input, shape index: {}]   ;;  %s15876_s1 = inlined_call_operand.hbm [shape: bf16[2176,2048], index: 1, kind: input, shape index: {}]   ;;  %s15877_s2 = inlined_call_operand.hbm [shape: f32[1,2048], index: 2, kind: input, shape index: {}]   ;;  %s15878_s3 = inlined_call_operand.hbm [shape: bf16[2048,640], index: 3, kind: input, shape index: {}]   ;;  %s15879_s4 = inlined_call_operand.hbm [shape: f32[1,640], index: 4, kind: input, shape index: {}]   ;;  %s15880_s5 = inlined_call_operand.hbm [shape: f32[2,640], index: 5, kind: output, shape index: {}]  }
   0x1   :  { %15892 = sst [smem:[#allocation19_spill]] %s15876_s1 }
   0x2   :  { %15893 = sst [smem:[#allocation20_spill]] %s15879_s4 }
   0x3   :  { %10 = vsyncpa [#allocation4], 0 }
   0x4   :  { %11 = vsyncpa [#allocation7], 0 }
   0x5   :  { %13 = vsyncpa [#allocation7 + $0x1], 0 }
   0x6   :  { %14 = vsyncpa [#allocation10], 0 }
   0x7   :  { %16 = vsyncpa [#allocation10 + $0x1], 0 }
   0x8   :  { %17 = vsyncpa [#allocation5], 0  ;;  %s13908_s18 = smov 0   ;;  %s13910_s19 = smov 0  }
   0x9   :  { %s13912_s20 = smov 0   ;;  %s13914_s21 = smov 0  }
   0xa LB: > { %s13927_s22 = sadd.s32 4294967295, %s13860_s21   ;;  %s13930_s23 = sadd.s32 1, %s13860_s21   ;;  %s13860_s21 = sphi %s13914_s21, %s15921_s21   ;;  %s13856_s20 = sphi %s13912_s20, %s15920_s20   ;;  %s13852_s19 = sphi %s13910_s19, %s15919_s19   ;;  %s13848_s18 = sphi %s13908_s18, %s15918_s18  }
   0xb   : > { %s48_s24 = ssub.s32 %s13860_s21, %s13930_s23  ;;  %s51_s25 = sadd.s32 1, %s13856_s20 }
   0xc   : > { %p49_p0 = scmp.eq.s32.totalorder %s48_s24, 0  ;;  %p58_p1 = scmp.ne.s32.totalorder %s13856_s20, %s13852_s19 }
   0xd   : > { %p59_p2 = scmp.eq.s32.totalorder %s13860_s21, 0  ;;  %p64_p3 = scmp.ne.s32.totalorder %s13852_s19, %s13848_s18 }
   0xe   : > { %s13940_s26 = scalar_select %p49_p0, %s13856_s20, %s51_s25  }
   0xf   : > { %p13942_p4 = por %p59_p2, %p58_p1  ;;  %p15881_p5 = scmp.eq.s32.totalorder %s13927_s22, 0 }
  0x10   : > { %15894 = sst [smem:[#allocation18_spill]] %s13940_s26  ;;  %p11398_p6 = scmp.ge.s32.totalorder %s13860_s21, 1 }
  0x11   : > { %p169_p7 = scmp.lt.s32.totalorder %s13860_s21, 3  ;;  %p13951_p8 = por %p15881_p5, %p64_p3 }
  0x12   : > { %s13862_s30 = smov [#allocation11]   ;;  %p13121_p12 = scmp.lt.s32.totalorder %s13860_s21, 2 }
  0x13   : > { %s15896_s28 = scalar_select %p13951_p8, 1, 0 }
  0x14   : > { %p13956_p10 = pnand %p11398_p6, %p169_p7  ;;  %s193_s6 = sshll.u32 %s13862_s30, 4  ;;  %s194_s6 = int_to_ptr.vmem [resolvable:$true] %s193_s6 }
  0x15   : > { %s15888_s7 = sand.u32 1, %s13860_s21   ;;  %p13972_p0 = pnand %p13121_p12, %p13942_p4 }
  0x16   : > { %s15897_s29 = scalar_select %p13956_p10, 1, 0 }
  0x17   : > { %p13102_p11 = pneg %p13956_p10  ;;  %s13977_s10 = sand.u32 1, %s13856_s20  }
  0x18   : > { %s15899_s9 = scalar_select %p13972_p0, 1, 0 }
  0x19   : > { %p13966_p13 = pnand %p13102_p11, %p15881_p5  ;;  %s13079_s11 = smul.u32 8704, %s13977_s10 }
  0x1a   : > { %s15900_s4 = sld [smem:[#allocation20_spill]] }
  0x1b   : > { %s15898_s8 = scalar_select %p13966_p13, 1, 0 }
  0x1c   : > { %p15885_p2 = pneg %p13966_p13 }
  0x20   : > { %s13638_s14 = scalar_lea.hbm %s15900_s4, 80 }
  0x21   : > { %p13639_p1 = scmp.ne.s32.totalorder %s15900_s4, %s13638_s14  ;;  %p13645_p6 = scmp.lt.u32.totalorder %s13638_s14, %s15900_s4 }
  0x23   : > { %p13641_p3 = pnand %p15885_p2, %p13639_p1 }
  0x25   : > { %p13642_p4 = pneg %p13641_p3 }
  0x27   : > { %p13647_p7 = pnand %p13645_p6, %p13642_p4 }
  0x29   : > { %13650 = shalt.err (!%p13647_p7)
}
  0x2a   : > { %s13651_s24 = scalar_lea.vmem %s194_s6, 80  ;;  %s13658_s25 = scalar_lea.vmem %s194_s6, 96 }
  0x2b   : > { %p13652_p11 = scmp.ne.s32.totalorder %s194_s6, %s13651_s24  ;;  %p13659_p5 = scmp.lt.s32.totalorder %s194_s6, %s194_s6 }
  0x2c   : > { %p13660_p8 = scmp.lt.s32.totalorder %s13658_s25, %s13651_s24 }
  0x2d   : > { %p13654_p12 = pnand %p13652_p11, %p15885_p2 }
  0x2e   : > { %p13661_p10 = por %p13660_p8, %p13659_p5 }
  0x2f   : > { %p13655_p9 = pneg %p13654_p12 }
  0x31   : > { %p13662_p0 = pnand %p13661_p10, %p13655_p9 }
  0x33   : > { %13665 = shalt.err (!%p13662_p0)
}
  0x34   : > { %13108 = dma.hbm_to_vmem [thread:$0]  (!%p13966_p13), %s15900_s4, 80, %s194_s6, [#allocation10]  }
  0x35   : > { %s12829_s12 = sshll.u32 %s13860_s21, 9  ;;  %s208_s13 = scalar_lea.vmem [#allocation6], %s13079_s11 }
  0x36   : > { %s215_s14 = sshll.u32 %s208_s13, 4  ;;  %s15901_s1 = sld [smem:[#allocation19_spill]]  ;;  %s14008_s14 = int_to_ptr.vmem [resolvable:$true] %s215_s14 }
  0x37   : > { %s14012_s18 = scalar_lea.sflag [#allocation7], %s15888_s7  ;;  %p15902_p8 = scmp.ne.s32.totalorder %s15899_s9, 0 }
  0x39   : > { %p14018_p9 = pneg %p15902_p8 }
  0x3b   : > { %s15903_s6 = scalar_select %p14018_p9, 1, 0 }
  0x3c   : > { %s14006_s17 = scalar_lea.hbm %s15901_s1, %s12829_s12  ;;  %s13671_s27 = scalar_lea.hbm %s15901_s1, 278528 }
  0x3d   : > { %s13666_s24 = scalar_lea.hbm %s14006_s17, 139264  ;;  %p13672_p1 = scmp.lt.u32.totalorder %s14006_s17, %s15901_s1 }
  0x3e   : > { %p13667_p5 = scmp.ne.s32.totalorder %s14006_s17, %s13666_s24  ;;  %p13673_p3 = scmp.lt.u32.totalorder %s13671_s27, %s13666_s24 }
  0x3f   : > { %p13675_p6 = scmp.lt.u32.totalorder %s13666_s24, %s14006_s17 }
  0x40   : > { %p13669_p10 = pnand %p14018_p9, %p13667_p5  ;;  %p13674_p4 = por %p13673_p3, %p13672_p1 }
  0x42   : > { %p13670_p0 = pneg %p13669_p10  ;;  %p13676_p7 = por %p13675_p6, %p13674_p4 }
  0x44   : > { %p13677_p11 = pnand %p13676_p7, %p13670_p0 }
  0x46   : > { %13680 = shalt.err (!%p13677_p11)
}
  0x47   : > { %s13681_s13 = scalar_lea.vmem %s14008_s14, 139264  ;;  %s13863_s15 = smov [#allocation6]  }
  0x48   : > { %p13682_p12 = scmp.ne.s32.totalorder %s14008_s14, %s13681_s13  ;;  %s13686_s16 = sshll.u32 %s13863_s15, 4  ;;  %s13687_s16 = int_to_ptr.vmem [resolvable:$false] %s13686_s16 }
  0x49   : > { %s13688_s11 = scalar_lea.vmem %s13687_s16, 278528  ;;  %p13689_p2 = scmp.lt.s32.totalorder %s14008_s14, %s13687_s16 }
  0x4a   : > { %p13684_p5 = pnand %p13682_p12, %p14018_p9  ;;  %p13690_p13 = scmp.lt.s32.totalorder %s13688_s11, %s13681_s13 }
  0x4c   : > { %p13685_p10 = pneg %p13684_p5  ;;  %p13691_p1 = por %p13690_p13, %p13689_p2 }
  0x4e   : > { %p13692_p3 = pnand %p13691_p1, %p13685_p10 }
  0x50   : > { %13695 = shalt.err (!%p13692_p3)
}
  0x51   : > { %s13864_s24 = smov 1024   ;;  %s13865_s25 = smov 512  }
  0x52   : > { %s13866_s27 = smov 32   ;;  %s13867_s30 = smov [#allocation3]  }
  0x53   : > { %13112 = dma.hbm_to_vmem [thread:$0]  (!%p15902_p8), %s14006_s17, 139264, %s14008_s14, %s14012_s18, %s13864_s24, %s13865_s25, %s13866_s27  }
  0x54   : > { %s182_s12 = sshll.u32 %s13867_s30, 4  ;;  %s11404_s15 = sshll.u32 %s13977_s10, 3  ;;  %s183_s12 = int_to_ptr.vmem [resolvable:$true] %s182_s12 }
  0x55   : > { %s13696_s11 = scalar_lea.hbm %s15875_s0, 272  ;;  %p15904_p2 = scmp.ne.s32.totalorder %s15898_s8, 0 }
  0x56   : > { %p13697_p13 = scmp.ne.s32.totalorder %s15875_s0, %s13696_s11  ;;  %p13703_p7 = scmp.lt.u32.totalorder %s13696_s11, %s15875_s0 }
  0x57   : > { %p15905_p0 = pneg %p15904_p2 }
  0x59   : > { %p13699_p4 = pnand %p13697_p13, %p15905_p0 }
  0x5b   : > { %p13700_p6 = pneg %p13699_p4 }
  0x5d   : > { %p13705_p11 = pnand %p13703_p7, %p13700_p6 }
  0x5f   : > { %13708 = shalt.err (!%p13705_p11)
}
  0x60   : > { %s13709_s14 = scalar_lea.vmem %s183_s12, 272  ;;  %p15906_p5 = pmov %p15905_p0 }
  0x61   : > { %p13710_p12 = scmp.ne.s32.totalorder %s183_s12, %s13709_s14  ;;  %s13716_s17 = scalar_lea.vmem %s183_s12, 288 }
  0x62   : > { %p13717_p3 = scmp.lt.s32.totalorder %s183_s12, %s183_s12  ;;  %p13718_p8 = scmp.lt.s32.totalorder %s13716_s17, %s13709_s14 }
  0x63   : > { %p13712_p10 = pnand %p13710_p12, %p15906_p5 }
  0x64   : > { %p13719_p9 = por %p13718_p8, %p13717_p3 }
  0x65   : > { %p13713_p1 = pneg %p13712_p10 }
  0x67   : > { %p13720_p0 = pnand %p13719_p9, %p13713_p1 }
  0x69   : > { %13723 = shalt.err (!%p13720_p0)
}
  0x6a   : > { %13105 = dma.hbm_to_vmem [thread:$0]  (!%p15904_p2), %s15875_s0, 272, %s183_s12, [#allocation4]  }
  0x6b   : > { %s12830_s26 = sshll.u32 %s13860_s21, 7  ;;  %s229_s7 = scalar_lea.vmem [#allocation8], %s11404_s15 }
  0x6c   : > { %s237_s24 = sshll.u32 %s229_s7, 4  ;;  %s235_s30 = scalar_lea.hbm %s15877_s2, %s12830_s26  ;;  %s238_s24 = int_to_ptr.vmem [resolvable:$true] %s237_s24 }
  0x6d   : > { %s13724_s16 = scalar_lea.hbm %s235_s30, 128  ;;  %p15907_p9 = scmp.ne.s32.totalorder %s15903_s6, 0 }
  0x6e   : > { %p13725_p8 = scmp.ne.s32.totalorder %s235_s30, %s13724_s16  ;;  %s13729_s11 = scalar_lea.hbm %s15877_s2, 256 }
  0x6f   : > { %p13730_p2 = scmp.lt.u32.totalorder %s235_s30, %s15877_s2  ;;  %p13731_p6 = scmp.lt.u32.totalorder %s13729_s11, %s13724_s16 }
  0x70   : > { %p13727_p13 = pnand %p13725_p8, %p15907_p9  ;;  %p13733_p11 = scmp.lt.u32.totalorder %s13724_s16, %s235_s30 }
  0x71   : > { %p13732_p7 = por %p13731_p6, %p13730_p2 }
  0x72   : > { %p13728_p4 = pneg %p13727_p13 }
  0x73   : > { %p13734_p12 = por %p13733_p11, %p13732_p7 }
  0x75   : > { %p13735_p5 = pnand %p13734_p12, %p13728_p4 }
  0x77   : > { %13738 = shalt.err (!%p13735_p5)
}
  0x78   : > { %s13739_s12 = scalar_lea.vmem %s238_s24, 128  ;;  %s13868_s15 = smov [#allocation8]  }
  0x79   : > { %p13740_p10 = scmp.ne.s32.totalorder %s238_s24, %s13739_s12  ;;  %s13744_s1 = sshll.u32 %s13868_s15, 4  ;;  %s13745_s1 = int_to_ptr.vmem [resolvable:$false] %s13744_s1 }
  0x7a   : > { %s13746_s4 = scalar_lea.vmem %s13745_s1, 256  ;;  %p13747_p0 = scmp.lt.s32.totalorder %s238_s24, %s13745_s1 }
  0x7b   : > { %p13742_p1 = pnand %p13740_p10, %p15907_p9  ;;  %p13748_p8 = scmp.lt.s32.totalorder %s13746_s4, %s13739_s12 }
  0x7d   : > { %p13743_p3 = pneg %p13742_p1  ;;  %p13749_p13 = por %p13748_p8, %p13747_p0 }
  0x7f   : > { %p13750_p2 = pnand %p13749_p13, %p13743_p3 }
  0x81   : > { %13753 = shalt.err (!%p13750_p2)
}
  0x82   : > { %p15908_p6 = scmp.ne.s32.totalorder %s15899_s9, 0  ;;  %s13080_s26 = smul.u32 2560, %s13977_s10 }
  0x83   : > { %s13081_s7 = smul.u32 40960, %s13860_s21  ;;  %s15909_s11 = sand.u32 1, %s13860_s21  }
  0x84   : > { %13115 = dma.hbm_to_vmem [thread:$0]  (!%p15908_p6), %s235_s30, 128, %s238_s24, %s14012_s18  }
  0x85   : > { %s14085_s16 = scalar_lea.hbm %s15878_s3, %s13081_s7  ;;  %s248_s8 = scalar_lea.vmem [#allocation9], %s13080_s26 }
  0x86   : > { %s256_s13 = sshll.u32 %s248_s8, 4  ;;  %s14091_s14 = scalar_lea.sflag [#allocation10], %s15909_s11  ;;  %s14087_s13 = int_to_ptr.vmem [resolvable:$true] %s256_s13 }
  0x87   : > { %s13754_s17 = scalar_lea.hbm %s14085_s16, 40960  ;;  %s13759_s24 = scalar_lea.hbm %s15878_s3, 81920 }
  0x88   : > { %p13755_p4 = scmp.ne.s32.totalorder %s14085_s16, %s13754_s17  ;;  %p13760_p12 = scmp.lt.u32.totalorder %s14085_s16, %s15878_s3 }
  0x89   : > { %p13761_p5 = scmp.lt.u32.totalorder %s13759_s24, %s13754_s17  ;;  %p13763_p1 = scmp.lt.u32.totalorder %s13754_s17, %s14085_s16 }
  0x8a   : > { %p13757_p7 = pnand %p13755_p4, %p15907_p9 }
  0x8b   : > { %p13762_p10 = por %p13761_p5, %p13760_p12 }
  0x8c   : > { %p13758_p11 = pneg %p13757_p7 }
  0x8d   : > { %p13764_p3 = por %p13763_p1, %p13762_p10 }
  0x8f   : > { %p13765_p0 = pnand %p13764_p3, %p13758_p11 }
  0x91   : > { %13768 = shalt.err (!%p13765_p0)
}
  0x92   : > { %s13769_s21 = scalar_lea.vmem %s14087_s13, 40960  ;;  %s13869_s15 = smov [#allocation9]  }
  0x93   : > { %p13770_p8 = scmp.ne.s32.totalorder %s14087_s13, %s13769_s21  ;;  %s13774_s1 = sshll.u32 %s13869_s15, 4  ;;  %s13775_s1 = int_to_ptr.vmem [resolvable:$false] %s13774_s1 }
  0x94   : > { %s13776_s4 = scalar_lea.vmem %s13775_s1, 81920  ;;  %p13777_p4 = scmp.lt.s32.totalorder %s14087_s13, %s13775_s1 }
  0x95   : > { %p13772_p13 = pnand %p13770_p8, %p15907_p9  ;;  %p13778_p7 = scmp.lt.s32.totalorder %s13776_s4, %s13769_s21 }
  0x97   : > { %p13773_p2 = pneg %p13772_p13  ;;  %p13779_p12 = por %p13778_p7, %p13777_p4 }
  0x99   : > { %p13780_p5 = pnand %p13779_p12, %p13773_p2 }
  0x9b   : > { %13783 = shalt.err (!%p13780_p5)
}
  0x9c   : > { %s13870_s26 = smov 320   ;;  %s13871_s7 = smov 20  }
  0x9d   : > { %13118 = dma.hbm_to_vmem [thread:$0]  (!%p15908_p6), %s14085_s16, 40960, %s14087_s13, %s14091_s14, %s13870_s26, %s13870_s26, %s13871_s7  }
  0x9e   : > { %p15910_p9 = scmp.ne.s32.totalorder %s15897_s29, 0 }
  0x9f   : > { %p15911_p11 = scmp.eq.s32.totalorder (!%p15910_p9), %s13927_s22, 0 }
  0xa0   : > { %268 = sbr.rel (%p15910_p9) target bundleno = 2205 (0x89d), region = 40 }
  0xa7   : > { %13827 = dma.done.wait (%p15911_p11), [#allocation4], 272   ;;  %p15912_p10 = pmov %p15911_p11 }
  0xa8   : > { %s274_s6 = sand.u32 1, %s13927_s22   ;;  %s276_s25 = sand.u32 1, %s13852_s19  }
  0xa9   : > { %13829 = vsyncadd (%p15912_p10), [#allocation4], 4294967024  ;;  %s13082_s27 = smul.u32 8704, %s276_s25  ;;  %s275_s8 = scalar_lea.sflag [#allocation7], %s274_s6 }
  0xaa   : > { %p15913_p1 = scmp.ne.s32.totalorder %s15896_s28, 0 }
  0xab   : > { %s14123_s11 = scalar_lea.vmem [#allocation6], %s13082_s27 }
  0xac   : > { %13831 = dma.done.wait (%p15913_p1), %s275_s8, 139392  }
  0xad   : > { %13833 = vsyncadd (%p15913_p1), %s275_s8, 4294827904  ;;  %s11412_s29 = sshll.u32 %s276_s25, 3  ;;  %s13083_s9 = smul.u32 2560, %s276_s25 }
  0xae   : > { %s14129_s16 = scalar_lea.vmem [#allocation8], %s11412_s29  ;;  %s293_s13 = scalar_lea.sflag [#allocation10], %s274_s6 }
  0xaf   : > { %s14131_s14 = scalar_lea.vmem [#allocation9], %s13083_s9 }
  0xb0   : > { %13835 = dma.done.wait (%p15913_p1), %s293_s13, 40960  }
  0xb1   : > { %13837 = vsyncadd (%p15913_p1), %s293_s13, 4294926336  ;;  %p15914_p6 = pmov %p15912_p10 }
  0xb3   : > { %13839 = dma.done.wait (%p15914_p6), [#allocation10], 80   ;;  %p15915_p3 = pmov %p15914_p6 }
  0xb4   : > { %p15916_p0 = scmp.ne.s32.totalorder %s13927_s22, 0 }
  0xb5   : > { %13841 = vsyncadd (%p15915_p3), [#allocation10], 4294967216  ;;  %v13872_v0 = vmov (!%p15916_p0), 0.0  }
  0xb6   : > { %339 = sbr.rel (%p15916_p0) target bundleno = 189 (0xbd), region = 64  ;;  %340 = vst [vmem:[#allocation2] sm:$0xff] (!%p15916_p0), %v13872_v0  ;;  %341 = vst [vmem:[#allocation2 + $0x8] sm:$0x3] (!%p15916_p0), %v13872_v0 }
  0xbd PF: > { %v345_v1 = vld [vmem:[%s14123_s11] sm:$0xff]  ;;  %v346_v3 = vld [vmem:[%s14123_s11 + $0x8] sm:$0xff]  ;;  %v1435_v33 = vlaneseq  ;;  %v13873_v34 = vmov 1966171168   ;;  %p12824_p8 = scmp.ne.s32.totalorder %s13927_s22, 1 }
  0xbe   : > { %v349_v2 = vld [vmem:[%s14123_s11 + $0x20] sm:$0xff]  ;;  %v350_v5 = vld [vmem:[%s14123_s11 + $0x28] sm:$0xff]  ;;  %v1480_v35 = vunpack.c.l.s4 %v13873_v34  ;;  %vm11179_vm0 = vcmask (!%p12824_p8), 1041408  }
  0xbf   : > { %v11417_v4 = vcombine.high %v345_v1, %v349_v2  ;;  %v11416_v6 = vcombine.low %v345_v1, %v349_v2  ;;  %v353_v7 = vld [vmem:[%s14123_s11 + $0x40] sm:$0xff]  ;;  %v11419_v9 = vcombine.high %v346_v3, %v350_v5  ;;  %v11418_v10 = vcombine.low %v346_v3, %v350_v5  ;;  %v354_v12 = vld [vmem:[%s14123_s11 + $0x48] sm:$0xff] }
  0xc0   : > { %v357_v8 = vld [vmem:[%s14123_s11 + $0x60] sm:$0xff]  ;;  %v358_v13 = vld [vmem:[%s14123_s11 + $0x68] sm:$0xff]  ;;  %v14165_v44 = vshrl.u32 %v1435_v33, 7  ;;  %v1481_v45 = vunpack.c.0.s8 %v1480_v35 }
  0xc1   : > { %v11425_v11 = vcombine.high %v353_v7, %v357_v8  ;;  %v361_v14 = vld [vmem:[%s14123_s11 + $0x80] sm:$0xff]  ;;  %7047 = vmatprep.subr.bf16.mxu0 %v11417_v4  ;;  %v11427_v15 = vcombine.high %v354_v12, %v358_v13  ;;  %v362_v17 = vld [vmem:[%s14123_s11 + $0x88] sm:$0xff]  ;;  %7416 = vmatprep.subr.bf16.mxu1 %v11419_v9  ;;  %v11424_v19 = vcombine.low %v353_v7, %v357_v8 }
  0xc2   : > { %v365_v16 = vld [vmem:[%s14123_s11 + $0xa0] sm:$0xff]  ;;  %v366_v18 = vld [vmem:[%s14123_s11 + $0xa8] sm:$0xff]  ;;  %7048 = vmatpush1.bf16.msra.mxu0 %v11416_v6  ;;  %7417 = vmatpush1.bf16.msra.mxu1 %v11418_v10  ;;  %v11426_v20 = vcombine.low %v354_v12, %v358_v13  ;;  %v14172_v54 = vsub.s32 %v1481_v45, %v14165_v44 }
  0xc3   : > { %7049 = vmatprep.subr.bf16.mxu0 %v11425_v11  ;;  %v11433_v21 = vcombine.high %v361_v14, %v365_v16  ;;  %7418 = vmatprep.subr.bf16.mxu1 %v11427_v15  ;;  %v11435_v22 = vcombine.high %v362_v17, %v366_v18  ;;  %v369_v23 = vld [vmem:[%s14123_s11 + $0xc0] sm:$0xff]  ;;  %v370_v25 = vld [vmem:[%s14123_s11 + $0xc8] sm:$0xff]  ;;  %v11432_v27 = vcombine.low %v361_v14, %v365_v16 }
  0xc4   : > { %v373_v24 = vld [vmem:[%s14123_s11 + $0xe0] sm:$0xff]  ;;  %v374_v26 = vld [vmem:[%s14123_s11 + $0xe8] sm:$0xff]  ;;  %v11434_v28 = vcombine.low %v362_v17, %v366_v18 }
  0xc5   : > { %v11441_v29 = vcombine.high %v369_v23, %v373_v24  ;;  %v11443_v30 = vcombine.high %v370_v25, %v374_v26  ;;  %v377_v31 = vld [vmem:[%s14123_s11 + $0x100] sm:$0xff]  ;;  %v378_v36 = vld [vmem:[%s14123_s11 + $0x108] sm:$0xff]  ;;  %v11440_v38 = vcombine.low %v369_v23, %v373_v24  ;;  %v11442_v39 = vcombine.low %v370_v25, %v374_v26 }
  0xc6   : > { %7050 = vmatpush1.bf16.msra.mxu0 %v11424_v19  ;;  %7419 = vmatpush1.bf16.msra.mxu1 %v11426_v20  ;;  %v381_v32 = vld [vmem:[%s14123_s11 + $0x120] sm:$0xff]  ;;  %v382_v37 = vld [vmem:[%s14123_s11 + $0x128] sm:$0xff] }
  0xc7   : > { %7051 = vmatprep.subr.bf16.mxu0 %v11433_v21  ;;  %7420 = vmatprep.subr.bf16.mxu1 %v11435_v22  ;;  %v11449_v40 = vcombine.high %v377_v31, %v381_v32  ;;  %v11451_v41 = vcombine.high %v378_v36, %v382_v37  ;;  %v385_v42 = vld [vmem:[%s14123_s11 + $0x140] sm:$0xff]  ;;  %v386_v46 = vld [vmem:[%s14123_s11 + $0x148] sm:$0xff]  ;;  %v11448_v48 = vcombine.low %v377_v31, %v381_v32 }
  0xc8   : > { %v389_v43 = vld [vmem:[%s14123_s11 + $0x160] sm:$0xff]  ;;  %v390_v47 = vld [vmem:[%s14123_s11 + $0x168] sm:$0xff]  ;;  %v11450_v49 = vcombine.low %v378_v36, %v382_v37 }
  0xc9   : > { %v11457_v50 = vcombine.high %v385_v42, %v389_v43  ;;  %v11459_v51 = vcombine.high %v386_v46, %v390_v47  ;;  %v393_v52 = vld [vmem:[%s14123_s11 + $0x180] sm:$0xff]  ;;  %v394_v55 = vld [vmem:[%s14123_s11 + $0x188] sm:$0xff]  ;;  %v11456_v57 = vcombine.low %v385_v42, %v389_v43  ;;  %v11458_v58 = vcombine.low %v386_v46, %v390_v47 }
  0xca   : > { %7052 = vmatpush1.bf16.msra.mxu0 %v11432_v27  ;;  %7421 = vmatpush1.bf16.msra.mxu1 %v11434_v28  ;;  %v397_v53 = vld [vmem:[%s14123_s11 + $0x1a0] sm:$0xff]  ;;  %v398_v56 = vld [vmem:[%s14123_s11 + $0x1a8] sm:$0xff] }
  0xcb   : > { %7053 = vmatprep.subr.bf16.mxu0 %v11441_v29  ;;  %7422 = vmatprep.subr.bf16.mxu1 %v11443_v30  ;;  %v11465_v59 = vcombine.high %v393_v52, %v397_v53  ;;  %v14176_v60 = vld [vmem:[#allocation3] sm:$0xff]  ;;  %v11467_v61 = vcombine.high %v394_v55, %v398_v56  ;;  %v401_v62 = vld [vmem:[%s14123_s11 + $0x1c0] sm:$0xff]  ;;  %v11464_v3 = vcombine.low %v393_v52, %v397_v53 }
  0xcc   : > { %v405_v63 = vld [vmem:[%s14123_s11 + $0x1e0] sm:$0xff]  ;;  %v14182_v0 = vrot.slane %v14176_v60, %v14172_v54  ;;  %v402_v1 = vld [vmem:[%s14123_s11 + $0x1c8] sm:$0xff]  ;;  %v11466_v5 = vcombine.low %v394_v55, %v398_v56 }
  0xcd   : > { %v406_v2 = vld [vmem:[%s14123_s11 + $0x1e8] sm:$0xff]  ;;  %v11473_v6 = vcombine.high %v401_v62, %v405_v63  ;;  %v409_v8 = vld [vmem:[%s14123_s11 + $0x200] sm:$0xff]  ;;  %v11472_v13 = vcombine.low %v401_v62, %v405_v63 }
  0xce   : > { %7054 = vmatpush1.bf16.msra.mxu0 %v11440_v38  ;;  %7423 = vmatpush1.bf16.msra.mxu1 %v11442_v39  ;;  %v1493_v4 = vcombine.high %v14182_v0, %v14182_v0  ;;  %v11475_v7 = vcombine.high %v402_v1, %v406_v2  ;;  %v413_v9 = vld [vmem:[%s14123_s11 + $0x220] sm:$0xff]  ;;  %v410_v11 = vld [vmem:[%s14123_s11 + $0x208] sm:$0xff]  ;;  %v11474_v14 = vcombine.low %v402_v1, %v406_v2 }
  0xcf   : > { %7055 = vmatprep.subr.bf16.mxu0 %v11449_v40  ;;  %7424 = vmatprep.subr.bf16.mxu1 %v11451_v41  ;;  %v414_v12 = vld [vmem:[%s14123_s11 + $0x228] sm:$0xff]  ;;  %v11481_v15 = vcombine.high %v409_v8, %v413_v9  ;;  %v417_v17 = vld [vmem:[%s14123_s11 + $0x240] sm:$0xff]  ;;  %v11480_v21 = vcombine.low %v409_v8, %v413_v9 }
  0xd0   : > { %v14191_v10 = vrot.slane %v1493_v4, %v14172_v54  ;;  %v11483_v16 = vcombine.high %v410_v11, %v414_v12  ;;  %v421_v18 = vld [vmem:[%s14123_s11 + $0x260] sm:$0xff]  ;;  %v418_v19 = vld [vmem:[%s14123_s11 + $0x248] sm:$0xff]  ;;  %v11482_v22 = vcombine.low %v410_v11, %v414_v12 }
  0xd1   : > { %v422_v20 = vld [vmem:[%s14123_s11 + $0x268] sm:$0xff]  ;;  %v11489_v23 = vcombine.high %v417_v17, %v421_v18  ;;  %v425_v25 = vld [vmem:[%s14123_s11 + $0x280] sm:$0xff]  ;;  %v11488_v29 = vcombine.low %v417_v17, %v421_v18 }
  0xd2   : > { %7056 = vmatpush1.bf16.msra.mxu0 %v11448_v48  ;;  %7425 = vmatpush1.bf16.msra.mxu1 %v11450_v49  ;;  %v11491_v24 = vcombine.high %v418_v19, %v422_v20  ;;  %v429_v26 = vld [vmem:[%s14123_s11 + $0x2a0] sm:$0xff]  ;;  %v426_v27 = vld [vmem:[%s14123_s11 + $0x288] sm:$0xff]  ;;  %v11490_v30 = vcombine.low %v418_v19, %v422_v20 }
  0xd3   : > { %7057 = vmatprep.subr.bf16.mxu0 %v11457_v50  ;;  %7426 = vmatprep.subr.bf16.mxu1 %v11459_v51  ;;  %v430_v28 = vld [vmem:[%s14123_s11 + $0x2a8] sm:$0xff]  ;;  %v11497_v31 = vcombine.high %v425_v25, %v429_v26  ;;  %v433_v33 = vld [vmem:[%s14123_s11 + $0x2c0] sm:$0xff]  ;;  %v11496_v37 = vcombine.low %v425_v25, %v429_v26 }
  0xd4   : > { %7079 = vmatprep.mubr.bf16.mxu0 %v14191_v10  ;;  %7448 = vmatprep.mubr.bf16.mxu1 %v14191_v10  ;;  %v11499_v32 = vcombine.high %v426_v27, %v430_v28  ;;  %v437_v34 = vld [vmem:[%s14123_s11 + $0x2e0] sm:$0xff]  ;;  %v434_v35 = vld [vmem:[%s14123_s11 + $0x2c8] sm:$0xff]  ;;  %v11498_v38 = vcombine.low %v426_v27, %v430_v28 }
  0xd5   : > { %v438_v36 = vld [vmem:[%s14123_s11 + $0x2e8] sm:$0xff]  ;;  %v11505_v39 = vcombine.high %v433_v33, %v437_v34  ;;  %v441_v41 = vld [vmem:[%s14123_s11 + $0x300] sm:$0xff]  ;;  %v11504_v46 = vcombine.low %v433_v33, %v437_v34 }
  0xd6   : > { %7058 = vmatpush1.bf16.msra.mxu0 %v11456_v57  ;;  %7427 = vmatpush1.bf16.msra.mxu1 %v11458_v58  ;;  %v11507_v40 = vcombine.high %v434_v35, %v438_v36  ;;  %v445_v42 = vld [vmem:[%s14123_s11 + $0x320] sm:$0xff]  ;;  %v442_v43 = vld [vmem:[%s14123_s11 + $0x308] sm:$0xff]  ;;  %v11506_v47 = vcombine.low %v434_v35, %v438_v36 }
  0xd7   : > { %7059 = vmatprep.subr.bf16.mxu0 %v11465_v59  ;;  %7428 = vmatprep.subr.bf16.mxu1 %v11467_v61  ;;  %v446_v45 = vld [vmem:[%s14123_s11 + $0x328] sm:$0xff]  ;;  %v11513_v48 = vcombine.high %v441_v41, %v445_v42  ;;  %v449_v50 = vld [vmem:[%s14123_s11 + $0x340] sm:$0xff]  ;;  %v11512_v55 = vcombine.low %v441_v41, %v445_v42 }
  0xd8   : > { %v11515_v49 = vcombine.high %v442_v43, %v446_v45  ;;  %v453_v51 = vld [vmem:[%s14123_s11 + $0x360] sm:$0xff]  ;;  %v450_v52 = vld [vmem:[%s14123_s11 + $0x348] sm:$0xff]  ;;  %v11514_v56 = vcombine.low %v442_v43, %v446_v45 }
  0xd9   : > { %v454_v53 = vld [vmem:[%s14123_s11 + $0x368] sm:$0xff]  ;;  %v11521_v57 = vcombine.high %v449_v50, %v453_v51  ;;  %v457_v59 = vld [vmem:[%s14123_s11 + $0x380] sm:$0xff]  ;;  %v11520_v1 = vcombine.low %v449_v50, %v453_v51 }
  0xda   : > { %7060 = vmatpush1.bf16.msra.mxu0 %v11464_v3  ;;  %7429 = vmatpush1.bf16.msra.mxu1 %v11466_v5  ;;  %v11523_v58 = vcombine.high %v450_v52, %v454_v53  ;;  %v461_v61 = vld [vmem:[%s14123_s11 + $0x3a0] sm:$0xff]  ;;  %v458_v62 = vld [vmem:[%s14123_s11 + $0x388] sm:$0xff]  ;;  %v11522_v2 = vcombine.low %v450_v52, %v454_v53 }
  0xdb   : > { %7061 = vmatprep.subr.bf16.mxu0 %v11473_v6  ;;  %7430 = vmatprep.subr.bf16.mxu1 %v11475_v7  ;;  %v462_v63 = vld [vmem:[%s14123_s11 + $0x3a8] sm:$0xff]  ;;  %v11529_v3 = vcombine.high %v457_v59, %v461_v61  ;;  %v465_v5 = vld [vmem:[%s14123_s11 + $0x3c0] sm:$0xff]  ;;  %v11528_v9 = vcombine.low %v457_v59, %v461_v61 }
  0xdc   : > { %v11531_v4 = vcombine.high %v458_v62, %v462_v63  ;;  %v469_v6 = vld [vmem:[%s14123_s11 + $0x3e0] sm:$0xff]  ;;  %v466_v7 = vld [vmem:[%s14123_s11 + $0x3c8] sm:$0xff]  ;;  %v11530_v11 = vcombine.low %v458_v62, %v462_v63 }
  0xdd   : > { %v470_v8 = vld [vmem:[%s14123_s11 + $0x3e8] sm:$0xff]  ;;  %v11537_v12 = vcombine.high %v465_v5, %v469_v6  ;;  %v11536_v18 = vcombine.low %v465_v5, %v469_v6 }
  0xde   : > { %7062 = vmatpush1.bf16.msra.mxu0 %v11472_v13  ;;  %7431 = vmatpush1.bf16.msra.mxu1 %v11474_v14  ;;  %v11539_v13 = vcombine.high %v466_v7, %v470_v8  ;;  %v473_v14 = vld [vmem:[%s14123_s11 + $0x400] sm:$0xff]  ;;  %v478_v17 = vld [vmem:[%s14123_s11 + $0x428] sm:$0xff]  ;;  %v11538_v19 = vcombine.low %v466_v7, %v470_v8 }
  0xdf   : > { %7063 = vmatprep.subr.bf16.mxu0 %v11481_v15  ;;  %7432 = vmatprep.subr.bf16.mxu1 %v11483_v16  ;;  %v477_v15 = vld [vmem:[%s14123_s11 + $0x420] sm:$0xff]  ;;  %v474_v16 = vld [vmem:[%s14123_s11 + $0x408] sm:$0xff] }
  0xe0   : > { %v11545_v20 = vcombine.high %v473_v14, %v477_v15  ;;  %v482_v25 = vld [vmem:[%s14123_s11 + $0x448] sm:$0xff]  ;;  %v11544_v27 = vcombine.low %v473_v14, %v477_v15  ;;  %v11546_v28 = vcombine.low %v474_v16, %v478_v17 }
  0xe1   : > { %v486_v26 = vld [vmem:[%s14123_s11 + $0x468] sm:$0xff] }
  0xe2   : > { %7064 = vmatpush1.bf16.msra.mxu0 %v11480_v21  ;;  %7433 = vmatpush1.bf16.msra.mxu1 %v11482_v22  ;;  %v11547_v21 = vcombine.high %v474_v16, %v478_v17  ;;  %v481_v22 = vld [vmem:[%s14123_s11 + $0x440] sm:$0xff]  ;;  %v11555_v33 = vcombine.high %v482_v25, %v486_v26  ;;  %v494_v34 = vld [vmem:[%s14123_s11 + $0x4a8] sm:$0xff]  ;;  %v11554_v36 = vcombine.low %v482_v25, %v486_v26 }
  0xe3   : > { %7065 = vmatprep.subr.bf16.mxu0 %v11489_v23  ;;  %7434 = vmatprep.subr.bf16.mxu1 %v11491_v24  ;;  %v485_v23 = vld [vmem:[%s14123_s11 + $0x460] sm:$0xff]  ;;  %v14233_v24 = vrot.slane %v14182_v0, %v14172_v54  ;;  %v14243_v0 = vcombine.high %v14191_v10, %v14191_v10  ;;  %v502_v42 = vld [vmem:[%s14123_s11 + $0x4e8] sm:$0xff] }
  0xe4   : > { %v11552_v35 = vcombine.low %v481_v22, %v485_v23  ;;  %v510_v51 = vld [vmem:[%s14123_s11 + $0x528] sm:$0xff] }
  0xe5   : > { %v518_v61 = vld [vmem:[%s14123_s11 + $0x568] sm:$0xff] }
  0xe6   : > { %7066 = vmatpush1.bf16.msra.mxu0 %v11488_v29  ;;  %7435 = vmatpush1.bf16.msra.mxu1 %v11490_v30  ;;  %v11553_v29 = vcombine.high %v481_v22, %v485_v23  ;;  %v489_v30 = vld [vmem:[%s14123_s11 + $0x480] sm:$0xff]  ;;  %v526_v6 = vld [vmem:[%s14123_s11 + $0x5a8] sm:$0xff] }
  0xe7   : > { %7067 = vmatprep.subr.bf16.mxu0 %v11497_v31  ;;  %7436 = vmatprep.subr.bf16.mxu1 %v11499_v32  ;;  %v493_v31 = vld [vmem:[%s14123_s11 + $0x4a0] sm:$0xff]  ;;  %v490_v32 = vld [vmem:[%s14123_s11 + $0x488] sm:$0xff] }
  0xe8   : > { %v11563_v41 = vcombine.high %v490_v32, %v494_v34  ;;  %v11560_v43 = vcombine.low %v489_v30, %v493_v31  ;;  %v11562_v45 = vcombine.low %v490_v32, %v494_v34  ;;  %v534_v15 = vld [vmem:[%s14123_s11 + $0x5e8] sm:$0xff] }
  0xe9   : > { %v542_v23 = vld [vmem:[%s14123_s11 + $0x628] sm:$0xff] }
  0xea   : > { %7068 = vmatpush1.bf16.msra.mxu0 %v11496_v37  ;;  %7437 = vmatpush1.bf16.msra.mxu1 %v11498_v38  ;;  %v11561_v37 = vcombine.high %v489_v30, %v493_v31  ;;  %v497_v38 = vld [vmem:[%s14123_s11 + $0x4c0] sm:$0xff]  ;;  %v546_v30 = vld [vmem:[%s14123_s11 + $0x648] sm:$0xff] }
  0xeb   : > { %7069 = vmatprep.subr.bf16.mxu0 %v11505_v39  ;;  %7438 = vmatprep.subr.bf16.mxu1 %v11507_v40  ;;  %v501_v39 = vld [vmem:[%s14123_s11 + $0x4e0] sm:$0xff]  ;;  %v498_v40 = vld [vmem:[%s14123_s11 + $0x4c8] sm:$0xff] }
  0xec   : > { %v11571_v50 = vcombine.high %v498_v40, %v502_v42  ;;  %v11568_v52 = vcombine.low %v497_v38, %v501_v39  ;;  %v11570_v53 = vcombine.low %v498_v40, %v502_v42  ;;  %v550_v32 = vld [vmem:[%s14123_s11 + $0x668] sm:$0xff] }
  0xed   : > { %v558_v40 = vld [vmem:[%s14123_s11 + $0x6a8] sm:$0xff]  ;;  %v11618_v42 = vcombine.low %v546_v30, %v550_v32 }
  0xee   : > { %7070 = vmatpush1.bf16.msra.mxu0 %v11504_v46  ;;  %7439 = vmatpush1.bf16.msra.mxu1 %v11506_v47  ;;  %v11569_v46 = vcombine.high %v497_v38, %v501_v39  ;;  %v505_v47 = vld [vmem:[%s14123_s11 + $0x500] sm:$0xff]  ;;  %v554_v38 = vld [vmem:[%s14123_s11 + $0x688] sm:$0xff]  ;;  %v11619_v39 = vcombine.high %v546_v30, %v550_v32 }
  0xef   : > { %7071 = vmatprep.subr.bf16.mxu0 %v11513_v48  ;;  %7440 = vmatprep.subr.bf16.mxu1 %v11515_v49  ;;  %v509_v48 = vld [vmem:[%s14123_s11 + $0x520] sm:$0xff]  ;;  %v506_v49 = vld [vmem:[%s14123_s11 + $0x508] sm:$0xff] }
  0xf0   : > { %v11579_v59 = vcombine.high %v506_v49, %v510_v51  ;;  %v11576_v62 = vcombine.low %v505_v47, %v509_v48  ;;  %v11578_v63 = vcombine.low %v506_v49, %v510_v51  ;;  %v566_v49 = vld [vmem:[%s14123_s11 + $0x6e8] sm:$0xff]  ;;  %v11626_v51 = vcombine.low %v554_v38, %v558_v40 }
  0xf2   : > { %7072 = vmatpush1.bf16.msra.mxu0 %v11512_v55  ;;  %7441 = vmatpush1.bf16.msra.mxu1 %v11514_v56  ;;  %v11577_v55 = vcombine.high %v505_v47, %v509_v48  ;;  %v513_v56 = vld [vmem:[%s14123_s11 + $0x540] sm:$0xff]  ;;  %v562_v47 = vld [vmem:[%s14123_s11 + $0x6c8] sm:$0xff]  ;;  %v11627_v48 = vcombine.high %v554_v38, %v558_v40 }
  0xf3   : > { %7073 = vmatprep.subr.bf16.mxu0 %v11521_v57  ;;  %7442 = vmatprep.subr.bf16.mxu1 %v11523_v58  ;;  %v517_v57 = vld [vmem:[%s14123_s11 + $0x560] sm:$0xff]  ;;  %v514_v58 = vld [vmem:[%s14123_s11 + $0x548] sm:$0xff] }
  0xf4   : > { %v11587_v5 = vcombine.high %v514_v58, %v518_v61  ;;  %v11584_v7 = vcombine.low %v513_v56, %v517_v57  ;;  %v11586_v8 = vcombine.low %v514_v58, %v518_v61  ;;  %v574_v58 = vld [vmem:[%s14123_s11 + $0x728] sm:$0xff]  ;;  %v11634_v61 = vcombine.low %v562_v47, %v566_v49 }
  0xf6   : > { %7074 = vmatpush1.bf16.msra.mxu0 %v11520_v1  ;;  %7443 = vmatpush1.bf16.msra.mxu1 %v11522_v2  ;;  %v11585_v1 = vcombine.high %v513_v56, %v517_v57  ;;  %v521_v2 = vld [vmem:[%s14123_s11 + $0x580] sm:$0xff]  ;;  %v570_v56 = vld [vmem:[%s14123_s11 + $0x708] sm:$0xff]  ;;  %v11635_v57 = vcombine.high %v562_v47, %v566_v49 }
  0xf7   : > { %7075 = vmatprep.subr.bf16.mxu0 %v11529_v3  ;;  %7444 = vmatprep.subr.bf16.mxu1 %v11531_v4  ;;  %v525_v3 = vld [vmem:[%s14123_s11 + $0x5a0] sm:$0xff]  ;;  %v522_v4 = vld [vmem:[%s14123_s11 + $0x588] sm:$0xff] }
  0xf8   : > { %v11595_v14 = vcombine.high %v522_v4, %v526_v6  ;;  %v11592_v16 = vcombine.low %v521_v2, %v525_v3  ;;  %v11594_v17 = vcombine.low %v522_v4, %v526_v6  ;;  %v582_v4 = vld [vmem:[%s14123_s11 + $0x768] sm:$0xff]  ;;  %v11642_v6 = vcombine.low %v570_v56, %v574_v58  ;;  %v621_v47 = vld [vmem:[%s14123_s11 + $0x8a0] sm:$0xff] }
  0xfa   : > { %7076 = vmatpush1.bf16.msra.mxu0 %v11528_v9  ;;  %7445 = vmatpush1.bf16.msra.mxu1 %v11530_v11  ;;  %v11593_v9 = vcombine.high %v521_v2, %v525_v3  ;;  %v529_v11 = vld [vmem:[%s14123_s11 + $0x5c0] sm:$0xff]  ;;  %v578_v2 = vld [vmem:[%s14123_s11 + $0x748] sm:$0xff]  ;;  %v11643_v3 = vcombine.high %v570_v56, %v574_v58 }
  0xfb   : > { %7077 = vmatprep.subr.bf16.mxu0 %v11537_v12  ;;  %7446 = vmatprep.subr.bf16.mxu1 %v11539_v13  ;;  %v533_v12 = vld [vmem:[%s14123_s11 + $0x5e0] sm:$0xff]  ;;  %v530_v13 = vld [vmem:[%s14123_s11 + $0x5c8] sm:$0xff] }
  0xfc   : > { %v11603_v22 = vcombine.high %v530_v13, %v534_v15  ;;  %v11600_v25 = vcombine.low %v529_v11, %v533_v12  ;;  %v11602_v26 = vcombine.low %v530_v13, %v534_v15  ;;  %v590_v13 = vld [vmem:[%s14123_s11 + $0x7a8] sm:$0xff]  ;;  %v11650_v15 = vcombine.low %v578_v2, %v582_v4  ;;  %v625_v56 = vld [vmem:[%s14123_s11 + $0x8c0] sm:$0xff] }
  0xfd   : > { %v626_v58 = vld [vmem:[%s14123_s11 + $0x8c8] sm:$0xff] }
  0xfe   : > { %7078 = vmatpush1.bf16.msra.mxu0 %v11536_v18  ;;  %7447 = vmatpush1.bf16.msra.mxu1 %v11538_v19  ;;  %v11601_v18 = vcombine.high %v529_v11, %v533_v12  ;;  %v537_v19 = vld [vmem:[%s14123_s11 + $0x600] sm:$0xff]  ;;  %v586_v11 = vld [vmem:[%s14123_s11 + $0x788] sm:$0xff]  ;;  %v11651_v12 = vcombine.high %v578_v2, %v582_v4 }
  0xff   : > { %7088 = vmatprep.subr.bf16.mxu0 %v11545_v20  ;;  %7457 = vmatprep.subr.bf16.mxu1 %v11547_v21  ;;  %v541_v20 = vld [vmem:[%s14123_s11 + $0x620] sm:$0xff]  ;;  %v538_v21 = vld [vmem:[%s14123_s11 + $0x608] sm:$0xff] }
 0x100   : > { %v11611_v31 = vcombine.high %v538_v21, %v542_v23  ;;  %v11610_v34 = vcombine.low %v538_v21, %v542_v23  ;;  %v598_v21 = vld [vmem:[%s14123_s11 + $0x7e8] sm:$0xff]  ;;  %v633_v2 = vld [vmem:[%s14123_s11 + $0x900] sm:$0xff] }
 0x101   : > { %7080 = vmatmul.mubr.bf16.vlgmr.msra.gmra.mrb[0].mxu0 %v14233_v24  ;;  %7449 = vmatmul.mubr.bf16.vlgmr.msra.gmra.mrb[0].mxu1 %v14233_v24  ;;  %v634_v4 = vld [vmem:[%s14123_s11 + $0x908] sm:$0xff] }
 0x102   : > { %7089 = vmatpush1.bf16.msra.mxu0 %v11544_v27  ;;  %7458 = vmatpush1.bf16.msra.mxu1 %v11546_v28  ;;  %v11609_v27 = vcombine.high %v537_v19, %v541_v20  ;;  %v545_v28 = vld [vmem:[%s14123_s11 + $0x640] sm:$0xff] }
 0x103   : > { %7090 = vmatprep.subr.bf16.mxu0 %v11553_v29  ;;  %7459 = vmatprep.subr.bf16.mxu1 %v11555_v33  ;;  %v549_v29 = vld [vmem:[%s14123_s11 + $0x660] sm:$0xff]  ;;  %v11608_v33 = vcombine.low %v537_v19, %v541_v20  ;;  %v594_v19 = vld [vmem:[%s14123_s11 + $0x7c8] sm:$0xff]  ;;  %v11659_v20 = vcombine.high %v586_v11, %v590_v13 }
 0x104   : > { %7120 = vmatprep.mubr.bf16.mxu0 %v14243_v0  ;;  %7489 = vmatprep.mubr.bf16.mxu1 %v14243_v0  ;;  %v11667_v30 = vcombine.high %v594_v19, %v598_v21 }
 0x106   : > { %7091 = vmatpush1.bf16.msra.mxu0 %v11552_v35  ;;  %7460 = vmatpush1.bf16.msra.mxu1 %v11554_v36  ;;  %v11617_v35 = vcombine.high %v545_v28, %v549_v29  ;;  %v553_v36 = vld [vmem:[%s14123_s11 + $0x680] sm:$0xff] }
 0x107   : > { %7092 = vmatprep.subr.bf16.mxu0 %v11561_v37  ;;  %7461 = vmatprep.subr.bf16.mxu1 %v11563_v41  ;;  %v557_v37 = vld [vmem:[%s14123_s11 + $0x6a0] sm:$0xff]  ;;  %v11616_v41 = vcombine.low %v545_v28, %v549_v29  ;;  %v602_v29 = vld [vmem:[%s14123_s11 + $0x808] sm:$0xff] }
 0x108   : > { %v605_v28 = vld [vmem:[%s14123_s11 + $0x820] sm:$0xff] }
 0x10a   : > { %7093 = vmatpush1.bf16.msra.mxu0 %v11560_v43  ;;  %7462 = vmatpush1.bf16.msra.mxu1 %v11562_v45  ;;  %v11625_v43 = vcombine.high %v553_v36, %v557_v37  ;;  %v561_v45 = vld [vmem:[%s14123_s11 + $0x6c0] sm:$0xff] }
 0x10b   : > { %7094 = vmatprep.subr.bf16.mxu0 %v11569_v46  ;;  %7463 = vmatprep.subr.bf16.mxu1 %v11571_v50  ;;  %v565_v46 = vld [vmem:[%s14123_s11 + $0x6e0] sm:$0xff]  ;;  %v11624_v50 = vcombine.low %v553_v36, %v557_v37  ;;  %v610_v37 = vld [vmem:[%s14123_s11 + $0x848] sm:$0xff] }
 0x10c   : > { %v613_v36 = vld [vmem:[%s14123_s11 + $0x860] sm:$0xff] }
 0x10e   : > { %7095 = vmatpush1.bf16.msra.mxu0 %v11568_v52  ;;  %7464 = vmatpush1.bf16.msra.mxu1 %v11570_v53  ;;  %v11633_v52 = vcombine.high %v561_v45, %v565_v46  ;;  %v569_v53 = vld [vmem:[%s14123_s11 + $0x700] sm:$0xff] }
 0x10f   : > { %7096 = vmatprep.subr.bf16.mxu0 %v11577_v55  ;;  %7465 = vmatprep.subr.bf16.mxu1 %v11579_v59  ;;  %v573_v55 = vld [vmem:[%s14123_s11 + $0x720] sm:$0xff]  ;;  %v11632_v59 = vcombine.low %v561_v45, %v565_v46 }
 0x110   : > { %v617_v46 = vld [vmem:[%s14123_s11 + $0x880] sm:$0xff] }
 0x112   : > { %7097 = vmatpush1.bf16.msra.mxu0 %v11576_v62  ;;  %7466 = vmatpush1.bf16.msra.mxu1 %v11578_v63  ;;  %v11641_v62 = vcombine.high %v569_v53, %v573_v55  ;;  %v577_v63 = vld [vmem:[%s14123_s11 + $0x740] sm:$0xff] }
 0x113   : > { %7098 = vmatprep.subr.bf16.mxu0 %v11585_v1  ;;  %7467 = vmatprep.subr.bf16.mxu1 %v11587_v5  ;;  %v581_v1 = vld [vmem:[%s14123_s11 + $0x760] sm:$0xff]  ;;  %v11640_v5 = vcombine.low %v569_v53, %v573_v55  ;;  %v11689_v55 = vcombine.high %v617_v46, %v621_v47 }
 0x116   : > { %7099 = vmatpush1.bf16.msra.mxu0 %v11584_v7  ;;  %7468 = vmatpush1.bf16.msra.mxu1 %v11586_v8  ;;  %v11649_v7 = vcombine.high %v577_v63, %v581_v1  ;;  %v585_v8 = vld [vmem:[%s14123_s11 + $0x780] sm:$0xff] }
 0x117   : > { %7100 = vmatprep.subr.bf16.mxu0 %v11593_v9  ;;  %7469 = vmatprep.subr.bf16.mxu1 %v11595_v14  ;;  %v589_v9 = vld [vmem:[%s14123_s11 + $0x7a0] sm:$0xff]  ;;  %v11648_v14 = vcombine.low %v577_v63, %v581_v1 }
 0x118   : > { %v11656_v23 = vcombine.low %v585_v8, %v589_v9 }
 0x11a   : > { %7101 = vmatpush1.bf16.msra.mxu0 %v11592_v16  ;;  %7470 = vmatpush1.bf16.msra.mxu1 %v11594_v17  ;;  %v11657_v16 = vcombine.high %v585_v8, %v589_v9  ;;  %v593_v17 = vld [vmem:[%s14123_s11 + $0x7c0] sm:$0xff] }
 0x11b   : > { %7102 = vmatprep.subr.bf16.mxu0 %v11601_v18  ;;  %7471 = vmatprep.subr.bf16.mxu1 %v11603_v22  ;;  %v597_v18 = vld [vmem:[%s14123_s11 + $0x7e0] sm:$0xff]  ;;  %v1478_v22 = vcombine.high %v14176_v60, %v14176_v60 }
 0x11c   : > { %v11664_v60 = vcombine.low %v593_v17, %v597_v18 }
 0x11d   : > { %v14308_v32 = vrot.slane %v1478_v22, %v14172_v54 }
 0x11e   : > { %7103 = vmatpush1.bf16.msra.mxu0 %v11600_v25  ;;  %7472 = vmatpush1.bf16.msra.mxu1 %v11602_v26  ;;  %v11658_v25 = vcombine.low %v586_v11, %v590_v13  ;;  %v11665_v26 = vcombine.high %v593_v17, %v597_v18  ;;  %v641_v11 = vld [vmem:[%s14123_s11 + $0x940] sm:$0xff]  ;;  %v642_v13 = vld [vmem:[%s14123_s11 + $0x948] sm:$0xff] }
 0x11f   : > { %7104 = vmatprep.subr.bf16.mxu0 %v11609_v27  ;;  %7473 = vmatprep.subr.bf16.mxu1 %v11611_v31  ;;  %v601_v27 = vld [vmem:[%s14123_s11 + $0x800] sm:$0xff]  ;;  %v606_v31 = vld [vmem:[%s14123_s11 + $0x828] sm:$0xff]  ;;  %v1494_v40 = vcombine.high %v14308_v32, %v14308_v32 }
 0x120   : > { %v11675_v38 = vcombine.high %v602_v29, %v606_v31 }
 0x122   : > { %7105 = vmatpush1.bf16.msra.mxu0 %v11608_v33  ;;  %7474 = vmatpush1.bf16.msra.mxu1 %v11610_v34  ;;  %v11666_v33 = vcombine.low %v594_v19, %v598_v21  ;;  %v11673_v34 = vcombine.high %v601_v27, %v605_v28  ;;  %v649_v19 = vld [vmem:[%s14123_s11 + $0x980] sm:$0xff]  ;;  %v650_v21 = vld [vmem:[%s14123_s11 + $0x988] sm:$0xff] }
 0x123   : > { %7106 = vmatprep.subr.bf16.mxu0 %v11617_v35  ;;  %7475 = vmatprep.subr.bf16.mxu1 %v11619_v39  ;;  %v609_v35 = vld [vmem:[%s14123_s11 + $0x840] sm:$0xff]  ;;  %v614_v39 = vld [vmem:[%s14123_s11 + $0x868] sm:$0xff] }
 0x124   : > { %v11681_v45 = vcombine.high %v609_v35, %v613_v36  ;;  %v11683_v49 = vcombine.high %v610_v37, %v614_v39  ;;  %v11682_v53 = vcombine.low %v610_v37, %v614_v39  ;;  %v669_v37 = vld [vmem:[%s14123_s11 + $0xa20] sm:$0xff] }
 0x126   : > { %7107 = vmatpush1.bf16.msra.mxu0 %v11616_v41  ;;  %7476 = vmatpush1.bf16.msra.mxu1 %v11618_v42  ;;  %v14318_v41 = vcombine.high %v14233_v24, %v14233_v24  ;;  %v11672_v42 = vcombine.low %v601_v27, %v605_v28  ;;  %v657_v28 = vld [vmem:[%s14123_s11 + $0x9c0] sm:$0xff] }
 0x127   : > { %7108 = vmatprep.subr.bf16.mxu0 %v11625_v43  ;;  %7477 = vmatprep.subr.bf16.mxu1 %v11627_v48  ;;  %v11674_v43 = vcombine.low %v602_v29, %v606_v31  ;;  %v618_v48 = vld [vmem:[%s14123_s11 + $0x888] sm:$0xff]  ;;  %v661_v29 = vld [vmem:[%s14123_s11 + $0x9e0] sm:$0xff] }
 0x12a   : > { %7109 = vmatpush1.bf16.msra.mxu0 %v11624_v50  ;;  %7478 = vmatpush1.bf16.msra.mxu1 %v11626_v51  ;;  %v622_v50 = vld [vmem:[%s14123_s11 + $0x8a8] sm:$0xff]  ;;  %v14325_v51 = vrot.slane %v1494_v40, %v14172_v54 }
 0x12b   : > { %7110 = vmatprep.subr.bf16.mxu0 %v11633_v52  ;;  %7479 = vmatprep.subr.bf16.mxu1 %v11635_v57  ;;  %v11680_v52 = vcombine.low %v609_v35, %v613_v36  ;;  %v629_v57 = vld [vmem:[%s14123_s11 + $0x8e0] sm:$0xff]  ;;  %v11690_v63 = vcombine.low %v618_v48, %v622_v50  ;;  %v11729_v35 = vcombine.high %v657_v28, %v661_v29  ;;  %v670_v40 = vld [vmem:[%s14123_s11 + $0xa28] sm:$0xff] }
 0x12c   : > { %v11697_v1 = vcombine.high %v625_v56, %v629_v57  ;;  %v665_v36 = vld [vmem:[%s14123_s11 + $0xa00] sm:$0xff] }
 0x12e   : > { %7111 = vmatpush1.bf16.msra.mxu0 %v11632_v59  ;;  %7480 = vmatpush1.bf16.msra.mxu1 %v11634_v61  ;;  %v11691_v59 = vcombine.high %v618_v48, %v622_v50  ;;  %v630_v61 = vld [vmem:[%s14123_s11 + $0x8e8] sm:$0xff] }
 0x12f   : > { %7112 = vmatprep.subr.bf16.mxu0 %v11641_v62  ;;  %7481 = vmatprep.subr.bf16.mxu1 %v11643_v3  ;;  %v11688_v62 = vcombine.low %v617_v46, %v621_v47  ;;  %v637_v3 = vld [vmem:[%s14123_s11 + $0x920] sm:$0xff]  ;;  %v11698_v8 = vcombine.low %v626_v58, %v630_v61  ;;  %v674_v48 = vld [vmem:[%s14123_s11 + $0xa48] sm:$0xff] }
 0x130   : > { %v11705_v9 = vcombine.high %v633_v2, %v637_v3  ;;  %v673_v46 = vld [vmem:[%s14123_s11 + $0xa40] sm:$0xff]  ;;  %v678_v50 = vld [vmem:[%s14123_s11 + $0xa68] sm:$0xff] }
 0x131   : > { %v677_v47 = vld [vmem:[%s14123_s11 + $0xa60] sm:$0xff] }
 0x132   : > { %7113 = vmatpush1.bf16.msra.mxu0 %v11640_v5  ;;  %7482 = vmatpush1.bf16.msra.mxu1 %v11642_v6  ;;  %v11699_v5 = vcombine.high %v626_v58, %v630_v61  ;;  %v638_v6 = vld [vmem:[%s14123_s11 + $0x928] sm:$0xff] }
 0x133   : > { %7114 = vmatprep.subr.bf16.mxu0 %v11649_v7  ;;  %7483 = vmatprep.subr.bf16.mxu1 %v11651_v12  ;;  %v11696_v7 = vcombine.low %v625_v56, %v629_v57  ;;  %v645_v12 = vld [vmem:[%s14123_s11 + $0x960] sm:$0xff]  ;;  %v11706_v17 = vcombine.low %v634_v4, %v638_v6  ;;  %v682_v58 = vld [vmem:[%s14123_s11 + $0xa88] sm:$0xff] }
 0x134   : > { %v11713_v18 = vcombine.high %v641_v11, %v645_v12  ;;  %v681_v56 = vld [vmem:[%s14123_s11 + $0xa80] sm:$0xff]  ;;  %v686_v61 = vld [vmem:[%s14123_s11 + $0xaa8] sm:$0xff] }
 0x135   : > { %v685_v57 = vld [vmem:[%s14123_s11 + $0xaa0] sm:$0xff] }
 0x136   : > { %7115 = vmatpush1.bf16.msra.mxu0 %v11648_v14  ;;  %7484 = vmatpush1.bf16.msra.mxu1 %v11650_v15  ;;  %v11707_v14 = vcombine.high %v634_v4, %v638_v6  ;;  %v646_v15 = vld [vmem:[%s14123_s11 + $0x968] sm:$0xff] }
 0x137   : > { %7116 = vmatprep.subr.bf16.mxu0 %v11657_v16  ;;  %7485 = vmatprep.subr.bf16.mxu1 %v11659_v20  ;;  %v11704_v16 = vcombine.low %v633_v2, %v637_v3  ;;  %v653_v20 = vld [vmem:[%s14123_s11 + $0x9a0] sm:$0xff]  ;;  %v11715_v22 = vcombine.high %v642_v13, %v646_v15  ;;  %v690_v4 = vld [vmem:[%s14123_s11 + $0xac8] sm:$0xff] }
 0x138   : > { %v11721_v27 = vcombine.high %v649_v19, %v653_v20  ;;  %v689_v2 = vld [vmem:[%s14123_s11 + $0xac0] sm:$0xff]  ;;  %v694_v6 = vld [vmem:[%s14123_s11 + $0xae8] sm:$0xff] }
 0x139   : > { %v693_v3 = vld [vmem:[%s14123_s11 + $0xae0] sm:$0xff] }
 0x13a   : > { %7117 = vmatpush1.bf16.msra.mxu0 %v11656_v23  ;;  %7486 = vmatpush1.bf16.msra.mxu1 %v11658_v25  ;;  %v654_v23 = vld [vmem:[%s14123_s11 + $0x9a8] sm:$0xff]  ;;  %v11712_v25 = vcombine.low %v641_v11, %v645_v12  ;;  %v697_v11 = vld [vmem:[%s14123_s11 + $0xb00] sm:$0xff] }
 0x13b   : > { %7118 = vmatprep.subr.bf16.mxu0 %v11665_v26  ;;  %7487 = vmatprep.subr.bf16.mxu1 %v11667_v30  ;;  %v11714_v26 = vcombine.low %v642_v13, %v646_v15  ;;  %v658_v30 = vld [vmem:[%s14123_s11 + $0x9c8] sm:$0xff]  ;;  %v11723_v31 = vcombine.high %v650_v21, %v654_v23  ;;  %v701_v12 = vld [vmem:[%s14123_s11 + $0xb20] sm:$0xff] }
 0x13c   : > { %v698_v13 = vld [vmem:[%s14123_s11 + $0xb08] sm:$0xff] }
 0x13d   : > { %v702_v15 = vld [vmem:[%s14123_s11 + $0xb28] sm:$0xff] }
 0x13e   : > { %7119 = vmatpush1.bf16.msra.mxu0 %v11664_v60  ;;  %7488 = vmatpush1.bf16.msra.mxu1 %v11666_v33  ;;  %v662_v60 = vld [vmem:[%s14123_s11 + $0x9e8] sm:$0xff]  ;;  %v11720_v33 = vcombine.low %v649_v19, %v653_v20  ;;  %v705_v19 = vld [vmem:[%s14123_s11 + $0xb40] sm:$0xff] }
 0x13f   : > { %7129 = vmatprep.subr.bf16.mxu0 %v11673_v34  ;;  %7498 = vmatprep.subr.bf16.mxu1 %v11675_v38  ;;  %v11722_v34 = vcombine.low %v650_v21, %v654_v23  ;;  %v666_v38 = vld [vmem:[%s14123_s11 + $0xa08] sm:$0xff]  ;;  %v11731_v39 = vcombine.high %v658_v30, %v662_v60  ;;  %v709_v20 = vld [vmem:[%s14123_s11 + $0xb60] sm:$0xff] }
 0x140   : > { %v706_v21 = vld [vmem:[%s14123_s11 + $0xb48] sm:$0xff] }
 0x141   : > { %7121 = vmatmul.mubr.bf16.vlgmr.msra.gmra.mrb[0].mxu0 %v14318_v41  ;;  %7490 = vmatmul.mubr.bf16.vlgmr.msra.gmra.mrb[0].mxu1 %v14318_v41  ;;  %v710_v23 = vld [vmem:[%s14123_s11 + $0xb68] sm:$0xff] }
 0x142   : > { %7130 = vmatpush1.bf16.msra.mxu0 %v11672_v42  ;;  %7499 = vmatpush1.bf16.msra.mxu1 %v11674_v43  ;;  %v11728_v42 = vcombine.low %v657_v28, %v661_v29  ;;  %v11730_v43 = vcombine.low %v658_v30, %v662_v60  ;;  %v713_v28 = vld [vmem:[%s14123_s11 + $0xb80] sm:$0xff]  ;;  %v714_v30 = vld [vmem:[%s14123_s11 + $0xb88] sm:$0xff] }
 0x143   : > { %7131 = vmatprep.subr.bf16.mxu0 %v11681_v45  ;;  %7500 = vmatprep.subr.bf16.mxu1 %v11683_v49  ;;  %v11737_v45 = vcombine.high %v665_v36, %v669_v37  ;;  %v11739_v49 = vcombine.high %v666_v38, %v670_v40  ;;  %v717_v29 = vld [vmem:[%s14123_s11 + $0xba0] sm:$0xff]  ;;  %v718_v60 = vld [vmem:[%s14123_s11 + $0xba8] sm:$0xff] }
 0x144   : > { %7161 = vmatprep.mubr.bf16.mxu0 %v14325_v51  ;;  %7530 = vmatprep.mubr.bf16.mxu1 %v14325_v51 }
 0x146   : > { %7132 = vmatpush1.bf16.msra.mxu0 %v11680_v52  ;;  %7501 = vmatpush1.bf16.msra.mxu1 %v11682_v53  ;;  %v11736_v52 = vcombine.low %v665_v36, %v669_v37  ;;  %v11738_v53 = vcombine.low %v666_v38, %v670_v40  ;;  %v721_v36 = vld [vmem:[%s14123_s11 + $0xbc0] sm:$0xff]  ;;  %v722_v38 = vld [vmem:[%s14123_s11 + $0xbc8] sm:$0xff] }
 0x147   : > { %7133 = vmatprep.subr.bf16.mxu0 %v11689_v55  ;;  %7502 = vmatprep.subr.bf16.mxu1 %v11691_v59  ;;  %v11745_v55 = vcombine.high %v673_v46, %v677_v47  ;;  %v11747_v59 = vcombine.high %v674_v48, %v678_v50  ;;  %v725_v37 = vld [vmem:[%s14123_s11 + $0xbe0] sm:$0xff]  ;;  %v726_v40 = vld [vmem:[%s14123_s11 + $0xbe8] sm:$0xff] }
 0x14a   : > { %7134 = vmatpush1.bf16.msra.mxu0 %v11688_v62  ;;  %7503 = vmatpush1.bf16.msra.mxu1 %v11690_v63  ;;  %v11744_v62 = vcombine.low %v673_v46, %v677_v47  ;;  %v11746_v63 = vcombine.low %v674_v48, %v678_v50  ;;  %v729_v46 = vld [vmem:[%s14123_s11 + $0xc00] sm:$0xff]  ;;  %v730_v48 = vld [vmem:[%s14123_s11 + $0xc08] sm:$0xff] }
 0x14b   : > { %7135 = vmatprep.subr.bf16.mxu0 %v11697_v1  ;;  %7504 = vmatprep.subr.bf16.mxu1 %v11699_v5  ;;  %v11753_v1 = vcombine.high %v681_v56, %v685_v57  ;;  %v11755_v5 = vcombine.high %v682_v58, %v686_v61  ;;  %v733_v47 = vld [vmem:[%s14123_s11 + $0xc20] sm:$0xff]  ;;  %v734_v50 = vld [vmem:[%s14123_s11 + $0xc28] sm:$0xff] }
 0x14e   : > { %7136 = vmatpush1.bf16.msra.mxu0 %v11696_v7  ;;  %7505 = vmatpush1.bf16.msra.mxu1 %v11698_v8  ;;  %v11752_v7 = vcombine.low %v681_v56, %v685_v57  ;;  %v11754_v8 = vcombine.low %v682_v58, %v686_v61  ;;  %v737_v56 = vld [vmem:[%s14123_s11 + $0xc40] sm:$0xff]  ;;  %v11803_v58 = vcombine.high %v730_v48, %v734_v50  ;;  %v742_v61 = vld [vmem:[%s14123_s11 + $0xc68] sm:$0xff] }
 0x14f   : > { %7137 = vmatprep.subr.bf16.mxu0 %v11705_v9  ;;  %7506 = vmatprep.subr.bf16.mxu1 %v11707_v14  ;;  %v11761_v9 = vcombine.high %v689_v2, %v693_v3  ;;  %v11763_v14 = vcombine.high %v690_v4, %v694_v6  ;;  %v741_v57 = vld [vmem:[%s14123_s11 + $0xc60] sm:$0xff] }
 0x152   : > { %7138 = vmatpush1.bf16.msra.mxu0 %v11704_v16  ;;  %7507 = vmatpush1.bf16.msra.mxu1 %v11706_v17  ;;  %v11760_v16 = vcombine.low %v689_v2, %v693_v3  ;;  %v11762_v17 = vcombine.low %v690_v4, %v694_v6  ;;  %v11809_v2 = vcombine.high %v737_v56, %v741_v57  ;;  %v745_v3 = vld [vmem:[%s14123_s11 + $0xc80] sm:$0xff] }
 0x153   : > { %7139 = vmatprep.subr.bf16.mxu0 %v11713_v18  ;;  %7508 = vmatprep.subr.bf16.mxu1 %v11715_v22  ;;  %v11769_v18 = vcombine.high %v697_v11, %v701_v12  ;;  %v11771_v22 = vcombine.high %v698_v13, %v702_v15  ;;  %v749_v4 = vld [vmem:[%s14123_s11 + $0xca0] sm:$0xff] }
 0x156   : > { %7140 = vmatpush1.bf16.msra.mxu0 %v11712_v25  ;;  %7509 = vmatpush1.bf16.msra.mxu1 %v11714_v26  ;;  %v11768_v25 = vcombine.low %v697_v11, %v701_v12  ;;  %v11770_v26 = vcombine.low %v698_v13, %v702_v15  ;;  %v11817_v11 = vcombine.high %v745_v3, %v749_v4  ;;  %v753_v12 = vld [vmem:[%s14123_s11 + $0xcc0] sm:$0xff] }
 0x157   : > { %7141 = vmatprep.subr.bf16.mxu0 %v11721_v27  ;;  %7510 = vmatprep.subr.bf16.mxu1 %v11723_v31  ;;  %v11777_v27 = vcombine.high %v705_v19, %v709_v20  ;;  %v11779_v31 = vcombine.high %v706_v21, %v710_v23  ;;  %v757_v13 = vld [vmem:[%s14123_s11 + $0xce0] sm:$0xff] }
 0x15a   : > { %7142 = vmatpush1.bf16.msra.mxu0 %v11720_v33  ;;  %7511 = vmatpush1.bf16.msra.mxu1 %v11722_v34  ;;  %v11776_v33 = vcombine.low %v705_v19, %v709_v20  ;;  %v11778_v34 = vcombine.low %v706_v21, %v710_v23  ;;  %v11825_v19 = vcombine.high %v753_v12, %v757_v13  ;;  %v761_v20 = vld [vmem:[%s14123_s11 + $0xd00] sm:$0xff] }
 0x15b   : > { %7143 = vmatprep.subr.bf16.mxu0 %v11729_v35  ;;  %7512 = vmatprep.subr.bf16.mxu1 %v11731_v39  ;;  %v11785_v35 = vcombine.high %v713_v28, %v717_v29  ;;  %v11787_v39 = vcombine.high %v714_v30, %v718_v60  ;;  %v765_v21 = vld [vmem:[%s14123_s11 + $0xd20] sm:$0xff] }
 0x15e   : > { %7144 = vmatpush1.bf16.msra.mxu0 %v11728_v42  ;;  %7513 = vmatpush1.bf16.msra.mxu1 %v11730_v43  ;;  %v11784_v42 = vcombine.low %v713_v28, %v717_v29  ;;  %v11786_v43 = vcombine.low %v714_v30, %v718_v60  ;;  %v11833_v28 = vcombine.high %v761_v20, %v765_v21  ;;  %v769_v29 = vld [vmem:[%s14123_s11 + $0xd40] sm:$0xff] }
 0x15f   : > { %7145 = vmatprep.subr.bf16.mxu0 %v11737_v45  ;;  %7514 = vmatprep.subr.bf16.mxu1 %v11739_v49  ;;  %v11793_v45 = vcombine.high %v721_v36, %v725_v37  ;;  %v11795_v49 = vcombine.high %v722_v38, %v726_v40  ;;  %v773_v30 = vld [vmem:[%s14123_s11 + $0xd60] sm:$0xff] }
 0x162   : > { %7146 = vmatpush1.bf16.msra.mxu0 %v11736_v52  ;;  %7515 = vmatpush1.bf16.msra.mxu1 %v11738_v53  ;;  %v11792_v52 = vcombine.low %v721_v36, %v725_v37  ;;  %v11794_v53 = vcombine.low %v722_v38, %v726_v40  ;;  %v11841_v36 = vcombine.high %v769_v29, %v773_v30  ;;  %v777_v37 = vld [vmem:[%s14123_s11 + $0xd80] sm:$0xff] }
 0x163   : > { %7147 = vmatprep.subr.bf16.mxu0 %v11745_v55  ;;  %7516 = vmatprep.subr.bf16.mxu1 %v11747_v59  ;;  %v11801_v55 = vcombine.high %v729_v46, %v733_v47  ;;  %v738_v59 = vld [vmem:[%s14123_s11 + $0xc48] sm:$0xff]  ;;  %v781_v38 = vld [vmem:[%s14123_s11 + $0xda0] sm:$0xff] }
 0x164   : > { %v11811_v6 = vcombine.high %v738_v59, %v742_v61 }
 0x166   : > { %7148 = vmatpush1.bf16.msra.mxu0 %v11744_v62  ;;  %7517 = vmatpush1.bf16.msra.mxu1 %v11746_v63  ;;  %v14393_v62 = vrot.slane %v14308_v32, %v14172_v54  ;;  %v11800_v63 = vcombine.low %v729_v46, %v733_v47  ;;  %v14401_v32 = vcombine.high %v14325_v51, %v14325_v51  ;;  %v785_v47 = vld [vmem:[%s14123_s11 + $0xdc0] sm:$0xff] }
 0x167   : > { %7149 = vmatprep.subr.bf16.mxu0 %v11753_v1  ;;  %7518 = vmatprep.subr.bf16.mxu1 %v11755_v5  ;;  %v11802_v1 = vcombine.low %v730_v48, %v734_v50  ;;  %v746_v5 = vld [vmem:[%s14123_s11 + $0xc88] sm:$0xff]  ;;  %v11849_v46 = vcombine.high %v777_v37, %v781_v38  ;;  %v789_v48 = vld [vmem:[%s14123_s11 + $0xde0] sm:$0xff] }
 0x16a   : > { %7150 = vmatpush1.bf16.msra.mxu0 %v11752_v7  ;;  %7519 = vmatpush1.bf16.msra.mxu1 %v11754_v8  ;;  %v750_v7 = vld [vmem:[%s14123_s11 + $0xca8] sm:$0xff]  ;;  %v11808_v8 = vcombine.low %v737_v56, %v741_v57  ;;  %v11857_v56 = vcombine.high %v785_v47, %v789_v48  ;;  %v793_v57 = vld [vmem:[%s14123_s11 + $0xe00] sm:$0xff] }
 0x16b   : > { %7151 = vmatprep.subr.bf16.mxu0 %v11761_v9  ;;  %7520 = vmatprep.subr.bf16.mxu1 %v11763_v14  ;;  %v11810_v9 = vcombine.low %v738_v59, %v742_v61  ;;  %v754_v14 = vld [vmem:[%s14123_s11 + $0xcc8] sm:$0xff]  ;;  %v11819_v15 = vcombine.high %v746_v5, %v750_v7 }
 0x16c   : > { %v794_v59 = vld [vmem:[%s14123_s11 + $0xe08] sm:$0xff] }
 0x16e   : > { %7152 = vmatpush1.bf16.msra.mxu0 %v11760_v16  ;;  %7521 = vmatpush1.bf16.msra.mxu1 %v11762_v17  ;;  %v758_v16 = vld [vmem:[%s14123_s11 + $0xce8] sm:$0xff]  ;;  %v11816_v17 = vcombine.low %v745_v3, %v749_v4  ;;  %v801_v4 = vld [vmem:[%s14123_s11 + $0xe40] sm:$0xff] }
 0x16f   : > { %7153 = vmatprep.subr.bf16.mxu0 %v11769_v18  ;;  %7522 = vmatprep.subr.bf16.mxu1 %v11771_v22  ;;  %v11818_v18 = vcombine.low %v746_v5, %v750_v7  ;;  %v762_v22 = vld [vmem:[%s14123_s11 + $0xd08] sm:$0xff]  ;;  %v11827_v23 = vcombine.high %v754_v14, %v758_v16  ;;  %v805_v5 = vld [vmem:[%s14123_s11 + $0xe60] sm:$0xff] }
 0x172   : > { %7154 = vmatpush1.bf16.msra.mxu0 %v11768_v25  ;;  %7523 = vmatpush1.bf16.msra.mxu1 %v11770_v26  ;;  %v766_v25 = vld [vmem:[%s14123_s11 + $0xd28] sm:$0xff]  ;;  %v11824_v26 = vcombine.low %v753_v12, %v757_v13  ;;  %v11873_v12 = vcombine.high %v801_v4, %v805_v5  ;;  %v809_v13 = vld [vmem:[%s14123_s11 + $0xe80] sm:$0xff] }
 0x173   : > { %7155 = vmatprep.subr.bf16.mxu0 %v11777_v27  ;;  %7524 = vmatprep.subr.bf16.mxu1 %v11779_v31  ;;  %v11826_v27 = vcombine.low %v754_v14, %v758_v16  ;;  %v770_v31 = vld [vmem:[%s14123_s11 + $0xd48] sm:$0xff]  ;;  %v11835_v60 = vcombine.high %v762_v22, %v766_v25  ;;  %v813_v14 = vld [vmem:[%s14123_s11 + $0xea0] sm:$0xff] }
 0x176   : > { %7156 = vmatpush1.bf16.msra.mxu0 %v11776_v33  ;;  %7525 = vmatpush1.bf16.msra.mxu1 %v11778_v34  ;;  %v774_v33 = vld [vmem:[%s14123_s11 + $0xd68] sm:$0xff]  ;;  %v11832_v34 = vcombine.low %v761_v20, %v765_v21  ;;  %v11881_v20 = vcombine.high %v809_v13, %v813_v14  ;;  %v817_v21 = vld [vmem:[%s14123_s11 + $0xec0] sm:$0xff] }
 0x177   : > { %7157 = vmatprep.subr.bf16.mxu0 %v11785_v35  ;;  %7526 = vmatprep.subr.bf16.mxu1 %v11787_v39  ;;  %v11834_v35 = vcombine.low %v762_v22, %v766_v25  ;;  %v778_v39 = vld [vmem:[%s14123_s11 + $0xd88] sm:$0xff]  ;;  %v11843_v40 = vcombine.high %v770_v31, %v774_v33  ;;  %v821_v22 = vld [vmem:[%s14123_s11 + $0xee0] sm:$0xff] }
 0x17a   : > { %7158 = vmatpush1.bf16.msra.mxu0 %v11784_v42  ;;  %7527 = vmatpush1.bf16.msra.mxu1 %v11786_v43  ;;  %v782_v42 = vld [vmem:[%s14123_s11 + $0xda8] sm:$0xff]  ;;  %v11840_v43 = vcombine.low %v769_v29, %v773_v30  ;;  %v11889_v29 = vcombine.high %v817_v21, %v821_v22  ;;  %v825_v30 = vld [vmem:[%s14123_s11 + $0xf00] sm:$0xff] }
 0x17b   : > { %7159 = vmatprep.subr.bf16.mxu0 %v11793_v45  ;;  %7528 = vmatprep.subr.bf16.mxu1 %v11795_v49  ;;  %v11842_v45 = vcombine.low %v770_v31, %v774_v33  ;;  %v786_v49 = vld [vmem:[%s14123_s11 + $0xdc8] sm:$0xff]  ;;  %v11851_v50 = vcombine.high %v778_v39, %v782_v42  ;;  %v829_v31 = vld [vmem:[%s14123_s11 + $0xf20] sm:$0xff] }
 0x17e   : > { %7160 = vmatpush1.bf16.msra.mxu0 %v11792_v52  ;;  %7529 = vmatpush1.bf16.msra.mxu1 %v11794_v53  ;;  %v790_v52 = vld [vmem:[%s14123_s11 + $0xde8] sm:$0xff]  ;;  %v11848_v53 = vcombine.low %v777_v37, %v781_v38  ;;  %v11897_v37 = vcombine.high %v825_v30, %v829_v31  ;;  %v833_v38 = vld [vmem:[%s14123_s11 + $0xf40] sm:$0xff] }
 0x17f   : > { %7170 = vmatprep.subr.bf16.mxu0 %v11801_v55  ;;  %7539 = vmatprep.subr.bf16.mxu1 %v11803_v58  ;;  %v11850_v55 = vcombine.low %v778_v39, %v782_v42  ;;  %v797_v58 = vld [vmem:[%s14123_s11 + $0xe20] sm:$0xff]  ;;  %v11859_v61 = vcombine.high %v786_v49, %v790_v52 }
 0x180   : > { %v11865_v3 = vcombine.high %v793_v57, %v797_v58  ;;  %v837_v39 = vld [vmem:[%s14123_s11 + $0xf60] sm:$0xff] }
 0x181   : > { %7162 = vmatmul.mubr.bf16.vlgmr.msra.gmra.mrb[0].mxu0 %v14393_v62  ;;  %7531 = vmatmul.mubr.bf16.vlgmr.msra.gmra.mrb[0].mxu1 %v14393_v62 }
 0x182   : > { %7171 = vmatpush1.bf16.msra.mxu0 %v11800_v63  ;;  %7540 = vmatpush1.bf16.msra.mxu1 %v11802_v1  ;;  %v798_v63 = vld [vmem:[%s14123_s11 + $0xe28] sm:$0xff]  ;;  %v11856_v1 = vcombine.low %v785_v47, %v789_v48  ;;  %v11905_v47 = vcombine.high %v833_v38, %v837_v39  ;;  %v841_v48 = vld [vmem:[%s14123_s11 + $0xf80] sm:$0xff] }
 0x183   : > { %7172 = vmatprep.subr.bf16.mxu0 %v11809_v2  ;;  %7541 = vmatprep.subr.bf16.mxu1 %v11811_v6  ;;  %v11858_v2 = vcombine.low %v786_v49, %v790_v52  ;;  %v802_v6 = vld [vmem:[%s14123_s11 + $0xe48] sm:$0xff]  ;;  %v11867_v7 = vcombine.high %v794_v59, %v798_v63  ;;  %v845_v49 = vld [vmem:[%s14123_s11 + $0xfa0] sm:$0xff] }
 0x184   : > { %7202 = vmatprep.mubr.bf16.mxu0 %v14401_v32  ;;  %7571 = vmatprep.mubr.bf16.mxu1 %v14401_v32 }
 0x186   : > { %7173 = vmatpush1.bf16.msra.mxu0 %v11808_v8  ;;  %7542 = vmatpush1.bf16.msra.mxu1 %v11810_v9  ;;  %v806_v8 = vld [vmem:[%s14123_s11 + $0xe68] sm:$0xff]  ;;  %v11864_v9 = vcombine.low %v793_v57, %v797_v58  ;;  %v11913_v58 = vcombine.high %v841_v48, %v845_v49 }
 0x187   : > { %7174 = vmatprep.subr.bf16.mxu0 %v11817_v11  ;;  %7543 = vmatprep.subr.bf16.mxu1 %v11819_v15  ;;  %v11866_v11 = vcombine.low %v794_v59, %v798_v63  ;;  %v810_v15 = vld [vmem:[%s14123_s11 + $0xe88] sm:$0xff]  ;;  %v11875_v16 = vcombine.high %v802_v6, %v806_v8  ;;  %v853_v59 = vld [vmem:[%s14123_s11 + $0xfe0] sm:$0xff] }
 0x188   : > { %v854_v63 = vld [vmem:[%s14123_s11 + $0xfe8] sm:$0xff] }
 0x18a   : > { %7175 = vmatpush1.bf16.msra.mxu0 %v11816_v17  ;;  %7544 = vmatpush1.bf16.msra.mxu1 %v11818_v18  ;;  %v814_v17 = vld [vmem:[%s14123_s11 + $0xea8] sm:$0xff]  ;;  %v11872_v18 = vcombine.low %v801_v4, %v805_v5 }
 0x18b   : > { %7176 = vmatprep.subr.bf16.mxu0 %v11825_v19  ;;  %7545 = vmatprep.subr.bf16.mxu1 %v11827_v23  ;;  %v11874_v19 = vcombine.low %v802_v6, %v806_v8  ;;  %v818_v23 = vld [vmem:[%s14123_s11 + $0xec8] sm:$0xff]  ;;  %v11883_v25 = vcombine.high %v810_v15, %v814_v17  ;;  %v857_v6 = vld [vmem:[%s14123_s11 + $0x1000] sm:$0xff] }
 0x18c   : > { %v858_v8 = vld [vmem:[%s14123_s11 + $0x1008] sm:$0xff] }
 0x18e   : > { %7177 = vmatpush1.bf16.msra.mxu0 %v11824_v26  ;;  %7546 = vmatpush1.bf16.msra.mxu1 %v11826_v27  ;;  %v822_v26 = vld [vmem:[%s14123_s11 + $0xee8] sm:$0xff]  ;;  %v11880_v27 = vcombine.low %v809_v13, %v813_v14 }
 0x18f   : > { %7178 = vmatprep.subr.bf16.mxu0 %v11833_v28  ;;  %7547 = vmatprep.subr.bf16.mxu1 %v11835_v60  ;;  %v11882_v28 = vcombine.low %v810_v15, %v814_v17  ;;  %v826_v60 = vld [vmem:[%s14123_s11 + $0xf08] sm:$0xff]  ;;  %v11891_v33 = vcombine.high %v818_v23, %v822_v26  ;;  %v869_v17 = vld [vmem:[%s14123_s11 + $0x1060] sm:$0xff] }
 0x192   : > { %7179 = vmatpush1.bf16.msra.mxu0 %v11832_v34  ;;  %7548 = vmatpush1.bf16.msra.mxu1 %v11834_v35  ;;  %v830_v34 = vld [vmem:[%s14123_s11 + $0xf28] sm:$0xff]  ;;  %v11888_v35 = vcombine.low %v817_v21, %v821_v22  ;;  %v14477_v22 = vcombine.high %v14393_v62, %v14393_v62 }
 0x193   : > { %7180 = vmatprep.subr.bf16.mxu0 %v11841_v36  ;;  %7549 = vmatprep.subr.bf16.mxu1 %v11843_v40  ;;  %v11890_v36 = vcombine.low %v818_v23, %v822_v26  ;;  %v834_v40 = vld [vmem:[%s14123_s11 + $0xf48] sm:$0xff]  ;;  %v11899_v42 = vcombine.high %v826_v60, %v830_v34 }
 0x196   : > { %7181 = vmatpush1.bf16.msra.mxu0 %v11840_v43  ;;  %7550 = vmatpush1.bf16.msra.mxu1 %v11842_v45  ;;  %v838_v43 = vld [vmem:[%s14123_s11 + $0xf68] sm:$0xff]  ;;  %v11896_v45 = vcombine.low %v825_v30, %v829_v31 }
 0x197   : > { %7182 = vmatprep.subr.bf16.mxu0 %v11849_v46  ;;  %7551 = vmatprep.subr.bf16.mxu1 %v11851_v50  ;;  %v11898_v46 = vcombine.low %v826_v60, %v830_v34  ;;  %v842_v50 = vld [vmem:[%s14123_s11 + $0xf88] sm:$0xff]  ;;  %v11907_v52 = vcombine.high %v834_v40, %v838_v43  ;;  %v11906_v57 = vcombine.low %v834_v40, %v838_v43 }
 0x198   : > { %v874_v31 = vld [vmem:[%s14123_s11 + $0x1088] sm:$0xff] }
 0x199   : > { %v878_v60 = vld [vmem:[%s14123_s11 + $0x10a8] sm:$0xff] }
 0x19a   : > { %7183 = vmatpush1.bf16.msra.mxu0 %v11848_v53  ;;  %7552 = vmatpush1.bf16.msra.mxu1 %v11850_v55  ;;  %v846_v53 = vld [vmem:[%s14123_s11 + $0xfa8] sm:$0xff]  ;;  %v11904_v55 = vcombine.low %v833_v38, %v837_v39  ;;  %v885_v38 = vld [vmem:[%s14123_s11 + $0x10e0] sm:$0xff]  ;;  %v11946_v43 = vcombine.low %v874_v31, %v878_v60 }
 0x19b   : > { %7184 = vmatprep.subr.bf16.mxu0 %v11857_v56  ;;  %7553 = vmatprep.subr.bf16.mxu1 %v11859_v61  ;;  %v849_v56 = vld [vmem:[%s14123_s11 + $0xfc0] sm:$0xff]  ;;  %v850_v61 = vld [vmem:[%s14123_s11 + $0xfc8] sm:$0xff]  ;;  %v11914_v4 = vcombine.low %v842_v50, %v846_v53 }
 0x19c   : > { %v11921_v5 = vcombine.high %v849_v56, %v853_v59  ;;  %v11920_v13 = vcombine.low %v849_v56, %v853_v59  ;;  %v11922_v14 = vcombine.low %v850_v61, %v854_v63  ;;  %v882_v39 = vld [vmem:[%s14123_s11 + $0x10c8] sm:$0xff] }
 0x19d   : > { %v886_v40 = vld [vmem:[%s14123_s11 + $0x10e8] sm:$0xff] }
 0x19e   : > { %7185 = vmatpush1.bf16.msra.mxu0 %v11856_v1  ;;  %7554 = vmatpush1.bf16.msra.mxu1 %v11858_v2  ;;  %v11915_v1 = vcombine.high %v842_v50, %v846_v53  ;;  %v14459_v2 = vld [vmem:[#allocation3 + $0x8] sm:$0xff]  ;;  %v894_v50 = vld [vmem:[%s14123_s11 + $0x1128] sm:$0xff]  ;;  %v11954_v53 = vcombine.low %v882_v39, %v886_v40 }
 0x19f   : > { %7186 = vmatprep.subr.bf16.mxu0 %v11865_v3  ;;  %7555 = vmatprep.subr.bf16.mxu1 %v11867_v7  ;;  %v11912_v3 = vcombine.low %v841_v48, %v845_v49  ;;  %v861_v7 = vld [vmem:[%s14123_s11 + $0x1020] sm:$0xff]  ;;  %v890_v49 = vld [vmem:[%s14123_s11 + $0x1108] sm:$0xff] }
 0x1a0   : > { %v11929_v15 = vcombine.high %v857_v6, %v861_v7  ;;  %v11928_v23 = vcombine.low %v857_v6, %v861_v7  ;;  %v893_v48 = vld [vmem:[%s14123_s11 + $0x1120] sm:$0xff]  ;;  %v11963_v56 = vcombine.high %v890_v49, %v894_v50  ;;  %v898_v59 = vld [vmem:[%s14123_s11 + $0x1148] sm:$0xff] }
 0x1a1   : > { %v909_v6 = vld [vmem:[%s14123_s11 + $0x11a0] sm:$0xff]  ;;  %v906_v7 = vld [vmem:[%s14123_s11 + $0x1188] sm:$0xff] }
 0x1a2   : > { %7187 = vmatpush1.bf16.msra.mxu0 %v11864_v9  ;;  %7556 = vmatpush1.bf16.msra.mxu1 %v11866_v11  ;;  %v11923_v9 = vcombine.high %v850_v61, %v854_v63  ;;  %v862_v11 = vld [vmem:[%s14123_s11 + $0x1028] sm:$0xff] }
 0x1a3   : > { %7188 = vmatprep.subr.bf16.mxu0 %v11873_v12  ;;  %7557 = vmatprep.subr.bf16.mxu1 %v11875_v16  ;;  %v14467_v12 = vrot.slane %v14459_v2, %v14172_v54  ;;  %v865_v16 = vld [vmem:[%s14123_s11 + $0x1040] sm:$0xff]  ;;  %v902_v61 = vld [vmem:[%s14123_s11 + $0x1168] sm:$0xff] }
 0x1a4   : > { %v11937_v26 = vcombine.high %v865_v16, %v869_v17 }
 0x1a5   : > { %v1542_v21 = vcombine.high %v14467_v12, %v14467_v12 }
 0x1a6   : > { %7189 = vmatpush1.bf16.msra.mxu0 %v11872_v18  ;;  %7558 = vmatpush1.bf16.msra.mxu1 %v11874_v19  ;;  %v866_v18 = vld [vmem:[%s14123_s11 + $0x1048] sm:$0xff]  ;;  %v11931_v19 = vcombine.high %v858_v8, %v862_v11 }
 0x1a7   : > { %7190 = vmatprep.subr.bf16.mxu0 %v11881_v20  ;;  %7559 = vmatprep.subr.bf16.mxu1 %v11883_v25  ;;  %v870_v20 = vld [vmem:[%s14123_s11 + $0x1068] sm:$0xff]  ;;  %v11930_v25 = vcombine.low %v858_v8, %v862_v11  ;;  %v14482_v30 = vrot.slane %v1542_v21, %v14172_v54  ;;  %v11970_v11 = vcombine.low %v898_v59, %v902_v61 }
 0x1a8   : > { %v11938_v34 = vcombine.low %v866_v18, %v870_v20  ;;  %v910_v8 = vld [vmem:[%s14123_s11 + $0x11a8] sm:$0xff] }
 0x1aa   : > { %7191 = vmatpush1.bf16.msra.mxu0 %v11880_v27  ;;  %7560 = vmatpush1.bf16.msra.mxu1 %v11882_v28  ;;  %v11939_v27 = vcombine.high %v866_v18, %v870_v20  ;;  %v873_v28 = vld [vmem:[%s14123_s11 + $0x1080] sm:$0xff]  ;;  %v918_v18 = vld [vmem:[%s14123_s11 + $0x11e8] sm:$0xff]  ;;  %v11978_v20 = vcombine.low %v906_v7, %v910_v8 }
 0x1ab   : > { %7192 = vmatprep.subr.bf16.mxu0 %v11889_v29  ;;  %7561 = vmatprep.subr.bf16.mxu1 %v11891_v33  ;;  %v877_v29 = vld [vmem:[%s14123_s11 + $0x10a0] sm:$0xff]  ;;  %v11936_v33 = vcombine.low %v865_v16, %v869_v17  ;;  %v914_v17 = vld [vmem:[%s14123_s11 + $0x11c8] sm:$0xff] }
 0x1ac   : > { %v917_v16 = vld [vmem:[%s14123_s11 + $0x11e0] sm:$0xff] }
 0x1ae   : > { %7193 = vmatpush1.bf16.msra.mxu0 %v11888_v35  ;;  %7562 = vmatpush1.bf16.msra.mxu1 %v11890_v36  ;;  %v11945_v35 = vcombine.high %v873_v28, %v877_v29  ;;  %v11947_v36 = vcombine.high %v874_v31, %v878_v60  ;;  %v11986_v31 = vcombine.low %v914_v17, %v918_v18 }
 0x1af   : > { %7194 = vmatprep.subr.bf16.mxu0 %v11897_v37  ;;  %7563 = vmatprep.subr.bf16.mxu1 %v11899_v42  ;;  %v881_v37 = vld [vmem:[%s14123_s11 + $0x10c0] sm:$0xff]  ;;  %v11944_v42 = vcombine.low %v873_v28, %v877_v29  ;;  %v926_v28 = vld [vmem:[%s14123_s11 + $0x1228] sm:$0xff] }
 0x1b2   : > { %7195 = vmatpush1.bf16.msra.mxu0 %v11896_v45  ;;  %7564 = vmatpush1.bf16.msra.mxu1 %v11898_v46  ;;  %v11953_v45 = vcombine.high %v881_v37, %v885_v38  ;;  %v11955_v46 = vcombine.high %v882_v39, %v886_v40 }
 0x1b3   : > { %7196 = vmatprep.subr.bf16.mxu0 %v11905_v47  ;;  %7565 = vmatprep.subr.bf16.mxu1 %v11907_v52  ;;  %v889_v47 = vld [vmem:[%s14123_s11 + $0x1100] sm:$0xff]  ;;  %v11952_v52 = vcombine.low %v881_v37, %v885_v38  ;;  %v934_v37 = vld [vmem:[%s14123_s11 + $0x1268] sm:$0xff] }
 0x1b4   : > { %v11960_v63 = vcombine.low %v889_v47, %v893_v48 }
 0x1b6   : > { %7197 = vmatpush1.bf16.msra.mxu0 %v11904_v55  ;;  %7566 = vmatpush1.bf16.msra.mxu1 %v11906_v57  ;;  %v11961_v55 = vcombine.high %v889_v47, %v893_v48  ;;  %v897_v57 = vld [vmem:[%s14123_s11 + $0x1140] sm:$0xff]  ;;  %v942_v47 = vld [vmem:[%s14123_s11 + $0x12a8] sm:$0xff] }
 0x1b7   : > { %7198 = vmatprep.subr.bf16.mxu0 %v11913_v58  ;;  %7567 = vmatprep.subr.bf16.mxu1 %v11915_v1  ;;  %v901_v58 = vld [vmem:[%s14123_s11 + $0x1160] sm:$0xff]  ;;  %v11962_v1 = vcombine.low %v890_v49, %v894_v50 }
 0x1ba   : > { %7199 = vmatpush1.bf16.msra.mxu0 %v11912_v3  ;;  %7568 = vmatpush1.bf16.msra.mxu1 %v11914_v4  ;;  %v11969_v3 = vcombine.high %v897_v57, %v901_v58  ;;  %v11971_v4 = vcombine.high %v898_v59, %v902_v61 }
 0x1bb   : > { %7200 = vmatprep.subr.bf16.mxu0 %v11921_v5  ;;  %7569 = vmatprep.subr.bf16.mxu1 %v11923_v9  ;;  %v905_v5 = vld [vmem:[%s14123_s11 + $0x1180] sm:$0xff]  ;;  %v11968_v9 = vcombine.low %v897_v57, %v901_v58  ;;  %v950_v57 = vld [vmem:[%s14123_s11 + $0x12e8] sm:$0xff] }
 0x1be   : > { %7201 = vmatpush1.bf16.msra.mxu0 %v11920_v13  ;;  %7570 = vmatpush1.bf16.msra.mxu1 %v11922_v14  ;;  %v11977_v13 = vcombine.high %v905_v5, %v909_v6  ;;  %v11979_v14 = vcombine.high %v906_v7, %v910_v8 }
 0x1bf   : > { %7211 = vmatprep.subr.bf16.mxu0 %v11929_v15  ;;  %7580 = vmatprep.subr.bf16.mxu1 %v11931_v19  ;;  %v913_v15 = vld [vmem:[%s14123_s11 + $0x11c0] sm:$0xff]  ;;  %v11976_v19 = vcombine.low %v905_v5, %v909_v6  ;;  %v958_v5 = vld [vmem:[%s14123_s11 + $0x1328] sm:$0xff] }
 0x1c0   : > { %v11985_v21 = vcombine.high %v913_v15, %v917_v16  ;;  %v11984_v29 = vcombine.low %v913_v15, %v917_v16  ;;  %v966_v15 = vld [vmem:[%s14123_s11 + $0x1368] sm:$0xff] }
 0x1c1   : > { %7203 = vmatmul.mubr.bf16.vlgmr.msra.gmra.mrb[0].mxu0 %v14477_v22  ;;  %7572 = vmatmul.mubr.bf16.vlgmr.msra.gmra.mrb[0].mxu1 %v14477_v22 }
 0x1c2   : > { %7212 = vmatpush1.bf16.msra.mxu0 %v11928_v23  ;;  %7581 = vmatpush1.bf16.msra.mxu1 %v11930_v25  ;;  %v11987_v23 = vcombine.high %v914_v17, %v918_v18  ;;  %v921_v25 = vld [vmem:[%s14123_s11 + $0x1200] sm:$0xff] }
 0x1c3   : > { %7213 = vmatprep.subr.bf16.mxu0 %v11937_v26  ;;  %7582 = vmatprep.subr.bf16.mxu1 %v11939_v27  ;;  %v925_v26 = vld [vmem:[%s14123_s11 + $0x1220] sm:$0xff]  ;;  %v922_v27 = vld [vmem:[%s14123_s11 + $0x1208] sm:$0xff] }
 0x1c4   : > { %7243 = vmatprep.mubr.bf16.mxu0 %v14482_v30  ;;  %7612 = vmatprep.mubr.bf16.mxu1 %v14482_v30  ;;  %v11993_v60 = vcombine.high %v921_v25, %v925_v26  ;;  %v11992_v38 = vcombine.low %v921_v25, %v925_v26  ;;  %v11994_v39 = vcombine.low %v922_v27, %v926_v28  ;;  %v974_v25 = vld [vmem:[%s14123_s11 + $0x13a8] sm:$0xff] }
 0x1c6   : > { %7214 = vmatpush1.bf16.msra.mxu0 %v11936_v33  ;;  %7583 = vmatpush1.bf16.msra.mxu1 %v11938_v34  ;;  %v11995_v33 = vcombine.high %v922_v27, %v926_v28  ;;  %v929_v34 = vld [vmem:[%s14123_s11 + $0x1240] sm:$0xff] }
 0x1c7   : > { %7215 = vmatprep.subr.bf16.mxu0 %v11945_v35  ;;  %7584 = vmatprep.subr.bf16.mxu1 %v11947_v36  ;;  %v933_v35 = vld [vmem:[%s14123_s11 + $0x1260] sm:$0xff]  ;;  %v930_v36 = vld [vmem:[%s14123_s11 + $0x1248] sm:$0xff] }
 0x1c8   : > { %v12001_v40 = vcombine.high %v929_v34, %v933_v35  ;;  %v12000_v48 = vcombine.low %v929_v34, %v933_v35  ;;  %v12002_v49 = vcombine.low %v930_v36, %v934_v37  ;;  %v982_v34 = vld [vmem:[%s14123_s11 + $0x13e8] sm:$0xff] }
 0x1ca   : > { %7216 = vmatpush1.bf16.msra.mxu0 %v11944_v42  ;;  %7585 = vmatpush1.bf16.msra.mxu1 %v11946_v43  ;;  %v12003_v42 = vcombine.high %v930_v36, %v934_v37  ;;  %v937_v43 = vld [vmem:[%s14123_s11 + $0x1280] sm:$0xff] }
 0x1cb   : > { %7217 = vmatprep.subr.bf16.mxu0 %v11953_v45  ;;  %7586 = vmatprep.subr.bf16.mxu1 %v11955_v46  ;;  %v941_v45 = vld [vmem:[%s14123_s11 + $0x12a0] sm:$0xff]  ;;  %v938_v46 = vld [vmem:[%s14123_s11 + $0x1288] sm:$0xff] }
 0x1cc   : > { %v12009_v50 = vcombine.high %v937_v43, %v941_v45  ;;  %v12008_v58 = vcombine.low %v937_v43, %v941_v45  ;;  %v12010_v59 = vcombine.low %v938_v46, %v942_v47  ;;  %v990_v43 = vld [vmem:[%s14123_s11 + $0x1428] sm:$0xff] }
 0x1ce   : > { %7218 = vmatpush1.bf16.msra.mxu0 %v11952_v52  ;;  %7587 = vmatpush1.bf16.msra.mxu1 %v11954_v53  ;;  %v12011_v52 = vcombine.high %v938_v46, %v942_v47  ;;  %v945_v53 = vld [vmem:[%s14123_s11 + $0x12c0] sm:$0xff] }
 0x1cf   : > { %7219 = vmatprep.subr.bf16.mxu0 %v11961_v55  ;;  %7588 = vmatprep.subr.bf16.mxu1 %v11963_v56  ;;  %v949_v55 = vld [vmem:[%s14123_s11 + $0x12e0] sm:$0xff]  ;;  %v946_v56 = vld [vmem:[%s14123_s11 + $0x12c8] sm:$0xff] }
 0x1d0   : > { %v12017_v61 = vcombine.high %v945_v53, %v949_v55  ;;  %v12016_v6 = vcombine.low %v945_v53, %v949_v55  ;;  %v12018_v7 = vcombine.low %v946_v56, %v950_v57  ;;  %v994_v53 = vld [vmem:[%s14123_s11 + $0x1448] sm:$0xff] }
 0x1d1   : > { %v998_v55 = vld [vmem:[%s14123_s11 + $0x1468] sm:$0xff] }
 0x1d2   : > { %7220 = vmatpush1.bf16.msra.mxu0 %v11960_v63  ;;  %7589 = vmatpush1.bf16.msra.mxu1 %v11962_v1  ;;  %v12019_v63 = vcombine.high %v946_v56, %v950_v57  ;;  %v953_v1 = vld [vmem:[%s14123_s11 + $0x1300] sm:$0xff] }
 0x1d3   : > { %7221 = vmatprep.subr.bf16.mxu0 %v11969_v3  ;;  %7590 = vmatprep.subr.bf16.mxu1 %v11971_v4  ;;  %v957_v3 = vld [vmem:[%s14123_s11 + $0x1320] sm:$0xff]  ;;  %v954_v4 = vld [vmem:[%s14123_s11 + $0x1308] sm:$0xff] }
 0x1d4   : > { %v12025_v8 = vcombine.high %v953_v1, %v957_v3  ;;  %v12024_v16 = vcombine.low %v953_v1, %v957_v3  ;;  %v12026_v17 = vcombine.low %v954_v4, %v958_v5  ;;  %v14558_v1 = vcombine.high %v14482_v30, %v14482_v30  ;;  %v1006_v3 = vld [vmem:[%s14123_s11 + $0x14a8] sm:$0xff] }
 0x1d6   : > { %7222 = vmatpush1.bf16.msra.mxu0 %v11968_v9  ;;  %7591 = vmatpush1.bf16.msra.mxu1 %v11970_v11  ;;  %v12027_v9 = vcombine.high %v954_v4, %v958_v5  ;;  %v961_v11 = vld [vmem:[%s14123_s11 + $0x1340] sm:$0xff]  ;;  %v12066_v5 = vcombine.low %v994_v53, %v998_v55 }
 0x1d7   : > { %7223 = vmatprep.subr.bf16.mxu0 %v11977_v13  ;;  %7592 = vmatprep.subr.bf16.mxu1 %v11979_v14  ;;  %v965_v13 = vld [vmem:[%s14123_s11 + $0x1360] sm:$0xff]  ;;  %v962_v14 = vld [vmem:[%s14123_s11 + $0x1348] sm:$0xff] }
 0x1d8   : > { %v12033_v18 = vcombine.high %v961_v11, %v965_v13  ;;  %v12032_v26 = vcombine.low %v961_v11, %v965_v13  ;;  %v12034_v27 = vcombine.low %v962_v14, %v966_v15  ;;  %v1010_v11 = vld [vmem:[%s14123_s11 + $0x14c8] sm:$0xff] }
 0x1d9   : > { %v1014_v13 = vld [vmem:[%s14123_s11 + $0x14e8] sm:$0xff] }
 0x1da   : > { %7224 = vmatpush1.bf16.msra.mxu0 %v11976_v19  ;;  %7593 = vmatpush1.bf16.msra.mxu1 %v11978_v20  ;;  %v12035_v19 = vcombine.high %v962_v14, %v966_v15  ;;  %v969_v20 = vld [vmem:[%s14123_s11 + $0x1380] sm:$0xff] }
 0x1db   : > { %7225 = vmatprep.subr.bf16.mxu0 %v11985_v21  ;;  %7594 = vmatprep.subr.bf16.mxu1 %v11987_v23  ;;  %v973_v21 = vld [vmem:[%s14123_s11 + $0x13a0] sm:$0xff]  ;;  %v970_v23 = vld [vmem:[%s14123_s11 + $0x1388] sm:$0xff] }
 0x1dc   : > { %v12041_v28 = vcombine.high %v969_v20, %v973_v21  ;;  %v12040_v35 = vcombine.low %v969_v20, %v973_v21  ;;  %v12042_v36 = vcombine.low %v970_v23, %v974_v25  ;;  %v1018_v20 = vld [vmem:[%s14123_s11 + $0x1508] sm:$0xff] }
 0x1dd   : > { %v1022_v21 = vld [vmem:[%s14123_s11 + $0x1528] sm:$0xff] }
 0x1de   : > { %7226 = vmatpush1.bf16.msra.mxu0 %v11984_v29  ;;  %7595 = vmatpush1.bf16.msra.mxu1 %v11986_v31  ;;  %v12043_v29 = vcombine.high %v970_v23, %v974_v25  ;;  %v977_v31 = vld [vmem:[%s14123_s11 + $0x13c0] sm:$0xff]  ;;  %v12082_v25 = vcombine.low %v1010_v11, %v1014_v13 }
 0x1df   : > { %7227 = vmatprep.subr.bf16.mxu0 %v11993_v60  ;;  %7596 = vmatprep.subr.bf16.mxu1 %v11995_v33  ;;  %v981_v60 = vld [vmem:[%s14123_s11 + $0x13e0] sm:$0xff]  ;;  %v978_v33 = vld [vmem:[%s14123_s11 + $0x13c8] sm:$0xff] }
 0x1e0   : > { %v12049_v37 = vcombine.high %v977_v31, %v981_v60  ;;  %v12048_v45 = vcombine.low %v977_v31, %v981_v60  ;;  %v12050_v46 = vcombine.low %v978_v33, %v982_v34  ;;  %v1026_v31 = vld [vmem:[%s14123_s11 + $0x1548] sm:$0xff] }
 0x1e1   : > { %v1030_v60 = vld [vmem:[%s14123_s11 + $0x1568] sm:$0xff] }
 0x1e2   : > { %7228 = vmatpush1.bf16.msra.mxu0 %v11992_v38  ;;  %7597 = vmatpush1.bf16.msra.mxu1 %v11994_v39  ;;  %v12051_v38 = vcombine.high %v978_v33, %v982_v34  ;;  %v985_v39 = vld [vmem:[%s14123_s11 + $0x1400] sm:$0xff]  ;;  %v12090_v34 = vcombine.low %v1018_v20, %v1022_v21 }
 0x1e3   : > { %7229 = vmatprep.subr.bf16.mxu0 %v12001_v40  ;;  %7598 = vmatprep.subr.bf16.mxu1 %v12003_v42  ;;  %v989_v40 = vld [vmem:[%s14123_s11 + $0x1420] sm:$0xff]  ;;  %v986_v42 = vld [vmem:[%s14123_s11 + $0x1408] sm:$0xff] }
 0x1e4   : > { %v12057_v47 = vcombine.high %v985_v39, %v989_v40  ;;  %v12056_v56 = vcombine.low %v985_v39, %v989_v40  ;;  %v12058_v57 = vcombine.low %v986_v42, %v990_v43  ;;  %v1034_v39 = vld [vmem:[%s14123_s11 + $0x1588] sm:$0xff] }
 0x1e5   : > { %v1038_v40 = vld [vmem:[%s14123_s11 + $0x15a8] sm:$0xff] }
 0x1e6   : > { %7230 = vmatpush1.bf16.msra.mxu0 %v12000_v48  ;;  %7599 = vmatpush1.bf16.msra.mxu1 %v12002_v49  ;;  %v12059_v48 = vcombine.high %v986_v42, %v990_v43  ;;  %v993_v49 = vld [vmem:[%s14123_s11 + $0x1440] sm:$0xff]  ;;  %v12098_v43 = vcombine.low %v1026_v31, %v1030_v60 }
 0x1e7   : > { %7231 = vmatprep.subr.bf16.mxu0 %v12009_v50  ;;  %7600 = vmatprep.subr.bf16.mxu1 %v12011_v52  ;;  %v997_v50 = vld [vmem:[%s14123_s11 + $0x1460] sm:$0xff]  ;;  %v14550_v52 = vrot.slane %v14467_v12, %v14172_v54  ;;  %v1002_v12 = vld [vmem:[%s14123_s11 + $0x1488] sm:$0xff] }
 0x1e8   : > { %v12064_v4 = vcombine.low %v993_v49, %v997_v50  ;;  %v12074_v15 = vcombine.low %v1002_v12, %v1006_v3 }
 0x1ea   : > { %7232 = vmatpush1.bf16.msra.mxu0 %v12008_v58  ;;  %7601 = vmatpush1.bf16.msra.mxu1 %v12010_v59  ;;  %v12065_v58 = vcombine.high %v993_v49, %v997_v50  ;;  %v12067_v59 = vcombine.high %v994_v53, %v998_v55  ;;  %v1042_v49 = vld [vmem:[%s14123_s11 + $0x15c8] sm:$0xff]  ;;  %v12106_v55 = vcombine.low %v1034_v39, %v1038_v40 }
 0x1eb   : > { %7233 = vmatprep.subr.bf16.mxu0 %v12017_v61  ;;  %7602 = vmatprep.subr.bf16.mxu1 %v12019_v63  ;;  %v1001_v61 = vld [vmem:[%s14123_s11 + $0x1480] sm:$0xff]  ;;  %v1046_v50 = vld [vmem:[%s14123_s11 + $0x15e8] sm:$0xff] }
 0x1ec   : > { %v1005_v63 = vld [vmem:[%s14123_s11 + $0x14a0] sm:$0xff] }
 0x1ed   : > { %v12072_v14 = vcombine.low %v1001_v61, %v1005_v63 }
 0x1ee   : > { %7234 = vmatpush1.bf16.msra.mxu0 %v12016_v6  ;;  %7603 = vmatpush1.bf16.msra.mxu1 %v12018_v7  ;;  %v12073_v6 = vcombine.high %v1001_v61, %v1005_v63  ;;  %v12075_v7 = vcombine.high %v1002_v12, %v1006_v3  ;;  %v1050_v61 = vld [vmem:[%s14123_s11 + $0x1608] sm:$0xff]  ;;  %v12114_v3 = vcombine.low %v1042_v49, %v1046_v50 }
 0x1ef   : > { %7235 = vmatprep.subr.bf16.mxu0 %v12025_v8  ;;  %7604 = vmatprep.subr.bf16.mxu1 %v12027_v9  ;;  %v1009_v8 = vld [vmem:[%s14123_s11 + $0x14c0] sm:$0xff]  ;;  %v1054_v63 = vld [vmem:[%s14123_s11 + $0x1628] sm:$0xff] }
 0x1f0   : > { %v1013_v9 = vld [vmem:[%s14123_s11 + $0x14e0] sm:$0xff] }
 0x1f1   : > { %v12080_v23 = vcombine.low %v1009_v8, %v1013_v9 }
 0x1f2   : > { %7236 = vmatpush1.bf16.msra.mxu0 %v12024_v16  ;;  %7605 = vmatpush1.bf16.msra.mxu1 %v12026_v17  ;;  %v12081_v16 = vcombine.high %v1009_v8, %v1013_v9  ;;  %v12083_v17 = vcombine.high %v1010_v11, %v1014_v13  ;;  %v1058_v8 = vld [vmem:[%s14123_s11 + $0x1648] sm:$0xff]  ;;  %v12122_v13 = vcombine.low %v1050_v61, %v1054_v63 }
 0x1f3   : > { %7237 = vmatprep.subr.bf16.mxu0 %v12033_v18  ;;  %7606 = vmatprep.subr.bf16.mxu1 %v12035_v19  ;;  %v1017_v18 = vld [vmem:[%s14123_s11 + $0x1500] sm:$0xff]  ;;  %v1062_v9 = vld [vmem:[%s14123_s11 + $0x1668] sm:$0xff] }
 0x1f4   : > { %v1021_v19 = vld [vmem:[%s14123_s11 + $0x1520] sm:$0xff] }
 0x1f5   : > { %v12088_v33 = vcombine.low %v1017_v18, %v1021_v19 }
 0x1f6   : > { %7238 = vmatpush1.bf16.msra.mxu0 %v12032_v26  ;;  %7607 = vmatpush1.bf16.msra.mxu1 %v12034_v27  ;;  %v12089_v26 = vcombine.high %v1017_v18, %v1021_v19  ;;  %v12091_v27 = vcombine.high %v1018_v20, %v1022_v21  ;;  %v1066_v18 = vld [vmem:[%s14123_s11 + $0x1688] sm:$0xff]  ;;  %v12130_v21 = vcombine.low %v1058_v8, %v1062_v9 }
 0x1f7   : > { %7239 = vmatprep.subr.bf16.mxu0 %v12041_v28  ;;  %7608 = vmatprep.subr.bf16.mxu1 %v12043_v29  ;;  %v1025_v28 = vld [vmem:[%s14123_s11 + $0x1540] sm:$0xff]  ;;  %v1070_v19 = vld [vmem:[%s14123_s11 + $0x16a8] sm:$0xff] }
 0x1f8   : > { %v1029_v29 = vld [vmem:[%s14123_s11 + $0x1560] sm:$0xff] }
 0x1f9   : > { %v12096_v42 = vcombine.low %v1025_v28, %v1029_v29 }
 0x1fa   : > { %7240 = vmatpush1.bf16.msra.mxu0 %v12040_v35  ;;  %7609 = vmatpush1.bf16.msra.mxu1 %v12042_v36  ;;  %v12097_v35 = vcombine.high %v1025_v28, %v1029_v29  ;;  %v12099_v36 = vcombine.high %v1026_v31, %v1030_v60  ;;  %v1074_v28 = vld [vmem:[%s14123_s11 + $0x16c8] sm:$0xff]  ;;  %v12138_v60 = vcombine.low %v1066_v18, %v1070_v19 }
 0x1fb   : > { %7241 = vmatprep.subr.bf16.mxu0 %v12049_v37  ;;  %7610 = vmatprep.subr.bf16.mxu1 %v12051_v38  ;;  %v1033_v37 = vld [vmem:[%s14123_s11 + $0x1580] sm:$0xff]  ;;  %v1078_v29 = vld [vmem:[%s14123_s11 + $0x16e8] sm:$0xff] }
 0x1fc   : > { %v1037_v38 = vld [vmem:[%s14123_s11 + $0x15a0] sm:$0xff] }
 0x1fd   : > { %v12104_v53 = vcombine.low %v1033_v37, %v1037_v38 }
 0x1fe   : > { %7242 = vmatpush1.bf16.msra.mxu0 %v12048_v45  ;;  %7611 = vmatpush1.bf16.msra.mxu1 %v12050_v46  ;;  %v12105_v45 = vcombine.high %v1033_v37, %v1037_v38  ;;  %v12107_v46 = vcombine.high %v1034_v39, %v1038_v40  ;;  %v1082_v37 = vld [vmem:[%s14123_s11 + $0x1708] sm:$0xff]  ;;  %v12146_v40 = vcombine.low %v1074_v28, %v1078_v29 }
 0x1ff   : > { %7252 = vmatprep.subr.bf16.mxu0 %v12057_v47  ;;  %7621 = vmatprep.subr.bf16.mxu1 %v12059_v48  ;;  %v1041_v47 = vld [vmem:[%s14123_s11 + $0x15c0] sm:$0xff]  ;;  %v1086_v38 = vld [vmem:[%s14123_s11 + $0x1728] sm:$0xff] }
 0x200   : > { %v1045_v48 = vld [vmem:[%s14123_s11 + $0x15e0] sm:$0xff] }
 0x201   : > { %7244 = vmatmul.mubr.bf16.vlgmr.msra.gmra.mrb[0].mxu0 %v14550_v52  ;;  %7613 = vmatmul.mubr.bf16.vlgmr.msra.gmra.mrb[0].mxu1 %v14550_v52  ;;  %v12112_v12 = vcombine.low %v1041_v47, %v1045_v48 }
 0x202   : > { %7253 = vmatpush1.bf16.msra.mxu0 %v12056_v56  ;;  %7622 = vmatpush1.bf16.msra.mxu1 %v12058_v57  ;;  %v12113_v56 = vcombine.high %v1041_v47, %v1045_v48  ;;  %v12115_v57 = vcombine.high %v1042_v49, %v1046_v50  ;;  %v1090_v47 = vld [vmem:[%s14123_s11 + $0x1748] sm:$0xff]  ;;  %v12154_v50 = vcombine.low %v1082_v37, %v1086_v38 }
 0x203   : > { %7254 = vmatprep.subr.bf16.mxu0 %v12065_v58  ;;  %7623 = vmatprep.subr.bf16.mxu1 %v12067_v59  ;;  %v1049_v58 = vld [vmem:[%s14123_s11 + $0x1600] sm:$0xff]  ;;  %v1094_v48 = vld [vmem:[%s14123_s11 + $0x1768] sm:$0xff] }
 0x204   : > { %7284 = vmatprep.mubr.bf16.mxu0 %v14558_v1  ;;  %7653 = vmatprep.mubr.bf16.mxu1 %v14558_v1  ;;  %v1053_v59 = vld [vmem:[%s14123_s11 + $0x1620] sm:$0xff] }
 0x205   : > { %v12120_v11 = vcombine.low %v1049_v58, %v1053_v59 }
 0x206   : > { %7255 = vmatpush1.bf16.msra.mxu0 %v12064_v4  ;;  %7624 = vmatpush1.bf16.msra.mxu1 %v12066_v5  ;;  %v12121_v4 = vcombine.high %v1049_v58, %v1053_v59  ;;  %v12123_v5 = vcombine.high %v1050_v61, %v1054_v63  ;;  %v1098_v58 = vld [vmem:[%s14123_s11 + $0x1788] sm:$0xff]  ;;  %v12162_v63 = vcombine.low %v1090_v47, %v1094_v48 }
 0x207   : > { %7256 = vmatprep.subr.bf16.mxu0 %v12073_v6  ;;  %7625 = vmatprep.subr.bf16.mxu1 %v12075_v7  ;;  %v1057_v6 = vld [vmem:[%s14123_s11 + $0x1640] sm:$0xff]  ;;  %v1102_v59 = vld [vmem:[%s14123_s11 + $0x17a8] sm:$0xff] }
 0x208   : > { %v1061_v7 = vld [vmem:[%s14123_s11 + $0x1660] sm:$0xff] }
 0x209   : > { %v12128_v20 = vcombine.low %v1057_v6, %v1061_v7 }
 0x20a   : > { %7257 = vmatpush1.bf16.msra.mxu0 %v12072_v14  ;;  %7626 = vmatpush1.bf16.msra.mxu1 %v12074_v15  ;;  %v12129_v14 = vcombine.high %v1057_v6, %v1061_v7  ;;  %v12131_v15 = vcombine.high %v1058_v8, %v1062_v9  ;;  %v1527_v6 = vcombine.high %v14459_v2, %v14459_v2  ;;  %v1106_v7 = vld [vmem:[%s14123_s11 + $0x17c8] sm:$0xff] }
 0x20b   : > { %7258 = vmatprep.subr.bf16.mxu0 %v12081_v16  ;;  %7627 = vmatprep.subr.bf16.mxu1 %v12083_v17  ;;  %v1065_v16 = vld [vmem:[%s14123_s11 + $0x1680] sm:$0xff]  ;;  %v1110_v8 = vld [vmem:[%s14123_s11 + $0x17e8] sm:$0xff] }
 0x20c   : > { %v1069_v17 = vld [vmem:[%s14123_s11 + $0x16a0] sm:$0xff]  ;;  %v1114_v2 = vld [vmem:[%s14123_s11 + $0x1808] sm:$0xff] }
 0x20d   : > { %v12136_v31 = vcombine.low %v1065_v16, %v1069_v17 }
 0x20e   : > { %7259 = vmatpush1.bf16.msra.mxu0 %v12080_v23  ;;  %7628 = vmatpush1.bf16.msra.mxu1 %v12082_v25  ;;  %v12137_v23 = vcombine.high %v1065_v16, %v1069_v17  ;;  %v12139_v25 = vcombine.high %v1066_v18, %v1070_v19  ;;  %v1117_v16 = vld [vmem:[%s14123_s11 + $0x1820] sm:$0xff]  ;;  %v14623_v17 = vrot.slane %v1527_v6, %v14172_v54  ;;  %v1118_v18 = vld [vmem:[%s14123_s11 + $0x1828] sm:$0xff] }
 0x20f   : > { %7260 = vmatprep.subr.bf16.mxu0 %v12089_v26  ;;  %7629 = vmatprep.subr.bf16.mxu1 %v12091_v27  ;;  %v1073_v26 = vld [vmem:[%s14123_s11 + $0x16c0] sm:$0xff] }
 0x210   : > { %v1077_v27 = vld [vmem:[%s14123_s11 + $0x16e0] sm:$0xff] }
 0x211   : > { %v12144_v39 = vcombine.low %v1073_v26, %v1077_v27  ;;  %v1153_v6 = vld [vmem:[%s14123_s11 + $0x1940] sm:$0xff] }
 0x212   : > { %7261 = vmatpush1.bf16.msra.mxu0 %v12088_v33  ;;  %7630 = vmatpush1.bf16.msra.mxu1 %v12090_v34  ;;  %v12145_v33 = vcombine.high %v1073_v26, %v1077_v27  ;;  %v12147_v34 = vcombine.high %v1074_v28, %v1078_v29  ;;  %v1125_v26 = vld [vmem:[%s14123_s11 + $0x1860] sm:$0xff]  ;;  %v1543_v27 = vcombine.high %v14623_v17, %v14623_v17  ;;  %v1122_v29 = vld [vmem:[%s14123_s11 + $0x1848] sm:$0xff] }
 0x213   : > { %7262 = vmatprep.subr.bf16.mxu0 %v12097_v35  ;;  %7631 = vmatprep.subr.bf16.mxu1 %v12099_v36  ;;  %v1081_v35 = vld [vmem:[%s14123_s11 + $0x1700] sm:$0xff]  ;;  %v14633_v28 = vcombine.high %v14550_v52, %v14550_v52 }
 0x214   : > { %v1085_v36 = vld [vmem:[%s14123_s11 + $0x1720] sm:$0xff] }
 0x215   : > { %v12152_v49 = vcombine.low %v1081_v35, %v1085_v36 }
 0x216   : > { %7263 = vmatpush1.bf16.msra.mxu0 %v12096_v42  ;;  %7632 = vmatpush1.bf16.msra.mxu1 %v12098_v43  ;;  %v12153_v42 = vcombine.high %v1081_v35, %v1085_v36  ;;  %v12155_v43 = vcombine.high %v1082_v37, %v1086_v38  ;;  %v1129_v36 = vld [vmem:[%s14123_s11 + $0x1880] sm:$0xff]  ;;  %v14640_v38 = vrot.slane %v1543_v27, %v14172_v54 }
 0x217   : > { %7264 = vmatprep.subr.bf16.mxu0 %v12105_v45  ;;  %7633 = vmatprep.subr.bf16.mxu1 %v12107_v46  ;;  %v1089_v45 = vld [vmem:[%s14123_s11 + $0x1740] sm:$0xff] }
 0x218   : > { %v1093_v46 = vld [vmem:[%s14123_s11 + $0x1760] sm:$0xff] }
 0x219   : > { %v12160_v61 = vcombine.low %v1089_v45, %v1093_v46  ;;  %v1133_v37 = vld [vmem:[%s14123_s11 + $0x18a0] sm:$0xff] }
 0x21a   : > { %7265 = vmatpush1.bf16.msra.mxu0 %v12104_v53  ;;  %7634 = vmatpush1.bf16.msra.mxu1 %v12106_v55  ;;  %v12161_v53 = vcombine.high %v1089_v45, %v1093_v46  ;;  %v12163_v55 = vcombine.high %v1090_v47, %v1094_v48  ;;  %v12201_v45 = vcombine.high %v1129_v36, %v1133_v37  ;;  %v1137_v47 = vld [vmem:[%s14123_s11 + $0x18c0] sm:$0xff] }
 0x21b   : > { %7266 = vmatprep.subr.bf16.mxu0 %v12113_v56  ;;  %7635 = vmatprep.subr.bf16.mxu1 %v12115_v57  ;;  %v1097_v56 = vld [vmem:[%s14123_s11 + $0x1780] sm:$0xff] }
 0x21c   : > { %v1101_v57 = vld [vmem:[%s14123_s11 + $0x17a0] sm:$0xff] }
 0x21d   : > { %v12168_v9 = vcombine.low %v1097_v56, %v1101_v57  ;;  %v1141_v48 = vld [vmem:[%s14123_s11 + $0x18e0] sm:$0xff] }
 0x21e   : > { %7267 = vmatpush1.bf16.msra.mxu0 %v12112_v12  ;;  %7636 = vmatpush1.bf16.msra.mxu1 %v12114_v3  ;;  %v12169_v12 = vcombine.high %v1097_v56, %v1101_v57  ;;  %v12171_v3 = vcombine.high %v1098_v58, %v1102_v59  ;;  %v12209_v56 = vcombine.high %v1137_v47, %v1141_v48  ;;  %v1173_v27 = vld [vmem:[%s14123_s11 + $0x19e0] sm:$0xff] }
 0x21f   : > { %7268 = vmatprep.subr.bf16.mxu0 %v12121_v4  ;;  %7637 = vmatprep.subr.bf16.mxu1 %v12123_v5  ;;  %v1105_v4 = vld [vmem:[%s14123_s11 + $0x17c0] sm:$0xff] }
 0x220   : > { %v1109_v5 = vld [vmem:[%s14123_s11 + $0x17e0] sm:$0xff] }
 0x221   : > { %v12176_v19 = vcombine.low %v1105_v4, %v1109_v5 }
 0x222   : > { %7269 = vmatpush1.bf16.msra.mxu0 %v12120_v11  ;;  %7638 = vmatpush1.bf16.msra.mxu1 %v12122_v13  ;;  %v12170_v11 = vcombine.low %v1098_v58, %v1102_v59  ;;  %v12177_v13 = vcombine.high %v1105_v4, %v1109_v5  ;;  %v1145_v58 = vld [vmem:[%s14123_s11 + $0x1900] sm:$0xff] }
 0x223   : > { %7270 = vmatprep.subr.bf16.mxu0 %v12129_v14  ;;  %7639 = vmatprep.subr.bf16.mxu1 %v12131_v15  ;;  %v12179_v14 = vcombine.high %v1106_v7, %v1110_v8  ;;  %v1113_v15 = vld [vmem:[%s14123_s11 + $0x1800] sm:$0xff] }
 0x224   : > { %v1149_v59 = vld [vmem:[%s14123_s11 + $0x1920] sm:$0xff] }
 0x225   : > { %v12217_v4 = vcombine.high %v1145_v58, %v1149_v59 }
 0x226   : > { %7271 = vmatpush1.bf16.msra.mxu0 %v12128_v20  ;;  %7640 = vmatpush1.bf16.msra.mxu1 %v12130_v21  ;;  %v12178_v20 = vcombine.low %v1106_v7, %v1110_v8  ;;  %v12185_v21 = vcombine.high %v1113_v15, %v1117_v16  ;;  %v1157_v7 = vld [vmem:[%s14123_s11 + $0x1960] sm:$0xff]  ;;  %v1154_v8 = vld [vmem:[%s14123_s11 + $0x1948] sm:$0xff] }
 0x227   : > { %7272 = vmatprep.subr.bf16.mxu0 %v12137_v23  ;;  %7641 = vmatprep.subr.bf16.mxu1 %v12139_v25  ;;  %v12187_v23 = vcombine.high %v1114_v2, %v1118_v18  ;;  %v1121_v25 = vld [vmem:[%s14123_s11 + $0x1840] sm:$0xff] }
 0x22a   : > { %7273 = vmatpush1.bf16.msra.mxu0 %v12136_v31  ;;  %7642 = vmatpush1.bf16.msra.mxu1 %v12138_v60  ;;  %v1126_v31 = vld [vmem:[%s14123_s11 + $0x1868] sm:$0xff]  ;;  %v12184_v60 = vcombine.low %v1113_v15, %v1117_v16  ;;  %v1161_v16 = vld [vmem:[%s14123_s11 + $0x1980] sm:$0xff] }
 0x22b   : > { %7274 = vmatprep.subr.bf16.mxu0 %v12145_v33  ;;  %7643 = vmatprep.subr.bf16.mxu1 %v12147_v34  ;;  %v12186_v33 = vcombine.low %v1114_v2, %v1118_v18  ;;  %v12193_v34 = vcombine.high %v1121_v25, %v1125_v26  ;;  %v12195_v35 = vcombine.high %v1122_v29, %v1126_v31  ;;  %v1165_v2 = vld [vmem:[%s14123_s11 + $0x19a0] sm:$0xff]  ;;  %v1162_v18 = vld [vmem:[%s14123_s11 + $0x1988] sm:$0xff] }
 0x22e   : > { %7275 = vmatpush1.bf16.msra.mxu0 %v12144_v39  ;;  %7644 = vmatpush1.bf16.msra.mxu1 %v12146_v40  ;;  %v1130_v39 = vld [vmem:[%s14123_s11 + $0x1888] sm:$0xff] }
 0x22f   : > { %7276 = vmatprep.subr.bf16.mxu0 %v12153_v42  ;;  %7645 = vmatprep.subr.bf16.mxu1 %v12155_v43  ;;  %v1134_v40 = vld [vmem:[%s14123_s11 + $0x18a8] sm:$0xff]  ;;  %v12192_v42 = vcombine.low %v1121_v25, %v1125_v26  ;;  %v12194_v43 = vcombine.low %v1122_v29, %v1126_v31  ;;  %v1169_v26 = vld [vmem:[%s14123_s11 + $0x19c0] sm:$0xff] }
 0x230   : > { %v12203_v46 = vcombine.high %v1130_v39, %v1134_v40  ;;  %v1170_v29 = vld [vmem:[%s14123_s11 + $0x19c8] sm:$0xff] }
 0x231   : > { %v1174_v31 = vld [vmem:[%s14123_s11 + $0x19e8] sm:$0xff] }
 0x232   : > { %7277 = vmatpush1.bf16.msra.mxu0 %v12152_v49  ;;  %7646 = vmatpush1.bf16.msra.mxu1 %v12154_v50  ;;  %v1138_v49 = vld [vmem:[%s14123_s11 + $0x18c8] sm:$0xff] }
 0x233   : > { %7278 = vmatprep.subr.bf16.mxu0 %v12161_v53  ;;  %7647 = vmatprep.subr.bf16.mxu1 %v12163_v55  ;;  %v1142_v50 = vld [vmem:[%s14123_s11 + $0x18e8] sm:$0xff]  ;;  %v12200_v53 = vcombine.low %v1129_v36, %v1133_v37  ;;  %v12202_v55 = vcombine.low %v1130_v39, %v1134_v40  ;;  %v1177_v36 = vld [vmem:[%s14123_s11 + $0x1a00] sm:$0xff] }
 0x234   : > { %v12211_v57 = vcombine.high %v1138_v49, %v1142_v50  ;;  %v1181_v37 = vld [vmem:[%s14123_s11 + $0x1a20] sm:$0xff]  ;;  %v1178_v39 = vld [vmem:[%s14123_s11 + $0x1a08] sm:$0xff] }
 0x235   : > { %v1182_v40 = vld [vmem:[%s14123_s11 + $0x1a28] sm:$0xff] }
 0x236   : > { %7279 = vmatpush1.bf16.msra.mxu0 %v12160_v61  ;;  %7648 = vmatpush1.bf16.msra.mxu1 %v12162_v63  ;;  %v1146_v61 = vld [vmem:[%s14123_s11 + $0x1908] sm:$0xff] }
 0x237   : > { %7280 = vmatprep.subr.bf16.mxu0 %v12169_v12  ;;  %7649 = vmatprep.subr.bf16.mxu1 %v12171_v3  ;;  %v1150_v63 = vld [vmem:[%s14123_s11 + $0x1928] sm:$0xff]  ;;  %v12208_v12 = vcombine.low %v1137_v47, %v1141_v48  ;;  %v12210_v3 = vcombine.low %v1138_v49, %v1142_v50  ;;  %v1185_v47 = vld [vmem:[%s14123_s11 + $0x1a40] sm:$0xff] }
 0x238   : > { %v12219_v5 = vcombine.high %v1146_v61, %v1150_v63  ;;  %v1189_v48 = vld [vmem:[%s14123_s11 + $0x1a60] sm:$0xff]  ;;  %v1186_v49 = vld [vmem:[%s14123_s11 + $0x1a48] sm:$0xff] }
 0x239   : > { %v1190_v50 = vld [vmem:[%s14123_s11 + $0x1a68] sm:$0xff] }
 0x23a   : > { %7281 = vmatpush1.bf16.msra.mxu0 %v12168_v9  ;;  %7650 = vmatpush1.bf16.msra.mxu1 %v12170_v11  ;;  %v1158_v9 = vld [vmem:[%s14123_s11 + $0x1968] sm:$0xff]  ;;  %v12216_v11 = vcombine.low %v1145_v58, %v1149_v59  ;;  %v1193_v58 = vld [vmem:[%s14123_s11 + $0x1a80] sm:$0xff] }
 0x23b   : > { %7282 = vmatprep.subr.bf16.mxu0 %v12177_v13  ;;  %7651 = vmatprep.subr.bf16.mxu1 %v12179_v14  ;;  %v12218_v13 = vcombine.low %v1146_v61, %v1150_v63  ;;  %v12225_v14 = vcombine.high %v1153_v6, %v1157_v7  ;;  %v12227_v15 = vcombine.high %v1154_v8, %v1158_v9  ;;  %v1197_v59 = vld [vmem:[%s14123_s11 + $0x1aa0] sm:$0xff]  ;;  %v1194_v61 = vld [vmem:[%s14123_s11 + $0x1a88] sm:$0xff] }
 0x23c   : > { %v1198_v63 = vld [vmem:[%s14123_s11 + $0x1aa8] sm:$0xff] }
 0x23e   : > { %7283 = vmatpush1.bf16.msra.mxu0 %v12176_v19  ;;  %7652 = vmatpush1.bf16.msra.mxu1 %v12178_v20  ;;  %v1166_v19 = vld [vmem:[%s14123_s11 + $0x19a8] sm:$0xff]  ;;  %v12224_v20 = vcombine.low %v1153_v6, %v1157_v7  ;;  %v1201_v6 = vld [vmem:[%s14123_s11 + $0x1ac0] sm:$0xff] }
 0x23f   : > { %7293 = vmatprep.subr.bf16.mxu0 %v12185_v21  ;;  %7662 = vmatprep.subr.bf16.mxu1 %v12187_v23  ;;  %v12226_v21 = vcombine.low %v1154_v8, %v1158_v9  ;;  %v12233_v23 = vcombine.high %v1161_v16, %v1165_v2  ;;  %v12235_v25 = vcombine.high %v1162_v18, %v1166_v19  ;;  %v1205_v7 = vld [vmem:[%s14123_s11 + $0x1ae0] sm:$0xff]  ;;  %v1202_v8 = vld [vmem:[%s14123_s11 + $0x1ac8] sm:$0xff] }
 0x240   : > { %v1206_v9 = vld [vmem:[%s14123_s11 + $0x1ae8] sm:$0xff] }
 0x241   : > { %7285 = vmatmul.mubr.bf16.vlgmr.msra.gmra.mrb[0].mxu0 %v14633_v28  ;;  %7654 = vmatmul.mubr.bf16.vlgmr.msra.gmra.mrb[0].mxu1 %v14633_v28 }
 0x242   : > { %7294 = vmatpush1.bf16.msra.mxu0 %v12184_v60  ;;  %7663 = vmatpush1.bf16.msra.mxu1 %v12186_v33  ;;  %v12232_v60 = vcombine.low %v1161_v16, %v1165_v2  ;;  %v12234_v33 = vcombine.low %v1162_v18, %v1166_v19  ;;  %v1209_v16 = vld [vmem:[%s14123_s11 + $0x1b00] sm:$0xff]  ;;  %v1210_v18 = vld [vmem:[%s14123_s11 + $0x1b08] sm:$0xff] }
 0x243   : > { %7295 = vmatprep.subr.bf16.mxu0 %v12193_v34  ;;  %7664 = vmatprep.subr.bf16.mxu1 %v12195_v35  ;;  %v12241_v34 = vcombine.high %v1169_v26, %v1173_v27  ;;  %v12243_v35 = vcombine.high %v1170_v29, %v1174_v31  ;;  %v1213_v2 = vld [vmem:[%s14123_s11 + $0x1b20] sm:$0xff]  ;;  %v1214_v19 = vld [vmem:[%s14123_s11 + $0x1b28] sm:$0xff] }
 0x244   : > { %7325 = vmatprep.mubr.bf16.mxu0 %v14640_v38  ;;  %7694 = vmatprep.mubr.bf16.mxu1 %v14640_v38 }
 0x246   : > { %7296 = vmatpush1.bf16.msra.mxu0 %v12192_v42  ;;  %7665 = vmatpush1.bf16.msra.mxu1 %v12194_v43  ;;  %v12240_v42 = vcombine.low %v1169_v26, %v1173_v27  ;;  %v12242_v43 = vcombine.low %v1170_v29, %v1174_v31  ;;  %v1217_v26 = vld [vmem:[%s14123_s11 + $0x1b40] sm:$0xff]  ;;  %v1218_v29 = vld [vmem:[%s14123_s11 + $0x1b48] sm:$0xff] }
 0x247   : > { %7297 = vmatprep.subr.bf16.mxu0 %v12201_v45  ;;  %7666 = vmatprep.subr.bf16.mxu1 %v12203_v46  ;;  %v12249_v45 = vcombine.high %v1177_v36, %v1181_v37  ;;  %v12251_v46 = vcombine.high %v1178_v39, %v1182_v40  ;;  %v1221_v27 = vld [vmem:[%s14123_s11 + $0x1b60] sm:$0xff]  ;;  %v1222_v31 = vld [vmem:[%s14123_s11 + $0x1b68] sm:$0xff] }
 0x24a   : > { %7298 = vmatpush1.bf16.msra.mxu0 %v12200_v53  ;;  %7667 = vmatpush1.bf16.msra.mxu1 %v12202_v55  ;;  %v12248_v53 = vcombine.low %v1177_v36, %v1181_v37  ;;  %v12250_v55 = vcombine.low %v1178_v39, %v1182_v40  ;;  %v1225_v36 = vld [vmem:[%s14123_s11 + $0x1b80] sm:$0xff]  ;;  %v1226_v39 = vld [vmem:[%s14123_s11 + $0x1b88] sm:$0xff] }
 0x24b   : > { %7299 = vmatprep.subr.bf16.mxu0 %v12209_v56  ;;  %7668 = vmatprep.subr.bf16.mxu1 %v12211_v57  ;;  %v12257_v56 = vcombine.high %v1185_v47, %v1189_v48  ;;  %v12259_v57 = vcombine.high %v1186_v49, %v1190_v50  ;;  %v1229_v37 = vld [vmem:[%s14123_s11 + $0x1ba0] sm:$0xff]  ;;  %v1230_v40 = vld [vmem:[%s14123_s11 + $0x1ba8] sm:$0xff] }
 0x24e   : > { %7300 = vmatpush1.bf16.msra.mxu0 %v12208_v12  ;;  %7669 = vmatpush1.bf16.msra.mxu1 %v12210_v3  ;;  %v12256_v12 = vcombine.low %v1185_v47, %v1189_v48  ;;  %v12258_v3 = vcombine.low %v1186_v49, %v1190_v50  ;;  %v1233_v47 = vld [vmem:[%s14123_s11 + $0x1bc0] sm:$0xff]  ;;  %v1234_v49 = vld [vmem:[%s14123_s11 + $0x1bc8] sm:$0xff] }
 0x24f   : > { %7301 = vmatprep.subr.bf16.mxu0 %v12217_v4  ;;  %7670 = vmatprep.subr.bf16.mxu1 %v12219_v5  ;;  %v12265_v4 = vcombine.high %v1193_v58, %v1197_v59  ;;  %v12267_v5 = vcombine.high %v1194_v61, %v1198_v63  ;;  %v1237_v48 = vld [vmem:[%s14123_s11 + $0x1be0] sm:$0xff]  ;;  %v1238_v50 = vld [vmem:[%s14123_s11 + $0x1be8] sm:$0xff] }
 0x252   : > { %7302 = vmatpush1.bf16.msra.mxu0 %v12216_v11  ;;  %7671 = vmatpush1.bf16.msra.mxu1 %v12218_v13  ;;  %v12264_v11 = vcombine.low %v1193_v58, %v1197_v59  ;;  %v12266_v13 = vcombine.low %v1194_v61, %v1198_v63  ;;  %v1241_v58 = vld [vmem:[%s14123_s11 + $0x1c00] sm:$0xff]  ;;  %v1242_v61 = vld [vmem:[%s14123_s11 + $0x1c08] sm:$0xff] }
 0x253   : > { %7303 = vmatprep.subr.bf16.mxu0 %v12225_v14  ;;  %7672 = vmatprep.subr.bf16.mxu1 %v12227_v15  ;;  %v12273_v14 = vcombine.high %v1201_v6, %v1205_v7  ;;  %v12275_v15 = vcombine.high %v1202_v8, %v1206_v9  ;;  %v1245_v59 = vld [vmem:[%s14123_s11 + $0x1c20] sm:$0xff]  ;;  %v1246_v63 = vld [vmem:[%s14123_s11 + $0x1c28] sm:$0xff] }
 0x256   : > { %7304 = vmatpush1.bf16.msra.mxu0 %v12224_v20  ;;  %7673 = vmatpush1.bf16.msra.mxu1 %v12226_v21  ;;  %v12272_v20 = vcombine.low %v1201_v6, %v1205_v7  ;;  %v12274_v21 = vcombine.low %v1202_v8, %v1206_v9  ;;  %v1249_v6 = vld [vmem:[%s14123_s11 + $0x1c40] sm:$0xff]  ;;  %v14708_v8 = vrot.slane %v14623_v17, %v14172_v54  ;;  %v1250_v9 = vld [vmem:[%s14123_s11 + $0x1c48] sm:$0xff] }
 0x257   : > { %7305 = vmatprep.subr.bf16.mxu0 %v12233_v23  ;;  %7674 = vmatprep.subr.bf16.mxu1 %v12235_v25  ;;  %v12281_v23 = vcombine.high %v1209_v16, %v1213_v2  ;;  %v12283_v25 = vcombine.high %v1210_v18, %v1214_v19  ;;  %v1253_v7 = vld [vmem:[%s14123_s11 + $0x1c60] sm:$0xff]  ;;  %v1258_v17 = vld [vmem:[%s14123_s11 + $0x1c88] sm:$0xff] }
 0x25a   : > { %7306 = vmatpush1.bf16.msra.mxu0 %v12232_v60  ;;  %7675 = vmatpush1.bf16.msra.mxu1 %v12234_v33  ;;  %v12280_v60 = vcombine.low %v1209_v16, %v1213_v2  ;;  %v12282_v33 = vcombine.low %v1210_v18, %v1214_v19  ;;  %v1257_v2 = vld [vmem:[%s14123_s11 + $0x1c80] sm:$0xff]  ;;  %v14716_v19 = vcombine.high %v14640_v38, %v14640_v38 }
 0x25b   : > { %7307 = vmatprep.subr.bf16.mxu0 %v12241_v34  ;;  %7676 = vmatprep.subr.bf16.mxu1 %v12243_v35  ;;  %v12289_v34 = vcombine.high %v1217_v26, %v1221_v27  ;;  %v12291_v35 = vcombine.high %v1218_v29, %v1222_v31  ;;  %v1261_v18 = vld [vmem:[%s14123_s11 + $0x1ca0] sm:$0xff] }
 0x25e   : > { %7308 = vmatpush1.bf16.msra.mxu0 %v12240_v42  ;;  %7677 = vmatpush1.bf16.msra.mxu1 %v12242_v43  ;;  %v12288_v42 = vcombine.low %v1217_v26, %v1221_v27  ;;  %v12290_v43 = vcombine.low %v1218_v29, %v1222_v31  ;;  %v1265_v27 = vld [vmem:[%s14123_s11 + $0x1cc0] sm:$0xff]  ;;  %v1266_v31 = vld [vmem:[%s14123_s11 + $0x1cc8] sm:$0xff] }
 0x25f   : > { %7309 = vmatprep.subr.bf16.mxu0 %v12249_v45  ;;  %7678 = vmatprep.subr.bf16.mxu1 %v12251_v46  ;;  %v12297_v45 = vcombine.high %v1225_v36, %v1229_v37  ;;  %v12299_v46 = vcombine.high %v1226_v39, %v1230_v40  ;;  %v1269_v29 = vld [vmem:[%s14123_s11 + $0x1ce0] sm:$0xff] }
 0x262   : > { %7310 = vmatpush1.bf16.msra.mxu0 %v12248_v53  ;;  %7679 = vmatpush1.bf16.msra.mxu1 %v12250_v55  ;;  %v12296_v53 = vcombine.low %v1225_v36, %v1229_v37  ;;  %v12298_v55 = vcombine.low %v1226_v39, %v1230_v40  ;;  %v1273_v37 = vld [vmem:[%s14123_s11 + $0x1d00] sm:$0xff]  ;;  %v1274_v40 = vld [vmem:[%s14123_s11 + $0x1d08] sm:$0xff] }
 0x263   : > { %7311 = vmatprep.subr.bf16.mxu0 %v12257_v56  ;;  %7680 = vmatprep.subr.bf16.mxu1 %v12259_v57  ;;  %v12305_v56 = vcombine.high %v1233_v47, %v1237_v48  ;;  %v12307_v57 = vcombine.high %v1234_v49, %v1238_v50  ;;  %v1277_v39 = vld [vmem:[%s14123_s11 + $0x1d20] sm:$0xff] }
 0x266   : > { %7312 = vmatpush1.bf16.msra.mxu0 %v12256_v12  ;;  %7681 = vmatpush1.bf16.msra.mxu1 %v12258_v3  ;;  %v12304_v12 = vcombine.low %v1233_v47, %v1237_v48  ;;  %v12306_v3 = vcombine.low %v1234_v49, %v1238_v50  ;;  %v1281_v48 = vld [vmem:[%s14123_s11 + $0x1d40] sm:$0xff]  ;;  %v1282_v50 = vld [vmem:[%s14123_s11 + $0x1d48] sm:$0xff] }
 0x267   : > { %7313 = vmatprep.subr.bf16.mxu0 %v12265_v4  ;;  %7682 = vmatprep.subr.bf16.mxu1 %v12267_v5  ;;  %v12313_v4 = vcombine.high %v1241_v58, %v1245_v59  ;;  %v12315_v5 = vcombine.high %v1242_v61, %v1246_v63  ;;  %v1285_v49 = vld [vmem:[%s14123_s11 + $0x1d60] sm:$0xff] }
 0x26a   : > { %7314 = vmatpush1.bf16.msra.mxu0 %v12264_v11  ;;  %7683 = vmatpush1.bf16.msra.mxu1 %v12266_v13  ;;  %v1254_v11 = vld [vmem:[%s14123_s11 + $0x1c68] sm:$0xff]  ;;  %v12312_v13 = vcombine.low %v1241_v58, %v1245_v59  ;;  %v1289_v59 = vld [vmem:[%s14123_s11 + $0x1d80] sm:$0xff] }
 0x26b   : > { %7315 = vmatprep.subr.bf16.mxu0 %v12273_v14  ;;  %7684 = vmatprep.subr.bf16.mxu1 %v12275_v15  ;;  %v12314_v14 = vcombine.low %v1242_v61, %v1246_v63  ;;  %v12321_v15 = vcombine.high %v1249_v6, %v1253_v7  ;;  %v12323_v16 = vcombine.high %v1250_v9, %v1254_v11  ;;  %v1293_v61 = vld [vmem:[%s14123_s11 + $0x1da0] sm:$0xff]  ;;  %v1290_v63 = vld [vmem:[%s14123_s11 + $0x1d88] sm:$0xff] }
 0x26e   : > { %7316 = vmatpush1.bf16.msra.mxu0 %v12272_v20  ;;  %7685 = vmatpush1.bf16.msra.mxu1 %v12274_v21  ;;  %v1262_v20 = vld [vmem:[%s14123_s11 + $0x1ca8] sm:$0xff]  ;;  %v12320_v21 = vcombine.low %v1249_v6, %v1253_v7  ;;  %v1297_v7 = vld [vmem:[%s14123_s11 + $0x1dc0] sm:$0xff] }
 0x26f   : > { %7317 = vmatprep.subr.bf16.mxu0 %v12281_v23  ;;  %7686 = vmatprep.subr.bf16.mxu1 %v12283_v25  ;;  %v12322_v23 = vcombine.low %v1250_v9, %v1254_v11  ;;  %v12329_v25 = vcombine.high %v1257_v2, %v1261_v18  ;;  %v12331_v26 = vcombine.high %v1258_v17, %v1262_v20  ;;  %v1301_v9 = vld [vmem:[%s14123_s11 + $0x1de0] sm:$0xff]  ;;  %v1298_v11 = vld [vmem:[%s14123_s11 + $0x1dc8] sm:$0xff] }
 0x272   : > { %7318 = vmatpush1.bf16.msra.mxu0 %v12280_v60  ;;  %7687 = vmatpush1.bf16.msra.mxu1 %v12282_v33  ;;  %v1270_v60 = vld [vmem:[%s14123_s11 + $0x1ce8] sm:$0xff]  ;;  %v12328_v33 = vcombine.low %v1257_v2, %v1261_v18  ;;  %v1305_v18 = vld [vmem:[%s14123_s11 + $0x1e00] sm:$0xff] }
 0x273   : > { %7319 = vmatprep.subr.bf16.mxu0 %v12289_v34  ;;  %7688 = vmatprep.subr.bf16.mxu1 %v12291_v35  ;;  %v12330_v34 = vcombine.low %v1258_v17, %v1262_v20  ;;  %v12337_v35 = vcombine.high %v1265_v27, %v1269_v29  ;;  %v12339_v36 = vcombine.high %v1266_v31, %v1270_v60  ;;  %v1309_v17 = vld [vmem:[%s14123_s11 + $0x1e20] sm:$0xff]  ;;  %v1306_v20 = vld [vmem:[%s14123_s11 + $0x1e08] sm:$0xff] }
 0x276   : > { %7320 = vmatpush1.bf16.msra.mxu0 %v12288_v42  ;;  %7689 = vmatpush1.bf16.msra.mxu1 %v12290_v43  ;;  %v1278_v42 = vld [vmem:[%s14123_s11 + $0x1d28] sm:$0xff]  ;;  %v12336_v43 = vcombine.low %v1265_v27, %v1269_v29  ;;  %v1313_v29 = vld [vmem:[%s14123_s11 + $0x1e40] sm:$0xff] }
 0x277   : > { %7321 = vmatprep.subr.bf16.mxu0 %v12297_v45  ;;  %7690 = vmatprep.subr.bf16.mxu1 %v12299_v46  ;;  %v12338_v45 = vcombine.low %v1266_v31, %v1270_v60  ;;  %v12345_v46 = vcombine.high %v1273_v37, %v1277_v39  ;;  %v12347_v47 = vcombine.high %v1274_v40, %v1278_v42  ;;  %v1317_v31 = vld [vmem:[%s14123_s11 + $0x1e60] sm:$0xff]  ;;  %v1314_v60 = vld [vmem:[%s14123_s11 + $0x1e48] sm:$0xff] }
 0x27a   : > { %7322 = vmatpush1.bf16.msra.mxu0 %v12296_v53  ;;  %7691 = vmatpush1.bf16.msra.mxu1 %v12298_v55  ;;  %v1286_v53 = vld [vmem:[%s14123_s11 + $0x1d68] sm:$0xff]  ;;  %v12344_v55 = vcombine.low %v1273_v37, %v1277_v39  ;;  %v1321_v39 = vld [vmem:[%s14123_s11 + $0x1e80] sm:$0xff] }
 0x27b   : > { %7323 = vmatprep.subr.bf16.mxu0 %v12305_v56  ;;  %7692 = vmatprep.subr.bf16.mxu1 %v12307_v57  ;;  %v12346_v56 = vcombine.low %v1274_v40, %v1278_v42  ;;  %v12353_v57 = vcombine.high %v1281_v48, %v1285_v49  ;;  %v12355_v58 = vcombine.high %v1282_v50, %v1286_v53  ;;  %v1325_v40 = vld [vmem:[%s14123_s11 + $0x1ea0] sm:$0xff]  ;;  %v1322_v42 = vld [vmem:[%s14123_s11 + $0x1e88] sm:$0xff] }
 0x27e   : > { %7324 = vmatpush1.bf16.msra.mxu0 %v12304_v12  ;;  %7693 = vmatpush1.bf16.msra.mxu1 %v12306_v3  ;;  %v1294_v12 = vld [vmem:[%s14123_s11 + $0x1da8] sm:$0xff]  ;;  %v12352_v3 = vcombine.low %v1281_v48, %v1285_v49  ;;  %v1329_v49 = vld [vmem:[%s14123_s11 + $0x1ec0] sm:$0xff] }
 0x27f   : > { %7334 = vmatprep.subr.bf16.mxu0 %v12313_v4  ;;  %7703 = vmatprep.subr.bf16.mxu1 %v12315_v5  ;;  %v12354_v4 = vcombine.low %v1282_v50, %v1286_v53  ;;  %v12361_v5 = vcombine.high %v1289_v59, %v1293_v61  ;;  %v12363_v6 = vcombine.high %v1290_v63, %v1294_v12  ;;  %v1333_v50 = vld [vmem:[%s14123_s11 + $0x1ee0] sm:$0xff]  ;;  %v1330_v53 = vld [vmem:[%s14123_s11 + $0x1ec8] sm:$0xff] }
 0x281   : > { %7326 = vmatmul.mubr.bf16.vlgmr.msra.gmra.mrb[0].mxu0 %v14708_v8  ;;  %7695 = vmatmul.mubr.bf16.vlgmr.msra.gmra.mrb[0].mxu1 %v14708_v8 }
 0x282   : > { %7335 = vmatpush1.bf16.msra.mxu0 %v12312_v13  ;;  %7704 = vmatpush1.bf16.msra.mxu1 %v12314_v14  ;;  %v1302_v13 = vld [vmem:[%s14123_s11 + $0x1de8] sm:$0xff]  ;;  %v12360_v14 = vcombine.low %v1289_v59, %v1293_v61  ;;  %v1337_v61 = vld [vmem:[%s14123_s11 + $0x1f00] sm:$0xff] }
 0x283   : > { %7336 = vmatprep.subr.bf16.mxu0 %v12321_v15  ;;  %7705 = vmatprep.subr.bf16.mxu1 %v12323_v16  ;;  %v12362_v15 = vcombine.low %v1290_v63, %v1294_v12  ;;  %v12369_v16 = vcombine.high %v1297_v7, %v1301_v9  ;;  %v12371_v2 = vcombine.high %v1298_v11, %v1302_v13  ;;  %v1341_v63 = vld [vmem:[%s14123_s11 + $0x1f20] sm:$0xff]  ;;  %v1338_v12 = vld [vmem:[%s14123_s11 + $0x1f08] sm:$0xff] }
 0x284   : > { %7366 = vmatprep.mubr.bf16.mxu0 %v14716_v19  ;;  %7735 = vmatprep.mubr.bf16.mxu1 %v14716_v19 }
 0x286   : > { %7337 = vmatpush1.bf16.msra.mxu0 %v12320_v21  ;;  %7706 = vmatpush1.bf16.msra.mxu1 %v12322_v23  ;;  %v1310_v21 = vld [vmem:[%s14123_s11 + $0x1e28] sm:$0xff]  ;;  %v12368_v23 = vcombine.low %v1297_v7, %v1301_v9  ;;  %v1345_v9 = vld [vmem:[%s14123_s11 + $0x1f40] sm:$0xff] }
 0x287   : > { %7338 = vmatprep.subr.bf16.mxu0 %v12329_v25  ;;  %7707 = vmatprep.subr.bf16.mxu1 %v12331_v26  ;;  %v12370_v25 = vcombine.low %v1298_v11, %v1302_v13  ;;  %v12377_v26 = vcombine.high %v1305_v18, %v1309_v17  ;;  %v12379_v27 = vcombine.high %v1306_v20, %v1310_v21  ;;  %v1349_v11 = vld [vmem:[%s14123_s11 + $0x1f60] sm:$0xff]  ;;  %v1346_v13 = vld [vmem:[%s14123_s11 + $0x1f48] sm:$0xff] }
 0x28a   : > { %7339 = vmatpush1.bf16.msra.mxu0 %v12328_v33  ;;  %7708 = vmatpush1.bf16.msra.mxu1 %v12330_v34  ;;  %v1318_v33 = vld [vmem:[%s14123_s11 + $0x1e68] sm:$0xff]  ;;  %v12376_v34 = vcombine.low %v1305_v18, %v1309_v17  ;;  %v1353_v17 = vld [vmem:[%s14123_s11 + $0x1f80] sm:$0xff] }
 0x28b   : > { %7340 = vmatprep.subr.bf16.mxu0 %v12337_v35  ;;  %7709 = vmatprep.subr.bf16.mxu1 %v12339_v36  ;;  %v12378_v35 = vcombine.low %v1306_v20, %v1310_v21  ;;  %v12385_v36 = vcombine.high %v1313_v29, %v1317_v31  ;;  %v12387_v37 = vcombine.high %v1314_v60, %v1318_v33  ;;  %v1357_v20 = vld [vmem:[%s14123_s11 + $0x1fa0] sm:$0xff]  ;;  %v1354_v21 = vld [vmem:[%s14123_s11 + $0x1f88] sm:$0xff] }
 0x28e   : > { %7341 = vmatpush1.bf16.msra.mxu0 %v12336_v43  ;;  %7710 = vmatpush1.bf16.msra.mxu1 %v12338_v45  ;;  %v1326_v43 = vld [vmem:[%s14123_s11 + $0x1ea8] sm:$0xff]  ;;  %v12384_v45 = vcombine.low %v1313_v29, %v1317_v31  ;;  %v1361_v31 = vld [vmem:[%s14123_s11 + $0x1fc0] sm:$0xff] }
 0x28f   : > { %7342 = vmatprep.subr.bf16.mxu0 %v12345_v46  ;;  %7711 = vmatprep.subr.bf16.mxu1 %v12347_v47  ;;  %v12386_v46 = vcombine.low %v1314_v60, %v1318_v33  ;;  %v12393_v47 = vcombine.high %v1321_v39, %v1325_v40  ;;  %v12395_v48 = vcombine.high %v1322_v42, %v1326_v43  ;;  %v1365_v60 = vld [vmem:[%s14123_s11 + $0x1fe0] sm:$0xff]  ;;  %v1362_v33 = vld [vmem:[%s14123_s11 + $0x1fc8] sm:$0xff] }
 0x292   : > { %7343 = vmatpush1.bf16.msra.mxu0 %v12344_v55  ;;  %7712 = vmatpush1.bf16.msra.mxu1 %v12346_v56  ;;  %v1334_v55 = vld [vmem:[%s14123_s11 + $0x1ee8] sm:$0xff]  ;;  %v12392_v56 = vcombine.low %v1321_v39, %v1325_v40  ;;  %v1369_v40 = vld [vmem:[%s14123_s11 + $0x2000] sm:$0xff] }
 0x293   : > { %7344 = vmatprep.subr.bf16.mxu0 %v12353_v57  ;;  %7713 = vmatprep.subr.bf16.mxu1 %v12355_v58  ;;  %v12394_v57 = vcombine.low %v1322_v42, %v1326_v43  ;;  %v12401_v58 = vcombine.high %v1329_v49, %v1333_v50  ;;  %v12403_v59 = vcombine.high %v1330_v53, %v1334_v55  ;;  %v1373_v42 = vld [vmem:[%s14123_s11 + $0x2020] sm:$0xff]  ;;  %v1370_v43 = vld [vmem:[%s14123_s11 + $0x2008] sm:$0xff] }
 0x296   : > { %7345 = vmatpush1.bf16.msra.mxu0 %v12352_v3  ;;  %7714 = vmatpush1.bf16.msra.mxu1 %v12354_v4  ;;  %v1342_v3 = vld [vmem:[%s14123_s11 + $0x1f28] sm:$0xff]  ;;  %v12400_v4 = vcombine.low %v1329_v49, %v1333_v50  ;;  %v1377_v50 = vld [vmem:[%s14123_s11 + $0x2040] sm:$0xff] }
 0x297   : > { %7346 = vmatprep.subr.bf16.mxu0 %v12361_v5  ;;  %7715 = vmatprep.subr.bf16.mxu1 %v12363_v6  ;;  %v12402_v5 = vcombine.low %v1330_v53, %v1334_v55  ;;  %v12409_v6 = vcombine.high %v1337_v61, %v1341_v63  ;;  %v12411_v7 = vcombine.high %v1338_v12, %v1342_v3  ;;  %v1381_v53 = vld [vmem:[%s14123_s11 + $0x2060] sm:$0xff] }
 0x298   : > { %v14784_v55 = vcombine.high %v14708_v8, %v14708_v8 }
 0x29a   : > { %7347 = vmatpush1.bf16.msra.mxu0 %v12360_v14  ;;  %7716 = vmatpush1.bf16.msra.mxu1 %v12362_v15  ;;  %v1350_v14 = vld [vmem:[%s14123_s11 + $0x1f68] sm:$0xff]  ;;  %v12408_v15 = vcombine.low %v1337_v61, %v1341_v63  ;;  %v12449_v61 = vcombine.high %v1377_v50, %v1381_v53 }
 0x29b   : > { %7348 = vmatprep.subr.bf16.mxu0 %v12369_v16  ;;  %7717 = vmatprep.subr.bf16.mxu1 %v12371_v2  ;;  %v12410_v16 = vcombine.low %v1338_v12, %v1342_v3  ;;  %v12417_v2 = vcombine.high %v1345_v9, %v1349_v11  ;;  %v12419_v18 = vcombine.high %v1346_v13, %v1350_v14  ;;  %v1385_v12 = vld [vmem:[%s14123_s11 + $0x2080] sm:$0xff] }
 0x29c   : > { %v1389_v3 = vld [vmem:[%s14123_s11 + $0x20a0] sm:$0xff] }
 0x29e   : > { %7349 = vmatpush1.bf16.msra.mxu0 %v12368_v23  ;;  %7718 = vmatpush1.bf16.msra.mxu1 %v12370_v25  ;;  %v1358_v23 = vld [vmem:[%s14123_s11 + $0x1fa8] sm:$0xff]  ;;  %v12416_v25 = vcombine.low %v1345_v9, %v1349_v11  ;;  %v12457_v9 = vcombine.high %v1385_v12, %v1389_v3 }
 0x29f   : > { %7350 = vmatprep.subr.bf16.mxu0 %v12377_v26  ;;  %7719 = vmatprep.subr.bf16.mxu1 %v12379_v27  ;;  %v12418_v26 = vcombine.low %v1346_v13, %v1350_v14  ;;  %v12425_v27 = vcombine.high %v1353_v17, %v1357_v20  ;;  %v12427_v29 = vcombine.high %v1354_v21, %v1358_v23  ;;  %v1393_v13 = vld [vmem:[%s14123_s11 + $0x20c0] sm:$0xff] }
 0x2a0   : > { %v1397_v14 = vld [vmem:[%s14123_s11 + $0x20e0] sm:$0xff] }
 0x2a2   : > { %7351 = vmatpush1.bf16.msra.mxu0 %v12376_v34  ;;  %7720 = vmatpush1.bf16.msra.mxu1 %v12378_v35  ;;  %v1366_v34 = vld [vmem:[%s14123_s11 + $0x1fe8] sm:$0xff]  ;;  %v12424_v35 = vcombine.low %v1353_v17, %v1357_v20  ;;  %v12465_v20 = vcombine.high %v1393_v13, %v1397_v14 }
 0x2a3   : > { %7352 = vmatprep.subr.bf16.mxu0 %v12385_v36  ;;  %7721 = vmatprep.subr.bf16.mxu1 %v12387_v37  ;;  %v12426_v36 = vcombine.low %v1354_v21, %v1358_v23  ;;  %v12433_v37 = vcombine.high %v1361_v31, %v1365_v60  ;;  %v12435_v39 = vcombine.high %v1362_v33, %v1366_v34  ;;  %v1401_v23 = vld [vmem:[%s14123_s11 + $0x2100] sm:$0xff] }
 0x2a6   : > { %7353 = vmatpush1.bf16.msra.mxu0 %v12384_v45  ;;  %7722 = vmatpush1.bf16.msra.mxu1 %v12386_v46  ;;  %v1374_v45 = vld [vmem:[%s14123_s11 + $0x2028] sm:$0xff]  ;;  %v12432_v46 = vcombine.low %v1361_v31, %v1365_v60 }
 0x2a7   : > { %7354 = vmatprep.subr.bf16.mxu0 %v12393_v47  ;;  %7723 = vmatprep.subr.bf16.mxu1 %v12395_v48  ;;  %v12434_v47 = vcombine.low %v1362_v33, %v1366_v34  ;;  %v12441_v48 = vcombine.high %v1369_v40, %v1373_v42  ;;  %v12443_v49 = vcombine.high %v1370_v43, %v1374_v45  ;;  %v1409_v34 = vld [vmem:[%s14123_s11 + $0x2140] sm:$0xff] }
 0x2aa   : > { %7355 = vmatpush1.bf16.msra.mxu0 %v12392_v56  ;;  %7724 = vmatpush1.bf16.msra.mxu1 %v12394_v57  ;;  %v1378_v56 = vld [vmem:[%s14123_s11 + $0x2048] sm:$0xff] }
 0x2ab   : > { %7356 = vmatprep.subr.bf16.mxu0 %v12401_v58  ;;  %7725 = vmatprep.subr.bf16.mxu1 %v12403_v59  ;;  %v1382_v57 = vld [vmem:[%s14123_s11 + $0x2068] sm:$0xff]  ;;  %v12440_v58 = vcombine.low %v1369_v40, %v1373_v42  ;;  %v12442_v59 = vcombine.low %v1370_v43, %v1374_v45  ;;  %v1417_v45 = vld [vmem:[%s14123_s11 + $0x2180] sm:$0xff] }
 0x2ac   : > { %v12451_v63 = vcombine.high %v1378_v56, %v1382_v57 }
 0x2ae   : > { %7357 = vmatpush1.bf16.msra.mxu0 %v12400_v4  ;;  %7726 = vmatpush1.bf16.msra.mxu1 %v12402_v5  ;;  %v1386_v4 = vld [vmem:[%s14123_s11 + $0x2088] sm:$0xff] }
 0x2af   : > { %7358 = vmatprep.subr.bf16.mxu0 %v12409_v6  ;;  %7727 = vmatprep.subr.bf16.mxu1 %v12411_v7  ;;  %v1390_v5 = vld [vmem:[%s14123_s11 + $0x20a8] sm:$0xff]  ;;  %v12448_v6 = vcombine.low %v1377_v50, %v1381_v53  ;;  %v12450_v7 = vcombine.low %v1378_v56, %v1382_v57  ;;  %v1425_v57 = vld [vmem:[%s14123_s11 + $0x21c0] sm:$0xff] }
 0x2b0   : > { %v12459_v11 = vcombine.high %v1386_v4, %v1390_v5  ;;  %v12458_v17 = vcombine.low %v1386_v4, %v1390_v5  ;;  %v347_v5 = vld [vmem:[%s14123_s11 + $0x10] sm:$0xff] }
 0x2b2   : > { %7359 = vmatpush1.bf16.msra.mxu0 %v12408_v15  ;;  %7728 = vmatpush1.bf16.msra.mxu1 %v12410_v16  ;;  %v13874_v15 = vmov 0   ;;  %v1394_v16 = vld [vmem:[%s14123_s11 + $0x20c8] sm:$0xff] }
 0x2b3   : > { %7360 = vmatprep.subr.bf16.mxu0 %v12417_v2  ;;  %7729 = vmatprep.subr.bf16.mxu1 %v12419_v18  ;;  %v1398_v2 = vld [vmem:[%s14123_s11 + $0x20e8] sm:$0xff]  ;;  %v12456_v18 = vcombine.low %v1385_v12, %v1389_v3 }
 0x2b4   : > { %v12467_v21 = vcombine.high %v1394_v16, %v1398_v2  ;;  %v12466_v31 = vcombine.low %v1394_v16, %v1398_v2 }
 0x2b6   : > { %7361 = vmatpush1.bf16.msra.mxu0 %v12416_v25  ;;  %7730 = vmatpush1.bf16.msra.mxu1 %v12418_v26  ;;  %v1405_v25 = vld [vmem:[%s14123_s11 + $0x2120] sm:$0xff]  ;;  %v1402_v26 = vld [vmem:[%s14123_s11 + $0x2108] sm:$0xff] }
 0x2b7   : > { %7362 = vmatprep.subr.bf16.mxu0 %v12425_v27  ;;  %7731 = vmatprep.subr.bf16.mxu1 %v12427_v29  ;;  %v1406_v27 = vld [vmem:[%s14123_s11 + $0x2128] sm:$0xff]  ;;  %v12464_v29 = vcombine.low %v1393_v13, %v1397_v14  ;;  %v12473_v60 = vcombine.high %v1401_v23, %v1405_v25  ;;  %v11415_v13 = vld.sshfl [vmem:[#allocation3 + $0x10] sm:$0x1 pattern:$0x75316420] }
 0x2b8   : > { %v12475_v33 = vcombine.high %v1402_v26, %v1406_v27  ;;  %v12474_v40 = vcombine.low %v1402_v26, %v1406_v27 }
 0x2ba   : > { %7363 = vmatpush1.bf16.msra.mxu0 %v12424_v35  ;;  %7732 = vmatpush1.bf16.msra.mxu1 %v12426_v36  ;;  %v1413_v35 = vld [vmem:[%s14123_s11 + $0x2160] sm:$0xff]  ;;  %v1410_v36 = vld [vmem:[%s14123_s11 + $0x2148] sm:$0xff] }
 0x2bb   : > { %7364 = vmatprep.subr.bf16.mxu0 %v12433_v37  ;;  %7733 = vmatprep.subr.bf16.mxu1 %v12435_v39  ;;  %v1414_v37 = vld [vmem:[%s14123_s11 + $0x2168] sm:$0xff]  ;;  %v12472_v39 = vcombine.low %v1401_v23, %v1405_v25  ;;  %v12481_v42 = vcombine.high %v1409_v34, %v1413_v35  ;;  %v360_v23 = vld [vmem:[%s14123_s11 + $0x78] sm:$0xff] }
 0x2bc   : > { %v12483_v43 = vcombine.high %v1410_v36, %v1414_v37  ;;  %v12482_v50 = vcombine.low %v1410_v36, %v1414_v37 }
 0x2be   : > { %7365 = vmatpush1.bf16.msra.mxu0 %v12432_v46  ;;  %7734 = vmatpush1.bf16.msra.mxu1 %v12434_v47  ;;  %v1421_v46 = vld [vmem:[%s14123_s11 + $0x21a0] sm:$0xff]  ;;  %v1418_v47 = vld [vmem:[%s14123_s11 + $0x2188] sm:$0xff] }
 0x2bf   : > { %7375 = vmatprep.subr.bf16.mxu0 %v12441_v48  ;;  %7744 = vmatprep.subr.bf16.mxu1 %v12443_v49  ;;  %v1422_v48 = vld [vmem:[%s14123_s11 + $0x21a8] sm:$0xff]  ;;  %v12480_v49 = vcombine.low %v1409_v34, %v1413_v35  ;;  %v12489_v53 = vcombine.high %v1417_v45, %v1421_v46 }
 0x2c0   : > { %v12491_v56 = vcombine.high %v1418_v47, %v1422_v48  ;;  %v12490_v12 = vcombine.low %v1418_v47, %v1422_v48 }
 0x2c1   : > { %7367 = vmatmul.mubr.bf16.vlgmr.msra.gmra.mrb[0].mxu0 %v14784_v55  ;;  %7736 = vmatmul.mubr.bf16.vlgmr.msra.gmra.mrb[0].mxu1 %v14784_v55 }
 0x2c2   : > { %7376 = vmatpush1.bf16.msra.mxu0 %v12440_v58  ;;  %7745 = vmatpush1.bf16.msra.mxu1 %v12442_v59  ;;  %v1429_v58 = vld [vmem:[%s14123_s11 + $0x21e0] sm:$0xff]  ;;  %v1426_v59 = vld [vmem:[%s14123_s11 + $0x21c8] sm:$0xff] }
 0x2c3   : > { %7377 = vmatprep.subr.bf16.mxu0 %v12449_v61  ;;  %7746 = vmatprep.subr.bf16.mxu1 %v12451_v63  ;;  %v1430_v61 = vld [vmem:[%s14123_s11 + $0x21e8] sm:$0xff]  ;;  %v12488_v63 = vcombine.low %v1417_v45, %v1421_v46  ;;  %v12497_v3 = vcombine.high %v1425_v57, %v1429_v58 }
 0x2c4   : > { %7407 = vmatprep.mubr.bf16.mxu0 %v13874_v15  ;;  %7776 = vmatprep.mubr.bf16.mxu1 %v13874_v15  ;;  %v12499_v4 = vcombine.high %v1426_v59, %v1430_v61  ;;  %v12498_v14 = vcombine.low %v1426_v59, %v1430_v61  ;;  %v387_v61 = vld [vmem:[%s14123_s11 + $0x150] sm:$0xff] }
 0x2c6   : > { %7378 = vmatpush1.bf16.msra.mxu0 %v12448_v6  ;;  %7747 = vmatpush1.bf16.msra.mxu1 %v12450_v7  ;;  %v351_v6 = vld [vmem:[%s14123_s11 + $0x30] sm:$0xff]  ;;  %v348_v7 = vld [vmem:[%s14123_s11 + $0x18] sm:$0xff] }
 0x2c7   : > { %7379 = vmatprep.subr.bf16.mxu0 %v12457_v9  ;;  %7748 = vmatprep.subr.bf16.mxu1 %v12459_v11  ;;  %v352_v9 = vld [vmem:[%s14123_s11 + $0x38] sm:$0xff]  ;;  %v12496_v11 = vcombine.low %v1425_v57, %v1429_v58  ;;  %v11421_v16 = vcombine.high %v347_v5, %v351_v6  ;;  %v11420_v25 = vcombine.low %v347_v5, %v351_v6 }
 0x2c8   : > { %v11423_v2 = vcombine.high %v348_v7, %v352_v9  ;;  %v11422_v26 = vcombine.low %v348_v7, %v352_v9  ;;  %v395_v9 = vld [vmem:[%s14123_s11 + $0x190] sm:$0xff] }
 0x2ca   : > { %7380 = vmatpush1.bf16.msra.mxu0 %v12456_v18  ;;  %7749 = vmatpush1.bf16.msra.mxu1 %v12458_v17  ;;  %v355_v18 = vld [vmem:[%s14123_s11 + $0x50] sm:$0xff] }
 0x2cb   : > { %7381 = vmatprep.subr.bf16.mxu0 %v12465_v20  ;;  %7750 = vmatprep.subr.bf16.mxu1 %v12467_v21  ;;  %v359_v17 = vld [vmem:[%s14123_s11 + $0x70] sm:$0xff]  ;;  %v14823_v20 = vrot.slane %v11415_v13, %v14172_v54  ;;  %v356_v21 = vld [vmem:[%s14123_s11 + $0x58] sm:$0xff] }
 0x2cc   : > { %v11429_v27 = vcombine.high %v355_v18, %v359_v17  ;;  %v364_v54 = vld [vmem:[%s14123_s11 + $0x98] sm:$0xff]  ;;  %v11428_v34 = vcombine.low %v355_v18, %v359_v17  ;;  %v11430_v35 = vcombine.low %v356_v21, %v360_v23 }
 0x2cd   : > { %v396_v13 = vld [vmem:[%s14123_s11 + $0x198] sm:$0xff] }
 0x2ce   : > { %7382 = vmatpush1.bf16.msra.mxu0 %v12464_v29  ;;  %7751 = vmatpush1.bf16.msra.mxu1 %v12466_v31  ;;  %v11431_v29 = vcombine.high %v356_v21, %v360_v23  ;;  %v363_v31 = vld [vmem:[%s14123_s11 + $0x90] sm:$0xff] }
 0x2cf   : > { %7383 = vmatprep.subr.bf16.mxu0 %v12473_v60  ;;  %7752 = vmatprep.subr.bf16.mxu1 %v12475_v33  ;;  %v367_v60 = vld [vmem:[%s14123_s11 + $0xb0] sm:$0xff]  ;;  %v368_v33 = vld [vmem:[%s14123_s11 + $0xb8] sm:$0xff] }
 0x2d0   : > { %v11437_v36 = vcombine.high %v363_v31, %v367_v60  ;;  %v11439_v37 = vcombine.high %v364_v54, %v368_v33  ;;  %v11436_v45 = vcombine.low %v363_v31, %v367_v60  ;;  %v11438_v46 = vcombine.low %v364_v54, %v368_v33  ;;  %v403_v21 = vld [vmem:[%s14123_s11 + $0x1d0] sm:$0xff] }
 0x2d1   : > { %v407_v23 = vld [vmem:[%s14123_s11 + $0x1f0] sm:$0xff] }
 0x2d2   : > { %7384 = vmatpush1.bf16.msra.mxu0 %v12472_v39  ;;  %7753 = vmatpush1.bf16.msra.mxu1 %v12474_v40  ;;  %v371_v39 = vld [vmem:[%s14123_s11 + $0xd0] sm:$0xff]  ;;  %v11477_v31 = vcombine.high %v403_v21, %v407_v23 }
 0x2d3   : > { %7385 = vmatprep.subr.bf16.mxu0 %v12481_v42  ;;  %7754 = vmatprep.subr.bf16.mxu1 %v12483_v43  ;;  %v375_v40 = vld [vmem:[%s14123_s11 + $0xf0] sm:$0xff]  ;;  %v372_v42 = vld [vmem:[%s14123_s11 + $0xd8] sm:$0xff] }
 0x2d4   : > { %v376_v43 = vld [vmem:[%s14123_s11 + $0xf8] sm:$0xff]  ;;  %v11445_v47 = vcombine.high %v371_v39, %v375_v40  ;;  %v11444_v57 = vcombine.low %v371_v39, %v375_v40  ;;  %v411_v54 = vld [vmem:[%s14123_s11 + $0x210] sm:$0xff] }
 0x2d5   : > { %v11447_v48 = vcombine.high %v372_v42, %v376_v43  ;;  %v415_v33 = vld [vmem:[%s14123_s11 + $0x230] sm:$0xff] }
 0x2d6   : > { %7386 = vmatpush1.bf16.msra.mxu0 %v12480_v49  ;;  %7755 = vmatpush1.bf16.msra.mxu1 %v12482_v50  ;;  %v379_v49 = vld [vmem:[%s14123_s11 + $0x110] sm:$0xff]  ;;  %v11485_v39 = vcombine.high %v411_v54, %v415_v33 }
 0x2d7   : > { %7387 = vmatprep.subr.bf16.mxu0 %v12489_v53  ;;  %7756 = vmatprep.subr.bf16.mxu1 %v12491_v56  ;;  %v383_v50 = vld [vmem:[%s14123_s11 + $0x130] sm:$0xff]  ;;  %v380_v53 = vld [vmem:[%s14123_s11 + $0x118] sm:$0xff] }
 0x2d8   : > { %v384_v56 = vld [vmem:[%s14123_s11 + $0x138] sm:$0xff]  ;;  %v11453_v58 = vcombine.high %v379_v49, %v383_v50 }
 0x2d9   : > { %v11455_v59 = vcombine.high %v380_v53, %v384_v56  ;;  %v11454_v5 = vcombine.low %v380_v53, %v384_v56  ;;  %v427_v53 = vld [vmem:[%s14123_s11 + $0x290] sm:$0xff] }
 0x2da   : > { %7388 = vmatpush1.bf16.msra.mxu0 %v12488_v63  ;;  %7757 = vmatpush1.bf16.msra.mxu1 %v12490_v12  ;;  %v391_v63 = vld [vmem:[%s14123_s11 + $0x170] sm:$0xff]  ;;  %v388_v12 = vld [vmem:[%s14123_s11 + $0x158] sm:$0xff] }
 0x2db   : > { %7389 = vmatprep.subr.bf16.mxu0 %v12497_v3  ;;  %7758 = vmatprep.subr.bf16.mxu1 %v12499_v4  ;;  %v392_v3 = vld [vmem:[%s14123_s11 + $0x178] sm:$0xff]  ;;  %v11452_v4 = vcombine.low %v379_v49, %v383_v50  ;;  %v11461_v6 = vcombine.high %v387_v61, %v391_v63  ;;  %v431_v56 = vld [vmem:[%s14123_s11 + $0x2b0] sm:$0xff] }
 0x2dc   : > { %v11463_v7 = vcombine.high %v388_v12, %v392_v3 }
 0x2de   : > { %7390 = vmatpush1.bf16.msra.mxu0 %v12496_v11  ;;  %7759 = vmatpush1.bf16.msra.mxu1 %v12498_v14  ;;  %v399_v11 = vld [vmem:[%s14123_s11 + $0x1b0] sm:$0xff]  ;;  %v400_v14 = vld [vmem:[%s14123_s11 + $0x1b8] sm:$0xff] }
 0x2df   : > { %7785 = vmatprep.subr.bf16.mxu0 %v11421_v16  ;;  %8154 = vmatprep.subr.bf16.mxu1 %v11423_v2  ;;  %v11460_v16 = vcombine.low %v387_v61, %v391_v63  ;;  %v11462_v2 = vcombine.low %v388_v12, %v392_v3  ;;  %v11469_v18 = vcombine.high %v395_v9, %v399_v11  ;;  %v435_v12 = vld [vmem:[%s14123_s11 + $0x2d0] sm:$0xff] }
 0x2e0   : > { %v11471_v17 = vcombine.high %v396_v13, %v400_v14  ;;  %v11501_v61 = vcombine.high %v427_v53, %v431_v56  ;;  %v439_v3 = vld [vmem:[%s14123_s11 + $0x2f0] sm:$0xff] }
 0x2e1   : > { %7408 = vmatmul.mubr.bf16.vlgmr.msra.gmra.mrb[0].mxu0 %v14823_v20  ;;  %7777 = vmatmul.mubr.bf16.vlgmr.msra.gmra.mrb[0].mxu1 %v14823_v20 }
 0x2e2   : > { %7786 = vmatpush1.bf16.msra.mxu0 %v11420_v25  ;;  %8155 = vmatpush1.bf16.msra.mxu1 %v11422_v26  ;;  %v404_v25 = vld [vmem:[%s14123_s11 + $0x1d8] sm:$0xff] }
 0x2e3   : > { %7787 = vmatprep.subr.bf16.mxu0 %v11429_v27  ;;  %8156 = vmatprep.subr.bf16.mxu1 %v11431_v29  ;;  %v408_v26 = vld [vmem:[%s14123_s11 + $0x1f8] sm:$0xff]  ;;  %v11468_v27 = vcombine.low %v395_v9, %v399_v11  ;;  %v11470_v29 = vcombine.low %v396_v13, %v400_v14  ;;  %v11509_v9 = vcombine.high %v435_v12, %v439_v3  ;;  %v443_v13 = vld [vmem:[%s14123_s11 + $0x310] sm:$0xff] }
 0x2e4   : > { %7817 = vmatprep.mubr.bf16.mxu0 %v14191_v10  ;;  %8186 = vmatprep.mubr.bf16.mxu1 %v14191_v10  ;;  %v11446_v10 = vcombine.low %v372_v42, %v376_v43  ;;  %v11479_v60 = vcombine.high %v404_v25, %v408_v26  ;;  %v419_v42 = vld [vmem:[%s14123_s11 + $0x250] sm:$0xff] }
 0x2e5   : > { %v423_v43 = vld [vmem:[%s14123_s11 + $0x270] sm:$0xff] }
 0x2e6   : > { %7788 = vmatpush1.bf16.msra.mxu0 %v11428_v34  ;;  %8157 = vmatpush1.bf16.msra.mxu1 %v11430_v35  ;;  %v412_v34 = vld [vmem:[%s14123_s11 + $0x218] sm:$0xff]  ;;  %v11493_v49 = vcombine.high %v419_v42, %v423_v43  ;;  %v447_v14 = vld [vmem:[%s14123_s11 + $0x330] sm:$0xff] }
 0x2e7   : > { %7789 = vmatprep.subr.bf16.mxu0 %v11437_v36  ;;  %8158 = vmatprep.subr.bf16.mxu1 %v11439_v37  ;;  %v416_v35 = vld [vmem:[%s14123_s11 + $0x238] sm:$0xff]  ;;  %v11476_v36 = vcombine.low %v403_v21, %v407_v23  ;;  %v11478_v37 = vcombine.low %v404_v25, %v408_v26  ;;  %v11517_v21 = vcombine.high %v443_v13, %v447_v14  ;;  %v451_v25 = vld [vmem:[%s14123_s11 + $0x350] sm:$0xff] }
 0x2e8   : > { %v11487_v40 = vcombine.high %v412_v34, %v416_v35  ;;  %v455_v26 = vld [vmem:[%s14123_s11 + $0x370] sm:$0xff] }
 0x2ea   : > { %7790 = vmatpush1.bf16.msra.mxu0 %v11436_v45  ;;  %8159 = vmatpush1.bf16.msra.mxu1 %v11438_v46  ;;  %v420_v45 = vld [vmem:[%s14123_s11 + $0x258] sm:$0xff] }
 0x2eb   : > { %7791 = vmatprep.subr.bf16.mxu0 %v11445_v47  ;;  %8160 = vmatprep.subr.bf16.mxu1 %v11447_v48  ;;  %v424_v46 = vld [vmem:[%s14123_s11 + $0x278] sm:$0xff]  ;;  %v11484_v47 = vcombine.low %v411_v54, %v415_v33  ;;  %v11486_v48 = vcombine.low %v412_v34, %v416_v35  ;;  %v11525_v54 = vcombine.high %v451_v25, %v455_v26  ;;  %v459_v34 = vld [vmem:[%s14123_s11 + $0x390] sm:$0xff] }
 0x2ec   : > { %v11495_v50 = vcombine.high %v420_v45, %v424_v46  ;;  %v463_v35 = vld [vmem:[%s14123_s11 + $0x3b0] sm:$0xff] }
 0x2ee   : > { %7792 = vmatpush1.bf16.msra.mxu0 %v11444_v57  ;;  %8161 = vmatpush1.bf16.msra.mxu1 %v11446_v10  ;;  %v428_v57 = vld [vmem:[%s14123_s11 + $0x298] sm:$0xff] }
 0x2ef   : > { %7793 = vmatprep.subr.bf16.mxu0 %v11453_v58  ;;  %8162 = vmatprep.subr.bf16.mxu1 %v11455_v59  ;;  %v432_v10 = vld [vmem:[%s14123_s11 + $0x2b8] sm:$0xff]  ;;  %v11492_v58 = vcombine.low %v419_v42, %v423_v43  ;;  %v11494_v59 = vcombine.low %v420_v45, %v424_v46  ;;  %v11533_v42 = vcombine.high %v459_v34, %v463_v35  ;;  %v467_v45 = vld [vmem:[%s14123_s11 + $0x3d0] sm:$0xff] }
 0x2f0   : > { %v11503_v63 = vcombine.high %v428_v57, %v432_v10  ;;  %v471_v46 = vld [vmem:[%s14123_s11 + $0x3f0] sm:$0xff] }
 0x2f2   : > { %7794 = vmatpush1.bf16.msra.mxu0 %v11452_v4  ;;  %8163 = vmatpush1.bf16.msra.mxu1 %v11454_v5  ;;  %v436_v4 = vld [vmem:[%s14123_s11 + $0x2d8] sm:$0xff] }
 0x2f3   : > { %7795 = vmatprep.subr.bf16.mxu0 %v11461_v6  ;;  %8164 = vmatprep.subr.bf16.mxu1 %v11463_v7  ;;  %v440_v5 = vld [vmem:[%s14123_s11 + $0x2f8] sm:$0xff]  ;;  %v11500_v6 = vcombine.low %v427_v53, %v431_v56  ;;  %v11502_v7 = vcombine.low %v428_v57, %v432_v10  ;;  %v11541_v53 = vcombine.high %v467_v45, %v471_v46  ;;  %v475_v57 = vld [vmem:[%s14123_s11 + $0x410] sm:$0xff] }
 0x2f4   : > { %v11511_v11 = vcombine.high %v436_v4, %v440_v5  ;;  %v479_v10 = vld [vmem:[%s14123_s11 + $0x430] sm:$0xff] }
 0x2f6   : > { %7796 = vmatpush1.bf16.msra.mxu0 %v11460_v16  ;;  %8165 = vmatpush1.bf16.msra.mxu1 %v11462_v2  ;;  %v444_v16 = vld [vmem:[%s14123_s11 + $0x318] sm:$0xff] }
 0x2f7   : > { %7797 = vmatprep.subr.bf16.mxu0 %v11469_v18  ;;  %8166 = vmatprep.subr.bf16.mxu1 %v11471_v17  ;;  %v448_v2 = vld [vmem:[%s14123_s11 + $0x338] sm:$0xff]  ;;  %v11508_v18 = vcombine.low %v435_v12, %v439_v3  ;;  %v11510_v17 = vcombine.low %v436_v4, %v440_v5  ;;  %v11549_v12 = vcombine.high %v475_v57, %v479_v10  ;;  %v483_v4 = vld [vmem:[%s14123_s11 + $0x450] sm:$0xff] }
 0x2f8   : > { %v11519_v23 = vcombine.high %v444_v16, %v448_v2  ;;  %v487_v5 = vld [vmem:[%s14123_s11 + $0x470] sm:$0xff] }
 0x2fa   : > { %7798 = vmatpush1.bf16.msra.mxu0 %v11468_v27  ;;  %8167 = vmatpush1.bf16.msra.mxu1 %v11470_v29  ;;  %v452_v27 = vld [vmem:[%s14123_s11 + $0x358] sm:$0xff] }
 0x2fb   : > { %7799 = vmatprep.subr.bf16.mxu0 %v11477_v31  ;;  %8168 = vmatprep.subr.bf16.mxu1 %v11479_v60  ;;  %v456_v29 = vld [vmem:[%s14123_s11 + $0x378] sm:$0xff]  ;;  %v11516_v31 = vcombine.low %v443_v13, %v447_v14  ;;  %v11518_v60 = vcombine.low %v444_v16, %v448_v2  ;;  %v11557_v13 = vcombine.high %v483_v4, %v487_v5  ;;  %v491_v16 = vld [vmem:[%s14123_s11 + $0x490] sm:$0xff] }
 0x2fc   : > { %v11527_v33 = vcombine.high %v452_v27, %v456_v29  ;;  %v495_v2 = vld [vmem:[%s14123_s11 + $0x4b0] sm:$0xff] }
 0x2fe   : > { %7800 = vmatpush1.bf16.msra.mxu0 %v11476_v36  ;;  %8169 = vmatpush1.bf16.msra.mxu1 %v11478_v37  ;;  %v460_v36 = vld [vmem:[%s14123_s11 + $0x398] sm:$0xff] }
 0x2ff   : > { %7801 = vmatprep.subr.bf16.mxu0 %v11485_v39  ;;  %8170 = vmatprep.subr.bf16.mxu1 %v11487_v40  ;;  %v464_v37 = vld [vmem:[%s14123_s11 + $0x3b8] sm:$0xff]  ;;  %v11524_v39 = vcombine.low %v451_v25, %v455_v26  ;;  %v11526_v40 = vcombine.low %v452_v27, %v456_v29  ;;  %v11565_v25 = vcombine.high %v491_v16, %v495_v2  ;;  %v499_v27 = vld [vmem:[%s14123_s11 + $0x4d0] sm:$0xff] }
 0x300   : > { %v11535_v43 = vcombine.high %v460_v36, %v464_v37  ;;  %v503_v29 = vld [vmem:[%s14123_s11 + $0x4f0] sm:$0xff] }
 0x302   : > { %7802 = vmatpush1.bf16.msra.mxu0 %v11484_v47  ;;  %8171 = vmatpush1.bf16.msra.mxu1 %v11486_v48  ;;  %v468_v47 = vld [vmem:[%s14123_s11 + $0x3d8] sm:$0xff] }
 0x303   : > { %7803 = vmatprep.subr.bf16.mxu0 %v11493_v49  ;;  %8172 = vmatprep.subr.bf16.mxu1 %v11495_v50  ;;  %v472_v48 = vld [vmem:[%s14123_s11 + $0x3f8] sm:$0xff]  ;;  %v11532_v49 = vcombine.low %v459_v34, %v463_v35  ;;  %v11534_v50 = vcombine.low %v460_v36, %v464_v37  ;;  %v507_v35 = vld [vmem:[%s14123_s11 + $0x510] sm:$0xff] }
 0x304   : > { %v11543_v56 = vcombine.high %v468_v47, %v472_v48  ;;  %v511_v36 = vld [vmem:[%s14123_s11 + $0x530] sm:$0xff]  ;;  %v508_v37 = vld [vmem:[%s14123_s11 + $0x518] sm:$0xff] }
 0x306   : > { %7804 = vmatpush1.bf16.msra.mxu0 %v11492_v58  ;;  %8173 = vmatpush1.bf16.msra.mxu1 %v11494_v59  ;;  %v476_v58 = vld [vmem:[%s14123_s11 + $0x418] sm:$0xff] }
 0x307   : > { %7805 = vmatprep.subr.bf16.mxu0 %v11501_v61  ;;  %8174 = vmatprep.subr.bf16.mxu1 %v11503_v63  ;;  %v480_v59 = vld [vmem:[%s14123_s11 + $0x438] sm:$0xff]  ;;  %v11540_v61 = vcombine.low %v467_v45, %v471_v46  ;;  %v11542_v63 = vcombine.low %v468_v47, %v472_v48  ;;  %v515_v45 = vld [vmem:[%s14123_s11 + $0x550] sm:$0xff] }
 0x308   : > { %v11551_v3 = vcombine.high %v476_v58, %v480_v59  ;;  %v519_v46 = vld [vmem:[%s14123_s11 + $0x570] sm:$0xff]  ;;  %v516_v47 = vld [vmem:[%s14123_s11 + $0x558] sm:$0xff] }
 0x309   : > { %v520_v48 = vld [vmem:[%s14123_s11 + $0x578] sm:$0xff] }
 0x30a   : > { %7806 = vmatpush1.bf16.msra.mxu0 %v11500_v6  ;;  %8175 = vmatpush1.bf16.msra.mxu1 %v11502_v7  ;;  %v484_v6 = vld [vmem:[%s14123_s11 + $0x458] sm:$0xff] }
 0x30b   : > { %7807 = vmatprep.subr.bf16.mxu0 %v11509_v9  ;;  %8176 = vmatprep.subr.bf16.mxu1 %v11511_v11  ;;  %v488_v7 = vld [vmem:[%s14123_s11 + $0x478] sm:$0xff]  ;;  %v11548_v9 = vcombine.low %v475_v57, %v479_v10  ;;  %v11550_v11 = vcombine.low %v476_v58, %v480_v59  ;;  %v523_v57 = vld [vmem:[%s14123_s11 + $0x590] sm:$0xff] }
 0x30c   : > { %v11559_v14 = vcombine.high %v484_v6, %v488_v7  ;;  %v527_v10 = vld [vmem:[%s14123_s11 + $0x5b0] sm:$0xff]  ;;  %v524_v58 = vld [vmem:[%s14123_s11 + $0x598] sm:$0xff] }
 0x30d   : > { %v528_v59 = vld [vmem:[%s14123_s11 + $0x5b8] sm:$0xff] }
 0x30e   : > { %7808 = vmatpush1.bf16.msra.mxu0 %v11508_v18  ;;  %8177 = vmatpush1.bf16.msra.mxu1 %v11510_v17  ;;  %v492_v18 = vld [vmem:[%s14123_s11 + $0x498] sm:$0xff] }
 0x30f   : > { %7809 = vmatprep.subr.bf16.mxu0 %v11517_v21  ;;  %8178 = vmatprep.subr.bf16.mxu1 %v11519_v23  ;;  %v496_v17 = vld [vmem:[%s14123_s11 + $0x4b8] sm:$0xff]  ;;  %v11556_v21 = vcombine.low %v483_v4, %v487_v5  ;;  %v11558_v23 = vcombine.low %v484_v6, %v488_v7  ;;  %v531_v4 = vld [vmem:[%s14123_s11 + $0x5d0] sm:$0xff] }
 0x310   : > { %v11567_v26 = vcombine.high %v492_v18, %v496_v17  ;;  %v535_v5 = vld [vmem:[%s14123_s11 + $0x5f0] sm:$0xff]  ;;  %v532_v6 = vld [vmem:[%s14123_s11 + $0x5d8] sm:$0xff] }
 0x311   : > { %v536_v7 = vld [vmem:[%s14123_s11 + $0x5f8] sm:$0xff] }
 0x312   : > { %7810 = vmatpush1.bf16.msra.mxu0 %v11516_v31  ;;  %8179 = vmatpush1.bf16.msra.mxu1 %v11518_v60  ;;  %v500_v31 = vld [vmem:[%s14123_s11 + $0x4d8] sm:$0xff] }
 0x313   : > { %7811 = vmatprep.subr.bf16.mxu0 %v11525_v54  ;;  %8180 = vmatprep.subr.bf16.mxu1 %v11527_v33  ;;  %v504_v60 = vld [vmem:[%s14123_s11 + $0x4f8] sm:$0xff]  ;;  %v11566_v54 = vcombine.low %v492_v18, %v496_v17  ;;  %v11573_v33 = vcombine.high %v499_v27, %v503_v29 }
 0x314   : > { %v11575_v34 = vcombine.high %v500_v31, %v504_v60  ;;  %v540_v18 = vld [vmem:[%s14123_s11 + $0x618] sm:$0xff] }
 0x315   : > { %v544_v17 = vld [vmem:[%s14123_s11 + $0x638] sm:$0xff] }
 0x316   : > { %7812 = vmatpush1.bf16.msra.mxu0 %v11524_v39  ;;  %8181 = vmatpush1.bf16.msra.mxu1 %v11526_v40  ;;  %v512_v39 = vld [vmem:[%s14123_s11 + $0x538] sm:$0xff]  ;;  %v11572_v40 = vcombine.low %v499_v27, %v503_v29  ;;  %v547_v27 = vld [vmem:[%s14123_s11 + $0x650] sm:$0xff] }
 0x317   : > { %7813 = vmatprep.subr.bf16.mxu0 %v11533_v42  ;;  %8182 = vmatprep.subr.bf16.mxu1 %v11535_v43  ;;  %v11581_v42 = vcombine.high %v507_v35, %v511_v36  ;;  %v11583_v43 = vcombine.high %v508_v37, %v512_v39  ;;  %v551_v29 = vld [vmem:[%s14123_s11 + $0x670] sm:$0xff] }
 0x31a   : > { %7814 = vmatpush1.bf16.msra.mxu0 %v11532_v49  ;;  %8183 = vmatpush1.bf16.msra.mxu1 %v11534_v50  ;;  %v11580_v49 = vcombine.low %v507_v35, %v511_v36  ;;  %v11582_v50 = vcombine.low %v508_v37, %v512_v39  ;;  %v555_v35 = vld [vmem:[%s14123_s11 + $0x690] sm:$0xff]  ;;  %v556_v37 = vld [vmem:[%s14123_s11 + $0x698] sm:$0xff] }
 0x31b   : > { %7815 = vmatprep.subr.bf16.mxu0 %v11541_v53  ;;  %8184 = vmatprep.subr.bf16.mxu1 %v11543_v56  ;;  %v11589_v53 = vcombine.high %v515_v45, %v519_v46  ;;  %v11591_v56 = vcombine.high %v516_v47, %v520_v48  ;;  %v559_v36 = vld [vmem:[%s14123_s11 + $0x6b0] sm:$0xff]  ;;  %v560_v39 = vld [vmem:[%s14123_s11 + $0x6b8] sm:$0xff] }
 0x31e   : > { %7816 = vmatpush1.bf16.msra.mxu0 %v11540_v61  ;;  %8185 = vmatpush1.bf16.msra.mxu1 %v11542_v63  ;;  %v11588_v61 = vcombine.low %v515_v45, %v519_v46  ;;  %v11590_v63 = vcombine.low %v516_v47, %v520_v48  ;;  %v563_v45 = vld [vmem:[%s14123_s11 + $0x6d0] sm:$0xff]  ;;  %v564_v47 = vld [vmem:[%s14123_s11 + $0x6d8] sm:$0xff] }
 0x31f   : > { %7826 = vmatprep.subr.bf16.mxu0 %v11549_v12  ;;  %8195 = vmatprep.subr.bf16.mxu1 %v11551_v3  ;;  %v11597_v12 = vcombine.high %v523_v57, %v527_v10  ;;  %v11599_v3 = vcombine.high %v524_v58, %v528_v59  ;;  %v567_v46 = vld [vmem:[%s14123_s11 + $0x6f0] sm:$0xff]  ;;  %v568_v48 = vld [vmem:[%s14123_s11 + $0x6f8] sm:$0xff] }
 0x321   : > { %7818 = vmatmul.mubr.bf16.vlgmr.msra.gmra.mrb[4].mxu0 %v14233_v24  ;;  %8187 = vmatmul.mubr.bf16.vlgmr.msra.gmra.mrb[4].mxu1 %v14233_v24  ;;  %v11564_v24 = vcombine.low %v491_v16, %v495_v2  ;;  %v539_v16 = vld [vmem:[%s14123_s11 + $0x610] sm:$0xff] }
 0x322   : > { %7827 = vmatpush1.bf16.msra.mxu0 %v11548_v9  ;;  %8196 = vmatpush1.bf16.msra.mxu1 %v11550_v11  ;;  %v11596_v9 = vcombine.low %v523_v57, %v527_v10  ;;  %v11598_v11 = vcombine.low %v524_v58, %v528_v59  ;;  %v543_v2 = vld [vmem:[%s14123_s11 + $0x630] sm:$0xff]  ;;  %v572_v58 = vld [vmem:[%s14123_s11 + $0x718] sm:$0xff] }
 0x323   : > { %7828 = vmatprep.subr.bf16.mxu0 %v11557_v13  ;;  %8197 = vmatprep.subr.bf16.mxu1 %v11559_v14  ;;  %v11605_v13 = vcombine.high %v531_v4, %v535_v5  ;;  %v11607_v14 = vcombine.high %v532_v6, %v536_v7  ;;  %v571_v57 = vld [vmem:[%s14123_s11 + $0x710] sm:$0xff]  ;;  %v576_v59 = vld [vmem:[%s14123_s11 + $0x738] sm:$0xff] }
 0x324   : > { %7858 = vmatprep.mubr.bf16.mxu0 %v14243_v0  ;;  %8227 = vmatprep.mubr.bf16.mxu1 %v14243_v0  ;;  %v11574_v0 = vcombine.low %v500_v31, %v504_v60  ;;  %v548_v31 = vld [vmem:[%s14123_s11 + $0x658] sm:$0xff]  ;;  %v575_v10 = vld [vmem:[%s14123_s11 + $0x730] sm:$0xff] }
 0x325   : > { %v552_v60 = vld [vmem:[%s14123_s11 + $0x678] sm:$0xff] }
 0x326   : > { %7829 = vmatpush1.bf16.msra.mxu0 %v11556_v21  ;;  %8198 = vmatpush1.bf16.msra.mxu1 %v11558_v23  ;;  %v11604_v21 = vcombine.low %v531_v4, %v535_v5  ;;  %v11606_v23 = vcombine.low %v532_v6, %v536_v7  ;;  %v579_v4 = vld [vmem:[%s14123_s11 + $0x750] sm:$0xff]  ;;  %v580_v6 = vld [vmem:[%s14123_s11 + $0x758] sm:$0xff] }
 0x327   : > { %7830 = vmatprep.subr.bf16.mxu0 %v11565_v25  ;;  %8199 = vmatprep.subr.bf16.mxu1 %v11567_v26  ;;  %v11613_v25 = vcombine.high %v539_v16, %v543_v2  ;;  %v11615_v26 = vcombine.high %v540_v18, %v544_v17  ;;  %v583_v5 = vld [vmem:[%s14123_s11 + $0x770] sm:$0xff]  ;;  %v584_v7 = vld [vmem:[%s14123_s11 + $0x778] sm:$0xff] }
 0x32a   : > { %7831 = vmatpush1.bf16.msra.mxu0 %v11564_v24  ;;  %8200 = vmatpush1.bf16.msra.mxu1 %v11566_v54  ;;  %v11612_v24 = vcombine.low %v539_v16, %v543_v2  ;;  %v11614_v54 = vcombine.low %v540_v18, %v544_v17  ;;  %v587_v16 = vld [vmem:[%s14123_s11 + $0x790] sm:$0xff]  ;;  %v588_v18 = vld [vmem:[%s14123_s11 + $0x798] sm:$0xff] }
 0x32b   : > { %7832 = vmatprep.subr.bf16.mxu0 %v11573_v33  ;;  %8201 = vmatprep.subr.bf16.mxu1 %v11575_v34  ;;  %v11621_v33 = vcombine.high %v547_v27, %v551_v29  ;;  %v11623_v34 = vcombine.high %v548_v31, %v552_v60  ;;  %v591_v2 = vld [vmem:[%s14123_s11 + $0x7b0] sm:$0xff]  ;;  %v592_v17 = vld [vmem:[%s14123_s11 + $0x7b8] sm:$0xff] }
 0x32e   : > { %7833 = vmatpush1.bf16.msra.mxu0 %v11572_v40  ;;  %8202 = vmatpush1.bf16.msra.mxu1 %v11574_v0  ;;  %v11620_v40 = vcombine.low %v547_v27, %v551_v29  ;;  %v11622_v0 = vcombine.low %v548_v31, %v552_v60  ;;  %v595_v27 = vld [vmem:[%s14123_s11 + $0x7d0] sm:$0xff]  ;;  %v596_v31 = vld [vmem:[%s14123_s11 + $0x7d8] sm:$0xff] }
 0x32f   : > { %7834 = vmatprep.subr.bf16.mxu0 %v11581_v42  ;;  %8203 = vmatprep.subr.bf16.mxu1 %v11583_v43  ;;  %v11629_v42 = vcombine.high %v555_v35, %v559_v36  ;;  %v11631_v43 = vcombine.high %v556_v37, %v560_v39  ;;  %v599_v29 = vld [vmem:[%s14123_s11 + $0x7f0] sm:$0xff]  ;;  %v600_v60 = vld [vmem:[%s14123_s11 + $0x7f8] sm:$0xff] }
 0x332   : > { %7835 = vmatpush1.bf16.msra.mxu0 %v11580_v49  ;;  %8204 = vmatpush1.bf16.msra.mxu1 %v11582_v50  ;;  %v11628_v49 = vcombine.low %v555_v35, %v559_v36  ;;  %v11630_v50 = vcombine.low %v556_v37, %v560_v39  ;;  %v603_v35 = vld [vmem:[%s14123_s11 + $0x810] sm:$0xff]  ;;  %v604_v37 = vld [vmem:[%s14123_s11 + $0x818] sm:$0xff] }
 0x333   : > { %7836 = vmatprep.subr.bf16.mxu0 %v11589_v53  ;;  %8205 = vmatprep.subr.bf16.mxu1 %v11591_v56  ;;  %v11637_v53 = vcombine.high %v563_v45, %v567_v46  ;;  %v11639_v56 = vcombine.high %v564_v47, %v568_v48  ;;  %v607_v36 = vld [vmem:[%s14123_s11 + $0x830] sm:$0xff]  ;;  %v608_v39 = vld [vmem:[%s14123_s11 + $0x838] sm:$0xff] }
 0x336   : > { %7837 = vmatpush1.bf16.msra.mxu0 %v11588_v61  ;;  %8206 = vmatpush1.bf16.msra.mxu1 %v11590_v63  ;;  %v11636_v61 = vcombine.low %v563_v45, %v567_v46  ;;  %v11638_v63 = vcombine.low %v564_v47, %v568_v48  ;;  %v611_v45 = vld [vmem:[%s14123_s11 + $0x850] sm:$0xff]  ;;  %v612_v47 = vld [vmem:[%s14123_s11 + $0x858] sm:$0xff] }
 0x337   : > { %7838 = vmatprep.subr.bf16.mxu0 %v11597_v12  ;;  %8207 = vmatprep.subr.bf16.mxu1 %v11599_v3  ;;  %v11645_v12 = vcombine.high %v571_v57, %v575_v10  ;;  %v11647_v3 = vcombine.high %v572_v58, %v576_v59  ;;  %v615_v46 = vld [vmem:[%s14123_s11 + $0x870] sm:$0xff]  ;;  %v616_v48 = vld [vmem:[%s14123_s11 + $0x878] sm:$0xff] }
 0x33a   : > { %7839 = vmatpush1.bf16.msra.mxu0 %v11596_v9  ;;  %8208 = vmatpush1.bf16.msra.mxu1 %v11598_v11  ;;  %v11644_v9 = vcombine.low %v571_v57, %v575_v10  ;;  %v11646_v11 = vcombine.low %v572_v58, %v576_v59  ;;  %v619_v57 = vld [vmem:[%s14123_s11 + $0x890] sm:$0xff]  ;;  %v620_v58 = vld [vmem:[%s14123_s11 + $0x898] sm:$0xff] }
 0x33b   : > { %7840 = vmatprep.subr.bf16.mxu0 %v11605_v13  ;;  %8209 = vmatprep.subr.bf16.mxu1 %v11607_v14  ;;  %v11653_v13 = vcombine.high %v579_v4, %v583_v5  ;;  %v11655_v14 = vcombine.high %v580_v6, %v584_v7  ;;  %v623_v10 = vld [vmem:[%s14123_s11 + $0x8b0] sm:$0xff]  ;;  %v624_v59 = vld [vmem:[%s14123_s11 + $0x8b8] sm:$0xff] }
 0x33e   : > { %7841 = vmatpush1.bf16.msra.mxu0 %v11604_v21  ;;  %8210 = vmatpush1.bf16.msra.mxu1 %v11606_v23  ;;  %v11652_v21 = vcombine.low %v579_v4, %v583_v5  ;;  %v11654_v23 = vcombine.low %v580_v6, %v584_v7  ;;  %v627_v4 = vld [vmem:[%s14123_s11 + $0x8d0] sm:$0xff]  ;;  %v628_v6 = vld [vmem:[%s14123_s11 + $0x8d8] sm:$0xff] }
 0x33f   : > { %7842 = vmatprep.subr.bf16.mxu0 %v11613_v25  ;;  %8211 = vmatprep.subr.bf16.mxu1 %v11615_v26  ;;  %v11661_v25 = vcombine.high %v587_v16, %v591_v2  ;;  %v11663_v26 = vcombine.high %v588_v18, %v592_v17  ;;  %v631_v5 = vld [vmem:[%s14123_s11 + $0x8f0] sm:$0xff]  ;;  %v632_v7 = vld [vmem:[%s14123_s11 + $0x8f8] sm:$0xff] }
 0x342   : > { %7843 = vmatpush1.bf16.msra.mxu0 %v11612_v24  ;;  %8212 = vmatpush1.bf16.msra.mxu1 %v11614_v54  ;;  %v11660_v24 = vcombine.low %v587_v16, %v591_v2  ;;  %v11662_v54 = vcombine.low %v588_v18, %v592_v17  ;;  %v639_v16 = vld [vmem:[%s14123_s11 + $0x930] sm:$0xff]  ;;  %v636_v2 = vld [vmem:[%s14123_s11 + $0x918] sm:$0xff]  ;;  %v11700_v17 = vcombine.low %v627_v4, %v631_v5 }
 0x343   : > { %7844 = vmatprep.subr.bf16.mxu0 %v11621_v33  ;;  %8213 = vmatprep.subr.bf16.mxu1 %v11623_v34  ;;  %v11669_v33 = vcombine.high %v595_v27, %v599_v29  ;;  %v11671_v34 = vcombine.high %v596_v31, %v600_v60  ;;  %v640_v18 = vld [vmem:[%s14123_s11 + $0x938] sm:$0xff] }
 0x346   : > { %7845 = vmatpush1.bf16.msra.mxu0 %v11620_v40  ;;  %8214 = vmatpush1.bf16.msra.mxu1 %v11622_v0  ;;  %v11668_v40 = vcombine.low %v595_v27, %v599_v29  ;;  %v11670_v0 = vcombine.low %v596_v31, %v600_v60  ;;  %v644_v27 = vld [vmem:[%s14123_s11 + $0x958] sm:$0xff]  ;;  %v11710_v60 = vcombine.low %v636_v2, %v640_v18 }
 0x347   : > { %7846 = vmatprep.subr.bf16.mxu0 %v11629_v42  ;;  %8215 = vmatprep.subr.bf16.mxu1 %v11631_v43  ;;  %v11677_v42 = vcombine.high %v603_v35, %v607_v36  ;;  %v11679_v43 = vcombine.high %v604_v37, %v608_v39  ;;  %v648_v29 = vld [vmem:[%s14123_s11 + $0x978] sm:$0xff] }
 0x34a   : > { %7847 = vmatpush1.bf16.msra.mxu0 %v11628_v49  ;;  %8216 = vmatpush1.bf16.msra.mxu1 %v11630_v50  ;;  %v11676_v49 = vcombine.low %v603_v35, %v607_v36  ;;  %v11678_v50 = vcombine.low %v604_v37, %v608_v39  ;;  %v652_v35 = vld [vmem:[%s14123_s11 + $0x998] sm:$0xff]  ;;  %v11718_v39 = vcombine.low %v644_v27, %v648_v29 }
 0x34b   : > { %7848 = vmatprep.subr.bf16.mxu0 %v11637_v53  ;;  %8217 = vmatprep.subr.bf16.mxu1 %v11639_v56  ;;  %v11685_v53 = vcombine.high %v611_v45, %v615_v46  ;;  %v11687_v56 = vcombine.high %v612_v47, %v616_v48  ;;  %v656_v36 = vld [vmem:[%s14123_s11 + $0x9b8] sm:$0xff] }
 0x34e   : > { %7849 = vmatpush1.bf16.msra.mxu0 %v11636_v61  ;;  %8218 = vmatpush1.bf16.msra.mxu1 %v11638_v63  ;;  %v11684_v61 = vcombine.low %v611_v45, %v615_v46  ;;  %v11686_v63 = vcombine.low %v612_v47, %v616_v48  ;;  %v660_v45 = vld [vmem:[%s14123_s11 + $0x9d8] sm:$0xff]  ;;  %v11726_v48 = vcombine.low %v652_v35, %v656_v36 }
 0x34f   : > { %7850 = vmatprep.subr.bf16.mxu0 %v11645_v12  ;;  %8219 = vmatprep.subr.bf16.mxu1 %v11647_v3  ;;  %v11693_v12 = vcombine.high %v619_v57, %v623_v10  ;;  %v11695_v3 = vcombine.high %v620_v58, %v624_v59  ;;  %v664_v46 = vld [vmem:[%s14123_s11 + $0x9f8] sm:$0xff] }
 0x352   : > { %7851 = vmatpush1.bf16.msra.mxu0 %v11644_v9  ;;  %8220 = vmatpush1.bf16.msra.mxu1 %v11646_v11  ;;  %v11694_v9 = vcombine.low %v620_v58, %v624_v59  ;;  %v11701_v11 = vcombine.high %v627_v4, %v631_v5  ;;  %v11734_v59 = vcombine.low %v660_v45, %v664_v46  ;;  %v676_v4 = vld [vmem:[%s14123_s11 + $0xa58] sm:$0xff] }
 0x353   : > { %7852 = vmatprep.subr.bf16.mxu0 %v11653_v13  ;;  %8221 = vmatprep.subr.bf16.mxu1 %v11655_v14  ;;  %v11703_v13 = vcombine.high %v628_v6, %v632_v7  ;;  %v635_v14 = vld [vmem:[%s14123_s11 + $0x910] sm:$0xff]  ;;  %v680_v5 = vld [vmem:[%s14123_s11 + $0xa78] sm:$0xff] }
 0x354   : > { %v11708_v31 = vcombine.low %v635_v14, %v639_v16 }
 0x356   : > { %7853 = vmatpush1.bf16.msra.mxu0 %v11652_v21  ;;  %8222 = vmatpush1.bf16.msra.mxu1 %v11654_v23  ;;  %v11709_v21 = vcombine.high %v635_v14, %v639_v16  ;;  %v11711_v23 = vcombine.high %v636_v2, %v640_v18  ;;  %v684_v14 = vld [vmem:[%s14123_s11 + $0xa98] sm:$0xff]  ;;  %v11750_v18 = vcombine.low %v676_v4, %v680_v5 }
 0x357   : > { %7854 = vmatprep.subr.bf16.mxu0 %v11661_v25  ;;  %8223 = vmatprep.subr.bf16.mxu1 %v11663_v26  ;;  %v643_v25 = vld [vmem:[%s14123_s11 + $0x950] sm:$0xff]  ;;  %v688_v16 = vld [vmem:[%s14123_s11 + $0xab8] sm:$0xff] }
 0x358   : > { %v647_v26 = vld [vmem:[%s14123_s11 + $0x970] sm:$0xff] }
 0x359   : > { %v11716_v37 = vcombine.low %v643_v25, %v647_v26 }
 0x35a   : > { %7855 = vmatpush1.bf16.msra.mxu0 %v11660_v24  ;;  %8224 = vmatpush1.bf16.msra.mxu1 %v11662_v54  ;;  %v11717_v24 = vcombine.high %v643_v25, %v647_v26  ;;  %v11719_v54 = vcombine.high %v644_v27, %v648_v29  ;;  %v692_v25 = vld [vmem:[%s14123_s11 + $0xad8] sm:$0xff]  ;;  %v11758_v29 = vcombine.low %v684_v14, %v688_v16 }
 0x35b   : > { %7856 = vmatprep.subr.bf16.mxu0 %v11669_v33  ;;  %8225 = vmatprep.subr.bf16.mxu1 %v11671_v34  ;;  %v651_v33 = vld [vmem:[%s14123_s11 + $0x990] sm:$0xff]  ;;  %v696_v26 = vld [vmem:[%s14123_s11 + $0xaf8] sm:$0xff] }
 0x35c   : > { %v655_v34 = vld [vmem:[%s14123_s11 + $0x9b0] sm:$0xff] }
 0x35d   : > { %v11724_v47 = vcombine.low %v651_v33, %v655_v34 }
 0x35e   : > { %7857 = vmatpush1.bf16.msra.mxu0 %v11668_v40  ;;  %8226 = vmatpush1.bf16.msra.mxu1 %v11670_v0  ;;  %v11725_v40 = vcombine.high %v651_v33, %v655_v34  ;;  %v11727_v0 = vcombine.high %v652_v35, %v656_v36  ;;  %v700_v33 = vld [vmem:[%s14123_s11 + $0xb18] sm:$0xff]  ;;  %v11766_v36 = vcombine.low %v692_v25, %v696_v26 }
 0x35f   : > { %7867 = vmatprep.subr.bf16.mxu0 %v11677_v42  ;;  %8236 = vmatprep.subr.bf16.mxu1 %v11679_v43  ;;  %v659_v42 = vld [vmem:[%s14123_s11 + $0x9d0] sm:$0xff]  ;;  %v704_v34 = vld [vmem:[%s14123_s11 + $0xb38] sm:$0xff] }
 0x360   : > { %v663_v43 = vld [vmem:[%s14123_s11 + $0x9f0] sm:$0xff] }
 0x361   : > { %7859 = vmatmul.mubr.bf16.vlgmr.msra.gmra.mrb[4].mxu0 %v14318_v41  ;;  %8228 = vmatmul.mubr.bf16.vlgmr.msra.gmra.mrb[4].mxu1 %v14318_v41  ;;  %v11692_v41 = vcombine.low %v619_v57, %v623_v10  ;;  %v668_v57 = vld [vmem:[%s14123_s11 + $0xa18] sm:$0xff]  ;;  %v11732_v58 = vcombine.low %v659_v42, %v663_v43 }
 0x362   : > { %7868 = vmatpush1.bf16.msra.mxu0 %v11676_v49  ;;  %8237 = vmatpush1.bf16.msra.mxu1 %v11678_v50  ;;  %v11733_v49 = vcombine.high %v659_v42, %v663_v43  ;;  %v11735_v50 = vcombine.high %v660_v45, %v664_v46  ;;  %v672_v10 = vld [vmem:[%s14123_s11 + $0xa38] sm:$0xff]  ;;  %v11774_v46 = vcombine.low %v700_v33, %v704_v34 }
 0x363   : > { %7869 = vmatprep.subr.bf16.mxu0 %v11685_v53  ;;  %8238 = vmatprep.subr.bf16.mxu1 %v11687_v56  ;;  %v667_v53 = vld [vmem:[%s14123_s11 + $0xa10] sm:$0xff]  ;;  %v708_v42 = vld [vmem:[%s14123_s11 + $0xb58] sm:$0xff] }
 0x364   : > { %7899 = vmatprep.mubr.bf16.mxu0 %v14325_v51  ;;  %8268 = vmatprep.mubr.bf16.mxu1 %v14325_v51  ;;  %v11702_v51 = vcombine.low %v628_v6, %v632_v7  ;;  %v671_v56 = vld [vmem:[%s14123_s11 + $0xa30] sm:$0xff]  ;;  %v11742_v7 = vcombine.low %v668_v57, %v672_v10  ;;  %v712_v43 = vld [vmem:[%s14123_s11 + $0xb78] sm:$0xff] }
 0x365   : > { %v11740_v6 = vcombine.low %v667_v53, %v671_v56 }
 0x366   : > { %7870 = vmatpush1.bf16.msra.mxu0 %v11684_v61  ;;  %8239 = vmatpush1.bf16.msra.mxu1 %v11686_v63  ;;  %v11741_v61 = vcombine.high %v667_v53, %v671_v56  ;;  %v11743_v63 = vcombine.high %v668_v57, %v672_v10  ;;  %v716_v53 = vld [vmem:[%s14123_s11 + $0xb98] sm:$0xff]  ;;  %v11782_v10 = vcombine.low %v708_v42, %v712_v43 }
 0x367   : > { %7871 = vmatprep.subr.bf16.mxu0 %v11693_v12  ;;  %8240 = vmatprep.subr.bf16.mxu1 %v11695_v3  ;;  %v675_v12 = vld [vmem:[%s14123_s11 + $0xa50] sm:$0xff]  ;;  %v720_v56 = vld [vmem:[%s14123_s11 + $0xbb8] sm:$0xff] }
 0x368   : > { %v679_v3 = vld [vmem:[%s14123_s11 + $0xa70] sm:$0xff] }
 0x369   : > { %v11748_v2 = vcombine.low %v675_v12, %v679_v3 }
 0x36a   : > { %7872 = vmatpush1.bf16.msra.mxu0 %v11692_v41  ;;  %8241 = vmatpush1.bf16.msra.mxu1 %v11694_v9  ;;  %v11749_v41 = vcombine.high %v675_v12, %v679_v3  ;;  %v11751_v9 = vcombine.high %v676_v4, %v680_v5  ;;  %v724_v12 = vld [vmem:[%s14123_s11 + $0xbd8] sm:$0xff]  ;;  %v11790_v5 = vcombine.low %v716_v53, %v720_v56 }
 0x36b   : > { %7873 = vmatprep.subr.bf16.mxu0 %v11701_v11  ;;  %8242 = vmatprep.subr.bf16.mxu1 %v11703_v13  ;;  %v683_v11 = vld [vmem:[%s14123_s11 + $0xa90] sm:$0xff]  ;;  %v728_v3 = vld [vmem:[%s14123_s11 + $0xbf8] sm:$0xff] }
 0x36c   : > { %v687_v13 = vld [vmem:[%s14123_s11 + $0xab0] sm:$0xff] }
 0x36d   : > { %v11756_v27 = vcombine.low %v683_v11, %v687_v13 }
 0x36e   : > { %7874 = vmatpush1.bf16.msra.mxu0 %v11700_v17  ;;  %8243 = vmatpush1.bf16.msra.mxu1 %v11702_v51  ;;  %v11757_v17 = vcombine.high %v683_v11, %v687_v13  ;;  %v11759_v51 = vcombine.high %v684_v14, %v688_v16  ;;  %v732_v11 = vld [vmem:[%s14123_s11 + $0xc18] sm:$0xff]  ;;  %v11798_v16 = vcombine.low %v724_v12, %v728_v3 }
 0x36f   : > { %7875 = vmatprep.subr.bf16.mxu0 %v11709_v21  ;;  %8244 = vmatprep.subr.bf16.mxu1 %v11711_v23  ;;  %v691_v21 = vld [vmem:[%s14123_s11 + $0xad0] sm:$0xff]  ;;  %v736_v13 = vld [vmem:[%s14123_s11 + $0xc38] sm:$0xff] }
 0x370   : > { %v695_v23 = vld [vmem:[%s14123_s11 + $0xaf0] sm:$0xff] }
 0x371   : > { %v11764_v35 = vcombine.low %v691_v21, %v695_v23 }
 0x372   : > { %7876 = vmatpush1.bf16.msra.mxu0 %v11708_v31  ;;  %8245 = vmatpush1.bf16.msra.mxu1 %v11710_v60  ;;  %v11765_v31 = vcombine.high %v691_v21, %v695_v23  ;;  %v11767_v60 = vcombine.high %v692_v25, %v696_v26  ;;  %v740_v21 = vld [vmem:[%s14123_s11 + $0xc58] sm:$0xff]  ;;  %v11806_v26 = vcombine.low %v732_v11, %v736_v13 }
 0x373   : > { %7877 = vmatprep.subr.bf16.mxu0 %v11717_v24  ;;  %8246 = vmatprep.subr.bf16.mxu1 %v11719_v54  ;;  %v699_v24 = vld [vmem:[%s14123_s11 + $0xb10] sm:$0xff]  ;;  %v744_v23 = vld [vmem:[%s14123_s11 + $0xc78] sm:$0xff] }
 0x374   : > { %v703_v54 = vld [vmem:[%s14123_s11 + $0xb30] sm:$0xff] }
 0x375   : > { %v11772_v45 = vcombine.low %v699_v24, %v703_v54 }
 0x376   : > { %7878 = vmatpush1.bf16.msra.mxu0 %v11716_v37  ;;  %8247 = vmatpush1.bf16.msra.mxu1 %v11718_v39  ;;  %v11773_v37 = vcombine.high %v699_v24, %v703_v54  ;;  %v11775_v39 = vcombine.high %v700_v33, %v704_v34  ;;  %v748_v24 = vld [vmem:[%s14123_s11 + $0xc98] sm:$0xff]  ;;  %v11814_v34 = vcombine.low %v740_v21, %v744_v23 }
 0x377   : > { %7879 = vmatprep.subr.bf16.mxu0 %v11725_v40  ;;  %8248 = vmatprep.subr.bf16.mxu1 %v11727_v0  ;;  %v707_v40 = vld [vmem:[%s14123_s11 + $0xb50] sm:$0xff]  ;;  %v752_v54 = vld [vmem:[%s14123_s11 + $0xcb8] sm:$0xff] }
 0x378   : > { %v711_v0 = vld [vmem:[%s14123_s11 + $0xb70] sm:$0xff] }
 0x379   : > { %v11780_v57 = vcombine.low %v707_v40, %v711_v0 }
 0x37a   : > { %7880 = vmatpush1.bf16.msra.mxu0 %v11724_v47  ;;  %8249 = vmatpush1.bf16.msra.mxu1 %v11726_v48  ;;  %v11781_v47 = vcombine.high %v707_v40, %v711_v0  ;;  %v11783_v48 = vcombine.high %v708_v42, %v712_v43  ;;  %v756_v40 = vld [vmem:[%s14123_s11 + $0xcd8] sm:$0xff]  ;;  %v11822_v42 = vcombine.low %v748_v24, %v752_v54 }
 0x37b   : > { %7881 = vmatprep.subr.bf16.mxu0 %v11733_v49  ;;  %8250 = vmatprep.subr.bf16.mxu1 %v11735_v50  ;;  %v715_v49 = vld [vmem:[%s14123_s11 + $0xb90] sm:$0xff]  ;;  %v760_v0 = vld [vmem:[%s14123_s11 + $0xcf8] sm:$0xff] }
 0x37c   : > { %v719_v50 = vld [vmem:[%s14123_s11 + $0xbb0] sm:$0xff] }
 0x37d   : > { %v11788_v4 = vcombine.low %v715_v49, %v719_v50 }
 0x37e   : > { %7882 = vmatpush1.bf16.msra.mxu0 %v11732_v58  ;;  %8251 = vmatpush1.bf16.msra.mxu1 %v11734_v59  ;;  %v11789_v58 = vcombine.high %v715_v49, %v719_v50  ;;  %v11791_v59 = vcombine.high %v716_v53, %v720_v56  ;;  %v768_v49 = vld [vmem:[%s14123_s11 + $0xd38] sm:$0xff] }
 0x37f   : > { %7883 = vmatprep.subr.bf16.mxu0 %v11741_v61  ;;  %8252 = vmatprep.subr.bf16.mxu1 %v11743_v63  ;;  %v723_v61 = vld [vmem:[%s14123_s11 + $0xbd0] sm:$0xff] }
 0x380   : > { %v727_v63 = vld [vmem:[%s14123_s11 + $0xbf0] sm:$0xff] }
 0x381   : > { %v11796_v14 = vcombine.low %v723_v61, %v727_v63 }
 0x382   : > { %7884 = vmatpush1.bf16.msra.mxu0 %v11740_v6  ;;  %8253 = vmatpush1.bf16.msra.mxu1 %v11742_v7  ;;  %v11797_v6 = vcombine.high %v723_v61, %v727_v63  ;;  %v11799_v7 = vcombine.high %v724_v12, %v728_v3 }
 0x383   : > { %7885 = vmatprep.subr.bf16.mxu0 %v11749_v41  ;;  %8254 = vmatprep.subr.bf16.mxu1 %v11751_v9  ;;  %v731_v41 = vld [vmem:[%s14123_s11 + $0xc10] sm:$0xff] }
 0x384   : > { %v735_v9 = vld [vmem:[%s14123_s11 + $0xc30] sm:$0xff] }
 0x385   : > { %v11804_v25 = vcombine.low %v731_v41, %v735_v9 }
 0x386   : > { %7886 = vmatpush1.bf16.msra.mxu0 %v11748_v2  ;;  %8255 = vmatpush1.bf16.msra.mxu1 %v11750_v18  ;;  %v11805_v2 = vcombine.high %v731_v41, %v735_v9  ;;  %v11807_v18 = vcombine.high %v732_v11, %v736_v13 }
 0x387   : > { %7887 = vmatprep.subr.bf16.mxu0 %v11757_v17  ;;  %8256 = vmatprep.subr.bf16.mxu1 %v11759_v51  ;;  %v739_v17 = vld [vmem:[%s14123_s11 + $0xc50] sm:$0xff] }
 0x388   : > { %v743_v51 = vld [vmem:[%s14123_s11 + $0xc70] sm:$0xff] }
 0x389   : > { %v11812_v33 = vcombine.low %v739_v17, %v743_v51 }
 0x38a   : > { %7888 = vmatpush1.bf16.msra.mxu0 %v11756_v27  ;;  %8257 = vmatpush1.bf16.msra.mxu1 %v11758_v29  ;;  %v11813_v27 = vcombine.high %v739_v17, %v743_v51  ;;  %v11815_v29 = vcombine.high %v740_v21, %v744_v23  ;;  %v788_v51 = vld [vmem:[%s14123_s11 + $0xdd8] sm:$0xff] }
 0x38b   : > { %7889 = vmatprep.subr.bf16.mxu0 %v11765_v31  ;;  %8258 = vmatprep.subr.bf16.mxu1 %v11767_v60  ;;  %v747_v31 = vld [vmem:[%s14123_s11 + $0xc90] sm:$0xff]  ;;  %v792_v21 = vld [vmem:[%s14123_s11 + $0xdf8] sm:$0xff] }
 0x38c   : > { %v751_v60 = vld [vmem:[%s14123_s11 + $0xcb0] sm:$0xff] }
 0x38e   : > { %7890 = vmatpush1.bf16.msra.mxu0 %v11764_v35  ;;  %8259 = vmatpush1.bf16.msra.mxu1 %v11766_v36  ;;  %v11821_v35 = vcombine.high %v747_v31, %v751_v60  ;;  %v11823_v36 = vcombine.high %v748_v24, %v752_v54  ;;  %v11863_v54 = vcombine.high %v788_v51, %v792_v21 }
 0x38f   : > { %7891 = vmatprep.subr.bf16.mxu0 %v11773_v37  ;;  %8260 = vmatprep.subr.bf16.mxu1 %v11775_v39  ;;  %v755_v37 = vld [vmem:[%s14123_s11 + $0xcd0] sm:$0xff] }
 0x390   : > { %v759_v39 = vld [vmem:[%s14123_s11 + $0xcf0] sm:$0xff] }
 0x391   : > { %v11829_v43 = vcombine.high %v755_v37, %v759_v39  ;;  %v11828_v50 = vcombine.low %v755_v37, %v759_v39  ;;  %v11862_v39 = vcombine.low %v788_v51, %v792_v21 }
 0x392   : > { %7892 = vmatpush1.bf16.msra.mxu0 %v11772_v45  ;;  %8261 = vmatpush1.bf16.msra.mxu1 %v11774_v46  ;;  %v11831_v45 = vcombine.high %v756_v40, %v760_v0  ;;  %v763_v46 = vld [vmem:[%s14123_s11 + $0xd10] sm:$0xff] }
 0x393   : > { %7893 = vmatprep.subr.bf16.mxu0 %v11781_v47  ;;  %8262 = vmatprep.subr.bf16.mxu1 %v11783_v48  ;;  %v767_v47 = vld [vmem:[%s14123_s11 + $0xd30] sm:$0xff]  ;;  %v764_v48 = vld [vmem:[%s14123_s11 + $0xd18] sm:$0xff] }
 0x394   : > { %v11837_v53 = vcombine.high %v763_v46, %v767_v47  ;;  %v11839_v56 = vcombine.high %v764_v48, %v768_v49  ;;  %v11836_v61 = vcombine.low %v763_v46, %v767_v47  ;;  %v11838_v63 = vcombine.low %v764_v48, %v768_v49 }
 0x396   : > { %7894 = vmatpush1.bf16.msra.mxu0 %v11780_v57  ;;  %8263 = vmatpush1.bf16.msra.mxu1 %v11782_v10  ;;  %v771_v57 = vld [vmem:[%s14123_s11 + $0xd50] sm:$0xff] }
 0x397   : > { %7895 = vmatprep.subr.bf16.mxu0 %v11789_v58  ;;  %8264 = vmatprep.subr.bf16.mxu1 %v11791_v59  ;;  %v775_v10 = vld [vmem:[%s14123_s11 + $0xd70] sm:$0xff]  ;;  %v772_v58 = vld [vmem:[%s14123_s11 + $0xd58] sm:$0xff] }
 0x398   : > { %v776_v59 = vld [vmem:[%s14123_s11 + $0xd78] sm:$0xff]  ;;  %v11845_v12 = vcombine.high %v771_v57, %v775_v10  ;;  %v11844_v41 = vcombine.low %v771_v57, %v775_v10 }
 0x399   : > { %v11847_v3 = vcombine.high %v772_v58, %v776_v59  ;;  %v11846_v9 = vcombine.low %v772_v58, %v776_v59 }
 0x39a   : > { %7896 = vmatpush1.bf16.msra.mxu0 %v11788_v4  ;;  %8265 = vmatpush1.bf16.msra.mxu1 %v11790_v5  ;;  %v779_v4 = vld [vmem:[%s14123_s11 + $0xd90] sm:$0xff] }
 0x39b   : > { %7897 = vmatprep.subr.bf16.mxu0 %v11797_v6  ;;  %8266 = vmatprep.subr.bf16.mxu1 %v11799_v7  ;;  %v783_v5 = vld [vmem:[%s14123_s11 + $0xdb0] sm:$0xff]  ;;  %v780_v6 = vld [vmem:[%s14123_s11 + $0xd98] sm:$0xff] }
 0x39c   : > { %v784_v7 = vld [vmem:[%s14123_s11 + $0xdb8] sm:$0xff]  ;;  %v11853_v11 = vcombine.high %v779_v4, %v783_v5 }
 0x39e   : > { %7898 = vmatpush1.bf16.msra.mxu0 %v11796_v14  ;;  %8267 = vmatpush1.bf16.msra.mxu1 %v11798_v16  ;;  %v11855_v14 = vcombine.high %v780_v6, %v784_v7  ;;  %v787_v16 = vld [vmem:[%s14123_s11 + $0xdd0] sm:$0xff] }
 0x39f   : > { %7908 = vmatprep.subr.bf16.mxu0 %v11805_v2  ;;  %8277 = vmatprep.subr.bf16.mxu1 %v11807_v18  ;;  %v791_v2 = vld [vmem:[%s14123_s11 + $0xdf0] sm:$0xff] }
 0x3a0   : > { %v11860_v37 = vcombine.low %v787_v16, %v791_v2 }
 0x3a1   : > { %7900 = vmatmul.mubr.bf16.vlgmr.msra.gmra.mrb[4].mxu0 %v14393_v62  ;;  %8269 = vmatmul.mubr.bf16.vlgmr.msra.gmra.mrb[4].mxu1 %v14393_v62  ;;  %v11820_v62 = vcombine.low %v747_v31, %v751_v60  ;;  %v11854_v31 = vcombine.low %v780_v6, %v784_v7  ;;  %v11861_v60 = vcombine.high %v787_v16, %v791_v2 }
 0x3a2   : > { %7909 = vmatpush1.bf16.msra.mxu0 %v11804_v25  ;;  %8278 = vmatpush1.bf16.msra.mxu1 %v11806_v26  ;;  %v11852_v26 = vcombine.low %v779_v4, %v783_v5 }
 0x3a3   : > { %7910 = vmatprep.subr.bf16.mxu0 %v11813_v27  ;;  %8279 = vmatprep.subr.bf16.mxu1 %v11815_v29 }
 0x3a4   : > { %7940 = vmatprep.mubr.bf16.mxu0 %v14401_v32  ;;  %8309 = vmatprep.mubr.bf16.mxu1 %v14401_v32  ;;  %v11830_v32 = vcombine.low %v756_v40, %v760_v0 }
 0x3a6   : > { %7911 = vmatpush1.bf16.msra.mxu0 %v11812_v33  ;;  %8280 = vmatpush1.bf16.msra.mxu1 %v11814_v34  ;;  %v795_v33 = vld [vmem:[%s14123_s11 + $0xe10] sm:$0xff] }
 0x3a7   : > { %7912 = vmatprep.subr.bf16.mxu0 %v11821_v35  ;;  %8281 = vmatprep.subr.bf16.mxu1 %v11823_v36  ;;  %v799_v34 = vld [vmem:[%s14123_s11 + $0xe30] sm:$0xff]  ;;  %v796_v35 = vld [vmem:[%s14123_s11 + $0xe18] sm:$0xff] }
 0x3a8   : > { %v800_v36 = vld [vmem:[%s14123_s11 + $0xe38] sm:$0xff]  ;;  %v11869_v40 = vcombine.high %v795_v33, %v799_v34  ;;  %v11868_v46 = vcombine.low %v795_v33, %v799_v34  ;;  %v843_v33 = vld [vmem:[%s14123_s11 + $0xf90] sm:$0xff] }
 0x3a9   : > { %v11871_v0 = vcombine.high %v796_v35, %v800_v36  ;;  %v11870_v47 = vcombine.low %v796_v35, %v800_v36  ;;  %v847_v34 = vld [vmem:[%s14123_s11 + $0xfb0] sm:$0xff]  ;;  %v844_v35 = vld [vmem:[%s14123_s11 + $0xf98] sm:$0xff] }
 0x3aa   : > { %7913 = vmatpush1.bf16.msra.mxu0 %v11820_v62  ;;  %8282 = vmatpush1.bf16.msra.mxu1 %v11822_v42  ;;  %v803_v62 = vld [vmem:[%s14123_s11 + $0xe50] sm:$0xff]  ;;  %v848_v36 = vld [vmem:[%s14123_s11 + $0xfb8] sm:$0xff] }
 0x3ab   : > { %7914 = vmatprep.subr.bf16.mxu0 %v11829_v43  ;;  %8283 = vmatprep.subr.bf16.mxu1 %v11831_v45  ;;  %v807_v42 = vld [vmem:[%s14123_s11 + $0xe70] sm:$0xff]  ;;  %v804_v43 = vld [vmem:[%s14123_s11 + $0xe58] sm:$0xff] }
 0x3ac   : > { %v808_v45 = vld [vmem:[%s14123_s11 + $0xe78] sm:$0xff]  ;;  %v11877_v48 = vcombine.high %v803_v62, %v807_v42  ;;  %v11876_v57 = vcombine.low %v803_v62, %v807_v42  ;;  %v851_v62 = vld [vmem:[%s14123_s11 + $0xfd0] sm:$0xff] }
 0x3ad   : > { %v11879_v49 = vcombine.high %v804_v43, %v808_v45  ;;  %v11878_v10 = vcombine.low %v804_v43, %v808_v45  ;;  %v855_v42 = vld [vmem:[%s14123_s11 + $0xff0] sm:$0xff]  ;;  %v852_v43 = vld [vmem:[%s14123_s11 + $0xfd8] sm:$0xff] }
 0x3ae   : > { %7915 = vmatpush1.bf16.msra.mxu0 %v11828_v50  ;;  %8284 = vmatpush1.bf16.msra.mxu1 %v11830_v32  ;;  %v811_v50 = vld [vmem:[%s14123_s11 + $0xe90] sm:$0xff]  ;;  %v856_v45 = vld [vmem:[%s14123_s11 + $0xff8] sm:$0xff] }
 0x3af   : > { %7916 = vmatprep.subr.bf16.mxu0 %v11837_v53  ;;  %8285 = vmatprep.subr.bf16.mxu1 %v11839_v56  ;;  %v815_v32 = vld [vmem:[%s14123_s11 + $0xeb0] sm:$0xff]  ;;  %v812_v53 = vld [vmem:[%s14123_s11 + $0xe98] sm:$0xff] }
 0x3b0   : > { %v816_v56 = vld [vmem:[%s14123_s11 + $0xeb8] sm:$0xff]  ;;  %v11885_v58 = vcombine.high %v811_v50, %v815_v32  ;;  %v11884_v4 = vcombine.low %v811_v50, %v815_v32  ;;  %v859_v50 = vld [vmem:[%s14123_s11 + $0x1010] sm:$0xff] }
 0x3b1   : > { %v11887_v59 = vcombine.high %v812_v53, %v816_v56  ;;  %v11886_v5 = vcombine.low %v812_v53, %v816_v56  ;;  %v863_v32 = vld [vmem:[%s14123_s11 + $0x1030] sm:$0xff]  ;;  %v860_v53 = vld [vmem:[%s14123_s11 + $0x1018] sm:$0xff] }
 0x3b2   : > { %7917 = vmatpush1.bf16.msra.mxu0 %v11836_v61  ;;  %8286 = vmatpush1.bf16.msra.mxu1 %v11838_v63  ;;  %v819_v61 = vld [vmem:[%s14123_s11 + $0xed0] sm:$0xff]  ;;  %v864_v56 = vld [vmem:[%s14123_s11 + $0x1038] sm:$0xff] }
 0x3b3   : > { %7918 = vmatprep.subr.bf16.mxu0 %v11845_v12  ;;  %8287 = vmatprep.subr.bf16.mxu1 %v11847_v3  ;;  %v823_v63 = vld [vmem:[%s14123_s11 + $0xef0] sm:$0xff]  ;;  %v820_v12 = vld [vmem:[%s14123_s11 + $0xed8] sm:$0xff] }
 0x3b4   : > { %v15055_v13 = vpop.f32.mrb[0].mxu0  ;;  %v15059_v18 = vpop.f32.mrb[0].mxu1  ;;  %v824_v3 = vld [vmem:[%s14123_s11 + $0xef8] sm:$0xff]  ;;  %v11893_v6 = vcombine.high %v819_v61, %v823_v63  ;;  %v11892_v16 = vcombine.low %v819_v61, %v823_v63  ;;  %v867_v61 = vld [vmem:[%s14123_s11 + $0x1050] sm:$0xff] }
 0x3b5   : > { %v15061_v17 = vpop.f32.mrb[1].mxu0  ;;  %v15065_v23 = vpop.f32.mrb[1].mxu1  ;;  %v11895_v7 = vcombine.high %v820_v12, %v824_v3  ;;  %v11894_v2 = vcombine.low %v820_v12, %v824_v3  ;;  %v871_v63 = vld [vmem:[%s14123_s11 + $0x1070] sm:$0xff]  ;;  %v868_v12 = vld [vmem:[%s14123_s11 + $0x1058] sm:$0xff] }
 0x3b6   : > { %v7413_v25 = vpop.f32.mrb[2].mxu0  ;;  %7919 = vmatpush1.bf16.msra.mxu0 %v11844_v41  ;;  %v7782_v27 = vpop.f32.mrb[2].mxu1  ;;  %8288 = vmatpush1.bf16.msra.mxu1 %v11846_v9  ;;  %v827_v41 = vld [vmem:[%s14123_s11 + $0xf10] sm:$0xff]  ;;  %v872_v3 = vld [vmem:[%s14123_s11 + $0x1078] sm:$0xff] }
 0x3b7   : > { %v7414_v29 = vpop.f32.mrb[3].mxu0  ;;  %7920 = vmatprep.subr.bf16.mxu0 %v11853_v11  ;;  %v7783_v24 = vpop.f32.mrb[3].mxu1  ;;  %8289 = vmatprep.subr.bf16.mxu1 %v11855_v14  ;;  %v831_v9 = vld [vmem:[%s14123_s11 + $0xf30] sm:$0xff]  ;;  %v828_v11 = vld [vmem:[%s14123_s11 + $0xf18] sm:$0xff] }
 0x3b8   : > { %v832_v14 = vld [vmem:[%s14123_s11 + $0xf38] sm:$0xff]  ;;  %v11901_v51 = vcombine.high %v827_v41, %v831_v9  ;;  %v835_v25 = vld [vmem:[%s14123_s11 + $0xf50] sm:$0xff] }
 0x3b9   : > { %v11903_v21 = vcombine.high %v828_v11, %v832_v14  ;;  %v836_v27 = vld [vmem:[%s14123_s11 + $0xf58] sm:$0xff] }
 0x3ba   : > { %7921 = vmatpush1.bf16.msra.mxu0 %v11852_v26  ;;  %8290 = vmatpush1.bf16.msra.mxu1 %v11854_v31  ;;  %v839_v26 = vld [vmem:[%s14123_s11 + $0xf70] sm:$0xff]  ;;  %v840_v29 = vld [vmem:[%s14123_s11 + $0xf78] sm:$0xff]  ;;  %v11900_v31 = vcombine.low %v827_v41, %v831_v9 }
 0x3bb   : > { %7922 = vmatprep.subr.bf16.mxu0 %v11861_v60  ;;  %8291 = vmatprep.subr.bf16.mxu1 %v11863_v54  ;;  %v11902_v60 = vcombine.low %v828_v11, %v832_v14  ;;  %v11909_v24 = vcombine.high %v835_v25, %v839_v26  ;;  %v11911_v54 = vcombine.high %v836_v27, %v840_v29  ;;  %v875_v41 = vld [vmem:[%s14123_s11 + $0x1090] sm:$0xff]  ;;  %v876_v11 = vld [vmem:[%s14123_s11 + $0x1098] sm:$0xff] }
 0x3bc   : > { %v879_v9 = vld [vmem:[%s14123_s11 + $0x10b0] sm:$0xff]  ;;  %v880_v14 = vld [vmem:[%s14123_s11 + $0x10b8] sm:$0xff] }
 0x3be   : > { %7923 = vmatpush1.bf16.msra.mxu0 %v11860_v37  ;;  %8292 = vmatpush1.bf16.msra.mxu1 %v11862_v39  ;;  %v11908_v37 = vcombine.low %v835_v25, %v839_v26  ;;  %v11910_v39 = vcombine.low %v836_v27, %v840_v29  ;;  %v883_v25 = vld [vmem:[%s14123_s11 + $0x10d0] sm:$0xff]  ;;  %v884_v27 = vld [vmem:[%s14123_s11 + $0x10d8] sm:$0xff] }
 0x3bf   : > { %7924 = vmatprep.subr.bf16.mxu0 %v11869_v40  ;;  %8293 = vmatprep.subr.bf16.mxu1 %v11871_v0  ;;  %v11917_v40 = vcombine.high %v843_v33, %v847_v34  ;;  %v11919_v0 = vcombine.high %v844_v35, %v848_v36  ;;  %v887_v26 = vld [vmem:[%s14123_s11 + $0x10f0] sm:$0xff]  ;;  %v888_v29 = vld [vmem:[%s14123_s11 + $0x10f8] sm:$0xff] }
 0x3c2   : > { %7925 = vmatpush1.bf16.msra.mxu0 %v11868_v46  ;;  %8294 = vmatpush1.bf16.msra.mxu1 %v11870_v47  ;;  %v11916_v46 = vcombine.low %v843_v33, %v847_v34  ;;  %v11918_v47 = vcombine.low %v844_v35, %v848_v36  ;;  %v895_v33 = vld [vmem:[%s14123_s11 + $0x1130] sm:$0xff]  ;;  %v892_v34 = vld [vmem:[%s14123_s11 + $0x1118] sm:$0xff]  ;;  %v11956_v36 = vcombine.low %v883_v25, %v887_v26 }
 0x3c3   : > { %7926 = vmatprep.subr.bf16.mxu0 %v11877_v48  ;;  %8295 = vmatprep.subr.bf16.mxu1 %v11879_v49  ;;  %v11925_v48 = vcombine.high %v851_v62, %v855_v42  ;;  %v11927_v49 = vcombine.high %v852_v43, %v856_v45  ;;  %v896_v35 = vld [vmem:[%s14123_s11 + $0x1138] sm:$0xff] }
 0x3c6   : > { %7927 = vmatpush1.bf16.msra.mxu0 %v11876_v57  ;;  %8296 = vmatpush1.bf16.msra.mxu1 %v11878_v10  ;;  %v11924_v57 = vcombine.low %v851_v62, %v855_v42  ;;  %v11926_v10 = vcombine.low %v852_v43, %v856_v45  ;;  %v900_v62 = vld [vmem:[%s14123_s11 + $0x1158] sm:$0xff]  ;;  %v11966_v45 = vcombine.low %v892_v34, %v896_v35 }
 0x3c7   : > { %7928 = vmatprep.subr.bf16.mxu0 %v11885_v58  ;;  %8297 = vmatprep.subr.bf16.mxu1 %v11887_v59  ;;  %v11933_v58 = vcombine.high %v859_v50, %v863_v32  ;;  %v11935_v59 = vcombine.high %v860_v53, %v864_v56  ;;  %v904_v42 = vld [vmem:[%s14123_s11 + $0x1178] sm:$0xff] }
 0x3ca   : > { %7929 = vmatpush1.bf16.msra.mxu0 %v11884_v4  ;;  %8298 = vmatpush1.bf16.msra.mxu1 %v11886_v5  ;;  %v11932_v4 = vcombine.low %v859_v50, %v863_v32  ;;  %v11934_v5 = vcombine.low %v860_v53, %v864_v56  ;;  %v908_v50 = vld [vmem:[%s14123_s11 + $0x1198] sm:$0xff]  ;;  %v11974_v56 = vcombine.low %v900_v62, %v904_v42 }
 0x3cb   : > { %7930 = vmatprep.subr.bf16.mxu0 %v11893_v6  ;;  %8299 = vmatprep.subr.bf16.mxu1 %v11895_v7  ;;  %v11941_v6 = vcombine.high %v867_v61, %v871_v63  ;;  %v11943_v7 = vcombine.high %v868_v12, %v872_v3  ;;  %v912_v32 = vld [vmem:[%s14123_s11 + $0x11b8] sm:$0xff] }
 0x3ce   : > { %7931 = vmatpush1.bf16.msra.mxu0 %v11892_v16  ;;  %8300 = vmatpush1.bf16.msra.mxu1 %v11894_v2  ;;  %v11940_v16 = vcombine.low %v867_v61, %v871_v63  ;;  %v11942_v2 = vcombine.low %v868_v12, %v872_v3  ;;  %v916_v61 = vld [vmem:[%s14123_s11 + $0x11d8] sm:$0xff]  ;;  %v11982_v3 = vcombine.low %v908_v50, %v912_v32 }
 0x3cf   : > { %7932 = vmatprep.subr.bf16.mxu0 %v11901_v51  ;;  %8301 = vmatprep.subr.bf16.mxu1 %v11903_v21  ;;  %v11949_v51 = vcombine.high %v875_v41, %v879_v9  ;;  %v11951_v21 = vcombine.high %v876_v11, %v880_v14  ;;  %v920_v63 = vld [vmem:[%s14123_s11 + $0x11f8] sm:$0xff] }
 0x3d2   : > { %7933 = vmatpush1.bf16.msra.mxu0 %v11900_v31  ;;  %8302 = vmatpush1.bf16.msra.mxu1 %v11902_v60  ;;  %v11950_v31 = vcombine.low %v876_v11, %v880_v14  ;;  %v11957_v60 = vcombine.high %v883_v25, %v887_v26  ;;  %v11990_v14 = vcombine.low %v916_v61, %v920_v63  ;;  %v932_v25 = vld [vmem:[%s14123_s11 + $0x1258] sm:$0xff] }
 0x3d3   : > { %7934 = vmatprep.subr.bf16.mxu0 %v11909_v24  ;;  %8303 = vmatprep.subr.bf16.mxu1 %v11911_v54  ;;  %v11959_v24 = vcombine.high %v884_v27, %v888_v29  ;;  %v891_v54 = vld [vmem:[%s14123_s11 + $0x1110] sm:$0xff]  ;;  %v936_v26 = vld [vmem:[%s14123_s11 + $0x1278] sm:$0xff] }
 0x3d4   : > { %v11964_v43 = vcombine.low %v891_v54, %v895_v33 }
 0x3d6   : > { %7935 = vmatpush1.bf16.msra.mxu0 %v11908_v37  ;;  %8304 = vmatpush1.bf16.msra.mxu1 %v11910_v39  ;;  %v11965_v37 = vcombine.high %v891_v54, %v895_v33  ;;  %v11967_v39 = vcombine.high %v892_v34, %v896_v35  ;;  %v940_v54 = vld [vmem:[%s14123_s11 + $0x1298] sm:$0xff]  ;;  %v12006_v35 = vcombine.low %v932_v25, %v936_v26 }
 0x3d7   : > { %7936 = vmatprep.subr.bf16.mxu0 %v11917_v40  ;;  %8305 = vmatprep.subr.bf16.mxu1 %v11919_v0  ;;  %v899_v40 = vld [vmem:[%s14123_s11 + $0x1150] sm:$0xff]  ;;  %v944_v33 = vld [vmem:[%s14123_s11 + $0x12b8] sm:$0xff] }
 0x3d8   : > { %v903_v0 = vld [vmem:[%s14123_s11 + $0x1170] sm:$0xff] }
 0x3d9   : > { %v11972_v53 = vcombine.low %v899_v40, %v903_v0 }
 0x3da   : > { %7937 = vmatpush1.bf16.msra.mxu0 %v11916_v46  ;;  %8306 = vmatpush1.bf16.msra.mxu1 %v11918_v47  ;;  %v11973_v46 = vcombine.high %v899_v40, %v903_v0  ;;  %v11975_v47 = vcombine.high %v900_v62, %v904_v42  ;;  %v948_v40 = vld [vmem:[%s14123_s11 + $0x12d8] sm:$0xff]  ;;  %v12014_v42 = vcombine.low %v940_v54, %v944_v33 }
 0x3db   : > { %7938 = vmatprep.subr.bf16.mxu0 %v11925_v48  ;;  %8307 = vmatprep.subr.bf16.mxu1 %v11927_v49  ;;  %v907_v48 = vld [vmem:[%s14123_s11 + $0x1190] sm:$0xff]  ;;  %v952_v0 = vld [vmem:[%s14123_s11 + $0x12f8] sm:$0xff] }
 0x3dc   : > { %v911_v49 = vld [vmem:[%s14123_s11 + $0x11b0] sm:$0xff] }
 0x3dd   : > { %v11980_v12 = vcombine.low %v907_v48, %v911_v49 }
 0x3de   : > { %7939 = vmatpush1.bf16.msra.mxu0 %v11924_v57  ;;  %8308 = vmatpush1.bf16.msra.mxu1 %v11926_v10  ;;  %v11981_v57 = vcombine.high %v907_v48, %v911_v49  ;;  %v11983_v10 = vcombine.high %v908_v50, %v912_v32  ;;  %v956_v48 = vld [vmem:[%s14123_s11 + $0x1318] sm:$0xff]  ;;  %v12022_v32 = vcombine.low %v948_v40, %v952_v0 }
 0x3df   : > { %7949 = vmatprep.subr.bf16.mxu0 %v11933_v58  ;;  %8318 = vmatprep.subr.bf16.mxu1 %v11935_v59  ;;  %v915_v58 = vld [vmem:[%s14123_s11 + $0x11d0] sm:$0xff]  ;;  %v960_v49 = vld [vmem:[%s14123_s11 + $0x1338] sm:$0xff] }
 0x3e0   : > { %v919_v59 = vld [vmem:[%s14123_s11 + $0x11f0] sm:$0xff] }
 0x3e1   : > { %7941 = vmatmul.mubr.bf16.vlgmr.msra.gmra.mrb[4].mxu0 %v14477_v22  ;;  %8310 = vmatmul.mubr.bf16.vlgmr.msra.gmra.mrb[4].mxu1 %v14477_v22  ;;  %v11948_v22 = vcombine.low %v875_v41, %v879_v9  ;;  %v924_v41 = vld [vmem:[%s14123_s11 + $0x1218] sm:$0xff]  ;;  %v11988_v11 = vcombine.low %v915_v58, %v919_v59 }
 0x3e2   : > { %7950 = vmatpush1.bf16.msra.mxu0 %v11932_v4  ;;  %8319 = vmatpush1.bf16.msra.mxu1 %v11934_v5  ;;  %v11989_v4 = vcombine.high %v915_v58, %v919_v59  ;;  %v11991_v5 = vcombine.high %v916_v61, %v920_v63  ;;  %v928_v9 = vld [vmem:[%s14123_s11 + $0x1238] sm:$0xff]  ;;  %v12030_v63 = vcombine.low %v956_v48, %v960_v49 }
 0x3e3   : > { %7951 = vmatprep.subr.bf16.mxu0 %v11941_v6  ;;  %8320 = vmatprep.subr.bf16.mxu1 %v11943_v7  ;;  %v923_v6 = vld [vmem:[%s14123_s11 + $0x1210] sm:$0xff]  ;;  %v964_v58 = vld [vmem:[%s14123_s11 + $0x1358] sm:$0xff] }
 0x3e4   : > { %7981 = vmatprep.mubr.bf16.mxu0 %v14482_v30  ;;  %8350 = vmatprep.mubr.bf16.mxu1 %v14482_v30  ;;  %v11958_v30 = vcombine.low %v884_v27, %v888_v29  ;;  %v927_v7 = vld [vmem:[%s14123_s11 + $0x1230] sm:$0xff]  ;;  %v11998_v29 = vcombine.low %v924_v41, %v928_v9  ;;  %v968_v59 = vld [vmem:[%s14123_s11 + $0x1378] sm:$0xff] }
 0x3e5   : > { %v11996_v27 = vcombine.low %v923_v6, %v927_v7 }
 0x3e6   : > { %7952 = vmatpush1.bf16.msra.mxu0 %v11940_v16  ;;  %8321 = vmatpush1.bf16.msra.mxu1 %v11942_v2  ;;  %v11997_v16 = vcombine.high %v923_v6, %v927_v7  ;;  %v11999_v2 = vcombine.high %v924_v41, %v928_v9  ;;  %v972_v6 = vld [vmem:[%s14123_s11 + $0x1398] sm:$0xff]  ;;  %v12038_v9 = vcombine.low %v964_v58, %v968_v59 }
 0x3e7   : > { %7953 = vmatprep.subr.bf16.mxu0 %v11949_v51  ;;  %8322 = vmatprep.subr.bf16.mxu1 %v11951_v21  ;;  %v931_v51 = vld [vmem:[%s14123_s11 + $0x1250] sm:$0xff]  ;;  %v976_v7 = vld [vmem:[%s14123_s11 + $0x13b8] sm:$0xff] }
 0x3e8   : > { %v935_v21 = vld [vmem:[%s14123_s11 + $0x1270] sm:$0xff] }
 0x3e9   : > { %v12004_v34 = vcombine.low %v931_v51, %v935_v21 }
 0x3ea   : > { %7954 = vmatpush1.bf16.msra.mxu0 %v11948_v22  ;;  %8323 = vmatpush1.bf16.msra.mxu1 %v11950_v31  ;;  %v12005_v22 = vcombine.high %v931_v51, %v935_v21  ;;  %v12007_v31 = vcombine.high %v932_v25, %v936_v26  ;;  %v980_v51 = vld [vmem:[%s14123_s11 + $0x13d8] sm:$0xff]  ;;  %v12046_v26 = vcombine.low %v972_v6, %v976_v7 }
 0x3eb   : > { %7955 = vmatprep.subr.bf16.mxu0 %v11957_v60  ;;  %8324 = vmatprep.subr.bf16.mxu1 %v11959_v24  ;;  %v939_v60 = vld [vmem:[%s14123_s11 + $0x1290] sm:$0xff]  ;;  %v984_v21 = vld [vmem:[%s14123_s11 + $0x13f8] sm:$0xff] }
 0x3ec   : > { %v943_v24 = vld [vmem:[%s14123_s11 + $0x12b0] sm:$0xff] }
 0x3ed   : > { %v12012_v62 = vcombine.low %v939_v60, %v943_v24 }
 0x3ee   : > { %7956 = vmatpush1.bf16.msra.mxu0 %v11956_v36  ;;  %8325 = vmatpush1.bf16.msra.mxu1 %v11958_v30  ;;  %v12013_v36 = vcombine.high %v939_v60, %v943_v24  ;;  %v12015_v30 = vcombine.high %v940_v54, %v944_v33  ;;  %v988_v60 = vld [vmem:[%s14123_s11 + $0x1418] sm:$0xff]  ;;  %v12054_v33 = vcombine.low %v980_v51, %v984_v21 }
 0x3ef   : > { %7957 = vmatprep.subr.bf16.mxu0 %v11965_v37  ;;  %8326 = vmatprep.subr.bf16.mxu1 %v11967_v39  ;;  %v947_v37 = vld [vmem:[%s14123_s11 + $0x12d0] sm:$0xff]  ;;  %v992_v24 = vld [vmem:[%s14123_s11 + $0x1438] sm:$0xff] }
 0x3f0   : > { %v951_v39 = vld [vmem:[%s14123_s11 + $0x12f0] sm:$0xff] }
 0x3f1   : > { %v12020_v50 = vcombine.low %v947_v37, %v951_v39 }
 0x3f2   : > { %7958 = vmatpush1.bf16.msra.mxu0 %v11964_v43  ;;  %8327 = vmatpush1.bf16.msra.mxu1 %v11966_v45  ;;  %v12021_v43 = vcombine.high %v947_v37, %v951_v39  ;;  %v12023_v45 = vcombine.high %v948_v40, %v952_v0  ;;  %v996_v37 = vld [vmem:[%s14123_s11 + $0x1458] sm:$0xff]  ;;  %v12062_v0 = vcombine.low %v988_v60, %v992_v24 }
 0x3f3   : > { %7959 = vmatprep.subr.bf16.mxu0 %v11973_v46  ;;  %8328 = vmatprep.subr.bf16.mxu1 %v11975_v47  ;;  %v955_v46 = vld [vmem:[%s14123_s11 + $0x1310] sm:$0xff]  ;;  %v1000_v39 = vld [vmem:[%s14123_s11 + $0x1478] sm:$0xff] }
 0x3f4   : > { %v959_v47 = vld [vmem:[%s14123_s11 + $0x1330] sm:$0xff] }
 0x3f5   : > { %v12028_v61 = vcombine.low %v955_v46, %v959_v47 }
 0x3f6   : > { %7960 = vmatpush1.bf16.msra.mxu0 %v11972_v53  ;;  %8329 = vmatpush1.bf16.msra.mxu1 %v11974_v56  ;;  %v12029_v53 = vcombine.high %v955_v46, %v959_v47  ;;  %v12031_v56 = vcombine.high %v956_v48, %v960_v49  ;;  %v1004_v46 = vld [vmem:[%s14123_s11 + $0x1498] sm:$0xff]  ;;  %v12070_v49 = vcombine.low %v996_v37, %v1000_v39 }
 0x3f7   : > { %7961 = vmatprep.subr.bf16.mxu0 %v11981_v57  ;;  %8330 = vmatprep.subr.bf16.mxu1 %v11983_v10  ;;  %v963_v57 = vld [vmem:[%s14123_s11 + $0x1350] sm:$0xff]  ;;  %v1008_v47 = vld [vmem:[%s14123_s11 + $0x14b8] sm:$0xff] }
 0x3f8   : > { %v967_v10 = vld [vmem:[%s14123_s11 + $0x1370] sm:$0xff] }
 0x3f9   : > { %v12036_v41 = vcombine.low %v963_v57, %v967_v10 }
 0x3fa   : > { %7962 = vmatpush1.bf16.msra.mxu0 %v11980_v12  ;;  %8331 = vmatpush1.bf16.msra.mxu1 %v11982_v3  ;;  %v12037_v12 = vcombine.high %v963_v57, %v967_v10  ;;  %v12039_v3 = vcombine.high %v964_v58, %v968_v59  ;;  %v1012_v57 = vld [vmem:[%s14123_s11 + $0x14d8] sm:$0xff]  ;;  %v12078_v58 = vcombine.low %v1004_v46, %v1008_v47 }
 0x3fb   : > { %7963 = vmatprep.subr.bf16.mxu0 %v11989_v4  ;;  %8332 = vmatprep.subr.bf16.mxu1 %v11991_v5  ;;  %v971_v4 = vld [vmem:[%s14123_s11 + $0x1390] sm:$0xff]  ;;  %v1016_v10 = vld [vmem:[%s14123_s11 + $0x14f8] sm:$0xff] }
 0x3fc   : > { %v975_v5 = vld [vmem:[%s14123_s11 + $0x13b0] sm:$0xff] }
 0x3fd   : > { %v12044_v25 = vcombine.low %v971_v4, %v975_v5 }
 0x3fe   : > { %7964 = vmatpush1.bf16.msra.mxu0 %v11988_v11  ;;  %8333 = vmatpush1.bf16.msra.mxu1 %v11990_v14  ;;  %v12045_v11 = vcombine.high %v971_v4, %v975_v5  ;;  %v12047_v14 = vcombine.high %v972_v6, %v976_v7  ;;  %v1024_v4 = vld [vmem:[%s14123_s11 + $0x1538] sm:$0xff] }
 0x3ff   : > { %7965 = vmatprep.subr.bf16.mxu0 %v11997_v16  ;;  %8334 = vmatprep.subr.bf16.mxu1 %v11999_v2  ;;  %v979_v16 = vld [vmem:[%s14123_s11 + $0x13d0] sm:$0xff] }
 0x400   : > { %v983_v2 = vld [vmem:[%s14123_s11 + $0x13f0] sm:$0xff] }
 0x401   : > { %v12052_v54 = vcombine.low %v979_v16, %v983_v2 }
 0x402   : > { %7966 = vmatpush1.bf16.msra.mxu0 %v11996_v27  ;;  %8335 = vmatpush1.bf16.msra.mxu1 %v11998_v29  ;;  %v12053_v27 = vcombine.high %v979_v16, %v983_v2  ;;  %v12055_v29 = vcombine.high %v980_v51, %v984_v21 }
 0x403   : > { %7967 = vmatprep.subr.bf16.mxu0 %v12005_v22  ;;  %8336 = vmatprep.subr.bf16.mxu1 %v12007_v31  ;;  %v987_v22 = vld [vmem:[%s14123_s11 + $0x1410] sm:$0xff] }
 0x404   : > { %v991_v31 = vld [vmem:[%s14123_s11 + $0x1430] sm:$0xff] }
 0x405   : > { %v12060_v40 = vcombine.low %v987_v22, %v991_v31 }
 0x406   : > { %7968 = vmatpush1.bf16.msra.mxu0 %v12004_v34  ;;  %8337 = vmatpush1.bf16.msra.mxu1 %v12006_v35  ;;  %v12061_v34 = vcombine.high %v987_v22, %v991_v31  ;;  %v12063_v35 = vcombine.high %v988_v60, %v992_v24 }
 0x407   : > { %7969 = vmatprep.subr.bf16.mxu0 %v12013_v36  ;;  %8338 = vmatprep.subr.bf16.mxu1 %v12015_v30  ;;  %v995_v36 = vld [vmem:[%s14123_s11 + $0x1450] sm:$0xff] }
 0x408   : > { %v999_v30 = vld [vmem:[%s14123_s11 + $0x1470] sm:$0xff] }
 0x409   : > { %v12068_v48 = vcombine.low %v995_v36, %v999_v30 }
 0x40a   : > { %7970 = vmatpush1.bf16.msra.mxu0 %v12012_v62  ;;  %8339 = vmatpush1.bf16.msra.mxu1 %v12014_v42  ;;  %v12069_v62 = vcombine.high %v995_v36, %v999_v30  ;;  %v12071_v42 = vcombine.high %v996_v37, %v1000_v39 }
 0x40b   : > { %7971 = vmatprep.subr.bf16.mxu0 %v12021_v43  ;;  %8340 = vmatprep.subr.bf16.mxu1 %v12023_v45  ;;  %v1003_v43 = vld [vmem:[%s14123_s11 + $0x1490] sm:$0xff] }
 0x40c   : > { %v1007_v45 = vld [vmem:[%s14123_s11 + $0x14b0] sm:$0xff] }
 0x40e   : > { %7972 = vmatpush1.bf16.msra.mxu0 %v12020_v50  ;;  %8341 = vmatpush1.bf16.msra.mxu1 %v12022_v32  ;;  %v12077_v50 = vcombine.high %v1003_v43, %v1007_v45  ;;  %v12079_v32 = vcombine.high %v1004_v46, %v1008_v47 }
 0x40f   : > { %7973 = vmatprep.subr.bf16.mxu0 %v12029_v53  ;;  %8342 = vmatprep.subr.bf16.mxu1 %v12031_v56  ;;  %v1011_v53 = vld [vmem:[%s14123_s11 + $0x14d0] sm:$0xff] }
 0x410   : > { %v1015_v56 = vld [vmem:[%s14123_s11 + $0x14f0] sm:$0xff] }
 0x411   : > { %v12085_v59 = vcombine.high %v1011_v53, %v1015_v56  ;;  %v12084_v5 = vcombine.low %v1011_v53, %v1015_v56 }
 0x412   : > { %7974 = vmatpush1.bf16.msra.mxu0 %v12028_v61  ;;  %8343 = vmatpush1.bf16.msra.mxu1 %v12030_v63  ;;  %v12087_v61 = vcombine.high %v1012_v57, %v1016_v10  ;;  %v1019_v63 = vld [vmem:[%s14123_s11 + $0x1510] sm:$0xff] }
 0x413   : > { %7975 = vmatprep.subr.bf16.mxu0 %v12037_v12  ;;  %8344 = vmatprep.subr.bf16.mxu1 %v12039_v3  ;;  %v1023_v12 = vld [vmem:[%s14123_s11 + $0x1530] sm:$0xff]  ;;  %v1020_v3 = vld [vmem:[%s14123_s11 + $0x1518] sm:$0xff] }
 0x414   : > { %v12093_v6 = vcombine.high %v1019_v63, %v1023_v12  ;;  %v12095_v7 = vcombine.high %v1020_v3, %v1024_v4  ;;  %v12092_v16 = vcombine.low %v1019_v63, %v1023_v12  ;;  %v12094_v2 = vcombine.low %v1020_v3, %v1024_v4 }
 0x416   : > { %7976 = vmatpush1.bf16.msra.mxu0 %v12036_v41  ;;  %8345 = vmatpush1.bf16.msra.mxu1 %v12038_v9  ;;  %v1027_v41 = vld [vmem:[%s14123_s11 + $0x1550] sm:$0xff] }
 0x417   : > { %7977 = vmatprep.subr.bf16.mxu0 %v12045_v11  ;;  %8346 = vmatprep.subr.bf16.mxu1 %v12047_v14  ;;  %v1031_v9 = vld [vmem:[%s14123_s11 + $0x1570] sm:$0xff]  ;;  %v1028_v11 = vld [vmem:[%s14123_s11 + $0x1558] sm:$0xff] }
 0x418   : > { %v1032_v14 = vld [vmem:[%s14123_s11 + $0x1578] sm:$0xff]  ;;  %v12101_v51 = vcombine.high %v1027_v41, %v1031_v9  ;;  %v12100_v22 = vcombine.low %v1027_v41, %v1031_v9 }
 0x419   : > { %v12103_v21 = vcombine.high %v1028_v11, %v1032_v14  ;;  %v12102_v31 = vcombine.low %v1028_v11, %v1032_v14 }
 0x41a   : > { %7978 = vmatpush1.bf16.msra.mxu0 %v12044_v25  ;;  %8347 = vmatpush1.bf16.msra.mxu1 %v12046_v26  ;;  %v1035_v25 = vld [vmem:[%s14123_s11 + $0x1590] sm:$0xff] }
 0x41b   : > { %7979 = vmatprep.subr.bf16.mxu0 %v12053_v27  ;;  %8348 = vmatprep.subr.bf16.mxu1 %v12055_v29  ;;  %v1039_v26 = vld [vmem:[%s14123_s11 + $0x15b0] sm:$0xff]  ;;  %v1036_v27 = vld [vmem:[%s14123_s11 + $0x1598] sm:$0xff] }
 0x41c   : > { %v1040_v29 = vld [vmem:[%s14123_s11 + $0x15b8] sm:$0xff]  ;;  %v12109_v60 = vcombine.high %v1035_v25, %v1039_v26  ;;  %v12108_v36 = vcombine.low %v1035_v25, %v1039_v26 }
 0x41d   : > { %v12111_v24 = vcombine.high %v1036_v27, %v1040_v29  ;;  %v12110_v30 = vcombine.low %v1036_v27, %v1040_v29 }
 0x41e   : > { %7980 = vmatpush1.bf16.msra.mxu0 %v12052_v54  ;;  %8349 = vmatpush1.bf16.msra.mxu1 %v12054_v33  ;;  %v1043_v54 = vld [vmem:[%s14123_s11 + $0x15d0] sm:$0xff] }
 0x41f   : > { %7990 = vmatprep.subr.bf16.mxu0 %v12061_v34  ;;  %8359 = vmatprep.subr.bf16.mxu1 %v12063_v35  ;;  %v1047_v33 = vld [vmem:[%s14123_s11 + $0x15f0] sm:$0xff]  ;;  %v1044_v34 = vld [vmem:[%s14123_s11 + $0x15d8] sm:$0xff] }
 0x420   : > { %v1048_v35 = vld [vmem:[%s14123_s11 + $0x15f8] sm:$0xff]  ;;  %v12117_v37 = vcombine.high %v1043_v54, %v1047_v33 }
 0x421   : > { %7982 = vmatmul.mubr.bf16.vlgmr.msra.gmra.mrb[4].mxu0 %v14550_v52  ;;  %8351 = vmatmul.mubr.bf16.vlgmr.msra.gmra.mrb[4].mxu1 %v14550_v52  ;;  %v12076_v52 = vcombine.low %v1003_v43, %v1007_v45  ;;  %v12119_v39 = vcombine.high %v1044_v34, %v1048_v35  ;;  %v12116_v43 = vcombine.low %v1043_v54, %v1047_v33 }
 0x422   : > { %7991 = vmatpush1.bf16.msra.mxu0 %v12060_v40  ;;  %8360 = vmatpush1.bf16.msra.mxu1 %v12062_v0  ;;  %v1051_v40 = vld [vmem:[%s14123_s11 + $0x1610] sm:$0xff]  ;;  %v12118_v45 = vcombine.low %v1044_v34, %v1048_v35 }
 0x423   : > { %7992 = vmatprep.subr.bf16.mxu0 %v12069_v62  ;;  %8361 = vmatprep.subr.bf16.mxu1 %v12071_v42  ;;  %v1055_v0 = vld [vmem:[%s14123_s11 + $0x1630] sm:$0xff]  ;;  %v1052_v62 = vld [vmem:[%s14123_s11 + $0x1618] sm:$0xff] }
 0x424   : > { %8022 = vmatprep.mubr.bf16.mxu0 %v14558_v1  ;;  %8391 = vmatprep.mubr.bf16.mxu1 %v14558_v1  ;;  %v12086_v1 = vcombine.low %v1012_v57, %v1016_v10  ;;  %v1056_v42 = vld [vmem:[%s14123_s11 + $0x1638] sm:$0xff]  ;;  %v12125_v46 = vcombine.high %v1051_v40, %v1055_v0  ;;  %v12124_v53 = vcombine.low %v1051_v40, %v1055_v0 }
 0x425   : > { %v12127_v47 = vcombine.high %v1052_v62, %v1056_v42  ;;  %v12126_v56 = vcombine.low %v1052_v62, %v1056_v42 }
 0x426   : > { %7993 = vmatpush1.bf16.msra.mxu0 %v12068_v48  ;;  %8362 = vmatpush1.bf16.msra.mxu1 %v12070_v49  ;;  %v1059_v48 = vld [vmem:[%s14123_s11 + $0x1650] sm:$0xff] }
 0x427   : > { %7994 = vmatprep.subr.bf16.mxu0 %v12077_v50  ;;  %8363 = vmatprep.subr.bf16.mxu1 %v12079_v32  ;;  %v1063_v49 = vld [vmem:[%s14123_s11 + $0x1670] sm:$0xff]  ;;  %v1060_v50 = vld [vmem:[%s14123_s11 + $0x1658] sm:$0xff] }
 0x428   : > { %v1064_v32 = vld [vmem:[%s14123_s11 + $0x1678] sm:$0xff]  ;;  %v12133_v57 = vcombine.high %v1059_v48, %v1063_v49  ;;  %v12132_v63 = vcombine.low %v1059_v48, %v1063_v49 }
 0x429   : > { %v12135_v10 = vcombine.high %v1060_v50, %v1064_v32  ;;  %v12134_v12 = vcombine.low %v1060_v50, %v1064_v32 }
 0x42a   : > { %7995 = vmatpush1.bf16.msra.mxu0 %v12076_v52  ;;  %8364 = vmatpush1.bf16.msra.mxu1 %v12078_v58  ;;  %v1067_v52 = vld [vmem:[%s14123_s11 + $0x1690] sm:$0xff] }
 0x42b   : > { %7996 = vmatprep.subr.bf16.mxu0 %v12085_v59  ;;  %8365 = vmatprep.subr.bf16.mxu1 %v12087_v61  ;;  %v1071_v58 = vld [vmem:[%s14123_s11 + $0x16b0] sm:$0xff]  ;;  %v1068_v59 = vld [vmem:[%s14123_s11 + $0x1698] sm:$0xff] }
 0x42c   : > { %v1072_v61 = vld [vmem:[%s14123_s11 + $0x16b8] sm:$0xff]  ;;  %v12141_v3 = vcombine.high %v1067_v52, %v1071_v58  ;;  %v12140_v41 = vcombine.low %v1067_v52, %v1071_v58 }
 0x42d   : > { %v12143_v4 = vcombine.high %v1068_v59, %v1072_v61  ;;  %v12142_v9 = vcombine.low %v1068_v59, %v1072_v61 }
 0x42e   : > { %7997 = vmatpush1.bf16.msra.mxu0 %v12084_v5  ;;  %8366 = vmatpush1.bf16.msra.mxu1 %v12086_v1  ;;  %v1075_v5 = vld [vmem:[%s14123_s11 + $0x16d0] sm:$0xff] }
 0x42f   : > { %7998 = vmatprep.subr.bf16.mxu0 %v12093_v6  ;;  %8367 = vmatprep.subr.bf16.mxu1 %v12095_v7  ;;  %v1079_v1 = vld [vmem:[%s14123_s11 + $0x16f0] sm:$0xff]  ;;  %v1076_v6 = vld [vmem:[%s14123_s11 + $0x16d8] sm:$0xff] }
 0x430   : > { %v1080_v7 = vld [vmem:[%s14123_s11 + $0x16f8] sm:$0xff]  ;;  %v12149_v11 = vcombine.high %v1075_v5, %v1079_v1  ;;  %v12148_v25 = vcombine.low %v1075_v5, %v1079_v1 }
 0x431   : > { %v12151_v14 = vcombine.high %v1076_v6, %v1080_v7  ;;  %v12150_v26 = vcombine.low %v1076_v6, %v1080_v7 }
 0x432   : > { %7999 = vmatpush1.bf16.msra.mxu0 %v12092_v16  ;;  %8368 = vmatpush1.bf16.msra.mxu1 %v12094_v2  ;;  %v1083_v16 = vld [vmem:[%s14123_s11 + $0x1710] sm:$0xff] }
 0x433   : > { %8000 = vmatprep.subr.bf16.mxu0 %v12101_v51  ;;  %8369 = vmatprep.subr.bf16.mxu1 %v12103_v21  ;;  %v1087_v2 = vld [vmem:[%s14123_s11 + $0x1730] sm:$0xff]  ;;  %v1084_v51 = vld [vmem:[%s14123_s11 + $0x1718] sm:$0xff] }
 0x434   : > { %v1088_v21 = vld [vmem:[%s14123_s11 + $0x1738] sm:$0xff]  ;;  %v12157_v27 = vcombine.high %v1083_v16, %v1087_v2  ;;  %v12156_v54 = vcombine.low %v1083_v16, %v1087_v2 }
 0x435   : > { %v12159_v29 = vcombine.high %v1084_v51, %v1088_v21  ;;  %v12158_v33 = vcombine.low %v1084_v51, %v1088_v21 }
 0x436   : > { %8001 = vmatpush1.bf16.msra.mxu0 %v12100_v22  ;;  %8370 = vmatpush1.bf16.msra.mxu1 %v12102_v31  ;;  %v1091_v22 = vld [vmem:[%s14123_s11 + $0x1750] sm:$0xff] }
 0x437   : > { %8002 = vmatprep.subr.bf16.mxu0 %v12109_v60  ;;  %8371 = vmatprep.subr.bf16.mxu1 %v12111_v24  ;;  %v1095_v31 = vld [vmem:[%s14123_s11 + $0x1770] sm:$0xff]  ;;  %v1092_v60 = vld [vmem:[%s14123_s11 + $0x1758] sm:$0xff] }
 0x438   : > { %v1096_v24 = vld [vmem:[%s14123_s11 + $0x1778] sm:$0xff]  ;;  %v12165_v34 = vcombine.high %v1091_v22, %v1095_v31  ;;  %v12164_v40 = vcombine.low %v1091_v22, %v1095_v31 }
 0x439   : > { %v12167_v35 = vcombine.high %v1092_v60, %v1096_v24  ;;  %v12166_v0 = vcombine.low %v1092_v60, %v1096_v24  ;;  %v1147_v24 = vld [vmem:[%s14123_s11 + $0x1910] sm:$0xff] }
 0x43a   : > { %8003 = vmatpush1.bf16.msra.mxu0 %v12108_v36  ;;  %8372 = vmatpush1.bf16.msra.mxu1 %v12110_v30  ;;  %v1099_v36 = vld [vmem:[%s14123_s11 + $0x1790] sm:$0xff] }
 0x43b   : > { %8004 = vmatprep.subr.bf16.mxu0 %v12117_v37  ;;  %8373 = vmatprep.subr.bf16.mxu1 %v12119_v39  ;;  %v1103_v30 = vld [vmem:[%s14123_s11 + $0x17b0] sm:$0xff]  ;;  %v1100_v37 = vld [vmem:[%s14123_s11 + $0x1798] sm:$0xff] }
 0x43c   : > { %v1104_v39 = vld [vmem:[%s14123_s11 + $0x17b8] sm:$0xff]  ;;  %v12173_v62 = vcombine.high %v1099_v36, %v1103_v30  ;;  %v12172_v48 = vcombine.low %v1099_v36, %v1103_v30 }
 0x43d   : > { %v12175_v42 = vcombine.high %v1100_v37, %v1104_v39  ;;  %v12174_v49 = vcombine.low %v1100_v37, %v1104_v39  ;;  %v1155_v37 = vld [vmem:[%s14123_s11 + $0x1950] sm:$0xff] }
 0x43e   : > { %8005 = vmatpush1.bf16.msra.mxu0 %v12116_v43  ;;  %8374 = vmatpush1.bf16.msra.mxu1 %v12118_v45  ;;  %v1107_v43 = vld [vmem:[%s14123_s11 + $0x17d0] sm:$0xff] }
 0x43f   : > { %8006 = vmatprep.subr.bf16.mxu0 %v12125_v46  ;;  %8375 = vmatprep.subr.bf16.mxu1 %v12127_v47  ;;  %v1111_v45 = vld [vmem:[%s14123_s11 + $0x17f0] sm:$0xff]  ;;  %v1108_v46 = vld [vmem:[%s14123_s11 + $0x17d8] sm:$0xff] }
 0x440   : > { %v1112_v47 = vld [vmem:[%s14123_s11 + $0x17f8] sm:$0xff]  ;;  %v12181_v50 = vcombine.high %v1107_v43, %v1111_v45  ;;  %v12180_v52 = vcombine.low %v1107_v43, %v1111_v45  ;;  %v1159_v39 = vld [vmem:[%s14123_s11 + $0x1970] sm:$0xff] }
 0x441   : > { %v12183_v32 = vcombine.high %v1108_v46, %v1112_v47  ;;  %v12182_v58 = vcombine.low %v1108_v46, %v1112_v47  ;;  %v12229_v43 = vcombine.high %v1155_v37, %v1159_v39  ;;  %v1163_v46 = vld [vmem:[%s14123_s11 + $0x1990] sm:$0xff] }
 0x442   : > { %8007 = vmatpush1.bf16.msra.mxu0 %v12124_v53  ;;  %8376 = vmatpush1.bf16.msra.mxu1 %v12126_v56  ;;  %v1115_v53 = vld [vmem:[%s14123_s11 + $0x1810] sm:$0xff] }
 0x443   : > { %8008 = vmatprep.subr.bf16.mxu0 %v12133_v57  ;;  %8377 = vmatprep.subr.bf16.mxu1 %v12135_v10  ;;  %v1119_v56 = vld [vmem:[%s14123_s11 + $0x1830] sm:$0xff]  ;;  %v1116_v57 = vld [vmem:[%s14123_s11 + $0x1818] sm:$0xff] }
 0x444   : > { %v1120_v10 = vld [vmem:[%s14123_s11 + $0x1838] sm:$0xff]  ;;  %v12189_v59 = vcombine.high %v1115_v53, %v1119_v56  ;;  %v12188_v5 = vcombine.low %v1115_v53, %v1119_v56  ;;  %v1167_v47 = vld [vmem:[%s14123_s11 + $0x19b0] sm:$0xff] }
 0x445   : > { %v12191_v61 = vcombine.high %v1116_v57, %v1120_v10  ;;  %v12190_v1 = vcombine.low %v1116_v57, %v1120_v10  ;;  %v12237_v53 = vcombine.high %v1163_v46, %v1167_v47  ;;  %v1171_v57 = vld [vmem:[%s14123_s11 + $0x19d0] sm:$0xff] }
 0x446   : > { %8009 = vmatpush1.bf16.msra.mxu0 %v12132_v63  ;;  %8378 = vmatpush1.bf16.msra.mxu1 %v12134_v12  ;;  %v1123_v63 = vld [vmem:[%s14123_s11 + $0x1850] sm:$0xff] }
 0x447   : > { %8010 = vmatprep.subr.bf16.mxu0 %v12141_v3  ;;  %8379 = vmatprep.subr.bf16.mxu1 %v12143_v4  ;;  %v1127_v12 = vld [vmem:[%s14123_s11 + $0x1870] sm:$0xff]  ;;  %v1124_v3 = vld [vmem:[%s14123_s11 + $0x1858] sm:$0xff] }
 0x448   : > { %v1128_v4 = vld [vmem:[%s14123_s11 + $0x1878] sm:$0xff]  ;;  %v12197_v6 = vcombine.high %v1123_v63, %v1127_v12  ;;  %v12196_v16 = vcombine.low %v1123_v63, %v1127_v12  ;;  %v1175_v10 = vld [vmem:[%s14123_s11 + $0x19f0] sm:$0xff] }
 0x449   : > { %v12199_v7 = vcombine.high %v1124_v3, %v1128_v4  ;;  %v12198_v2 = vcombine.low %v1124_v3, %v1128_v4  ;;  %v12245_v63 = vcombine.high %v1171_v57, %v1175_v10  ;;  %v1179_v3 = vld [vmem:[%s14123_s11 + $0x1a10] sm:$0xff] }
 0x44a   : > { %8011 = vmatpush1.bf16.msra.mxu0 %v12140_v41  ;;  %8380 = vmatpush1.bf16.msra.mxu1 %v12142_v9  ;;  %v1131_v41 = vld [vmem:[%s14123_s11 + $0x1890] sm:$0xff] }
 0x44b   : > { %8012 = vmatprep.subr.bf16.mxu0 %v12149_v11  ;;  %8381 = vmatprep.subr.bf16.mxu1 %v12151_v14  ;;  %v1135_v9 = vld [vmem:[%s14123_s11 + $0x18b0] sm:$0xff]  ;;  %v1132_v11 = vld [vmem:[%s14123_s11 + $0x1898] sm:$0xff] }
 0x44c   : > { %v1136_v14 = vld [vmem:[%s14123_s11 + $0x18b8] sm:$0xff]  ;;  %v12205_v51 = vcombine.high %v1131_v41, %v1135_v9  ;;  %v1183_v4 = vld [vmem:[%s14123_s11 + $0x1a30] sm:$0xff] }
 0x44d   : > { %v12207_v21 = vcombine.high %v1132_v11, %v1136_v14  ;;  %v12206_v22 = vcombine.low %v1132_v11, %v1136_v14  ;;  %v1187_v11 = vld [vmem:[%s14123_s11 + $0x1a50] sm:$0xff] }
 0x44e   : > { %8013 = vmatpush1.bf16.msra.mxu0 %v12148_v25  ;;  %8382 = vmatpush1.bf16.msra.mxu1 %v12150_v26  ;;  %v1139_v25 = vld [vmem:[%s14123_s11 + $0x18d0] sm:$0xff] }
 0x44f   : > { %8014 = vmatprep.subr.bf16.mxu0 %v12157_v27  ;;  %8383 = vmatprep.subr.bf16.mxu1 %v12159_v29  ;;  %v1143_v26 = vld [vmem:[%s14123_s11 + $0x18f0] sm:$0xff]  ;;  %v1140_v27 = vld [vmem:[%s14123_s11 + $0x18d8] sm:$0xff] }
 0x450   : > { %v1144_v29 = vld [vmem:[%s14123_s11 + $0x18f8] sm:$0xff]  ;;  %v12213_v31 = vcombine.high %v1139_v25, %v1143_v26  ;;  %v1191_v14 = vld [vmem:[%s14123_s11 + $0x1a70] sm:$0xff] }
 0x451   : > { %v12215_v60 = vcombine.high %v1140_v27, %v1144_v29 }
 0x452   : > { %8015 = vmatpush1.bf16.msra.mxu0 %v12156_v54  ;;  %8384 = vmatpush1.bf16.msra.mxu1 %v12158_v33  ;;  %v1151_v54 = vld [vmem:[%s14123_s11 + $0x1930] sm:$0xff]  ;;  %v1148_v33 = vld [vmem:[%s14123_s11 + $0x1918] sm:$0xff] }
 0x453   : > { %8016 = vmatprep.subr.bf16.mxu0 %v12165_v34  ;;  %8385 = vmatprep.subr.bf16.mxu1 %v12167_v35  ;;  %v1152_v34 = vld [vmem:[%s14123_s11 + $0x1938] sm:$0xff]  ;;  %v12212_v35 = vcombine.low %v1139_v25, %v1143_v26  ;;  %v12221_v36 = vcombine.high %v1147_v24, %v1151_v54  ;;  %v12261_v25 = vcombine.high %v1187_v11, %v1191_v14 }
 0x454   : > { %v12223_v30 = vcombine.high %v1148_v33, %v1152_v34 }
 0x456   : > { %8017 = vmatpush1.bf16.msra.mxu0 %v12164_v40  ;;  %8386 = vmatpush1.bf16.msra.mxu1 %v12166_v0  ;;  %v1156_v40 = vld [vmem:[%s14123_s11 + $0x1958] sm:$0xff] }
 0x457   : > { %8018 = vmatprep.subr.bf16.mxu0 %v12173_v62  ;;  %8387 = vmatprep.subr.bf16.mxu1 %v12175_v42  ;;  %v1160_v0 = vld [vmem:[%s14123_s11 + $0x1978] sm:$0xff]  ;;  %v12220_v62 = vcombine.low %v1147_v24, %v1151_v54  ;;  %v12222_v42 = vcombine.low %v1148_v33, %v1152_v34  ;;  %v1203_v33 = vld [vmem:[%s14123_s11 + $0x1ad0] sm:$0xff] }
 0x458   : > { %v12231_v45 = vcombine.high %v1156_v40, %v1160_v0  ;;  %v1207_v34 = vld [vmem:[%s14123_s11 + $0x1af0] sm:$0xff] }
 0x45a   : > { %8019 = vmatpush1.bf16.msra.mxu0 %v12172_v48  ;;  %8388 = vmatpush1.bf16.msra.mxu1 %v12174_v49  ;;  %v1164_v48 = vld [vmem:[%s14123_s11 + $0x1998] sm:$0xff] }
 0x45b   : > { %8020 = vmatprep.subr.bf16.mxu0 %v12181_v50  ;;  %8389 = vmatprep.subr.bf16.mxu1 %v12183_v32  ;;  %v1168_v49 = vld [vmem:[%s14123_s11 + $0x19b8] sm:$0xff]  ;;  %v12228_v50 = vcombine.low %v1155_v37, %v1159_v39  ;;  %v12230_v32 = vcombine.low %v1156_v40, %v1160_v0  ;;  %v12277_v37 = vcombine.high %v1203_v33, %v1207_v34  ;;  %v1211_v40 = vld [vmem:[%s14123_s11 + $0x1b10] sm:$0xff] }
 0x45c   : > { %v12239_v56 = vcombine.high %v1164_v48, %v1168_v49  ;;  %v1215_v0 = vld [vmem:[%s14123_s11 + $0x1b30] sm:$0xff] }
 0x45e   : > { %8021 = vmatpush1.bf16.msra.mxu0 %v12180_v52  ;;  %8390 = vmatpush1.bf16.msra.mxu1 %v12182_v58  ;;  %v1172_v52 = vld [vmem:[%s14123_s11 + $0x19d8] sm:$0xff] }
 0x45f   : > { %8031 = vmatprep.subr.bf16.mxu0 %v12189_v59  ;;  %8400 = vmatprep.subr.bf16.mxu1 %v12191_v61  ;;  %v1176_v58 = vld [vmem:[%s14123_s11 + $0x19f8] sm:$0xff]  ;;  %v12236_v59 = vcombine.low %v1163_v46, %v1167_v47  ;;  %v12238_v61 = vcombine.low %v1164_v48, %v1168_v49  ;;  %v12285_v46 = vcombine.high %v1211_v40, %v1215_v0  ;;  %v1219_v48 = vld [vmem:[%s14123_s11 + $0x1b50] sm:$0xff] }
 0x460   : > { %v12247_v12 = vcombine.high %v1172_v52, %v1176_v58  ;;  %v1223_v49 = vld [vmem:[%s14123_s11 + $0x1b70] sm:$0xff] }
 0x461   : > { %8023 = vmatmul.mubr.bf16.vlgmr.msra.gmra.mrb[4].mxu0 %v14633_v28  ;;  %8392 = vmatmul.mubr.bf16.vlgmr.msra.gmra.mrb[4].mxu1 %v14633_v28  ;;  %v12204_v28 = vcombine.low %v1131_v41, %v1135_v9  ;;  %v12253_v41 = vcombine.high %v1179_v3, %v1183_v4 }
 0x462   : > { %8032 = vmatpush1.bf16.msra.mxu0 %v12188_v5  ;;  %8401 = vmatpush1.bf16.msra.mxu1 %v12190_v1  ;;  %v1180_v5 = vld [vmem:[%s14123_s11 + $0x1a18] sm:$0xff] }
 0x463   : > { %8033 = vmatprep.subr.bf16.mxu0 %v12197_v6  ;;  %8402 = vmatprep.subr.bf16.mxu1 %v12199_v7  ;;  %v1184_v1 = vld [vmem:[%s14123_s11 + $0x1a38] sm:$0xff]  ;;  %v12244_v6 = vcombine.low %v1171_v57, %v1175_v10  ;;  %v12246_v7 = vcombine.low %v1172_v52, %v1176_v58  ;;  %v12293_v57 = vcombine.high %v1219_v48, %v1223_v49  ;;  %v1227_v52 = vld [vmem:[%s14123_s11 + $0x1b90] sm:$0xff] }
 0x464   : > { %8063 = vmatprep.mubr.bf16.mxu0 %v14640_v38  ;;  %8432 = vmatprep.mubr.bf16.mxu1 %v14640_v38  ;;  %v12214_v38 = vcombine.low %v1140_v27, %v1144_v29  ;;  %v12255_v9 = vcombine.high %v1180_v5, %v1184_v1  ;;  %v1195_v27 = vld [vmem:[%s14123_s11 + $0x1a90] sm:$0xff] }
 0x465   : > { %v1199_v29 = vld [vmem:[%s14123_s11 + $0x1ab0] sm:$0xff] }
 0x466   : > { %8034 = vmatpush1.bf16.msra.mxu0 %v12196_v16  ;;  %8403 = vmatpush1.bf16.msra.mxu1 %v12198_v2  ;;  %v1188_v16 = vld [vmem:[%s14123_s11 + $0x1a58] sm:$0xff]  ;;  %v12269_v24 = vcombine.high %v1195_v27, %v1199_v29  ;;  %v1231_v58 = vld [vmem:[%s14123_s11 + $0x1bb0] sm:$0xff] }
 0x467   : > { %8035 = vmatprep.subr.bf16.mxu0 %v12205_v51  ;;  %8404 = vmatprep.subr.bf16.mxu1 %v12207_v21  ;;  %v1192_v2 = vld [vmem:[%s14123_s11 + $0x1a78] sm:$0xff]  ;;  %v12252_v51 = vcombine.low %v1179_v3, %v1183_v4  ;;  %v12254_v21 = vcombine.low %v1180_v5, %v1184_v1  ;;  %v12301_v3 = vcombine.high %v1227_v52, %v1231_v58  ;;  %v1235_v5 = vld [vmem:[%s14123_s11 + $0x1bd0] sm:$0xff] }
 0x468   : > { %v12263_v26 = vcombine.high %v1188_v16, %v1192_v2  ;;  %v1239_v1 = vld [vmem:[%s14123_s11 + $0x1bf0] sm:$0xff] }
 0x46a   : > { %8036 = vmatpush1.bf16.msra.mxu0 %v12204_v28  ;;  %8405 = vmatpush1.bf16.msra.mxu1 %v12206_v22  ;;  %v1196_v28 = vld [vmem:[%s14123_s11 + $0x1a98] sm:$0xff] }
 0x46b   : > { %8037 = vmatprep.subr.bf16.mxu0 %v12213_v31  ;;  %8406 = vmatprep.subr.bf16.mxu1 %v12215_v60  ;;  %v1200_v22 = vld [vmem:[%s14123_s11 + $0x1ab8] sm:$0xff]  ;;  %v12260_v31 = vcombine.low %v1187_v11, %v1191_v14  ;;  %v12262_v60 = vcombine.low %v1188_v16, %v1192_v2  ;;  %v12309_v11 = vcombine.high %v1235_v5, %v1239_v1  ;;  %v1243_v16 = vld [vmem:[%s14123_s11 + $0x1c10] sm:$0xff] }
 0x46c   : > { %v12271_v54 = vcombine.high %v1196_v28, %v1200_v22  ;;  %v1247_v2 = vld [vmem:[%s14123_s11 + $0x1c30] sm:$0xff] }
 0x46e   : > { %8038 = vmatpush1.bf16.msra.mxu0 %v12212_v35  ;;  %8407 = vmatpush1.bf16.msra.mxu1 %v12214_v38  ;;  %v1204_v35 = vld [vmem:[%s14123_s11 + $0x1ad8] sm:$0xff] }
 0x46f   : > { %8039 = vmatprep.subr.bf16.mxu0 %v12221_v36  ;;  %8408 = vmatprep.subr.bf16.mxu1 %v12223_v30  ;;  %v1208_v38 = vld [vmem:[%s14123_s11 + $0x1af8] sm:$0xff]  ;;  %v12268_v36 = vcombine.low %v1195_v27, %v1199_v29  ;;  %v12270_v30 = vcombine.low %v1196_v28, %v1200_v22  ;;  %v12317_v27 = vcombine.high %v1243_v16, %v1247_v2  ;;  %v1251_v28 = vld [vmem:[%s14123_s11 + $0x1c50] sm:$0xff] }
 0x470   : > { %v12279_v39 = vcombine.high %v1204_v35, %v1208_v38  ;;  %v1255_v22 = vld [vmem:[%s14123_s11 + $0x1c70] sm:$0xff] }
 0x472   : > { %8040 = vmatpush1.bf16.msra.mxu0 %v12220_v62  ;;  %8409 = vmatpush1.bf16.msra.mxu1 %v12222_v42  ;;  %v1212_v62 = vld [vmem:[%s14123_s11 + $0x1b18] sm:$0xff] }
 0x473   : > { %8041 = vmatprep.subr.bf16.mxu0 %v12229_v43  ;;  %8410 = vmatprep.subr.bf16.mxu1 %v12231_v45  ;;  %v1216_v42 = vld [vmem:[%s14123_s11 + $0x1b38] sm:$0xff]  ;;  %v12276_v43 = vcombine.low %v1203_v33, %v1207_v34  ;;  %v12278_v45 = vcombine.low %v1204_v35, %v1208_v38  ;;  %v12325_v33 = vcombine.high %v1251_v28, %v1255_v22  ;;  %v1259_v35 = vld [vmem:[%s14123_s11 + $0x1c90] sm:$0xff] }
 0x474   : > { %v12287_v47 = vcombine.high %v1212_v62, %v1216_v42  ;;  %v1263_v38 = vld [vmem:[%s14123_s11 + $0x1cb0] sm:$0xff] }
 0x476   : > { %8042 = vmatpush1.bf16.msra.mxu0 %v12228_v50  ;;  %8411 = vmatpush1.bf16.msra.mxu1 %v12230_v32  ;;  %v1220_v50 = vld [vmem:[%s14123_s11 + $0x1b58] sm:$0xff] }
 0x477   : > { %8043 = vmatprep.subr.bf16.mxu0 %v12237_v53  ;;  %8412 = vmatprep.subr.bf16.mxu1 %v12239_v56  ;;  %v1224_v32 = vld [vmem:[%s14123_s11 + $0x1b78] sm:$0xff]  ;;  %v12284_v53 = vcombine.low %v1211_v40, %v1215_v0  ;;  %v12286_v56 = vcombine.low %v1212_v62, %v1216_v42  ;;  %v12333_v40 = vcombine.high %v1259_v35, %v1263_v38  ;;  %v1267_v62 = vld [vmem:[%s14123_s11 + $0x1cd0] sm:$0xff] }
 0x478   : > { %v12295_v10 = vcombine.high %v1220_v50, %v1224_v32  ;;  %v1271_v42 = vld [vmem:[%s14123_s11 + $0x1cf0] sm:$0xff] }
 0x47a   : > { %8044 = vmatpush1.bf16.msra.mxu0 %v12236_v59  ;;  %8413 = vmatpush1.bf16.msra.mxu1 %v12238_v61  ;;  %v1228_v59 = vld [vmem:[%s14123_s11 + $0x1b98] sm:$0xff] }
 0x47b   : > { %8045 = vmatprep.subr.bf16.mxu0 %v12245_v63  ;;  %8414 = vmatprep.subr.bf16.mxu1 %v12247_v12  ;;  %v1232_v61 = vld [vmem:[%s14123_s11 + $0x1bb8] sm:$0xff]  ;;  %v12292_v63 = vcombine.low %v1219_v48, %v1223_v49  ;;  %v12294_v12 = vcombine.low %v1220_v50, %v1224_v32  ;;  %v1275_v49 = vld [vmem:[%s14123_s11 + $0x1d10] sm:$0xff] }
 0x47c   : > { %v12303_v4 = vcombine.high %v1228_v59, %v1232_v61  ;;  %v1279_v50 = vld [vmem:[%s14123_s11 + $0x1d30] sm:$0xff]  ;;  %v1276_v32 = vld [vmem:[%s14123_s11 + $0x1d18] sm:$0xff] }
 0x47e   : > { %8046 = vmatpush1.bf16.msra.mxu0 %v12244_v6  ;;  %8415 = vmatpush1.bf16.msra.mxu1 %v12246_v7  ;;  %v1236_v6 = vld [vmem:[%s14123_s11 + $0x1bd8] sm:$0xff] }
 0x47f   : > { %8047 = vmatprep.subr.bf16.mxu0 %v12253_v41  ;;  %8416 = vmatprep.subr.bf16.mxu1 %v12255_v9  ;;  %v1240_v7 = vld [vmem:[%s14123_s11 + $0x1bf8] sm:$0xff]  ;;  %v12300_v41 = vcombine.low %v1227_v52, %v1231_v58  ;;  %v12302_v9 = vcombine.low %v1228_v59, %v1232_v61  ;;  %v1283_v52 = vld [vmem:[%s14123_s11 + $0x1d50] sm:$0xff] }
 0x480   : > { %v12311_v14 = vcombine.high %v1236_v6, %v1240_v7  ;;  %v1287_v58 = vld [vmem:[%s14123_s11 + $0x1d70] sm:$0xff]  ;;  %v1284_v59 = vld [vmem:[%s14123_s11 + $0x1d58] sm:$0xff] }
 0x481   : > { %v1288_v61 = vld [vmem:[%s14123_s11 + $0x1d78] sm:$0xff] }
 0x482   : > { %8048 = vmatpush1.bf16.msra.mxu0 %v12252_v51  ;;  %8417 = vmatpush1.bf16.msra.mxu1 %v12254_v21  ;;  %v1244_v51 = vld [vmem:[%s14123_s11 + $0x1c18] sm:$0xff] }
 0x483   : > { %8049 = vmatprep.subr.bf16.mxu0 %v12261_v25  ;;  %8418 = vmatprep.subr.bf16.mxu1 %v12263_v26  ;;  %v1248_v21 = vld [vmem:[%s14123_s11 + $0x1c38] sm:$0xff]  ;;  %v12308_v25 = vcombine.low %v1235_v5, %v1239_v1  ;;  %v12310_v26 = vcombine.low %v1236_v6, %v1240_v7  ;;  %v1291_v5 = vld [vmem:[%s14123_s11 + $0x1d90] sm:$0xff] }
 0x484   : > { %v12319_v29 = vcombine.high %v1244_v51, %v1248_v21  ;;  %v1295_v1 = vld [vmem:[%s14123_s11 + $0x1db0] sm:$0xff]  ;;  %v1292_v6 = vld [vmem:[%s14123_s11 + $0x1d98] sm:$0xff] }
 0x485   : > { %v1296_v7 = vld [vmem:[%s14123_s11 + $0x1db8] sm:$0xff] }
 0x486   : > { %8050 = vmatpush1.bf16.msra.mxu0 %v12260_v31  ;;  %8419 = vmatpush1.bf16.msra.mxu1 %v12262_v60  ;;  %v1252_v31 = vld [vmem:[%s14123_s11 + $0x1c58] sm:$0xff] }
 0x487   : > { %8051 = vmatprep.subr.bf16.mxu0 %v12269_v24  ;;  %8420 = vmatprep.subr.bf16.mxu1 %v12271_v54  ;;  %v1256_v60 = vld [vmem:[%s14123_s11 + $0x1c78] sm:$0xff]  ;;  %v12316_v24 = vcombine.low %v1243_v16, %v1247_v2  ;;  %v12318_v54 = vcombine.low %v1244_v51, %v1248_v21  ;;  %v1299_v16 = vld [vmem:[%s14123_s11 + $0x1dd0] sm:$0xff] }
 0x488   : > { %v12327_v34 = vcombine.high %v1252_v31, %v1256_v60  ;;  %v1303_v2 = vld [vmem:[%s14123_s11 + $0x1df0] sm:$0xff]  ;;  %v1300_v51 = vld [vmem:[%s14123_s11 + $0x1dd8] sm:$0xff] }
 0x489   : > { %v1304_v21 = vld [vmem:[%s14123_s11 + $0x1df8] sm:$0xff] }
 0x48a   : > { %8052 = vmatpush1.bf16.msra.mxu0 %v12268_v36  ;;  %8421 = vmatpush1.bf16.msra.mxu1 %v12270_v30  ;;  %v1260_v36 = vld [vmem:[%s14123_s11 + $0x1c98] sm:$0xff] }
 0x48b   : > { %8053 = vmatprep.subr.bf16.mxu0 %v12277_v37  ;;  %8422 = vmatprep.subr.bf16.mxu1 %v12279_v39  ;;  %v1264_v30 = vld [vmem:[%s14123_s11 + $0x1cb8] sm:$0xff]  ;;  %v12324_v37 = vcombine.low %v1251_v28, %v1255_v22  ;;  %v12326_v39 = vcombine.low %v1252_v31, %v1256_v60  ;;  %v1307_v28 = vld [vmem:[%s14123_s11 + $0x1e10] sm:$0xff] }
 0x48c   : > { %v12335_v0 = vcombine.high %v1260_v36, %v1264_v30  ;;  %v1311_v22 = vld [vmem:[%s14123_s11 + $0x1e30] sm:$0xff]  ;;  %v1308_v31 = vld [vmem:[%s14123_s11 + $0x1e18] sm:$0xff] }
 0x48d   : > { %v1312_v60 = vld [vmem:[%s14123_s11 + $0x1e38] sm:$0xff] }
 0x48e   : > { %8054 = vmatpush1.bf16.msra.mxu0 %v12276_v43  ;;  %8423 = vmatpush1.bf16.msra.mxu1 %v12278_v45  ;;  %v1268_v43 = vld [vmem:[%s14123_s11 + $0x1cd8] sm:$0xff] }
 0x48f   : > { %8055 = vmatprep.subr.bf16.mxu0 %v12285_v46  ;;  %8424 = vmatprep.subr.bf16.mxu1 %v12287_v47  ;;  %v1272_v45 = vld [vmem:[%s14123_s11 + $0x1cf8] sm:$0xff]  ;;  %v12334_v46 = vcombine.low %v1260_v36, %v1264_v30  ;;  %v12341_v47 = vcombine.high %v1267_v62, %v1271_v42 }
 0x490   : > { %v12343_v48 = vcombine.high %v1268_v43, %v1272_v45  ;;  %v1316_v36 = vld [vmem:[%s14123_s11 + $0x1e58] sm:$0xff] }
 0x491   : > { %v1320_v30 = vld [vmem:[%s14123_s11 + $0x1e78] sm:$0xff] }
 0x492   : > { %8056 = vmatpush1.bf16.msra.mxu0 %v12284_v53  ;;  %8425 = vmatpush1.bf16.msra.mxu1 %v12286_v56  ;;  %v1280_v53 = vld [vmem:[%s14123_s11 + $0x1d38] sm:$0xff]  ;;  %v12340_v56 = vcombine.low %v1267_v62, %v1271_v42  ;;  %v1323_v62 = vld [vmem:[%s14123_s11 + $0x1e90] sm:$0xff] }
 0x493   : > { %8057 = vmatprep.subr.bf16.mxu0 %v12293_v57  ;;  %8426 = vmatprep.subr.bf16.mxu1 %v12295_v10  ;;  %v12349_v57 = vcombine.high %v1275_v49, %v1279_v50  ;;  %v12351_v10 = vcombine.high %v1276_v32, %v1280_v53  ;;  %v1327_v42 = vld [vmem:[%s14123_s11 + $0x1eb0] sm:$0xff] }
 0x496   : > { %8058 = vmatpush1.bf16.msra.mxu0 %v12292_v63  ;;  %8427 = vmatpush1.bf16.msra.mxu1 %v12294_v12  ;;  %v12348_v63 = vcombine.low %v1275_v49, %v1279_v50  ;;  %v12350_v12 = vcombine.low %v1276_v32, %v1280_v53  ;;  %v1331_v49 = vld [vmem:[%s14123_s11 + $0x1ed0] sm:$0xff]  ;;  %v1332_v32 = vld [vmem:[%s14123_s11 + $0x1ed8] sm:$0xff] }
 0x497   : > { %8059 = vmatprep.subr.bf16.mxu0 %v12301_v3  ;;  %8428 = vmatprep.subr.bf16.mxu1 %v12303_v4  ;;  %v12357_v3 = vcombine.high %v1283_v52, %v1287_v58  ;;  %v12359_v4 = vcombine.high %v1284_v59, %v1288_v61  ;;  %v1335_v50 = vld [vmem:[%s14123_s11 + $0x1ef0] sm:$0xff]  ;;  %v1336_v53 = vld [vmem:[%s14123_s11 + $0x1ef8] sm:$0xff] }
 0x49a   : > { %8060 = vmatpush1.bf16.msra.mxu0 %v12300_v41  ;;  %8429 = vmatpush1.bf16.msra.mxu1 %v12302_v9  ;;  %v12356_v41 = vcombine.low %v1283_v52, %v1287_v58  ;;  %v12358_v9 = vcombine.low %v1284_v59, %v1288_v61  ;;  %v1339_v52 = vld [vmem:[%s14123_s11 + $0x1f10] sm:$0xff]  ;;  %v1340_v59 = vld [vmem:[%s14123_s11 + $0x1f18] sm:$0xff] }
 0x49b   : > { %8061 = vmatprep.subr.bf16.mxu0 %v12309_v11  ;;  %8430 = vmatprep.subr.bf16.mxu1 %v12311_v14  ;;  %v12365_v11 = vcombine.high %v1291_v5, %v1295_v1  ;;  %v12367_v14 = vcombine.high %v1292_v6, %v1296_v7  ;;  %v1343_v58 = vld [vmem:[%s14123_s11 + $0x1f30] sm:$0xff]  ;;  %v1344_v61 = vld [vmem:[%s14123_s11 + $0x1f38] sm:$0xff] }
 0x49e   : > { %8062 = vmatpush1.bf16.msra.mxu0 %v12308_v25  ;;  %8431 = vmatpush1.bf16.msra.mxu1 %v12310_v26  ;;  %v12364_v25 = vcombine.low %v1291_v5, %v1295_v1  ;;  %v12366_v26 = vcombine.low %v1292_v6, %v1296_v7  ;;  %v1347_v5 = vld [vmem:[%s14123_s11 + $0x1f50] sm:$0xff]  ;;  %v1348_v6 = vld [vmem:[%s14123_s11 + $0x1f58] sm:$0xff] }
 0x49f   : > { %8072 = vmatprep.subr.bf16.mxu0 %v12317_v27  ;;  %8441 = vmatprep.subr.bf16.mxu1 %v12319_v29  ;;  %v12373_v27 = vcombine.high %v1299_v16, %v1303_v2  ;;  %v12375_v29 = vcombine.high %v1300_v51, %v1304_v21  ;;  %v1351_v1 = vld [vmem:[%s14123_s11 + $0x1f70] sm:$0xff]  ;;  %v1352_v7 = vld [vmem:[%s14123_s11 + $0x1f78] sm:$0xff] }
 0x4a1   : > { %8064 = vmatmul.mubr.bf16.vlgmr.msra.gmra.mrb[4].mxu0 %v14708_v8  ;;  %8433 = vmatmul.mubr.bf16.vlgmr.msra.gmra.mrb[4].mxu1 %v14708_v8  ;;  %v12332_v8 = vcombine.low %v1259_v35, %v1263_v38  ;;  %v1315_v35 = vld [vmem:[%s14123_s11 + $0x1e50] sm:$0xff] }
 0x4a2   : > { %8073 = vmatpush1.bf16.msra.mxu0 %v12316_v24  ;;  %8442 = vmatpush1.bf16.msra.mxu1 %v12318_v54  ;;  %v12372_v24 = vcombine.low %v1299_v16, %v1303_v2  ;;  %v12374_v54 = vcombine.low %v1300_v51, %v1304_v21  ;;  %v1319_v38 = vld [vmem:[%s14123_s11 + $0x1e70] sm:$0xff]  ;;  %v1356_v51 = vld [vmem:[%s14123_s11 + $0x1f98] sm:$0xff] }
 0x4a3   : > { %8074 = vmatprep.subr.bf16.mxu0 %v12325_v33  ;;  %8443 = vmatprep.subr.bf16.mxu1 %v12327_v34  ;;  %v12381_v33 = vcombine.high %v1307_v28, %v1311_v22  ;;  %v12383_v34 = vcombine.high %v1308_v31, %v1312_v60  ;;  %v1355_v16 = vld [vmem:[%s14123_s11 + $0x1f90] sm:$0xff]  ;;  %v1360_v21 = vld [vmem:[%s14123_s11 + $0x1fb8] sm:$0xff] }
 0x4a4   : > { %8104 = vmatprep.mubr.bf16.mxu0 %v14716_v19  ;;  %8473 = vmatprep.mubr.bf16.mxu1 %v14716_v19  ;;  %v12342_v19 = vcombine.low %v1268_v43, %v1272_v45  ;;  %v1324_v43 = vld [vmem:[%s14123_s11 + $0x1e98] sm:$0xff]  ;;  %v1359_v2 = vld [vmem:[%s14123_s11 + $0x1fb0] sm:$0xff] }
 0x4a5   : > { %v1328_v45 = vld [vmem:[%s14123_s11 + $0x1eb8] sm:$0xff] }
 0x4a6   : > { %8075 = vmatpush1.bf16.msra.mxu0 %v12324_v37  ;;  %8444 = vmatpush1.bf16.msra.mxu1 %v12326_v39  ;;  %v12380_v37 = vcombine.low %v1307_v28, %v1311_v22  ;;  %v12382_v39 = vcombine.low %v1308_v31, %v1312_v60  ;;  %v1363_v28 = vld [vmem:[%s14123_s11 + $0x1fd0] sm:$0xff]  ;;  %v1364_v31 = vld [vmem:[%s14123_s11 + $0x1fd8] sm:$0xff] }
 0x4a7   : > { %8076 = vmatprep.subr.bf16.mxu0 %v12333_v40  ;;  %8445 = vmatprep.subr.bf16.mxu1 %v12335_v0  ;;  %v12389_v40 = vcombine.high %v1315_v35, %v1319_v38  ;;  %v12391_v0 = vcombine.high %v1316_v36, %v1320_v30  ;;  %v1367_v22 = vld [vmem:[%s14123_s11 + $0x1ff0] sm:$0xff]  ;;  %v1368_v60 = vld [vmem:[%s14123_s11 + $0x1ff8] sm:$0xff] }
 0x4aa   : > { %8077 = vmatpush1.bf16.msra.mxu0 %v12332_v8  ;;  %8446 = vmatpush1.bf16.msra.mxu1 %v12334_v46  ;;  %v12388_v8 = vcombine.low %v1315_v35, %v1319_v38  ;;  %v12390_v46 = vcombine.low %v1316_v36, %v1320_v30  ;;  %v1371_v35 = vld [vmem:[%s14123_s11 + $0x2010] sm:$0xff]  ;;  %v1372_v36 = vld [vmem:[%s14123_s11 + $0x2018] sm:$0xff] }
 0x4ab   : > { %8078 = vmatprep.subr.bf16.mxu0 %v12341_v47  ;;  %8447 = vmatprep.subr.bf16.mxu1 %v12343_v48  ;;  %v12397_v47 = vcombine.high %v1323_v62, %v1327_v42  ;;  %v12399_v48 = vcombine.high %v1324_v43, %v1328_v45  ;;  %v1375_v38 = vld [vmem:[%s14123_s11 + $0x2030] sm:$0xff]  ;;  %v1376_v30 = vld [vmem:[%s14123_s11 + $0x2038] sm:$0xff] }
 0x4ae   : > { %8079 = vmatpush1.bf16.msra.mxu0 %v12340_v56  ;;  %8448 = vmatpush1.bf16.msra.mxu1 %v12342_v19  ;;  %v12396_v56 = vcombine.low %v1323_v62, %v1327_v42  ;;  %v12398_v19 = vcombine.low %v1324_v43, %v1328_v45  ;;  %v1379_v62 = vld [vmem:[%s14123_s11 + $0x2050] sm:$0xff]  ;;  %v1380_v43 = vld [vmem:[%s14123_s11 + $0x2058] sm:$0xff] }
 0x4af   : > { %8080 = vmatprep.subr.bf16.mxu0 %v12349_v57  ;;  %8449 = vmatprep.subr.bf16.mxu1 %v12351_v10  ;;  %v12405_v57 = vcombine.high %v1331_v49, %v1335_v50  ;;  %v12407_v10 = vcombine.high %v1332_v32, %v1336_v53  ;;  %v1383_v42 = vld [vmem:[%s14123_s11 + $0x2070] sm:$0xff]  ;;  %v1384_v45 = vld [vmem:[%s14123_s11 + $0x2078] sm:$0xff] }
 0x4b2   : > { %8081 = vmatpush1.bf16.msra.mxu0 %v12348_v63  ;;  %8450 = vmatpush1.bf16.msra.mxu1 %v12350_v12  ;;  %v12404_v63 = vcombine.low %v1331_v49, %v1335_v50  ;;  %v12406_v12 = vcombine.low %v1332_v32, %v1336_v53  ;;  %v1387_v49 = vld [vmem:[%s14123_s11 + $0x2090] sm:$0xff]  ;;  %v1388_v32 = vld [vmem:[%s14123_s11 + $0x2098] sm:$0xff] }
 0x4b3   : > { %8082 = vmatprep.subr.bf16.mxu0 %v12357_v3  ;;  %8451 = vmatprep.subr.bf16.mxu1 %v12359_v4  ;;  %v12413_v3 = vcombine.high %v1339_v52, %v1343_v58  ;;  %v12415_v4 = vcombine.high %v1340_v59, %v1344_v61  ;;  %v1391_v50 = vld [vmem:[%s14123_s11 + $0x20b0] sm:$0xff]  ;;  %v1392_v53 = vld [vmem:[%s14123_s11 + $0x20b8] sm:$0xff] }
 0x4b6   : > { %8083 = vmatpush1.bf16.msra.mxu0 %v12356_v41  ;;  %8452 = vmatpush1.bf16.msra.mxu1 %v12358_v9  ;;  %v12412_v41 = vcombine.low %v1339_v52, %v1343_v58  ;;  %v12414_v9 = vcombine.low %v1340_v59, %v1344_v61  ;;  %v1395_v52 = vld [vmem:[%s14123_s11 + $0x20d0] sm:$0xff]  ;;  %v1396_v59 = vld [vmem:[%s14123_s11 + $0x20d8] sm:$0xff] }
 0x4b7   : > { %8084 = vmatprep.subr.bf16.mxu0 %v12365_v11  ;;  %8453 = vmatprep.subr.bf16.mxu1 %v12367_v14  ;;  %v12421_v11 = vcombine.high %v1347_v5, %v1351_v1  ;;  %v12423_v14 = vcombine.high %v1348_v6, %v1352_v7  ;;  %v1399_v58 = vld [vmem:[%s14123_s11 + $0x20f0] sm:$0xff]  ;;  %v1400_v61 = vld [vmem:[%s14123_s11 + $0x20f8] sm:$0xff] }
 0x4ba   : > { %8085 = vmatpush1.bf16.msra.mxu0 %v12364_v25  ;;  %8454 = vmatpush1.bf16.msra.mxu1 %v12366_v26  ;;  %v12420_v25 = vcombine.low %v1347_v5, %v1351_v1  ;;  %v12422_v26 = vcombine.low %v1348_v6, %v1352_v7  ;;  %v1407_v5 = vld [vmem:[%s14123_s11 + $0x2130] sm:$0xff]  ;;  %v1404_v1 = vld [vmem:[%s14123_s11 + $0x2118] sm:$0xff]  ;;  %v12468_v7 = vcombine.low %v1395_v52, %v1399_v58 }
 0x4bb   : > { %8086 = vmatprep.subr.bf16.mxu0 %v12373_v27  ;;  %8455 = vmatprep.subr.bf16.mxu1 %v12375_v29  ;;  %v12429_v27 = vcombine.high %v1355_v16, %v1359_v2  ;;  %v12431_v29 = vcombine.high %v1356_v51, %v1360_v21  ;;  %v1408_v6 = vld [vmem:[%s14123_s11 + $0x2138] sm:$0xff] }
 0x4be   : > { %8087 = vmatpush1.bf16.msra.mxu0 %v12372_v24  ;;  %8456 = vmatpush1.bf16.msra.mxu1 %v12374_v54  ;;  %v12428_v24 = vcombine.low %v1355_v16, %v1359_v2  ;;  %v12430_v54 = vcombine.low %v1356_v51, %v1360_v21  ;;  %v1412_v16 = vld [vmem:[%s14123_s11 + $0x2158] sm:$0xff]  ;;  %v12478_v21 = vcombine.low %v1404_v1, %v1408_v6 }
 0x4bf   : > { %8088 = vmatprep.subr.bf16.mxu0 %v12381_v33  ;;  %8457 = vmatprep.subr.bf16.mxu1 %v12383_v34  ;;  %v12437_v33 = vcombine.high %v1363_v28, %v1367_v22  ;;  %v12439_v34 = vcombine.high %v1364_v31, %v1368_v60  ;;  %v1416_v2 = vld [vmem:[%s14123_s11 + $0x2178] sm:$0xff] }
 0x4c2   : > { %8089 = vmatpush1.bf16.msra.mxu0 %v12380_v37  ;;  %8458 = vmatpush1.bf16.msra.mxu1 %v12382_v39  ;;  %v12436_v37 = vcombine.low %v1363_v28, %v1367_v22  ;;  %v12438_v39 = vcombine.low %v1364_v31, %v1368_v60  ;;  %v1441_v28 = vsub.s32 1, %v14165_v44  ;;  %v1420_v22 = vld [vmem:[%s14123_s11 + $0x2198] sm:$0xff]  ;;  %v15405_v60 = vld [vmem:[%s14129_s16] sm:$0xff] }
 0x4c3   : > { %8090 = vmatprep.subr.bf16.mxu0 %v12389_v40  ;;  %8459 = vmatprep.subr.bf16.mxu1 %v12391_v0  ;;  %v12445_v40 = vcombine.high %v1371_v35, %v1375_v38  ;;  %v12447_v0 = vcombine.high %v1372_v36, %v1376_v30  ;;  %v1424_v31 = vld [vmem:[%s14123_s11 + $0x21b8] sm:$0xff] }
 0x4c6   : > { %8091 = vmatpush1.bf16.msra.mxu0 %v12388_v8  ;;  %8460 = vmatpush1.bf16.msra.mxu1 %v12390_v46  ;;  %v12444_v8 = vcombine.low %v1371_v35, %v1375_v38  ;;  %v12446_v46 = vcombine.low %v1372_v36, %v1376_v30  ;;  %v1427_v35 = vld [vmem:[%s14123_s11 + $0x21d0] sm:$0xff]  ;;  %v1442_v36 = vrot.slane %v15405_v60, %v1441_v28  ;;  %v1428_v30 = vld [vmem:[%s14123_s11 + $0x21d8] sm:$0xff] }
 0x4c7   : > { %8092 = vmatprep.subr.bf16.mxu0 %v12397_v47  ;;  %8461 = vmatprep.subr.bf16.mxu1 %v12399_v48  ;;  %v12453_v47 = vcombine.high %v1379_v62, %v1383_v42  ;;  %v12455_v48 = vcombine.high %v1380_v43, %v1384_v45  ;;  %v1431_v38 = vld [vmem:[%s14123_s11 + $0x21f0] sm:$0xff] }
 0x4ca   : > { %8093 = vmatpush1.bf16.msra.mxu0 %v12396_v56  ;;  %8462 = vmatpush1.bf16.msra.mxu1 %v12398_v19  ;;  %v12452_v56 = vcombine.low %v1379_v62, %v1383_v42  ;;  %v12454_v19 = vcombine.low %v1380_v43, %v1384_v45  ;;  %v12920_v42 = vadd.f32 %v15061_v17, %v1442_v36  ;;  %v13176_v17 = vld [vmem:[%s14131_s14 + $0x8] ss:$20 sps:$4 sm:$0xff]   ;;  %v13239_v36 = vld [vmem:[%s14131_s14 + $0x1b8] ss:$20 sps:$4 sm:$0xff]  }
 0x4cb   : > { %8094 = vmatprep.subr.bf16.mxu0 %v12405_v57  ;;  %8463 = vmatprep.subr.bf16.mxu1 %v12407_v10  ;;  %v12461_v57 = vcombine.high %v1387_v49, %v1391_v50  ;;  %v12463_v10 = vcombine.high %v1388_v32, %v1392_v53  ;;  %v12500_v43 = vcombine.low %v1427_v35, %v1431_v38 }
 0x4ce   : > { %8095 = vmatpush1.bf16.msra.mxu0 %v12404_v63  ;;  %8464 = vmatpush1.bf16.msra.mxu1 %v12406_v12  ;;  %v12462_v63 = vcombine.low %v1388_v32, %v1392_v53  ;;  %v12469_v12 = vcombine.high %v1395_v52, %v1399_v58  ;;  %v13184_v32 = vld [vmem:[%s14131_s14 + $0x34] ss:$20 sps:$4 sm:$0xff]   ;;  %v13193_v52 = vld [vmem:[%s14131_s14 + $0x7c] ss:$20 sps:$4 sm:$0xff]   ;;  %v13196_v58 = vld [vmem:[%s14131_s14 + $0x84] ss:$20 sps:$4 sm:$0xff]  }
 0x4cf   : > { %8096 = vmatprep.subr.bf16.mxu0 %v12413_v3  ;;  %8465 = vmatprep.subr.bf16.mxu1 %v12415_v4  ;;  %v12471_v3 = vcombine.high %v1396_v59, %v1400_v61  ;;  %v1403_v4 = vld [vmem:[%s14123_s11 + $0x2110] sm:$0xff]  ;;  %v13179_v53 = vld [vmem:[%s14131_s14 + $0x28] ss:$20 sps:$4 sm:$0xff]  }
 0x4d0   : > { %v12476_v51 = vcombine.low %v1403_v4, %v1407_v5 }
 0x4d2   : > { %8097 = vmatpush1.bf16.msra.mxu0 %v12412_v41  ;;  %8466 = vmatpush1.bf16.msra.mxu1 %v12414_v9  ;;  %v12477_v41 = vcombine.high %v1403_v4, %v1407_v5  ;;  %v12479_v9 = vcombine.high %v1404_v1, %v1408_v6  ;;  %v13205_v4 = vld [vmem:[%s14131_s14 + $0xcc] ss:$20 sps:$4 sm:$0xff]   ;;  %v13208_v5 = vld [vmem:[%s14131_s14 + $0xd4] ss:$20 sps:$4 sm:$0xff]   ;;  %v13206_v6 = vld [vmem:[%s14131_s14 + $0xd0] ss:$20 sps:$4 sm:$0xff]  }
 0x4d3   : > { %8098 = vmatprep.subr.bf16.mxu0 %v12421_v11  ;;  %8467 = vmatprep.subr.bf16.mxu1 %v12423_v14  ;;  %v1411_v11 = vld [vmem:[%s14123_s11 + $0x2150] sm:$0xff]  ;;  %v13203_v1 = vld [vmem:[%s14131_s14 + $0xc8] ss:$20 sps:$4 sm:$0xff]  }
 0x4d4   : > { %v1415_v14 = vld [vmem:[%s14123_s11 + $0x2170] sm:$0xff] }
 0x4d6   : > { %8099 = vmatpush1.bf16.msra.mxu0 %v12420_v25  ;;  %8468 = vmatpush1.bf16.msra.mxu1 %v12422_v26  ;;  %v12485_v25 = vcombine.high %v1411_v11, %v1415_v14  ;;  %v12487_v26 = vcombine.high %v1412_v16, %v1416_v2 }
 0x4d7   : > { %8100 = vmatprep.subr.bf16.mxu0 %v12429_v27  ;;  %8469 = vmatprep.subr.bf16.mxu1 %v12431_v29  ;;  %v1419_v27 = vld [vmem:[%s14123_s11 + $0x2190] sm:$0xff] }
 0x4d8   : > { %v1423_v29 = vld [vmem:[%s14123_s11 + $0x21b0] sm:$0xff] }
 0x4da   : > { %8101 = vmatpush1.bf16.msra.mxu0 %v12428_v24  ;;  %8470 = vmatpush1.bf16.msra.mxu1 %v12430_v54  ;;  %v12484_v24 = vcombine.low %v1411_v11, %v1415_v14  ;;  %v12486_v54 = vcombine.low %v1412_v16, %v1416_v2  ;;  %v13217_v11 = vld [vmem:[%s14131_s14 + $0x11c] ss:$20 sps:$4 sm:$0xff]   ;;  %v13220_v14 = vld [vmem:[%s14131_s14 + $0x124] ss:$20 sps:$4 sm:$0xff]   ;;  %v13218_v2 = vld [vmem:[%s14131_s14 + $0x120] ss:$20 sps:$4 sm:$0xff]  }
 0x4db   : > { %8102 = vmatprep.subr.bf16.mxu0 %v12437_v33  ;;  %8471 = vmatprep.subr.bf16.mxu1 %v12439_v34  ;;  %v12493_v33 = vcombine.high %v1419_v27, %v1423_v29  ;;  %v12495_v34 = vcombine.high %v1420_v22, %v1424_v31  ;;  %v13215_v16 = vld [vmem:[%s14131_s14 + $0x118] ss:$20 sps:$4 sm:$0xff]  }
 0x4de   : > { %8103 = vmatpush1.bf16.msra.mxu0 %v12436_v37  ;;  %8472 = vmatpush1.bf16.msra.mxu1 %v12438_v39  ;;  %v1432_v37 = vld [vmem:[%s14123_s11 + $0x21f8] sm:$0xff]  ;;  %v12492_v39 = vcombine.low %v1419_v27, %v1423_v29 }
 0x4df   : > { %8113 = vmatprep.subr.bf16.mxu0 %v12445_v40  ;;  %8482 = vmatprep.subr.bf16.mxu1 %v12447_v0  ;;  %v12494_v40 = vcombine.low %v1420_v22, %v1424_v31  ;;  %v12501_v0 = vcombine.high %v1427_v35, %v1431_v38  ;;  %v12503_v62 = vcombine.high %v1428_v30, %v1432_v37  ;;  %v13229_v27 = vld [vmem:[%s14131_s14 + $0x16c] ss:$20 sps:$4 sm:$0xff]   ;;  %v13232_v29 = vld [vmem:[%s14131_s14 + $0x174] ss:$20 sps:$4 sm:$0xff]   ;;  %v13230_v31 = vld [vmem:[%s14131_s14 + $0x170] ss:$20 sps:$4 sm:$0xff]  }
 0x4e0   : > { %v12502_v45 = vcombine.low %v1428_v30, %v1432_v37  ;;  %v13227_v22 = vld [vmem:[%s14131_s14 + $0x168] ss:$20 sps:$4 sm:$0xff]   ;;  %v13244_v38 = vld [vmem:[%s14131_s14 + $0x1c4] ss:$20 sps:$4 sm:$0xff]   ;;  %v13242_v30 = vld [vmem:[%s14131_s14 + $0x1c0] ss:$20 sps:$4 sm:$0xff]  }
 0x4e1   : > { %8105 = vmatmul.mubr.bf16.vlgmr.msra.gmra.mrb[4].mxu0 %v14784_v55  ;;  %8474 = vmatmul.mubr.bf16.vlgmr.msra.gmra.mrb[4].mxu1 %v14784_v55  ;;  %v12460_v55 = vcombine.low %v1387_v49, %v1391_v50  ;;  %v13181_v49 = vld [vmem:[%s14131_s14 + $0x2c] ss:$20 sps:$4 sm:$0xff]   ;;  %v13241_v35 = vld [vmem:[%s14131_s14 + $0x1bc] ss:$20 sps:$4 sm:$0xff]   ;;  %v13247_v37 = vld [vmem:[%s14131_s14 + $0x1e4] ss:$20 sps:$4 sm:$0xff]  }
 0x4e2   : > { %8114 = vmatpush1.bf16.msra.mxu0 %v12444_v8  ;;  %8483 = vmatpush1.bf16.msra.mxu1 %v12446_v46  ;;  %v13175_v8 = vld [vmem:[%s14131_s14 + $0x4] ss:$20 sps:$4 sm:$0xff]   ;;  %v13178_v46 = vld [vmem:[%s14131_s14 + $0xc] ss:$20 sps:$4 sm:$0xff]  }
 0x4e3   : > { %8115 = vmatprep.subr.bf16.mxu0 %v12453_v47  ;;  %8484 = vmatprep.subr.bf16.mxu1 %v12455_v48  ;;  %v8524_v47 = vmax.f32 %v12920_v42, 0.0  ;;  %v13173_v48 = vld [vmem:[%s14131_s14] ss:$20 sps:$4 sm:$0xff]  }
 0x4e4   : > { %8145 = vmatprep.mubr.bf16.mxu0 %v13874_v15  ;;  %8514 = vmatprep.mubr.bf16.mxu1 %v13874_v15  ;;  %v12470_v15 = vcombine.low %v1396_v59, %v1400_v61  ;;  %v13191_v59 = vld [vmem:[%s14131_s14 + $0x78] ss:$20 sps:$4 sm:$0xff]   ;;  %v13194_v61 = vld [vmem:[%s14131_s14 + $0x80] ss:$20 sps:$4 sm:$0xff]  }
 0x4e5   : > { %v15420_v50 = vpack.c.bf16 %v8524_v47, %v8524_v47  ;;  %v13253_v42 = vld [vmem:[%s14131_s14 + $0x20c] ss:$20 sps:$4 sm:$0xff]   ;;  %v13254_v47 = vld [vmem:[%s14131_s14 + $0x210] ss:$20 sps:$4 sm:$0xff]  }
 0x4e6   : > { %8116 = vmatpush1.bf16.msra.mxu0 %v12452_v56  ;;  %8485 = vmatpush1.bf16.msra.mxu1 %v12454_v19  ;;  %v13182_v56 = vld [vmem:[%s14131_s14 + $0x30] ss:$20 sps:$4 sm:$0xff]   ;;  %v13187_v19 = vld [vmem:[%s14131_s14 + $0x54] ss:$20 sps:$4 sm:$0xff]  }
 0x4e7   : > { %8117 = vmatprep.subr.bf16.mxu0 %v12461_v57  ;;  %8486 = vmatprep.subr.bf16.mxu1 %v12463_v10  ;;  %v13190_v57 = vld [vmem:[%s14131_s14 + $0x5c] ss:$20 sps:$4 sm:$0xff]   ;;  %v13188_v10 = vld [vmem:[%s14131_s14 + $0x58] ss:$20 sps:$4 sm:$0xff]  }
 0x4ea   : > { %8118 = vmatpush1.bf16.msra.mxu0 %v12460_v55  ;;  %8487 = vmatpush1.bf16.msra.mxu1 %v12462_v63  ;;  %v13199_v55 = vld [vmem:[%s14131_s14 + $0xa4] ss:$20 sps:$4 sm:$0xff]   ;;  %v13202_v63 = vld [vmem:[%s14131_s14 + $0xac] ss:$20 sps:$4 sm:$0xff]  }
 0x4eb   : > { %8119 = vmatprep.subr.bf16.mxu0 %v12469_v12  ;;  %8488 = vmatprep.subr.bf16.mxu1 %v12471_v3  ;;  %v13197_v12 = vld [vmem:[%s14131_s14 + $0xa0] ss:$20 sps:$4 sm:$0xff]   ;;  %v13200_v3 = vld [vmem:[%s14131_s14 + $0xa8] ss:$20 sps:$4 sm:$0xff]  }
 0x4ee   : > { %8120 = vmatpush1.bf16.msra.mxu0 %v12468_v7  ;;  %8489 = vmatpush1.bf16.msra.mxu1 %v12470_v15  ;;  %v13211_v7 = vld [vmem:[%s14131_s14 + $0xf4] ss:$20 sps:$4 sm:$0xff]   ;;  %v13214_v15 = vld [vmem:[%s14131_s14 + $0xfc] ss:$20 sps:$4 sm:$0xff]  }
 0x4ef   : > { %8121 = vmatprep.subr.bf16.mxu0 %v12477_v41  ;;  %8490 = vmatprep.subr.bf16.mxu1 %v12479_v9  ;;  %v13209_v41 = vld [vmem:[%s14131_s14 + $0xf0] ss:$20 sps:$4 sm:$0xff]   ;;  %v13212_v9 = vld [vmem:[%s14131_s14 + $0xf8] ss:$20 sps:$4 sm:$0xff]  }
 0x4f2   : > { %8122 = vmatpush1.bf16.msra.mxu0 %v12476_v51  ;;  %8491 = vmatpush1.bf16.msra.mxu1 %v12478_v21  ;;  %v13223_v51 = vld [vmem:[%s14131_s14 + $0x144] ss:$20 sps:$4 sm:$0xff]   ;;  %v13226_v21 = vld [vmem:[%s14131_s14 + $0x14c] ss:$20 sps:$4 sm:$0xff]  }
 0x4f3   : > { %8123 = vmatprep.subr.bf16.mxu0 %v12485_v25  ;;  %8492 = vmatprep.subr.bf16.mxu1 %v12487_v26  ;;  %v13221_v25 = vld [vmem:[%s14131_s14 + $0x140] ss:$20 sps:$4 sm:$0xff]   ;;  %v13224_v26 = vld [vmem:[%s14131_s14 + $0x148] ss:$20 sps:$4 sm:$0xff]  }
 0x4f6   : > { %8124 = vmatpush1.bf16.msra.mxu0 %v12484_v24  ;;  %8493 = vmatpush1.bf16.msra.mxu1 %v12486_v54  ;;  %v13235_v24 = vld [vmem:[%s14131_s14 + $0x194] ss:$20 sps:$4 sm:$0xff]   ;;  %v13238_v54 = vld [vmem:[%s14131_s14 + $0x19c] ss:$20 sps:$4 sm:$0xff]  }
 0x4f7   : > { %8125 = vmatprep.subr.bf16.mxu0 %v12493_v33  ;;  %8494 = vmatprep.subr.bf16.mxu1 %v12495_v34  ;;  %v13233_v33 = vld [vmem:[%s14131_s14 + $0x190] ss:$20 sps:$4 sm:$0xff]   ;;  %v13236_v34 = vld [vmem:[%s14131_s14 + $0x198] ss:$20 sps:$4 sm:$0xff]  }
 0x4fa   : > { %8126 = vmatpush1.bf16.msra.mxu0 %v12492_v39  ;;  %8495 = vmatpush1.bf16.msra.mxu1 %v12494_v40  ;;  %v13250_v39 = vld [vmem:[%s14131_s14 + $0x1ec] ss:$20 sps:$4 sm:$0xff]  }
 0x4fb   : > { %8127 = vmatprep.subr.bf16.mxu0 %v12501_v0  ;;  %8496 = vmatprep.subr.bf16.mxu1 %v12503_v62  ;;  %v13245_v40 = vld [vmem:[%s14131_s14 + $0x1e0] ss:$20 sps:$4 sm:$0xff]   ;;  %v1437_v0 = vsub.s32 0, %v14165_v44  ;;  %v13248_v62 = vld [vmem:[%s14131_s14 + $0x1e8] ss:$20 sps:$4 sm:$0xff]  }
 0x4fe   : > { %8128 = vmatpush1.bf16.msra.mxu0 %v12500_v43  ;;  %8497 = vmatpush1.bf16.msra.mxu1 %v12502_v45  ;;  %v13256_v43 = vld [vmem:[%s14131_s14 + $0x214] ss:$20 sps:$4 sm:$0xff]   ;;  %v1449_v45 = vsub.s32 3, %v14165_v44 }
 0x4ff   : > { %10589 = vmatprep.subr.bf16.mxu0 %v13175_v8  ;;  %10753 = vmatprep.subr.bf16.mxu1 %v13178_v46  ;;  %v13251_v8 = vld [vmem:[%s14131_s14 + $0x208] ss:$20 sps:$4 sm:$0xff]   ;;  %v1438_v46 = vrot.slane %v15405_v60, %v1437_v0 }
 0x501   : > { %8146 = vmatmul.mubr.bf16.vlgmr.msra.gmra.mrb[4].mxu0 %v14823_v20  ;;  %8515 = vmatmul.mubr.bf16.vlgmr.msra.gmra.mrb[4].mxu1 %v14823_v20  ;;  %v13185_v20 = vld [vmem:[%s14131_s14 + $0x50] ss:$20 sps:$4 sm:$0xff]  }
 0x502   : > { %10590 = vmatpush1.bf16.msra.mxu0 %v13173_v48  ;;  %10621 = vmatprep.mubr.bf16.mxu0 %v15420_v50  ;;  %v13259_v48 = vld [vmem:[%s14131_s14 + $0x234] ss:$20 sps:$4 sm:$0xff]  }
 0x503   : > { %10754 = vmatpush1.bf16.msra.mxu1 %v13176_v17  ;;  %10785 = vmatprep.mubr.bf16.mxu1 %v15420_v50  ;;  %v13262_v17 = vld [vmem:[%s14131_s14 + $0x23c] ss:$20 sps:$4 sm:$0xff]  }
 0x504   : > { %10591 = vmatprep.subr.bf16.mxu0 %v13181_v49  ;;  %10755 = vmatprep.subr.bf16.mxu1 %v13184_v32  ;;  %v1450_v49 = vrot.slane %v15405_v60, %v1449_v45  ;;  %v13257_v32 = vld [vmem:[%s14131_s14 + $0x230] ss:$20 sps:$4 sm:$0xff]  }
 0x506   : > { %10592 = vmatpush1.bf16.msra.mxu0 %v13179_v53  ;;  %v12919_v53 = vadd.f32 %v15055_v13, %v1438_v46  ;;  %v13271_v13 = vld [vmem:[%s14131_s14 + $0x284] ss:$20 sps:$4 sm:$0xff]   ;;  %v13331_v46 = vld [vmem:[%s14131_s14 + $0x414] ss:$20 sps:$4 sm:$0xff]  }
 0x507   : > { %10756 = vmatpush1.bf16.msra.mxu1 %v13182_v56  ;;  %10593 = vmatprep.subr.bf16.mxu0 %v13187_v19  ;;  %v13260_v56 = vld [vmem:[%s14131_s14 + $0x238] ss:$20 sps:$4 sm:$0xff]   ;;  %v13265_v19 = vld [vmem:[%s14131_s14 + $0x25c] ss:$20 sps:$4 sm:$0xff]  }
 0x508   : > { %10757 = vmatprep.subr.bf16.mxu1 %v13190_v57  ;;  %v13268_v57 = vld [vmem:[%s14131_s14 + $0x264] ss:$20 sps:$4 sm:$0xff]  }
 0x50a   : > { %10594 = vmatpush1.bf16.msra.mxu0 %v13185_v20  ;;  %v12922_v20 = vadd.f32 %v15065_v23, %v1450_v49  ;;  %v13272_v23 = vld [vmem:[%s14131_s14 + $0x288] ss:$20 sps:$4 sm:$0xff]  }
 0x50b   : > { %10758 = vmatpush1.bf16.msra.mxu1 %v13188_v10  ;;  %10595 = vmatprep.subr.bf16.mxu0 %v13193_v52  ;;  %v13263_v10 = vld [vmem:[%s14131_s14 + $0x258] ss:$20 sps:$4 sm:$0xff]   ;;  %v8523_v52 = vmax.f32 %v12919_v53, 0.0  ;;  %v13337_v49 = vld [vmem:[%s14131_s14 + $0x43c] ss:$20 sps:$4 sm:$0xff]  }
 0x50c   : > { %10759 = vmatprep.subr.bf16.mxu1 %v13196_v58  ;;  %v13266_v58 = vld [vmem:[%s14131_s14 + $0x260] ss:$20 sps:$4 sm:$0xff]   ;;  %v13335_v53 = vld [vmem:[%s14131_s14 + $0x438] ss:$20 sps:$4 sm:$0xff]  }
 0x50e   : > { %10596 = vmatpush1.bf16.msra.mxu0 %v13191_v59  ;;  %v13274_v59 = vld [vmem:[%s14131_s14 + $0x28c] ss:$20 sps:$4 sm:$0xff]  }
 0x50f   : > { %10760 = vmatpush1.bf16.msra.mxu1 %v13194_v61  ;;  %10597 = vmatprep.subr.bf16.mxu0 %v13199_v55  ;;  %v8526_v61 = vmax.f32 %v12922_v20, 0.0  ;;  %v13269_v55 = vld [vmem:[%s14131_s14 + $0x280] ss:$20 sps:$4 sm:$0xff]  }
 0x510   : > { %10761 = vmatprep.subr.bf16.mxu1 %v13202_v63  ;;  %v15498_v63 = vpack.c.bf16 %v8523_v52, %v8523_v52  ;;  %v13341_v20 = vld [vmem:[%s14131_s14 + $0x460] ss:$20 sps:$4 sm:$0xff]   ;;  %v13344_v52 = vld [vmem:[%s14131_s14 + $0x468] ss:$20 sps:$4 sm:$0xff]  }
 0x512   : > { %10598 = vmatpush1.bf16.msra.mxu0 %v13197_v12  ;;  %v13277_v12 = vld [vmem:[%s14131_s14 + $0x2ac] ss:$20 sps:$4 sm:$0xff]  }
 0x513   : > { %10762 = vmatpush1.bf16.msra.mxu1 %v13200_v3  ;;  %10599 = vmatprep.subr.bf16.mxu0 %v13205_v4  ;;  %v15502_v3 = vpack.c.bf16 %v8526_v61, %v8526_v61  ;;  %v13280_v4 = vld [vmem:[%s14131_s14 + $0x2b4] ss:$20 sps:$4 sm:$0xff]  }
 0x514   : > { %10763 = vmatprep.subr.bf16.mxu1 %v13208_v5  ;;  %v13275_v5 = vld [vmem:[%s14131_s14 + $0x2a8] ss:$20 sps:$4 sm:$0xff]  }
 0x516   : > { %10600 = vmatpush1.bf16.msra.mxu0 %v13203_v1  ;;  %v13278_v1 = vld [vmem:[%s14131_s14 + $0x2b0] ss:$20 sps:$4 sm:$0xff]  }
 0x517   : > { %10764 = vmatpush1.bf16.msra.mxu1 %v13206_v6  ;;  %10601 = vmatprep.subr.bf16.mxu0 %v13211_v7  ;;  %v13283_v6 = vld [vmem:[%s14131_s14 + $0x2d4] ss:$20 sps:$4 sm:$0xff]   ;;  %v13286_v7 = vld [vmem:[%s14131_s14 + $0x2dc] ss:$20 sps:$4 sm:$0xff]  }
 0x518   : > { %10765 = vmatprep.subr.bf16.mxu1 %v13214_v15  ;;  %v13281_v15 = vld [vmem:[%s14131_s14 + $0x2d0] ss:$20 sps:$4 sm:$0xff]  }
 0x51a   : > { %10602 = vmatpush1.bf16.msra.mxu0 %v13209_v41  ;;  %v13284_v41 = vld [vmem:[%s14131_s14 + $0x2d8] ss:$20 sps:$4 sm:$0xff]  }
 0x51b   : > { %10766 = vmatpush1.bf16.msra.mxu1 %v13212_v9  ;;  %10603 = vmatprep.subr.bf16.mxu0 %v13217_v11  ;;  %v13289_v9 = vld [vmem:[%s14131_s14 + $0x2fc] ss:$20 sps:$4 sm:$0xff]   ;;  %v13292_v11 = vld [vmem:[%s14131_s14 + $0x304] ss:$20 sps:$4 sm:$0xff]  }
 0x51c   : > { %10767 = vmatprep.subr.bf16.mxu1 %v13220_v14  ;;  %v13287_v14 = vld [vmem:[%s14131_s14 + $0x2f8] ss:$20 sps:$4 sm:$0xff]  }
 0x51e   : > { %10604 = vmatpush1.bf16.msra.mxu0 %v13215_v16  ;;  %v13290_v16 = vld [vmem:[%s14131_s14 + $0x300] ss:$20 sps:$4 sm:$0xff]  }
 0x51f   : > { %10768 = vmatpush1.bf16.msra.mxu1 %v13218_v2  ;;  %10605 = vmatprep.subr.bf16.mxu0 %v13223_v51  ;;  %v13295_v2 = vld [vmem:[%s14131_s14 + $0x324] ss:$20 sps:$4 sm:$0xff]   ;;  %v13298_v51 = vld [vmem:[%s14131_s14 + $0x32c] ss:$20 sps:$4 sm:$0xff]  }
 0x520   : > { %10769 = vmatprep.subr.bf16.mxu1 %v13226_v21  ;;  %v13293_v21 = vld [vmem:[%s14131_s14 + $0x320] ss:$20 sps:$4 sm:$0xff]  }
 0x522   : > { %10606 = vmatpush1.bf16.msra.mxu0 %v13221_v25  ;;  %v13296_v25 = vld [vmem:[%s14131_s14 + $0x328] ss:$20 sps:$4 sm:$0xff]  }
 0x523   : > { %10770 = vmatpush1.bf16.msra.mxu1 %v13224_v26  ;;  %10607 = vmatprep.subr.bf16.mxu0 %v13229_v27  ;;  %v13301_v26 = vld [vmem:[%s14131_s14 + $0x34c] ss:$20 sps:$4 sm:$0xff]   ;;  %v13304_v27 = vld [vmem:[%s14131_s14 + $0x354] ss:$20 sps:$4 sm:$0xff]  }
 0x524   : > { %10771 = vmatprep.subr.bf16.mxu1 %v13232_v29  ;;  %v13299_v29 = vld [vmem:[%s14131_s14 + $0x348] ss:$20 sps:$4 sm:$0xff]  }
 0x526   : > { %10608 = vmatpush1.bf16.msra.mxu0 %v13227_v22  ;;  %v13302_v22 = vld [vmem:[%s14131_s14 + $0x350] ss:$20 sps:$4 sm:$0xff]  }
 0x527   : > { %10772 = vmatpush1.bf16.msra.mxu1 %v13230_v31  ;;  %10609 = vmatprep.subr.bf16.mxu0 %v13235_v24  ;;  %v13307_v31 = vld [vmem:[%s14131_s14 + $0x374] ss:$20 sps:$4 sm:$0xff]   ;;  %v13310_v24 = vld [vmem:[%s14131_s14 + $0x37c] ss:$20 sps:$4 sm:$0xff]  }
 0x528   : > { %10773 = vmatprep.subr.bf16.mxu1 %v13238_v54  ;;  %v13305_v54 = vld [vmem:[%s14131_s14 + $0x370] ss:$20 sps:$4 sm:$0xff]  }
 0x52a   : > { %10610 = vmatpush1.bf16.msra.mxu0 %v13233_v33  ;;  %v13308_v33 = vld [vmem:[%s14131_s14 + $0x378] ss:$20 sps:$4 sm:$0xff]  }
 0x52b   : > { %10774 = vmatpush1.bf16.msra.mxu1 %v13236_v34  ;;  %10611 = vmatprep.subr.bf16.mxu0 %v13241_v35  ;;  %v13313_v34 = vld [vmem:[%s14131_s14 + $0x39c] ss:$20 sps:$4 sm:$0xff]   ;;  %v13316_v35 = vld [vmem:[%s14131_s14 + $0x3a4] ss:$20 sps:$4 sm:$0xff]  }
 0x52c   : > { %10775 = vmatprep.subr.bf16.mxu1 %v13244_v38  ;;  %v13311_v38 = vld [vmem:[%s14131_s14 + $0x398] ss:$20 sps:$4 sm:$0xff]  }
 0x52e   : > { %10612 = vmatpush1.bf16.msra.mxu0 %v13239_v36  ;;  %v13314_v36 = vld [vmem:[%s14131_s14 + $0x3a0] ss:$20 sps:$4 sm:$0xff]  }
 0x52f   : > { %10776 = vmatpush1.bf16.msra.mxu1 %v13242_v30  ;;  %10613 = vmatprep.subr.bf16.mxu0 %v13247_v37  ;;  %v13319_v30 = vld [vmem:[%s14131_s14 + $0x3c4] ss:$20 sps:$4 sm:$0xff]   ;;  %v13322_v37 = vld [vmem:[%s14131_s14 + $0x3cc] ss:$20 sps:$4 sm:$0xff]  }
 0x530   : > { %10777 = vmatprep.subr.bf16.mxu1 %v13250_v39  ;;  %v13317_v39 = vld [vmem:[%s14131_s14 + $0x3c0] ss:$20 sps:$4 sm:$0xff]  }
 0x532   : > { %10614 = vmatpush1.bf16.msra.mxu0 %v13245_v40  ;;  %v13320_v40 = vld [vmem:[%s14131_s14 + $0x3c8] ss:$20 sps:$4 sm:$0xff]  }
 0x533   : > { %10778 = vmatpush1.bf16.msra.mxu1 %v13248_v62  ;;  %10615 = vmatprep.subr.bf16.mxu0 %v13253_v42  ;;  %v13325_v62 = vld [vmem:[%s14131_s14 + $0x3ec] ss:$20 sps:$4 sm:$0xff]   ;;  %v13328_v42 = vld [vmem:[%s14131_s14 + $0x3f4] ss:$20 sps:$4 sm:$0xff]  }
 0x534   : > { %10779 = vmatprep.subr.bf16.mxu1 %v13256_v43  ;;  %v13323_v43 = vld [vmem:[%s14131_s14 + $0x3e8] ss:$20 sps:$4 sm:$0xff]  }
 0x536   : > { %10616 = vmatpush1.bf16.msra.mxu0 %v13251_v8  ;;  %v13326_v8 = vld [vmem:[%s14131_s14 + $0x3f0] ss:$20 sps:$4 sm:$0xff]  }
 0x537   : > { %10780 = vmatpush1.bf16.msra.mxu1 %v13254_v47  ;;  %10617 = vmatprep.subr.bf16.mxu0 %v13259_v48  ;;  %v13334_v47 = vld [vmem:[%s14131_s14 + $0x41c] ss:$20 sps:$4 sm:$0xff]  }
 0x538   : > { %10781 = vmatprep.subr.bf16.mxu1 %v13262_v17  ;;  %v13329_v48 = vld [vmem:[%s14131_s14 + $0x410] ss:$20 sps:$4 sm:$0xff]   ;;  %v13332_v17 = vld [vmem:[%s14131_s14 + $0x418] ss:$20 sps:$4 sm:$0xff]  }
 0x53a   : > { %10618 = vmatpush1.bf16.msra.mxu0 %v13257_v32  ;;  %v13340_v32 = vld [vmem:[%s14131_s14 + $0x444] ss:$20 sps:$4 sm:$0xff]  }
 0x53b   : > { %10782 = vmatpush1.bf16.msra.mxu1 %v13260_v56  ;;  %10619 = vmatprep.subr.bf16.mxu0 %v13265_v19  ;;  %v13338_v56 = vld [vmem:[%s14131_s14 + $0x440] ss:$20 sps:$4 sm:$0xff]   ;;  %v13343_v19 = vld [vmem:[%s14131_s14 + $0x464] ss:$20 sps:$4 sm:$0xff]  }
 0x53c   : > { %10783 = vmatprep.subr.bf16.mxu1 %v13268_v57  ;;  %v13346_v57 = vld [vmem:[%s14131_s14 + $0x46c] ss:$20 sps:$4 sm:$0xff]  }
 0x53e   : > { %10620 = vmatpush1.bf16.msra.mxu0 %v13263_v10  ;;  %v1445_v10 = vsub.s32 2, %v14165_v44 }
 0x53f   : > { %10784 = vmatpush1.bf16.msra.mxu1 %v13266_v58  ;;  %10630 = vmatprep.subr.bf16.mxu0 %v13271_v13  ;;  %v13349_v58 = vld [vmem:[%s14131_s14 + $0x48c] ss:$20 sps:$4 sm:$0xff]   ;;  %v13352_v13 = vld [vmem:[%s14131_s14 + $0x494] ss:$20 sps:$4 sm:$0xff]  }
 0x540   : > { %10794 = vmatprep.subr.bf16.mxu1 %v13274_v59  ;;  %v13347_v59 = vld [vmem:[%s14131_s14 + $0x488] ss:$20 sps:$4 sm:$0xff]   ;;  %v1446_v61 = vrot.slane %v15405_v60, %v1445_v10 }
 0x541   : > { %10622 = vmatmul.mubr.bf16.vlgmr.msra.gmra.mrb[8].mxu0 %v15498_v63 }
 0x542   : > { %10786 = vmatmul.mubr.bf16.vlgmr.msra.gmra.mrb[8].mxu1 %v15498_v63  ;;  %10631 = vmatpush1.bf16.msra.mxu0 %v13269_v55  ;;  %v13350_v55 = vld [vmem:[%s14131_s14 + $0x490] ss:$20 sps:$4 sm:$0xff]  }
 0x543   : > { %10662 = vmatprep.mubr.bf16.mxu0 %v15502_v3  ;;  %10795 = vmatpush1.bf16.msra.mxu1 %v13272_v23  ;;  %v13355_v23 = vld [vmem:[%s14131_s14 + $0x4b4] ss:$20 sps:$4 sm:$0xff]  }
 0x544   : > { %10826 = vmatprep.mubr.bf16.mxu1 %v15502_v3  ;;  %10632 = vmatprep.subr.bf16.mxu0 %v13277_v12  ;;  %v13358_v12 = vld [vmem:[%s14131_s14 + $0x4bc] ss:$20 sps:$4 sm:$0xff]  }
 0x545   : > { %10796 = vmatprep.subr.bf16.mxu1 %v13280_v4  ;;  %v13353_v4 = vld [vmem:[%s14131_s14 + $0x4b0] ss:$20 sps:$4 sm:$0xff]  }
 0x546   : > { %10633 = vmatpush1.bf16.msra.mxu0 %v13275_v5  ;;  %v12921_v5 = vadd.f32 %v15059_v18, %v1446_v61  ;;  %v13370_v18 = vld [vmem:[%s14131_s14 + $0x50c] ss:$20 sps:$4 sm:$0xff]   ;;  %v13425_v61 = vld [vmem:[%s14131_s14 + $0x690] ss:$20 sps:$4 sm:$0xff]  }
 0x547   : > { %10797 = vmatpush1.bf16.msra.mxu1 %v13278_v1  ;;  %10634 = vmatprep.subr.bf16.mxu0 %v13283_v6  ;;  %v13356_v1 = vld [vmem:[%s14131_s14 + $0x4b8] ss:$20 sps:$4 sm:$0xff]   ;;  %v13361_v6 = vld [vmem:[%s14131_s14 + $0x4dc] ss:$20 sps:$4 sm:$0xff]  }
 0x548   : > { %10798 = vmatprep.subr.bf16.mxu1 %v13286_v7  ;;  %v13364_v7 = vld [vmem:[%s14131_s14 + $0x4e4] ss:$20 sps:$4 sm:$0xff]  }
 0x54a   : > { %10635 = vmatpush1.bf16.msra.mxu0 %v13281_v15  ;;  %v13359_v15 = vld [vmem:[%s14131_s14 + $0x4d8] ss:$20 sps:$4 sm:$0xff]  }
 0x54b   : > { %10799 = vmatpush1.bf16.msra.mxu1 %v13284_v41  ;;  %10636 = vmatprep.subr.bf16.mxu0 %v13289_v9  ;;  %v8525_v41 = vmax.f32 %v12921_v5, 0.0  ;;  %v13362_v9 = vld [vmem:[%s14131_s14 + $0x4e0] ss:$20 sps:$4 sm:$0xff]  }
 0x54c   : > { %10800 = vmatprep.subr.bf16.mxu1 %v13292_v11  ;;  %v13367_v11 = vld [vmem:[%s14131_s14 + $0x504] ss:$20 sps:$4 sm:$0xff]   ;;  %v13434_v5 = vld [vmem:[%s14131_s14 + $0x6c0] ss:$20 sps:$4 sm:$0xff]  }
 0x54e   : > { %10637 = vmatpush1.bf16.msra.mxu0 %v13287_v14  ;;  %v13365_v14 = vld [vmem:[%s14131_s14 + $0x500] ss:$20 sps:$4 sm:$0xff]  }
 0x54f   : > { %10801 = vmatpush1.bf16.msra.mxu1 %v13290_v16  ;;  %10638 = vmatprep.subr.bf16.mxu0 %v13295_v2  ;;  %v15575_v16 = vpack.c.bf16 %v8525_v41, %v8525_v41  ;;  %v13368_v2 = vld [vmem:[%s14131_s14 + $0x508] ss:$20 sps:$4 sm:$0xff]   ;;  %v13445_v41 = vld [vmem:[%s14131_s14 + $0x70c] ss:$20 sps:$4 sm:$0xff]  }
 0x550   : > { %10802 = vmatprep.subr.bf16.mxu1 %v13298_v51  ;;  %v13373_v51 = vld [vmem:[%s14131_s14 + $0x52c] ss:$20 sps:$4 sm:$0xff]  }
 0x552   : > { %10639 = vmatpush1.bf16.msra.mxu0 %v13293_v21  ;;  %v13376_v21 = vld [vmem:[%s14131_s14 + $0x534] ss:$20 sps:$4 sm:$0xff]  }
 0x553   : > { %10803 = vmatpush1.bf16.msra.mxu1 %v13296_v25  ;;  %10640 = vmatprep.subr.bf16.mxu0 %v13301_v26  ;;  %v13371_v25 = vld [vmem:[%s14131_s14 + $0x528] ss:$20 sps:$4 sm:$0xff]   ;;  %v13374_v26 = vld [vmem:[%s14131_s14 + $0x530] ss:$20 sps:$4 sm:$0xff]  }
 0x554   : > { %10804 = vmatprep.subr.bf16.mxu1 %v13304_v27  ;;  %v13379_v27 = vld [vmem:[%s14131_s14 + $0x554] ss:$20 sps:$4 sm:$0xff]  }
 0x556   : > { %10641 = vmatpush1.bf16.msra.mxu0 %v13299_v29  ;;  %v13382_v29 = vld [vmem:[%s14131_s14 + $0x55c] ss:$20 sps:$4 sm:$0xff]  }
 0x557   : > { %10805 = vmatpush1.bf16.msra.mxu1 %v13302_v22  ;;  %10642 = vmatprep.subr.bf16.mxu0 %v13307_v31  ;;  %v13377_v22 = vld [vmem:[%s14131_s14 + $0x550] ss:$20 sps:$4 sm:$0xff]   ;;  %v13380_v31 = vld [vmem:[%s14131_s14 + $0x558] ss:$20 sps:$4 sm:$0xff]  }
 0x558   : > { %10806 = vmatprep.subr.bf16.mxu1 %v13310_v24  ;;  %v13385_v24 = vld [vmem:[%s14131_s14 + $0x57c] ss:$20 sps:$4 sm:$0xff]  }
 0x55a   : > { %10643 = vmatpush1.bf16.msra.mxu0 %v13305_v54  ;;  %v13388_v54 = vld [vmem:[%s14131_s14 + $0x584] ss:$20 sps:$4 sm:$0xff]  }
 0x55b   : > { %10807 = vmatpush1.bf16.msra.mxu1 %v13308_v33  ;;  %10644 = vmatprep.subr.bf16.mxu0 %v13313_v34  ;;  %v13383_v33 = vld [vmem:[%s14131_s14 + $0x578] ss:$20 sps:$4 sm:$0xff]   ;;  %v13386_v34 = vld [vmem:[%s14131_s14 + $0x580] ss:$20 sps:$4 sm:$0xff]  }
 0x55c   : > { %10808 = vmatprep.subr.bf16.mxu1 %v13316_v35  ;;  %v13391_v35 = vld [vmem:[%s14131_s14 + $0x5a4] ss:$20 sps:$4 sm:$0xff]  }
 0x55e   : > { %10645 = vmatpush1.bf16.msra.mxu0 %v13311_v38  ;;  %v13394_v38 = vld [vmem:[%s14131_s14 + $0x5ac] ss:$20 sps:$4 sm:$0xff]  }
 0x55f   : > { %10809 = vmatpush1.bf16.msra.mxu1 %v13314_v36  ;;  %10646 = vmatprep.subr.bf16.mxu0 %v13319_v30  ;;  %v13389_v36 = vld [vmem:[%s14131_s14 + $0x5a0] ss:$20 sps:$4 sm:$0xff]   ;;  %v13392_v30 = vld [vmem:[%s14131_s14 + $0x5a8] ss:$20 sps:$4 sm:$0xff]  }
 0x560   : > { %10810 = vmatprep.subr.bf16.mxu1 %v13322_v37  ;;  %v13397_v37 = vld [vmem:[%s14131_s14 + $0x5cc] ss:$20 sps:$4 sm:$0xff]  }
 0x562   : > { %10647 = vmatpush1.bf16.msra.mxu0 %v13317_v39  ;;  %v13400_v39 = vld [vmem:[%s14131_s14 + $0x5d4] ss:$20 sps:$4 sm:$0xff]  }
 0x563   : > { %10811 = vmatpush1.bf16.msra.mxu1 %v13320_v40  ;;  %10648 = vmatprep.subr.bf16.mxu0 %v13325_v62  ;;  %v13395_v40 = vld [vmem:[%s14131_s14 + $0x5c8] ss:$20 sps:$4 sm:$0xff]   ;;  %v13398_v62 = vld [vmem:[%s14131_s14 + $0x5d0] ss:$20 sps:$4 sm:$0xff]  }
 0x564   : > { %10812 = vmatprep.subr.bf16.mxu1 %v13328_v42  ;;  %v13403_v42 = vld [vmem:[%s14131_s14 + $0x5f4] ss:$20 sps:$4 sm:$0xff]  }
 0x566   : > { %10649 = vmatpush1.bf16.msra.mxu0 %v13323_v43  ;;  %v13406_v43 = vld [vmem:[%s14131_s14 + $0x5fc] ss:$20 sps:$4 sm:$0xff]  }
 0x567   : > { %10813 = vmatpush1.bf16.msra.mxu1 %v13326_v8  ;;  %10650 = vmatprep.subr.bf16.mxu0 %v13331_v46  ;;  %v13401_v8 = vld [vmem:[%s14131_s14 + $0x5f0] ss:$20 sps:$4 sm:$0xff]   ;;  %v13404_v46 = vld [vmem:[%s14131_s14 + $0x5f8] ss:$20 sps:$4 sm:$0xff]  }
 0x568   : > { %10814 = vmatprep.subr.bf16.mxu1 %v13334_v47  ;;  %v13409_v47 = vld [vmem:[%s14131_s14 + $0x61c] ss:$20 sps:$4 sm:$0xff]  }
 0x56a   : > { %10651 = vmatpush1.bf16.msra.mxu0 %v13329_v48  ;;  %v13412_v48 = vld [vmem:[%s14131_s14 + $0x624] ss:$20 sps:$4 sm:$0xff]  }
 0x56b   : > { %10815 = vmatpush1.bf16.msra.mxu1 %v13332_v17  ;;  %10652 = vmatprep.subr.bf16.mxu0 %v13337_v49  ;;  %v13407_v17 = vld [vmem:[%s14131_s14 + $0x618] ss:$20 sps:$4 sm:$0xff]   ;;  %v13410_v49 = vld [vmem:[%s14131_s14 + $0x620] ss:$20 sps:$4 sm:$0xff]  }
 0x56c   : > { %10816 = vmatprep.subr.bf16.mxu1 %v13340_v32  ;;  %v13415_v32 = vld [vmem:[%s14131_s14 + $0x644] ss:$20 sps:$4 sm:$0xff]  }
 0x56e   : > { %10653 = vmatpush1.bf16.msra.mxu0 %v13335_v53  ;;  %v13418_v53 = vld [vmem:[%s14131_s14 + $0x64c] ss:$20 sps:$4 sm:$0xff]  }
 0x56f   : > { %10817 = vmatpush1.bf16.msra.mxu1 %v13338_v56  ;;  %10654 = vmatprep.subr.bf16.mxu0 %v13343_v19  ;;  %v13413_v56 = vld [vmem:[%s14131_s14 + $0x640] ss:$20 sps:$4 sm:$0xff]   ;;  %v13416_v19 = vld [vmem:[%s14131_s14 + $0x648] ss:$20 sps:$4 sm:$0xff]  }
 0x570   : > { %10818 = vmatprep.subr.bf16.mxu1 %v13346_v57  ;;  %v13421_v57 = vld [vmem:[%s14131_s14 + $0x66c] ss:$20 sps:$4 sm:$0xff]  }
 0x572   : > { %10655 = vmatpush1.bf16.msra.mxu0 %v13341_v20  ;;  %v13424_v20 = vld [vmem:[%s14131_s14 + $0x674] ss:$20 sps:$4 sm:$0xff]  }
 0x573   : > { %10819 = vmatpush1.bf16.msra.mxu1 %v13344_v52  ;;  %10656 = vmatprep.subr.bf16.mxu0 %v13349_v58  ;;  %v13419_v52 = vld [vmem:[%s14131_s14 + $0x668] ss:$20 sps:$4 sm:$0xff]   ;;  %v13422_v58 = vld [vmem:[%s14131_s14 + $0x670] ss:$20 sps:$4 sm:$0xff]  }
 0x574   : > { %10820 = vmatprep.subr.bf16.mxu1 %v13352_v13  ;;  %v13427_v13 = vld [vmem:[%s14131_s14 + $0x694] ss:$20 sps:$4 sm:$0xff]  }
 0x576   : > { %10657 = vmatpush1.bf16.msra.mxu0 %v13347_v59  ;;  %v13430_v59 = vld [vmem:[%s14131_s14 + $0x69c] ss:$20 sps:$4 sm:$0xff]  }
 0x577   : > { %10821 = vmatpush1.bf16.msra.mxu1 %v13350_v55  ;;  %10658 = vmatprep.subr.bf16.mxu0 %v13355_v23  ;;  %v13428_v55 = vld [vmem:[%s14131_s14 + $0x698] ss:$20 sps:$4 sm:$0xff]   ;;  %v13433_v23 = vld [vmem:[%s14131_s14 + $0x6bc] ss:$20 sps:$4 sm:$0xff]  }
 0x578   : > { %10822 = vmatprep.subr.bf16.mxu1 %v13358_v12  ;;  %v13436_v12 = vld [vmem:[%s14131_s14 + $0x6c4] ss:$20 sps:$4 sm:$0xff]  }
 0x57a   : > { %10659 = vmatpush1.bf16.msra.mxu0 %v13353_v4  ;;  %v13431_v4 = vld [vmem:[%s14131_s14 + $0x6b8] ss:$20 sps:$4 sm:$0xff]  }
 0x57b   : > { %10823 = vmatpush1.bf16.msra.mxu1 %v13356_v1  ;;  %10660 = vmatprep.subr.bf16.mxu0 %v13361_v6  ;;  %v13439_v1 = vld [vmem:[%s14131_s14 + $0x6e4] ss:$20 sps:$4 sm:$0xff]   ;;  %v13442_v6 = vld [vmem:[%s14131_s14 + $0x6ec] ss:$20 sps:$4 sm:$0xff]  }
 0x57c   : > { %10824 = vmatprep.subr.bf16.mxu1 %v13364_v7  ;;  %v13437_v7 = vld [vmem:[%s14131_s14 + $0x6e0] ss:$20 sps:$4 sm:$0xff]  }
 0x57e   : > { %10661 = vmatpush1.bf16.msra.mxu0 %v13359_v15  ;;  %v13440_v15 = vld [vmem:[%s14131_s14 + $0x6e8] ss:$20 sps:$4 sm:$0xff]  }
 0x57f   : > { %10825 = vmatpush1.bf16.msra.mxu1 %v13362_v9  ;;  %10671 = vmatprep.subr.bf16.mxu0 %v13367_v11  ;;  %v13448_v9 = vld [vmem:[%s14131_s14 + $0x714] ss:$20 sps:$4 sm:$0xff]  }
 0x580   : > { %10835 = vmatprep.subr.bf16.mxu1 %v13370_v18  ;;  %v13443_v11 = vld [vmem:[%s14131_s14 + $0x708] ss:$20 sps:$4 sm:$0xff]   ;;  %v13446_v18 = vld [vmem:[%s14131_s14 + $0x710] ss:$20 sps:$4 sm:$0xff]  }
 0x581   : > { %10663 = vmatmul.mubr.bf16.vlgmr.msra.gmra.mrb[8].mxu0 %v15575_v16 }
 0x582   : > { %10827 = vmatmul.mubr.bf16.vlgmr.msra.gmra.mrb[8].mxu1 %v15575_v16  ;;  %10672 = vmatpush1.bf16.msra.mxu0 %v13365_v14  ;;  %v13451_v14 = vld [vmem:[%s14131_s14 + $0x734] ss:$20 sps:$4 sm:$0xff]  }
 0x583   : > { %10836 = vmatpush1.bf16.msra.mxu1 %v13368_v2  ;;  %10673 = vmatprep.subr.bf16.mxu0 %v13373_v51  ;;  %v13454_v2 = vld [vmem:[%s14131_s14 + $0x73c] ss:$20 sps:$4 sm:$0xff]  }
 0x584   : > { %10837 = vmatprep.subr.bf16.mxu1 %v13376_v21  ;;  %v13449_v51 = vld [vmem:[%s14131_s14 + $0x730] ss:$20 sps:$4 sm:$0xff]   ;;  %v13452_v21 = vld [vmem:[%s14131_s14 + $0x738] ss:$20 sps:$4 sm:$0xff]  }
 0x586   : > { %10674 = vmatpush1.bf16.msra.mxu0 %v13371_v25  ;;  %v13457_v25 = vld [vmem:[%s14131_s14 + $0x75c] ss:$20 sps:$4 sm:$0xff]  }
 0x587   : > { %10838 = vmatpush1.bf16.msra.mxu1 %v13374_v26  ;;  %10675 = vmatprep.subr.bf16.mxu0 %v13379_v27  ;;  %v13460_v26 = vld [vmem:[%s14131_s14 + $0x764] ss:$20 sps:$4 sm:$0xff]  }
 0x588   : > { %10839 = vmatprep.subr.bf16.mxu1 %v13382_v29  ;;  %v13455_v27 = vld [vmem:[%s14131_s14 + $0x758] ss:$20 sps:$4 sm:$0xff]   ;;  %v13458_v29 = vld [vmem:[%s14131_s14 + $0x760] ss:$20 sps:$4 sm:$0xff]  }
 0x58a   : > { %10676 = vmatpush1.bf16.msra.mxu0 %v13377_v22  ;;  %v13463_v22 = vld [vmem:[%s14131_s14 + $0x784] ss:$20 sps:$4 sm:$0xff]  }
 0x58b   : > { %10840 = vmatpush1.bf16.msra.mxu1 %v13380_v31  ;;  %10677 = vmatprep.subr.bf16.mxu0 %v13385_v24  ;;  %v13466_v31 = vld [vmem:[%s14131_s14 + $0x78c] ss:$20 sps:$4 sm:$0xff]   ;;  %v1453_v24 = vsub.s32 4, %v14165_v44 }
 0x58c   : > { %10841 = vmatprep.subr.bf16.mxu1 %v13388_v54  ;;  %v1457_v54 = vsub.s32 5, %v14165_v44 }
 0x58e   : > { %10678 = vmatpush1.bf16.msra.mxu0 %v13383_v33  ;;  %v1465_v33 = vsub.s32 7, %v14165_v44 }
 0x58f   : > { %10842 = vmatpush1.bf16.msra.mxu1 %v13386_v34  ;;  %10679 = vmatprep.subr.bf16.mxu0 %v13391_v35  ;;  %v1454_v34 = vrot.slane %v15405_v60, %v1453_v24  ;;  %v1458_v35 = vrot.slane %v15405_v60, %v1457_v54  ;;  %v13509_v54 = vld [vmem:[%s14131_s14 + $0x8c0] ss:$20 sps:$4 sm:$0xff]  }
 0x590   : > { %10843 = vmatprep.subr.bf16.mxu1 %v13394_v38  ;;  %v1466_v38 = vrot.slane %v15405_v60, %v1465_v33  ;;  %v13512_v33 = vld [vmem:[%s14131_s14 + $0x8c8] ss:$20 sps:$4 sm:$0xff]  }
 0x592   : > { %10680 = vmatpush1.bf16.msra.mxu0 %v13389_v36 }
 0x593   : > { %10844 = vmatpush1.bf16.msra.mxu1 %v13392_v30  ;;  %10681 = vmatprep.subr.bf16.mxu0 %v13397_v37 }
 0x594   : > { %10845 = vmatprep.subr.bf16.mxu1 %v13400_v39 }
 0x596   : > { %10682 = vmatpush1.bf16.msra.mxu0 %v13395_v40 }
 0x597   : > { %10846 = vmatpush1.bf16.msra.mxu1 %v13398_v62  ;;  %10683 = vmatprep.subr.bf16.mxu0 %v13403_v42 }
 0x598   : > { %10847 = vmatprep.subr.bf16.mxu1 %v13406_v43 }
 0x59a   : > { %10684 = vmatpush1.bf16.msra.mxu0 %v13401_v8 }
 0x59b   : > { %10848 = vmatpush1.bf16.msra.mxu1 %v13404_v46  ;;  %10685 = vmatprep.subr.bf16.mxu0 %v13409_v47 }
 0x59c   : > { %10849 = vmatprep.subr.bf16.mxu1 %v13412_v48 }
 0x59e   : > { %10686 = vmatpush1.bf16.msra.mxu0 %v13407_v17 }
 0x59f   : > { %10850 = vmatpush1.bf16.msra.mxu1 %v13410_v49  ;;  %10687 = vmatprep.subr.bf16.mxu0 %v13415_v32  ;;  %v13461_v32 = vld [vmem:[%s14131_s14 + $0x780] ss:$20 sps:$4 sm:$0xff]  }
 0x5a0   : > { %10851 = vmatprep.subr.bf16.mxu1 %v13418_v53  ;;  %v13464_v53 = vld [vmem:[%s14131_s14 + $0x788] ss:$20 sps:$4 sm:$0xff]  }
 0x5a2   : > { %10688 = vmatpush1.bf16.msra.mxu0 %v13413_v56 }
 0x5a3   : > { %10852 = vmatpush1.bf16.msra.mxu1 %v13416_v19  ;;  %10689 = vmatprep.subr.bf16.mxu0 %v13421_v57  ;;  %v13469_v19 = vld [vmem:[%s14131_s14 + $0x7ac] ss:$20 sps:$4 sm:$0xff]   ;;  %v13472_v57 = vld [vmem:[%s14131_s14 + $0x7b4] ss:$20 sps:$4 sm:$0xff]  }
 0x5a4   : > { %10853 = vmatprep.subr.bf16.mxu1 %v13424_v20 }
 0x5a6   : > { %10690 = vmatpush1.bf16.msra.mxu0 %v13419_v52  ;;  %v13467_v52 = vld [vmem:[%s14131_s14 + $0x7a8] ss:$20 sps:$4 sm:$0xff]  }
 0x5a7   : > { %10854 = vmatpush1.bf16.msra.mxu1 %v13422_v58  ;;  %10691 = vmatprep.subr.bf16.mxu0 %v13427_v13  ;;  %v13470_v58 = vld [vmem:[%s14131_s14 + $0x7b0] ss:$20 sps:$4 sm:$0xff]   ;;  %v13475_v13 = vld [vmem:[%s14131_s14 + $0x7d4] ss:$20 sps:$4 sm:$0xff]  }
 0x5a8   : > { %10855 = vmatprep.subr.bf16.mxu1 %v13430_v59  ;;  %v13478_v59 = vld [vmem:[%s14131_s14 + $0x7dc] ss:$20 sps:$4 sm:$0xff]  }
 0x5aa   : > { %10692 = vmatpush1.bf16.msra.mxu0 %v13425_v61  ;;  %v13473_v61 = vld [vmem:[%s14131_s14 + $0x7d0] ss:$20 sps:$4 sm:$0xff]  }
 0x5ab   : > { %10856 = vmatpush1.bf16.msra.mxu1 %v13428_v55  ;;  %10693 = vmatprep.subr.bf16.mxu0 %v13433_v23  ;;  %v13476_v55 = vld [vmem:[%s14131_s14 + $0x7d8] ss:$20 sps:$4 sm:$0xff]   ;;  %v13481_v23 = vld [vmem:[%s14131_s14 + $0x7fc] ss:$20 sps:$4 sm:$0xff]  }
 0x5ac   : > { %10857 = vmatprep.subr.bf16.mxu1 %v13436_v12  ;;  %v13484_v12 = vld [vmem:[%s14131_s14 + $0x804] ss:$20 sps:$4 sm:$0xff]  }
 0x5ae   : > { %10694 = vmatpush1.bf16.msra.mxu0 %v13431_v4  ;;  %v13479_v4 = vld [vmem:[%s14131_s14 + $0x7f8] ss:$20 sps:$4 sm:$0xff]  }
 0x5af   : > { %10858 = vmatpush1.bf16.msra.mxu1 %v13434_v5  ;;  %10695 = vmatprep.subr.bf16.mxu0 %v13439_v1  ;;  %v13482_v5 = vld [vmem:[%s14131_s14 + $0x800] ss:$20 sps:$4 sm:$0xff]   ;;  %v13487_v1 = vld [vmem:[%s14131_s14 + $0x824] ss:$20 sps:$4 sm:$0xff]  }
 0x5b0   : > { %10859 = vmatprep.subr.bf16.mxu1 %v13442_v6  ;;  %v13490_v6 = vld [vmem:[%s14131_s14 + $0x82c] ss:$20 sps:$4 sm:$0xff]  }
 0x5b2   : > { %10696 = vmatpush1.bf16.msra.mxu0 %v13437_v7  ;;  %v13485_v7 = vld [vmem:[%s14131_s14 + $0x820] ss:$20 sps:$4 sm:$0xff]  }
 0x5b3   : > { %10860 = vmatpush1.bf16.msra.mxu1 %v13440_v15  ;;  %10697 = vmatprep.subr.bf16.mxu0 %v13445_v41  ;;  %v13488_v15 = vld [vmem:[%s14131_s14 + $0x828] ss:$20 sps:$4 sm:$0xff]   ;;  %v13493_v41 = vld [vmem:[%s14131_s14 + $0x84c] ss:$20 sps:$4 sm:$0xff]  }
 0x5b4   : > { %10861 = vmatprep.subr.bf16.mxu1 %v13448_v9  ;;  %v13496_v9 = vld [vmem:[%s14131_s14 + $0x854] ss:$20 sps:$4 sm:$0xff]  }
 0x5b6   : > { %10698 = vmatpush1.bf16.msra.mxu0 %v13443_v11  ;;  %v13491_v11 = vld [vmem:[%s14131_s14 + $0x848] ss:$20 sps:$4 sm:$0xff]  }
 0x5b7   : > { %10862 = vmatpush1.bf16.msra.mxu1 %v13446_v18  ;;  %10699 = vmatprep.subr.bf16.mxu0 %v13451_v14  ;;  %v13494_v18 = vld [vmem:[%s14131_s14 + $0x850] ss:$20 sps:$4 sm:$0xff]   ;;  %v13499_v14 = vld [vmem:[%s14131_s14 + $0x874] ss:$20 sps:$4 sm:$0xff]  }
 0x5b8   : > { %10863 = vmatprep.subr.bf16.mxu1 %v13454_v2  ;;  %v13502_v2 = vld [vmem:[%s14131_s14 + $0x87c] ss:$20 sps:$4 sm:$0xff]  }
 0x5ba   : > { %10700 = vmatpush1.bf16.msra.mxu0 %v13449_v51  ;;  %v13497_v51 = vld [vmem:[%s14131_s14 + $0x870] ss:$20 sps:$4 sm:$0xff]  }
 0x5bb   : > { %10864 = vmatpush1.bf16.msra.mxu1 %v13452_v21  ;;  %10701 = vmatprep.subr.bf16.mxu0 %v13457_v25  ;;  %v13500_v21 = vld [vmem:[%s14131_s14 + $0x878] ss:$20 sps:$4 sm:$0xff]   ;;  %v13505_v25 = vld [vmem:[%s14131_s14 + $0x89c] ss:$20 sps:$4 sm:$0xff]  }
 0x5bc   : > { %10865 = vmatprep.subr.bf16.mxu1 %v13460_v26  ;;  %v13508_v26 = vld [vmem:[%s14131_s14 + $0x8a4] ss:$20 sps:$4 sm:$0xff]  }
 0x5be   : > { %10702 = vmatpush1.bf16.msra.mxu0 %v13455_v27  ;;  %v13503_v27 = vld [vmem:[%s14131_s14 + $0x898] ss:$20 sps:$4 sm:$0xff]  }
 0x5bf   : > { %10866 = vmatpush1.bf16.msra.mxu1 %v13458_v29  ;;  %10712 = vmatprep.subr.bf16.mxu0 %v13463_v22  ;;  %v13506_v29 = vld [vmem:[%s14131_s14 + $0x8a0] ss:$20 sps:$4 sm:$0xff]   ;;  %v13511_v22 = vld [vmem:[%s14131_s14 + $0x8c4] ss:$20 sps:$4 sm:$0xff]  }
 0x5c0   : > { %10876 = vmatprep.subr.bf16.mxu1 %v13466_v31  ;;  %v13514_v31 = vld [vmem:[%s14131_s14 + $0x8cc] ss:$20 sps:$4 sm:$0xff]  }
 0x5d4   : > { %v8147_v36 = vpop.f32.mrb[4].mxu0  ;;  %v15650_v37 = vpop.f32.mrb[4].mxu1 }
 0x5d5   : > { %v12923_v30 = vadd.f32 %v8147_v36, %v1454_v34  ;;  %v8149_v39 = vpop.f32.mrb[5].mxu0  ;;  %v8518_v62 = vpop.f32.mrb[5].mxu1  ;;  %v13517_v34 = vld [vmem:[%s14131_s14 + $0x8ec] ss:$20 sps:$4 sm:$0xff]   ;;  %v13518_v36 = vld [vmem:[%s14131_s14 + $0x8f0] ss:$20 sps:$4 sm:$0xff]  }
 0x5d6   : > { %v12924_v40 = vadd.f32 %v8149_v39, %v1458_v35  ;;  %v8151_v42 = vpop.f32.mrb[6].mxu0  ;;  %v12926_v8 = vadd.f32 %v8518_v62, %v1466_v38  ;;  %v8520_v46 = vpop.f32.mrb[6].mxu1  ;;  %v13520_v35 = vld [vmem:[%s14131_s14 + $0x8f4] ss:$20 sps:$4 sm:$0xff]   ;;  %v13526_v39 = vld [vmem:[%s14131_s14 + $0x91c] ss:$20 sps:$4 sm:$0xff]  }
 0x5d7   : > { %v8527_v43 = vmax.f32 %v12923_v30, 0.0  ;;  %v8152_v47 = vpop.f32.mrb[7].mxu0  ;;  %v8521_v17 = vpop.f32.mrb[7].mxu1  ;;  %v13515_v38 = vld [vmem:[%s14131_s14 + $0x8e8] ss:$20 sps:$4 sm:$0xff]  }
 0x5d8   : > { %v8528_v48 = vmax.f32 %v12924_v40, 0.0  ;;  %v8530_v60 = vmax.f32 %v12926_v8, 0.0  ;;  %v13523_v30 = vld [vmem:[%s14131_s14 + $0x914] ss:$20 sps:$4 sm:$0xff]   ;;  %v13521_v40 = vld [vmem:[%s14131_s14 + $0x910] ss:$20 sps:$4 sm:$0xff]  }
 0x5d9   : > { %v15656_v56 = vpack.c.bf16 %v8527_v43, %v8527_v43  ;;  %v13524_v62 = vld [vmem:[%s14131_s14 + $0x918] ss:$20 sps:$4 sm:$0xff]   ;;  %v13529_v42 = vld [vmem:[%s14131_s14 + $0x93c] ss:$20 sps:$4 sm:$0xff]   ;;  %v13530_v46 = vld [vmem:[%s14131_s14 + $0x940] ss:$20 sps:$4 sm:$0xff]  }
 0x5da   : > { %v15652_v49 = vpack.c.bf16 %v8528_v48, %v8528_v48  ;;  %v15662_v20 = vpack.c.bf16 %v8530_v60, %v8530_v60  ;;  %v13532_v43 = vld [vmem:[%s14131_s14 + $0x944] ss:$20 sps:$4 sm:$0xff]   ;;  %v13538_v48 = vld [vmem:[%s14131_s14 + $0x96c] ss:$20 sps:$4 sm:$0xff]   ;;  %v13536_v60 = vld [vmem:[%s14131_s14 + $0x968] ss:$20 sps:$4 sm:$0xff]  }
 0x5db   : > { %v13527_v8 = vld [vmem:[%s14131_s14 + $0x938] ss:$20 sps:$4 sm:$0xff]   ;;  %v13533_v17 = vld [vmem:[%s14131_s14 + $0x960] ss:$20 sps:$4 sm:$0xff]  }
 0x5dc   : > { %10703 = vmatprep.mubr.bf16.mxu0 %v15652_v49  ;;  %10867 = vmatprep.mubr.bf16.mxu1 %v15652_v49  ;;  %v13535_v47 = vld [vmem:[%s14131_s14 + $0x964] ss:$20 sps:$4 sm:$0xff]  }
 0x5dd   : > { %10704 = vmatmul.mubr.bf16.vlgmr.msra.gmra.mrb[8].mxu0 %v15656_v56  ;;  %10868 = vmatmul.mubr.bf16.vlgmr.msra.gmra.mrb[8].mxu1 %v15656_v56 }
 0x5de   : > { %10713 = vmatpush1.bf16.msra.mxu0 %v13461_v32  ;;  %10877 = vmatpush1.bf16.msra.mxu1 %v13464_v53  ;;  %v1461_v32 = vsub.s32 6, %v14165_v44  ;;  %v13541_v53 = vld [vmem:[%s14131_s14 + $0x98c] ss:$20 sps:$4 sm:$0xff]  }
 0x5df   : > { %10744 = vmatprep.mubr.bf16.mxu0 %v15662_v20  ;;  %10908 = vmatprep.mubr.bf16.mxu1 %v15662_v20 }
 0x5e0   : > { %10714 = vmatprep.subr.bf16.mxu0 %v13469_v19  ;;  %10878 = vmatprep.subr.bf16.mxu1 %v13472_v57  ;;  %v13544_v19 = vld [vmem:[%s14131_s14 + $0x994] ss:$20 sps:$4 sm:$0xff]  }
 0x5e1   : > { %v13539_v57 = vld [vmem:[%s14131_s14 + $0x988] ss:$20 sps:$4 sm:$0xff]  }
 0x5e2   : > { %10715 = vmatpush1.bf16.msra.mxu0 %v13467_v52  ;;  %10879 = vmatpush1.bf16.msra.mxu1 %v13470_v58  ;;  %v13542_v52 = vld [vmem:[%s14131_s14 + $0x990] ss:$20 sps:$4 sm:$0xff]  }
 0x5e3   : > { %10716 = vmatprep.subr.bf16.mxu0 %v13475_v13  ;;  %10880 = vmatprep.subr.bf16.mxu1 %v13478_v59  ;;  %v13621_v58 = vld [vmem:[%s14129_s16] sm:$0xff] }
 0x5e4   : > { %v1462_v13 = vrot.slane %v13621_v58, %v1461_v32  ;;  %v13547_v59 = vld [vmem:[%s14131_s14 + $0x9b4] ss:$20 sps:$4 sm:$0xff]   ;;  %v13592_v32 = vld [vmem:[%s14131_s14 + $0x790] ss:$20 sps:$4 sm:$0xff]  }
 0x5e5   : > { %v13597_v58 = vld [vmem:[%s14131_s14 + $0x6a0] ss:$20 sps:$4 sm:$0xff]  }
 0x5e6   : > { %10717 = vmatpush1.bf16.msra.mxu0 %v13473_v61  ;;  %10881 = vmatpush1.bf16.msra.mxu1 %v13476_v55  ;;  %v13550_v61 = vld [vmem:[%s14131_s14 + $0x9bc] ss:$20 sps:$4 sm:$0xff]  }
 0x5e7   : > { %10718 = vmatprep.subr.bf16.mxu0 %v13481_v23  ;;  %10882 = vmatprep.subr.bf16.mxu1 %v13484_v12  ;;  %v13545_v55 = vld [vmem:[%s14131_s14 + $0x9b0] ss:$20 sps:$4 sm:$0xff]   ;;  %v13548_v23 = vld [vmem:[%s14131_s14 + $0x9b8] ss:$20 sps:$4 sm:$0xff]   ;;  %v12925_v12 = vadd.f32 %v15650_v37, %v1462_v13  ;;  %v13600_v13 = vld [vmem:[%s14131_s14 + $0x7e0] ss:$20 sps:$4 sm:$0xff]  }
 0x5e8   : > { %v13559_v37 = vld [vmem:[%s14131_s14 + $0x10] ss:$20 sps:$4 sm:$0xff]  }
 0x5ea   : > { %10719 = vmatpush1.bf16.msra.mxu0 %v13479_v4  ;;  %10883 = vmatpush1.bf16.msra.mxu1 %v13482_v5  ;;  %v13553_v4 = vld [vmem:[%s14131_s14 + $0x9dc] ss:$20 sps:$4 sm:$0xff]   ;;  %v13556_v5 = vld [vmem:[%s14131_s14 + $0x9e4] ss:$20 sps:$4 sm:$0xff]  }
 0x5eb   : > { %10720 = vmatprep.subr.bf16.mxu0 %v13487_v1  ;;  %10884 = vmatprep.subr.bf16.mxu1 %v13490_v6  ;;  %v13551_v1 = vld [vmem:[%s14131_s14 + $0x9d8] ss:$20 sps:$4 sm:$0xff]   ;;  %v13554_v6 = vld [vmem:[%s14131_s14 + $0x9e0] ss:$20 sps:$4 sm:$0xff]  }
 0x5ee   : > { %10721 = vmatpush1.bf16.msra.mxu0 %v13485_v7  ;;  %10885 = vmatpush1.bf16.msra.mxu1 %v13488_v15  ;;  %v8529_v7 = vmax.f32 %v12925_v12, 0.0  ;;  %v13557_v15 = vld [vmem:[%s14131_s14 + $0x150] ss:$20 sps:$4 sm:$0xff]  }
 0x5ef   : > { %10722 = vmatprep.subr.bf16.mxu0 %v13493_v41  ;;  %10886 = vmatprep.subr.bf16.mxu1 %v13496_v9  ;;  %v13558_v41 = vld [vmem:[%s14131_s14 + $0x3d0] ss:$20 sps:$4 sm:$0xff]  }
 0x5f0   : > { %v15732_v9 = vpack.c.bf16 %v8529_v7, %v8529_v7  ;;  %v13607_v12 = vld [vmem:[%s14131_s14 + $0x5b0] ss:$20 sps:$4 sm:$0xff]   ;;  %v13612_v7 = vld [vmem:[%s14131_s14 + $0x858] ss:$20 sps:$4 sm:$0xff]  }
 0x5f2   : > { %10723 = vmatpush1.bf16.msra.mxu0 %v13491_v11  ;;  %10887 = vmatpush1.bf16.msra.mxu1 %v13494_v18  ;;  %v13560_v11 = vld [vmem:[%s14131_s14 + $0x290] ss:$20 sps:$4 sm:$0xff]   ;;  %v13561_v18 = vld [vmem:[%s14131_s14 + $0x178] ss:$20 sps:$4 sm:$0xff]  }
 0x5f3   : > { %10724 = vmatprep.subr.bf16.mxu0 %v13499_v14  ;;  %10888 = vmatprep.subr.bf16.mxu1 %v13502_v2  ;;  %v13562_v14 = vld [vmem:[%s14131_s14 + $0x3f8] ss:$20 sps:$4 sm:$0xff]  }
 0x5f4   : > { %v13563_v2 = vld [vmem:[%s14131_s14 + $0x38] ss:$20 sps:$4 sm:$0xff]  }
 0x5f6   : > { %10725 = vmatpush1.bf16.msra.mxu0 %v13497_v51  ;;  %10889 = vmatpush1.bf16.msra.mxu1 %v13500_v21  ;;  %v13564_v51 = vld [vmem:[%s14131_s14 + $0x2b8] ss:$20 sps:$4 sm:$0xff]   ;;  %v13565_v21 = vld [vmem:[%s14131_s14 + $0x1a0] ss:$20 sps:$4 sm:$0xff]  }
 0x5f7   : > { %10726 = vmatprep.subr.bf16.mxu0 %v13505_v25  ;;  %10890 = vmatprep.subr.bf16.mxu1 %v13508_v26  ;;  %v13566_v25 = vld [vmem:[%s14131_s14 + $0x420] ss:$20 sps:$4 sm:$0xff]  }
 0x5f8   : > { %v13567_v26 = vld [vmem:[%s14131_s14 + $0x60] ss:$20 sps:$4 sm:$0xff]  }
 0x5fa   : > { %10727 = vmatpush1.bf16.msra.mxu0 %v13503_v27  ;;  %10891 = vmatpush1.bf16.msra.mxu1 %v13506_v29  ;;  %v13569_v27 = vld [vmem:[%s14131_s14 + $0x1c8] ss:$20 sps:$4 sm:$0xff]  }
 0x5fb   : > { %10728 = vmatprep.subr.bf16.mxu0 %v13511_v22  ;;  %10892 = vmatprep.subr.bf16.mxu1 %v13514_v31  ;;  %v13570_v29 = vld [vmem:[%s14131_s14 + $0x448] ss:$20 sps:$4 sm:$0xff]   ;;  %v13573_v31 = vld [vmem:[%s14131_s14 + $0x1f0] ss:$20 sps:$4 sm:$0xff]  }
 0x5fc   : > { %v13572_v22 = vld [vmem:[%s14131_s14 + $0x308] ss:$20 sps:$4 sm:$0xff]  }
 0x5fe   : > { %10729 = vmatpush1.bf16.msra.mxu0 %v13509_v54  ;;  %10893 = vmatpush1.bf16.msra.mxu1 %v13512_v33  ;;  %v13574_v54 = vld [vmem:[%s14131_s14 + $0x470] ss:$20 sps:$4 sm:$0xff]  }
 0x5ff   : > { %10730 = vmatprep.subr.bf16.mxu0 %v13517_v34  ;;  %10894 = vmatprep.subr.bf16.mxu1 %v13520_v35  ;;  %v13575_v33 = vld [vmem:[%s14131_s14 + $0xb0] ss:$20 sps:$4 sm:$0xff]   ;;  %v13577_v35 = vld [vmem:[%s14131_s14 + $0x218] ss:$20 sps:$4 sm:$0xff]  }
 0x600   : > { %v13576_v34 = vld [vmem:[%s14131_s14 + $0x330] ss:$20 sps:$4 sm:$0xff]  }
 0x602   : > { %10731 = vmatpush1.bf16.msra.mxu0 %v13515_v38  ;;  %10895 = vmatpush1.bf16.msra.mxu1 %v13518_v36  ;;  %v13578_v38 = vld [vmem:[%s14131_s14 + $0x498] ss:$20 sps:$4 sm:$0xff]  }
 0x603   : > { %10732 = vmatprep.subr.bf16.mxu0 %v13523_v30  ;;  %10896 = vmatprep.subr.bf16.mxu1 %v13526_v39  ;;  %v13579_v36 = vld [vmem:[%s14131_s14 + $0xd8] ss:$20 sps:$4 sm:$0xff]   ;;  %v13581_v39 = vld [vmem:[%s14131_s14 + $0x240] ss:$20 sps:$4 sm:$0xff]  }
 0x604   : > { %v13580_v30 = vld [vmem:[%s14131_s14 + $0x358] ss:$20 sps:$4 sm:$0xff]  }
 0x606   : > { %10733 = vmatpush1.bf16.msra.mxu0 %v13521_v40  ;;  %10897 = vmatpush1.bf16.msra.mxu1 %v13524_v62  ;;  %v13582_v40 = vld [vmem:[%s14131_s14 + $0x4c0] ss:$20 sps:$4 sm:$0xff]  }
 0x607   : > { %10734 = vmatprep.subr.bf16.mxu0 %v13529_v42  ;;  %10898 = vmatprep.subr.bf16.mxu1 %v13532_v43  ;;  %v13583_v62 = vld [vmem:[%s14131_s14 + $0x100] ss:$20 sps:$4 sm:$0xff]   ;;  %v13585_v43 = vld [vmem:[%s14131_s14 + $0x268] ss:$20 sps:$4 sm:$0xff]  }
 0x608   : > { %v13584_v42 = vld [vmem:[%s14131_s14 + $0x380] ss:$20 sps:$4 sm:$0xff]  }
 0x60a   : > { %10735 = vmatpush1.bf16.msra.mxu0 %v13527_v8  ;;  %10899 = vmatpush1.bf16.msra.mxu1 %v13530_v46  ;;  %v13586_v8 = vld [vmem:[%s14131_s14 + $0x4e8] ss:$20 sps:$4 sm:$0xff]  }
 0x60b   : > { %10736 = vmatprep.subr.bf16.mxu0 %v13535_v47  ;;  %10900 = vmatprep.subr.bf16.mxu1 %v13538_v48  ;;  %v13587_v46 = vld [vmem:[%s14131_s14 + $0x128] ss:$20 sps:$4 sm:$0xff]   ;;  %v13589_v48 = vld [vmem:[%s14131_s14 + $0x650] ss:$20 sps:$4 sm:$0xff]  }
 0x60c   : > { %v13588_v47 = vld [vmem:[%s14131_s14 + $0x3a8] ss:$20 sps:$4 sm:$0xff]  }
 0x60e   : > { %10737 = vmatpush1.bf16.msra.mxu0 %v13533_v17  ;;  %10901 = vmatpush1.bf16.msra.mxu1 %v13536_v60  ;;  %v13590_v17 = vld [vmem:[%s14131_s14 + $0x8d0] ss:$20 sps:$4 sm:$0xff]  }
 0x60f   : > { %10738 = vmatprep.subr.bf16.mxu0 %v13541_v53  ;;  %10902 = vmatprep.subr.bf16.mxu1 %v13544_v19  ;;  %v13591_v60 = vld [vmem:[%s14131_s14 + $0x510] ss:$20 sps:$4 sm:$0xff]   ;;  %v13593_v53 = vld [vmem:[%s14131_s14 + $0x678] ss:$20 sps:$4 sm:$0xff]  }
 0x610   : > { %v13594_v19 = vld [vmem:[%s14131_s14 + $0x8f8] ss:$20 sps:$4 sm:$0xff]  }
 0x612   : > { %10739 = vmatpush1.bf16.msra.mxu0 %v13539_v57  ;;  %10903 = vmatpush1.bf16.msra.mxu1 %v13542_v52  ;;  %v13595_v57 = vld [vmem:[%s14131_s14 + $0x538] ss:$20 sps:$4 sm:$0xff]  }
 0x613   : > { %10740 = vmatprep.subr.bf16.mxu0 %v13547_v59  ;;  %10904 = vmatprep.subr.bf16.mxu1 %v13550_v61  ;;  %v13596_v52 = vld [vmem:[%s14131_s14 + $0x7b8] ss:$20 sps:$4 sm:$0xff]   ;;  %v13602_v59 = vld [vmem:[%s14131_s14 + $0x948] ss:$20 sps:$4 sm:$0xff]  }
 0x614   : > { %v13604_v61 = vld [vmem:[%s14131_s14 + $0x808] ss:$20 sps:$4 sm:$0xff]  }
 0x616   : > { %10741 = vmatpush1.bf16.msra.mxu0 %v13545_v55  ;;  %10905 = vmatpush1.bf16.msra.mxu1 %v13548_v23  ;;  %v13605_v55 = vld [vmem:[%s14131_s14 + $0x6f0] ss:$20 sps:$4 sm:$0xff]  }
 0x617   : > { %10742 = vmatprep.subr.bf16.mxu0 %v13553_v4  ;;  %10906 = vmatprep.subr.bf16.mxu1 %v13556_v5  ;;  %v13606_v23 = vld [vmem:[%s14131_s14 + $0x970] ss:$20 sps:$4 sm:$0xff]   ;;  %v13609_v5 = vld [vmem:[%s14131_s14 + $0x718] ss:$20 sps:$4 sm:$0xff]  }
 0x618   : > { %v13608_v4 = vld [vmem:[%s14131_s14 + $0x830] ss:$20 sps:$4 sm:$0xff]  }
 0x61a   : > { %10743 = vmatpush1.bf16.msra.mxu0 %v13551_v1  ;;  %10907 = vmatpush1.bf16.msra.mxu1 %v13554_v6  ;;  %v13610_v1 = vld [vmem:[%s14131_s14 + $0x998] ss:$20 sps:$4 sm:$0xff]  }
 0x61b   : > { %12831 = vmatprep.subr.bf16.mxu0 %v13557_v15  ;;  %12853 = vmatprep.subr.bf16.mxu1 %v13558_v41  ;;  %v13611_v6 = vld [vmem:[%s14131_s14 + $0x5d8] ss:$20 sps:$4 sm:$0xff]   ;;  %v13613_v15 = vld [vmem:[%s14131_s14 + $0x740] ss:$20 sps:$4 sm:$0xff]  }
 0x61c   : > { %v13614_v41 = vld [vmem:[%s14131_s14 + $0x9c0] ss:$20 sps:$4 sm:$0xff]  }
 0x61d   : > { %10745 = vmatmul.mubr.bf16.vlgmr.msra.gmra.mrb[8].mxu0 %v15732_v9  ;;  %10909 = vmatmul.mubr.bf16.vlgmr.msra.gmra.mrb[8].mxu1 %v15732_v9 }
 0x61e   : > { %12832 = vmatpush3.bf16.msra.mxu0 %v13559_v37  ;;  %10949 = vmatprep.mubr.bf16.mxu0 %v15420_v50  ;;  %v13568_v50 = vld [vmem:[%s14131_s14 + $0x2e0] ss:$20 sps:$4 sm:$0xff]  }
 0x61f   : > { %12854 = vmatpush3.bf16.msra.mxu1 %v13560_v11  ;;  %10989 = vmatprep.mubr.bf16.mxu1 %v15502_v3  ;;  %v13571_v3 = vld [vmem:[%s14131_s14 + $0x88] ss:$20 sps:$4 sm:$0xff]   ;;  %v13615_v37 = vld [vmem:[%s14131_s14 + $0x600] ss:$20 sps:$4 sm:$0xff]  }
 0x620   : > { %12833 = vmatprep.subr.bf16.mxu0 %v13561_v18  ;;  %12855 = vmatprep.subr.bf16.mxu1 %v13562_v14  ;;  %v13616_v11 = vld [vmem:[%s14131_s14 + $0x880] ss:$20 sps:$4 sm:$0xff]   ;;  %v13617_v18 = vld [vmem:[%s14131_s14 + $0x768] ss:$20 sps:$4 sm:$0xff]  }
 0x621   : > { %v13618_v14 = vld [vmem:[%s14131_s14 + $0x9e8] ss:$20 sps:$4 sm:$0xff]  }
 0x622   : > { %12834 = vmatpush3.bf16.msra.mxu0 %v13563_v2  ;;  %v13619_v2 = vld [vmem:[%s14131_s14 + $0x628] ss:$20 sps:$4 sm:$0xff]  }
 0x623   : > { %12856 = vmatpush3.bf16.msra.mxu1 %v13564_v51  ;;  %12835 = vmatprep.subr.bf16.mxu0 %v13565_v21  ;;  %v13620_v51 = vld [vmem:[%s14131_s14 + $0x8a8] ss:$20 sps:$4 sm:$0xff]   ;;  %v13875_v21 = vmov 1983009808  }
 0x624   : > { %12857 = vmatprep.subr.bf16.mxu1 %v13566_v25  ;;  %v11085_v25 = vunpack.c.l.s4 %v13875_v21 }
 0x626   : > { %12836 = vmatpush3.bf16.msra.mxu0 %v13567_v26  ;;  %v11086_v26 = vunpack.c.0.s8 %v11085_v25 }
 0x627   : > { %12858 = vmatpush3.bf16.msra.mxu1 %v13568_v50  ;;  %12837 = vmatprep.subr.bf16.mxu0 %v13569_v27 }
 0x628   : > { %12859 = vmatprep.subr.bf16.mxu1 %v13570_v29  ;;  %v15806_v29 = vsub.s32 %v11086_v26, %v14165_v44 }
 0x62a   : > { %12838 = vmatpush3.bf16.msra.mxu0 %v13571_v3 }
 0x62b   : > { %12860 = vmatpush3.bf16.msra.mxu1 %v13572_v22  ;;  %12839 = vmatprep.subr.bf16.mxu0 %v13573_v31 }
 0x62c   : > { %12861 = vmatprep.subr.bf16.mxu1 %v13574_v54 }
 0x62e   : > { %12840 = vmatpush3.bf16.msra.mxu0 %v13575_v33 }
 0x62f   : > { %12862 = vmatpush3.bf16.msra.mxu1 %v13576_v34  ;;  %12841 = vmatprep.subr.bf16.mxu0 %v13577_v35 }
 0x630   : > { %12863 = vmatprep.subr.bf16.mxu1 %v13578_v38 }
 0x632   : > { %12842 = vmatpush3.bf16.msra.mxu0 %v13579_v36  ;;  %v8531_v36 = vld [vmem:[#allocation2] sm:$0xff] }
 0x633   : > { %12864 = vmatpush3.bf16.msra.mxu1 %v13580_v30  ;;  %12843 = vmatprep.subr.bf16.mxu0 %v13581_v39 }
 0x634   : > { %12865 = vmatprep.subr.bf16.mxu1 %v13582_v40 }
 0x636   : > { %12844 = vmatpush3.bf16.msra.mxu0 %v13583_v62 }
 0x637   : > { %12866 = vmatpush3.bf16.msra.mxu1 %v13584_v42  ;;  %12845 = vmatprep.subr.bf16.mxu0 %v13585_v43 }
 0x638   : > { %12867 = vmatprep.subr.bf16.mxu1 %v13586_v8 }
 0x63a   : > { %12846 = vmatpush3.bf16.msra.mxu0 %v13587_v46 }
 0x63b   : > { %12868 = vmatpush3.bf16.msra.mxu1 %v13588_v47  ;;  %12875 = vmatprep.subr.bf16.mxu0 %v13589_v48 }
 0x63c   : > { %12897 = vmatprep.subr.bf16.mxu1 %v13590_v17 }
 0x63d   : > { %10950 = vmatmul.mubr.bf16.vlgmr.msra.gmra.mrb[12].mxu0 %v15498_v63  ;;  %v13598_v63 = vld [vmem:[%s14131_s14 + $0x920] ss:$20 sps:$4 sm:$0xff]  }
 0x63e   : > { %10990 = vmatmul.mubr.bf16.vlgmr.msra.gmra.mrb[12].mxu1 %v15575_v16  ;;  %12876 = vmatpush3.bf16.msra.mxu0 %v13591_v60  ;;  %v13599_v16 = vld [vmem:[%s14131_s14 + $0x560] ss:$20 sps:$4 sm:$0xff]  }
 0x63f   : > { %11029 = vmatprep.mubr.bf16.mxu0 %v15652_v49  ;;  %12898 = vmatpush3.bf16.msra.mxu1 %v13592_v32  ;;  %v13601_v49 = vld [vmem:[%s14131_s14 + $0x6c8] ss:$20 sps:$4 sm:$0xff]  }
 0x640   : > { %11069 = vmatprep.mubr.bf16.mxu1 %v15662_v20  ;;  %12877 = vmatprep.subr.bf16.mxu0 %v13593_v53  ;;  %v13603_v20 = vld [vmem:[%s14131_s14 + $0x588] ss:$20 sps:$4 sm:$0xff]  }
 0x641   : > { %12899 = vmatprep.subr.bf16.mxu1 %v13594_v19 }
 0x642   : > { %12878 = vmatpush3.bf16.msra.mxu0 %v13595_v57 }
 0x643   : > { %12900 = vmatpush3.bf16.msra.mxu1 %v13596_v52  ;;  %12879 = vmatprep.subr.bf16.mxu0 %v13597_v58 }
 0x644   : > { %12901 = vmatprep.subr.bf16.mxu1 %v13598_v63 }
 0x646   : > { %12880 = vmatpush3.bf16.msra.mxu0 %v13599_v16 }
 0x647   : > { %12902 = vmatpush3.bf16.msra.mxu1 %v13600_v13  ;;  %12881 = vmatprep.subr.bf16.mxu0 %v13601_v49 }
 0x648   : > { %12903 = vmatprep.subr.bf16.mxu1 %v13602_v59 }
 0x64a   : > { %12882 = vmatpush3.bf16.msra.mxu0 %v13603_v20 }
 0x64b   : > { %12904 = vmatpush3.bf16.msra.mxu1 %v13604_v61  ;;  %12883 = vmatprep.subr.bf16.mxu0 %v13605_v55  ;;  %v8532_v55 = vld [vmem:[#allocation2 + $0x8] sm:$0x3] }
 0x64c   : > { %12905 = vmatprep.subr.bf16.mxu1 %v13606_v23 }
 0x64e   : > { %12884 = vmatpush3.bf16.msra.mxu0 %v13607_v12 }
 0x64f   : > { %12906 = vmatpush3.bf16.msra.mxu1 %v13608_v4  ;;  %12885 = vmatprep.subr.bf16.mxu0 %v13609_v5  ;;  %v11118_v4 = vld [vmem:[#allocation11] sm:$0x1f] (!%p12824_p8) }
 0x650   : > { %12907 = vmatprep.subr.bf16.mxu1 %v13610_v1  ;;  %v11123_v5 = vrot.slane (!%p12824_p8), %v11118_v4, %v1437_v0  ;;  %v11127_v1 = vrot.slane (!%p12824_p8), %v11118_v4, %v1441_v28  ;;  %v11139_v0 = vrot.slane (!%p12824_p8), %v11118_v4, %v1453_v24 }
 0x652   : > { %12886 = vmatpush3.bf16.msra.mxu0 %v13611_v6  ;;  %v11131_v6 = vrot.slane (!%p12824_p8), %v11118_v4, %v1445_v10  ;;  %v11163_v10 = vrot.slane (!%p12824_p8), %v11139_v0, %v15806_v29 }
 0x653   : > { %12908 = vmatpush3.bf16.msra.mxu1 %v13612_v7  ;;  %12887 = vmatprep.subr.bf16.mxu0 %v13613_v15  ;;  %v11135_v7 = vrot.slane (!%p12824_p8), %v11118_v4, %v1449_v45  ;;  %v11140_v15 = vcombine.low (!%p12824_p8), %v11123_v5, %v11127_v1 }
 0x654   : > { %12909 = vmatprep.subr.bf16.mxu1 %v13614_v41 }
 0x655   : > { %v11141_v41 = vcombine.low (!%p12824_p8), %v11131_v6, %v11135_v7 }
 0x656   : > { %12888 = vmatpush3.bf16.msra.mxu0 %v13615_v37  ;;  %v11148_v37 = vrot.slane (!%p12824_p8), %v11140_v15, %v15806_v29 }
 0x657   : > { %12910 = vmatpush3.bf16.msra.mxu1 %v13616_v11  ;;  %12889 = vmatprep.subr.bf16.mxu0 %v13617_v18  ;;  %v11155_v11 = vrot.slane (!%p12824_p8), %v11141_v41, %v15806_v29 }
 0x658   : > { %12911 = vmatprep.subr.bf16.mxu1 %v13618_v14 }
 0x659   : > { %v11156_v14 = vcombine.low (!%p12824_p8), %v11148_v37, %v11155_v11 }
 0x65a   : > { %12890 = vmatpush3.bf16.msra.mxu0 %v13619_v2 }
 0x65b   : > { %12912 = vmatpush3.bf16.msra.mxu1 %v13620_v51 }
 0x65d   : > { %11030 = vmatmul.mubr.bf16.vlgmr.msra.gmra.mrb[16].mxu0 %v15656_v56 }
 0x65e   : > { %11070 = vmatmul.mubr.bf16.vlgmr.msra.gmra.mrb[16].mxu1 %v15732_v9 }
 0x6f0   : > { %v10746_v50 = vpop.f32.mrb[8].mxu0  ;;  %v10910_v27 = vpop.f32.mrb[8].mxu1 }
 0x6f1   : > { %v10748_v3 = vpop.f32.mrb[9].mxu0  ;;  %v10912_v22 = vpop.f32.mrb[9].mxu1 }
 0x6f2   : > { %v11082_v31 = vcombine.low %v10746_v50, %v10748_v3  ;;  %v11083_v54 = vcombine.low %v10910_v27, %v10912_v22  ;;  %v10750_v33 = vpop.f32.mrb[10].mxu0  ;;  %v10914_v34 = vpop.f32.mrb[10].mxu1 }
 0x6f3   : > { %v10751_v35 = vpop.f32.mrb[11].mxu0  ;;  %v10915_v38 = vpop.f32.mrb[11].mxu1  ;;  %v13876_v33 = vmov (!%p12824_p8), 269488144  }
 0x6f4   : > { %v11090_v56 = vrot.slane %v11082_v31, %v15806_v29  ;;  %v11097_v9 = vrot.slane %v11083_v54, %v15806_v29  ;;  %v11187_v34 = vunpack.c.l.s4 (!%p12824_p8), %v13876_v33 }
 0x6f6   : > { %v11098_v30 = vcombine.low %v11090_v56, %v11097_v9  ;;  %v11188_v35 = vunpack.c.0.s8 (!%p12824_p8), %v11187_v34 }
 0x6f8   : > { %v11108_v39 = vadd.f32 %v11098_v30, %v8531_v36  ;;  %v11191_v38 = vsub.s32 (!%p12824_p8), %v11188_v35, %v14165_v44 }
 0x6fa   : > { %11110 = vst [vmem:[#allocation2] sm:$0xff] %v11108_v39 }
 0x701   : > { %v11116_v18 = vld [vmem:[#allocation2] sm:$0xff] (!%p12824_p8) }
 0x702   : > { %v11166_v2 = vadd.f32 (!%p12824_p8), %v11156_v14, %v11116_v18 }
 0x704   : > { %v11175_v28 = vrot.slane (!%p12824_p8), %v11166_v2, %v15806_v29  ;;  %v11225_v51 = vcombine.high (!%p12824_p8), %v11166_v2, %v11166_v2  ;;  %v11237_v30 = vrot.slane (!%p12824_p8), %v11166_v2, 4 }
 0x706   : > { %v11176_v45 = vcombine.high (!%p12824_p8), %v11175_v28, %v11175_v28  ;;  %v11180_v25 = vsel (!%p12824_p8), %vm11179_vm0, %v11175_v28, -inf  ;;  %v11232_v26 = vrot.slane (!%p12824_p8), %v11225_v51, %v15806_v29 }
 0x708   : > { %v11181_v50 = vsel (!%p12824_p8), %vm11179_vm0, %v11176_v45, -inf  ;;  %v11248_v27 = vcombine.high (!%p12824_p8), %v11232_v26, %v11232_v26  ;;  %v11234_v31 = vsel (!%p12824_p8), %vm11179_vm0, %v11232_v26, -inf }
 0x709   : > { %v11182_v22 = vmax.f32 (!%p12824_p8), %v11180_v25, %v11181_v50 }
 0x70a   : > { %v11250_v24 = vsel (!%p12824_p8), %vm11179_vm0, %v11248_v27, -inf }
 0x70b   : > { %11183 = vmax.xlane.f32.xlu0 (!%p12824_p8), %v11182_v22  ;;  %11251 = vmax.xlane.f32.xlu1 (!%p12824_p8), %v11250_v24 }
 0x70f   : > { %11235 = vmax.xlane.f32.xlu0 (!%p12824_p8), %v11234_v31 }
 0x710   : > { %v12847_v40 = vpop.f32.mrb[12].mxu0 }
 0x711   : > { %v12869_v62 = vpop.f32.mrb[12].mxu1  ;;  %v12848_v42 = vpop.f32.mrb[13].mxu0 }
 0x712   : > { %v12849_v43 = vadd.f32 %v12848_v42, %v12847_v40  ;;  %v12870_v8 = vpop.f32.mrb[13].mxu1  ;;  %v12850_v46 = vpop.f32.mrb[14].mxu0  ;;  %v11253_v40 = vrot.slane (!%p12824_p8), %v11166_v2, 6 }
 0x713   : > { %v12871_v47 = vadd.f32 %v12870_v8, %v12869_v62  ;;  %v12872_v48 = vpop.f32.mrb[14].mxu1  ;;  %v12851_v17 = vpop.f32.mrb[15].mxu0 }
 0x714   : > { %v12873_v60 = vpop.f32.mrb[15].mxu1 }
 0x715   : > { %v10992_v32 = vadd.f32 %v12871_v47, %v12849_v43 }
 0x730   : > { %v12891_v53 = vpop.f32.mrb[16].mxu0 }
 0x731   : > { %v12913_v19 = vpop.f32.mrb[16].mxu1  ;;  %v12892_v57 = vpop.f32.mrb[17].mxu0 }
 0x732   : > { %v12893_v52 = vadd.f32 %v12892_v57, %v12891_v53  ;;  %v12914_v58 = vpop.f32.mrb[17].mxu1  ;;  %v12894_v63 = vpop.f32.mrb[18].mxu0 }
 0x733   : > { %v12915_v16 = vadd.f32 %v12914_v58, %v12913_v19  ;;  %v12916_v13 = vpop.f32.mrb[18].mxu1  ;;  %v12895_v49 = vpop.f32.mrb[19].mxu0 }
 0x734   : > { %v11032_v59 = vadd.f32 %v12893_v52, %v10992_v32  ;;  %v12917_v20 = vpop.f32.mrb[19].mxu1 }
 0x736   : > { %v11072_v61 = vadd.f32 %v12915_v16, %v11032_v59  ;;  %11115 = sbr.rel (%p12824_p8) target bundleno = 2180 (0x884), region = 68 }
 0x738   : > { %v11105_v23 = vrot.slane %v11072_v61, %v15806_v29 }
 0x73a   : > { %v11109_v12 = vadd.f32 %v11105_v23, %v8532_v55 }
 0x73c   : > { %11111 = vst [vmem:[#allocation2 + $0x8] sm:$0x3] %v11109_v12 }
 0x743   : > { %v11117_v21 = vld [vmem:[#allocation2 + $0x8] sm:$0x3] }
 0x744   : > { %v11167_v3 = vadd.f32 %v11163_v10, %v11117_v21 }
 0x746   : > { %v11264_v54 = vsel %vm11179_vm0, %v11167_v3, -inf }
 0x747   : > { %11265 = vmax.xlane.f32.xlu1 %v11264_v54 }
 0x798   : > { %v11184_v56 = vpop.xlane.xlu0 %11183  ;;  %v11252_v9 = vpop.xlane.xlu1 %11251 }
 0x799   : > { %v11192_v36 = vrot.slane %v11184_v56, %v11191_v38  ;;  %v11255_v47 = vsub.f32 %v11253_v40, %v11252_v9 }
 0x79b   : > { %v11194_v39 = vsub.f32 %v11166_v2, %v11192_v36  ;;  %v11256_v60 = vmul.f32 1.442695, %v11255_v47 }
 0x79c   : > { %v11236_v62 = vpop.xlane.xlu0 %11235 }
 0x79d   : > { %v11195_v43 = vmul.f32 1.442695, %v11194_v39  ;;  %v11239_v8 = vsub.f32 %v11237_v30, %v11236_v62 }
 0x79f   : > { %13622 = vpow2.f32 %v11195_v43  ;;  %v11240_v48 = vmul.f32 1.442695, %v11239_v8 }
 0x7a1   : > { %13624 = vpow2.f32 %v11240_v48 }
 0x7a9   : > { %v13623_v44 = vpop.eup %13622 }
 0x7aa   : > { %v11204_v32 = vrot.slane %v13623_v44, %v15806_v29 }
 0x7ab   : > { %v13625_v53 = vpop.eup %13624 }
 0x7ac   : > { %v11242_v57 = vsel %vm11179_vm0, %v13625_v53, 0.0  ;;  %v11205_v52 = vcombine.high %v11204_v32, %v11204_v32  ;;  %v11208_v58 = vsel %vm11179_vm0, %v11204_v32, 0.0 }
 0x7ad   : > { %11243 = vadd.xlane.f32.xlu1 %v11242_v57 }
 0x7ae   : > { %v11209_v63 = vsel %vm11179_vm0, %v11205_v52, 0.0 }
 0x7af   : > { %v11210_v13 = vadd.f32 %v11209_v63, %v11208_v58 }
 0x7b1   : > { %11211 = vadd.xlane.f32.xlu0 %v11210_v13 }
 0x7d4   : > { %v11266_v42 = vpop.xlane.xlu1 %11265 }
 0x7d5   : > { %v11267_v46 = vsub.f32 %v11167_v3, %v11266_v42 }
 0x7d7   : > { %v11268_v17 = vmul.f32 1.442695, %v11267_v46 }
 0x7d9   : > { %13626 = vpow2.f32 %v11268_v17 }
 0x7da   : > { %13628 = vpow2.f32 %v11256_v60 }
 0x7e3   : > { %v13627_v19 = vpop.eup %13626 }
 0x7e4   : > { %v11270_v16 = vsel %vm11179_vm0, %v13627_v19, 0.0  ;;  %v13629_v49 = vpop.eup %13628 }
 0x7e5   : > { %11271 = vadd.xlane.f32.xlu1 %v11270_v16  ;;  %v11258_v59 = vsel %vm11179_vm0, %v13629_v49, 0.0 }
 0x7e6   : > { %11259 = vadd.xlane.f32.xlu0 %v11258_v59 }
 0x83a   : > { %v11244_v29 = vpop.xlane.xlu1 %11243 }
 0x83b   : > { %13630 = vrcp.f32 %v11244_v29 }
 0x83e   : > { %v11212_v61 = vpop.xlane.xlu0 %11211 }
 0x845   : > { %v13631_v23 = vpop.eup %13630 }
 0x846   : > { %v11246_v12 = vmul.f32 %v13631_v23, %v13625_v53 }
 0x848   : > { %11247 = vst [vmem:[#allocation12 + $0x4] sm:$0x3] %v11246_v12 }
 0x872   : > { %v11272_v20 = vpop.xlane.xlu1 %11271 }
 0x873   : > { %13632 = vrcp.f32 %v11272_v20  ;;  %v11260_v55 = vpop.xlane.xlu0 %11259 }
 0x874   : > { %13634 = vrcp.f32 %v11212_v61 }
 0x875   : > { %13636 = vrcp.f32 %v11260_v55 }
 0x87d   : > { %v13633_v4 = vpop.eup %13632 }
 0x87e   : > { %v13635_v5 = vpop.eup %13634  ;;  %v11274_v1 = vmul.f32 %v13633_v4, %v13627_v19 }
 0x87f   : > { %v11221_v6 = vrot.slane %v13635_v5, %v11191_v38  ;;  %v13637_v7 = vpop.eup %13636 }
 0x880   : > { %11275 = vst [vmem:[#allocation12 + $0x8] sm:$0x3] %v11274_v1  ;;  %v11262_v41 = vmul.f32 %v13637_v7, %v13629_v49 }
 0x881   : > { %v11223_v15 = vmul.f32 %v13623_v44, %v11221_v6 }
 0x882   : > { %11263 = vst [vmem:[#allocation12 + $0x6] sm:$0x3] %v11262_v41 }
 0x883   : > { %11224 = vst [vmem:[#allocation12] sm:$0xf] %v11223_v15 }
 0x884 PF: > { %p13124_p13 = scmp.eq.s32.totalorder %s13927_s22, 1  ;;  %s13877_s28 = smov [#allocation12]  }
 0x885   : > { %s11283_s17 = sshll.u32 %s13877_s28, 4  ;;  %s11284_s17 = int_to_ptr.vmem [resolvable:$true] %s11283_s17 }
 0x886   : > { %s13784_s10 = scalar_lea.vmem %s11284_s17, 160  ;;  %p13791_p12 = scmp.lt.s32.totalorder %s11284_s17, %s11284_s17 }
 0x887   : > { %p13785_p2 = scmp.ne.s32.totalorder %s11284_s17, %s13784_s10  ;;  %p13792_p5 = scmp.lt.s32.totalorder %s13784_s10, %s13784_s10 }
 0x889   : > { %p13786_p4 = pnand %p13785_p2, %p13124_p13  ;;  %p13793_p9 = por %p13792_p5, %p13791_p12 }
 0x88b   : > { %p13787_p7 = pneg %p13786_p4 }
 0x88d   : > { %p13794_p11 = pnand %p13793_p9, %p13787_p7 }
 0x88f   : > { %13797 = shalt.err (!%p13794_p11)
}
 0x890   : > { %s13798_s30 = scalar_lea.hbm %s15880_s5, 160 }
 0x891   : > { %p13799_p10 = scmp.ne.s32.totalorder %s15880_s5, %s13798_s30  ;;  %p13804_p3 = scmp.lt.u32.totalorder %s13798_s30, %s15880_s5 }
 0x893   : > { %p13800_p1 = pnand %p13799_p10, %p13124_p13 }
 0x895   : > { %p13801_p6 = pneg %p13800_p1 }
 0x897   : > { %p13806_p0 = pnand %p13804_p3, %p13801_p6 }
 0x899   : > { %13809 = shalt.err (!%p13806_p0)
}
 0x89a   : > { %13099 = dma.vmem_to_hbm [thread:$0]  (%p13124_p13), %s11284_s17, 160, %s15880_s5, [#allocation5]  }
 0x89b   : > { %13843 = dma.done.wait (%p13124_p13), [#allocation5], 160  }
 0x89c   : > { %13845 = vsyncadd (%p13124_p13), [#allocation5], 4294967136 }
 0x89d PF: > { %s15917_s7 = sld [smem:[#allocation18_spill]]  ;;  %p20_p8 = scmp.ge.s32.totalorder %s13930_s23, 4  }
 0x89e   : > { %s15918_s18 = smov %s13852_s19  ;;  %s15919_s19 = smov %s13856_s20 }
 0x89f   : > { %s15921_s21 = smov %s13930_s23  ;;  %22 = sbr.rel (!%p20_p8) target bundleno = 10 (0xa), region = 118 }
 0x8a3   : > { %s15920_s20 = smov %s15917_s7 }
 0x8a6   :  { %11296 = vsyncpa [#allocation4], 1 }
 0x8a7   :  { %11298 = vsyncpa [#allocation4 + $0x1], 1 }
 0x8a8   :  { %11299 = vsyncpa [#allocation7], 1 }
 0x8a9   :  { %11301 = vsyncpa [#allocation7 + $0x1], 1 }
 0x8aa   :  { %11302 = vsyncpa [#allocation10], 1 }
 0x8ab   :  { %11304 = vsyncpa [#allocation10 + $0x1], 1 }
 0x8ac   :  { %11305 = vsyncpa [#allocation5], 1 }
 0x8ad   :  { %11307 = vsyncpa [#allocation5 + $0x1], 1 }

</bundles_post_ra>
